<compile_context>
chip_gen: v5e
topology: v5e:2x2
jax: 0.10.0
libtpu: 0.0.40
codegen_flags: <defaults>
</compile_context>

<pallas_src>
import functools

import jax
import jax.numpy as jnp
from jax import lax
from jax.experimental import pallas as pl
from jax.experimental.pallas import tpu as pltpu


def _round_up(x, m):
    return ((x + m - 1) // m) * m


# ---------------- Pallas kernel 1: fused conv + BN + ReLU + 2x2 maxpool -------
#
# u_ref     : (Hp, Wo2p, (KW+1)*Cin)  bf16   width-unfolded input, one image
# w_ref     : (KH, (KW+1)*Cin, 2*Cout) bf16  duplicated weights (even|odd cols)
# scale_ref : (1, 2*Cout) f32   BN scale, tiled twice
# shift_ref : (1, 2*Cout) f32   BN shift (+ folded conv bias), tiled twice
# o_ref     : (Ho2, Wo2, Cout) bf16   pooled output, one image

def _conv_pool_kernel(u_ref, w_ref, scale_ref, shift_ref, o_ref):
    kh = w_ref.shape[0]
    ho2, wo2, cout = o_ref.shape
    cout2 = 2 * cout
    wo2p = u_ref.shape[1]

    s = scale_ref[...]            # hoisted out of the row loop
    t = shift_ref[...]

    def body(r, carry):
        row = 2 * r               # conv output row of the H-pair
        acc0 = jnp.zeros((wo2p, cout2), jnp.float32)
        acc1 = jnp.zeros((wo2p, cout2), jnp.float32)
        for i in range(kh):       # unrolled KH-tap reduction on the MXU
            wi = w_ref[i]
            acc0 = acc0 + jnp.dot(u_ref[row + i], wi,
                                  preferred_element_type=jnp.float32)
            acc1 = acc1 + jnp.dot(u_ref[row + i + 1], wi,
                                  preferred_element_type=jnp.float32)
        # BN (+ folded bias) and ReLU, then the 2x2 max pool.
        y0 = jnp.maximum(acc0 * s + t, 0.0)
        y1 = jnp.maximum(acc1 * s + t, 0.0)
        h = jnp.maximum(y0, y1)                            # H-pair max
        p = jnp.maximum(h[:, :cout], h[:, cout:cout2])     # W-pair max (lanes)
        o_ref[r] = p[:wo2, :].astype(o_ref.dtype)
        return carry

    lax.fori_loop(0, ho2, body, 0)


def conv_bn_relu_pool(x, wdup, scale, shift, *, kh, kw, pad):
    """x: (N, H, W, C) bf16 NHWC.  Returns pooled (N, Ho//2, Wo//2, Cout) bf16."""
    N, H, W, C = x.shape
    Ho = H + 2 * pad - kh + 1
    Wo = W + 2 * pad - kw + 1
    Ho2, Wo2 = Ho // 2, Wo // 2
    Wo2p = _round_up(Wo2, 8)           # keeps in-kernel layouts tile-aligned
    Hp = H + 2 * pad
    w_req = 2 * Wo2p + kw              # padded width needed by the unfold
    xp = jnp.pad(x, ((0, 0), (pad, pad), (pad, w_req - W - pad), (0, 0)))

    # width unfold at even output columns only: U[n,h,w2,j*C+c] = x[n,h,2*w2+j,c]
    cols = [xp[:, :, j:j + 2 * Wo2p:2, :] for j in range(kw + 1)]
    kwc1 = (kw + 1) * C
    u = jnp.concatenate(cols, axis=-1).reshape(N * Hp, Wo2p, kwc1)

    cout = wdup.shape[-1] // 2
    scale2 = jnp.concatenate([scale, scale]).reshape(1, 2 * cout).astype(jnp.float32)
    shift2 = jnp.concatenate([shift, shift]).reshape(1, 2 * cout).astype(jnp.float32)

    out = pl.pallas_call(
        _conv_pool_kernel,
        out_shape=jax.ShapeDtypeStruct((N * Ho2, Wo2, cout), jnp.bfloat16),
        grid=(N,),
        in_specs=[
            pl.BlockSpec((Hp, Wo2p, kwc1), lambda n: (n, 0, 0)),
            pl.BlockSpec((kh, kwc1, 2 * cout), lambda n: (0, 0, 0)),
            pl.BlockSpec((1, 2 * cout), lambda n: (0, 0)),
            pl.BlockSpec((1, 2 * cout), lambda n: (0, 0)),
        ],
        out_specs=pl.BlockSpec((Ho2, Wo2, cout), lambda n: (n, 0, 0)),
        compiler_params=pltpu.CompilerParams(
            dimension_semantics=("parallel",)),
    )(u, wdup, scale2, shift2)
    return out.reshape(N, Ho2, Wo2, cout)


# ---------------- Pallas kernel 2: linear (+bias, optional ReLU) --------------

def _linear_kernel(a_ref, w_ref, b_ref, o_ref, *, relu):
    n = o_ref.shape[1]
    y = jnp.dot(a_ref[...], w_ref[...], preferred_element_type=jnp.float32)
    y = y[:, :n] + b_ref[:, :n]
    if relu:
        y = jnp.maximum(y, 0.0)
    o_ref[...] = y.astype(o_ref.dtype)


def pallas_linear(a, w, b, *, relu, out_dtype, n_real, tn):
    """a: (M, K), w: (Kp, Np) bf16 pre-padded, b: (n_real,).  out: (M, n_real)."""
    M, K = a.shape
    Kp, Np = w.shape
    Mp = 16
    a_p = jnp.pad(a.astype(jnp.bfloat16), ((0, Mp - M), (0, Kp - K)))
    b_p = jnp.pad(b.astype(jnp.float32).reshape(1, -1),
                  ((0, 0), (0, Np - b.shape[-1])))
    nblocks = Np // tn
    assert n_real % tn == 0 or nblocks == 1
    out_block_n = tn if n_real % tn == 0 else n_real

    out = pl.pallas_call(
        functools.partial(_linear_kernel, relu=relu),
        out_shape=jax.ShapeDtypeStruct((Mp, n_real), out_dtype),
        grid=(nblocks,),
        in_specs=[
            pl.BlockSpec((Mp, Kp), lambda j: (0, 0)),     # resident activations
            pl.BlockSpec((Kp, tn), lambda j: (0, j)),     # streamed weight tile
            pl.BlockSpec((1, tn), lambda j: (0, j)),
        ],
        out_specs=pl.BlockSpec((Mp, out_block_n), lambda j: (0, j)),
        compiler_params=pltpu.CompilerParams(
            dimension_semantics=("parallel",)),
    )(a_p, w, b_p)
    return out[:M]


# ------------------------------- parameter prep -------------------------------

def conv_weight_dup(w_hwio):
    """(KH,KW,Cin,Cout) -> (KH, (KW+1)*Cin, 2*Cout); even cols use taps 0..KW-1,
    odd cols use taps 1..KW (shifted), so one matmul yields a W-pair."""
    kh, kw, cin, cout = w_hwio.shape
    w = w_hwio.astype(jnp.float32)
    wd = jnp.zeros((kh, kw + 1, cin, 2 * cout), jnp.float32)
    wd = wd.at[:, :kw, :, :cout].set(w)
    wd = wd.at[:, 1:, :, cout:].set(w)
    return wd.reshape(kh, (kw + 1) * cin, 2 * cout).astype(jnp.bfloat16)


def bn_scale_shift(gamma, beta, mean, var, bias=None, eps=1e-5):
    scale = gamma / jnp.sqrt(var + eps)
    shift = beta - mean * scale
    if bias is not None:
        shift = shift + scale * bias
    return scale, shift


def init_params(key):
    ks = jax.random.split(key, 14)

    def conv_w(k, kh, kw, cin, cout):
        w = jax.random.normal(k, (kh, kw, cin, cout), jnp.float32)
        return (w / jnp.sqrt(float(kh * kw * cin))).astype(jnp.bfloat16)

    def bn_params(k, c):
        k1, k2, k3, k4 = jax.random.split(k, 4)
        gamma = 1.0 + 0.1 * jax.random.normal(k1, (c,), jnp.float32)
        beta = 0.1 * jax.random.normal(k2, (c,), jnp.float32)
        mean = 0.1 * jax.random.normal(k3, (c,), jnp.float32)
        var = jax.random.uniform(k4, (c,), jnp.float32, minval=0.5, maxval=1.5)
        return (gamma, beta, mean, var)

    def lin_w(k, in_f, out_f, out_pad):
        w = jax.random.normal(k, (in_f, out_f), jnp.float32) / jnp.sqrt(float(in_f))
        kp = _round_up(in_f, 128)
        return jnp.pad(w, ((0, kp - in_f), (0, out_pad - out_f))).astype(jnp.bfloat16)

    c1 = conv_w(ks[0], 5, 5, 3, 10)
    c2 = conv_w(ks[1], 5, 5, 10, 20)
    c3 = conv_w(ks[2], 7, 7, 20, 10)
    return {
        "conv1_w": c1, "conv1_wdup": conv_weight_dup(c1),
        "bn1": bn_params(ks[3], 10),
        "conv2_w": c2, "conv2_wdup": conv_weight_dup(c2),
        "conv2_b": 0.1 * jax.random.normal(ks[4], (20,), jnp.float32),
        "bn2": bn_params(ks[5], 20),
        "conv3_w": c3, "conv3_wdup": conv_weight_dup(c3),
        "conv3_b": 0.1 * jax.random.normal(ks[6], (10,), jnp.float32),
        "bn3": bn_params(ks[7], 10),
        "lin1_w": lin_w(ks[8], 2250, 1024, 1024),
        "lin1_b": 0.1 * jax.random.normal(ks[9], (1024,), jnp.float32),
        "lin2_w": lin_w(ks[10], 1024, 512, 512),
        "lin2_b": 0.1 * jax.random.normal(ks[11], (512,), jnp.float32),
        "lin3_w": lin_w(ks[12], 512, 6, 128),
        "lin3_b": 0.1 * jax.random.normal(ks[13], (6,), jnp.float32),
    }


# ---------------------------------- forward ----------------------------------

@jax.jit
def custom_cnn_forward(x_nchw, params):
    x = jnp.transpose(x_nchw, (0, 2, 3, 1)).astype(jnp.bfloat16)   # NCHW -> NHWC
    n = x.shape[0]

    s, t = bn_scale_shift(*params["bn1"])                      # conv1: bias=False
    y = conv_bn_relu_pool(x, params["conv1_wdup"], s, t, kh=5, kw=5, pad=1)

    s, t = bn_scale_shift(*params["bn2"], bias=params["conv2_b"])
    y = conv_bn_relu_pool(y, params["conv2_wdup"], s, t, kh=5, kw=5, pad=1)

    s, t = bn_scale_shift(*params["bn3"], bias=params["conv3_b"])
    y = conv_bn_relu_pool(y, params["conv3_wdup"], s, t, kh=7, kw=7, pad=0)

    # flatten in NCHW order to match PyTorch output.view(-1, 2250)
    flat = jnp.transpose(y, (0, 3, 1, 2)).reshape(n, 2250)

    # linear1 -> dropout1 (eval identity) -> ReLU
    h = pallas_linear(flat, params["lin1_w"], params["lin1_b"],
                      relu=True, out_dtype=jnp.bfloat16, n_real=1024, tn=512)
    # linear2 -> ReLU -> dropout2 (eval identity)
    h = pallas_linear(h, params["lin2_w"], params["lin2_b"],
                      relu=True, out_dtype=jnp.bfloat16, n_real=512, tn=256)
    # linear3 (no ReLU), f32 logits
    return pallas_linear(h, params["lin3_w"], params["lin3_b"],
                         relu=False, out_dtype=jnp.float32, n_real=6, tn=128)


# --------------------------- pure-JAX reference ------------------------------

@jax.jit
def reference_forward(x_nchw, params):
    x = jnp.transpose(x_nchw, (0, 2, 3, 1)).astype(jnp.bfloat16)

    def conv_block(x, w_hwio, bn, bias, pad):
        s, t = bn_scale_shift(*bn, bias=bias)
        y = lax.conv_general_dilated(
            x.astype(jnp.float32), w_hwio.astype(jnp.float32),
            window_strides=(1, 1), padding=[(pad, pad), (pad, pad)],
            dimension_numbers=("NHWC", "HWIO", "NHWC"))
        y = jnp.maximum(y * s + t, 0.0)
        y = lax.reduce_window(y, -jnp.inf, lax.max,
                              (1, 2, 2, 1), (1, 2, 2, 1), "VALID")
        return y.astype(jnp.bfloat16)

    y = conv_block(x, params["conv1_w"], params["bn1"], None, 1)
    y = conv_block(y, params["conv2_w"], params["bn2"], params["conv2_b"], 1)
    y = conv_block(y, params["conv3_w"], params["bn3"], params["conv3_b"], 0)
    n = x.shape[0]
    flat = jnp.transpose(y, (0, 3, 1, 2)).reshape(n, 2250).astype(jnp.float32)

    def lin(a, w, b, n_real, relu):
        k = a.shape[1]
        y = jnp.dot(a, w[:k, :n_real].astype(jnp.float32)) + b[:n_real]
        return jnp.maximum(y, 0.0) if relu else y

    h = lin(flat, params["lin1_w"], params["lin1_b"], 1024, True)
    h = h.astype(jnp.bfloat16).astype(jnp.float32)
    h = lin(h, params["lin2_w"], params["lin2_b"], 512, True)
    h = h.astype(jnp.bfloat16).astype(jnp.float32)
    return lin(h, params["lin3_w"], params["lin3_b"], 6, False)


if __name__ == "__main__":
    key = jax.random.PRNGKey(0)
    pkey, xkey = jax.random.split(key)
    params = init_params(pkey)
    # Spatial size 150x150 is forced by .view(-1, 2250) == 10 * 15 * 15.
    x = jax.random.normal(xkey, (2, 3, 150, 150), jnp.float32)

    out = jax.block_until_ready(custom_cnn_forward(x, params))
    assert out.shape == (2, 6), out.shape
    assert bool(jnp.all(jnp.isfinite(out)))

    ref = jax.block_until_ready(reference_forward(x, params))
    assert bool(jnp.allclose(out, ref, rtol=5e-2, atol=5e-2)), (out, ref)

    print("KERNEL_OK")
</pallas_src>

<mosaic_0001>
module attributes {stable_mosaic.version = 11 : i64} {
  func.func @_conv_pool_kernel(%arg0: i32, %arg1: memref<152x80x18xbf16, #tpu.memory_space<vmem>>, %arg2: memref<5x18x20xbf16, #tpu.memory_space<vmem>>, %arg3: memref<1x20xf32, #tpu.memory_space<vmem>>, %arg4: memref<1x20xf32, #tpu.memory_space<vmem>>, %arg5: memref<74x74x10xbf16, #tpu.memory_space<vmem>>) attributes {dimension_semantics = [#tpu.dimension_semantics<parallel>], iteration_bounds = array<i64: 2>, scalar_prefetch = 0 : i64, scratch_operands = 0 : i64, tpu.core_type = #tpu.core_type<tc>, window_params = [{transform_indices = @transform_0, window_bounds = array<i64: 152, 80, 18>}, {pipeline_mode = #tpu.pipeline_mode<synchronous>, transform_indices = @transform_1, window_bounds = array<i64: 5, 18, 20>}, {pipeline_mode = #tpu.pipeline_mode<synchronous>, transform_indices = @transform_2, window_bounds = array<i64: 1, 20>}, {pipeline_mode = #tpu.pipeline_mode<synchronous>, transform_indices = @transform_3, window_bounds = array<i64: 1, 20>}, {transform_indices = @transform_4, window_bounds = array<i64: 74, 74, 10>}]} {
    %c0 = arith.constant 0 : index
    %c0_0 = arith.constant 0 : index
    %0 = vector.load %arg3[%c0, %c0_0] : memref<1x20xf32, #tpu.memory_space<vmem>>, vector<1x20xf32>
    %c0_1 = arith.constant 0 : index
    %c0_2 = arith.constant 0 : index
    %1 = vector.load %arg4[%c0_1, %c0_2] : memref<1x20xf32, #tpu.memory_space<vmem>>, vector<1x20xf32>
    %c0_i32 = arith.constant 0 : i32
    %c74_i32 = arith.constant 74 : i32
    %2 = arith.addi %c0_i32, %c74_i32 : i32
    %c1_i32 = arith.constant 1 : i32
    scf.for %arg6 = %c0_i32 to %2 step %c1_i32  : i32 {
      %c2_i32 = arith.constant 2 : i32
      %3 = arith.muli %c2_i32, %arg6 : i32
      %cst = arith.constant 0.000000e+00 : f32
      %4 = vector.broadcast %cst : f32 to vector<80x20xf32>
      %cst_4 = arith.constant 0.000000e+00 : f32
      %5 = vector.broadcast %cst_4 : f32 to vector<80x20xf32>
      %c0_5 = arith.constant 0 : index
      %c0_6 = arith.constant 0 : index
      %c0_7 = arith.constant 0 : index
      %6 = vector.load %arg2[%c0_5, %c0_6, %c0_7] : memref<5x18x20xbf16, #tpu.memory_space<vmem>>, vector<1x18x20xbf16>
      %7 = vector.shape_cast %6 : vector<1x18x20xbf16> to vector<18x20xbf16>
      %c0_i32_8 = arith.constant 0 : i32
      %8 = arith.addi %3, %c0_i32_8 : i32
      %9 = arith.index_cast %8 : i32 to index
      %c0_9 = arith.constant 0 : index
      %c0_10 = arith.constant 0 : index
      %10 = vector.load %arg1[%9, %c0_9, %c0_10] : memref<152x80x18xbf16, #tpu.memory_space<vmem>>, vector<1x80x18xbf16>
      %11 = vector.shape_cast %10 : vector<1x80x18xbf16> to vector<80x18xbf16>
      %cst_11 = arith.constant dense<0.000000e+00> : vector<80x20xf32>
      %12 = tpu.matmul %11, %7, %cst_11 {dimension_numbers = #tpu.dot_dimension_numbers<[1], [0], [0], [1], [0, 0, 1, 1], [], []>} : vector<80x18xbf16>, vector<18x20xbf16>, vector<80x20xf32> -> vector<80x20xf32>
      %13 = arith.addf %4, %12 : vector<80x20xf32>
      %c0_i32_12 = arith.constant 0 : i32
      %14 = arith.addi %3, %c0_i32_12 : i32
      %c1_i32_13 = arith.constant 1 : i32
      %15 = arith.addi %14, %c1_i32_13 : i32
      %16 = arith.index_cast %15 : i32 to index
      %c0_14 = arith.constant 0 : index
      %c0_15 = arith.constant 0 : index
      %17 = vector.load %arg1[%16, %c0_14, %c0_15] : memref<152x80x18xbf16, #tpu.memory_space<vmem>>, vector<1x80x18xbf16>
      %18 = vector.shape_cast %17 : vector<1x80x18xbf16> to vector<80x18xbf16>
      %cst_16 = arith.constant dense<0.000000e+00> : vector<80x20xf32>
      %19 = tpu.matmul %18, %7, %cst_16 {dimension_numbers = #tpu.dot_dimension_numbers<[1], [0], [0], [1], [0, 0, 1, 1], [], []>} : vector<80x18xbf16>, vector<18x20xbf16>, vector<80x20xf32> -> vector<80x20xf32>
      %20 = arith.addf %5, %19 : vector<80x20xf32>
      %c1 = arith.constant 1 : index
      %c0_17 = arith.constant 0 : index
      %c0_18 = arith.constant 0 : index
      %21 = vector.load %arg2[%c1, %c0_17, %c0_18] : memref<5x18x20xbf16, #tpu.memory_space<vmem>>, vector<1x18x20xbf16>
      %22 = vector.shape_cast %21 : vector<1x18x20xbf16> to vector<18x20xbf16>
      %c1_i32_19 = arith.constant 1 : i32
      %23 = arith.addi %3, %c1_i32_19 : i32
      %24 = arith.index_cast %23 : i32 to index
      %c0_20 = arith.constant 0 : index
      %c0_21 = arith.constant 0 : index
      %25 = vector.load %arg1[%24, %c0_20, %c0_21] : memref<152x80x18xbf16, #tpu.memory_space<vmem>>, vector<1x80x18xbf16>
      %26 = vector.shape_cast %25 : vector<1x80x18xbf16> to vector<80x18xbf16>
      %cst_22 = arith.constant dense<0.000000e+00> : vector<80x20xf32>
      %27 = tpu.matmul %26, %22, %cst_22 {dimension_numbers = #tpu.dot_dimension_numbers<[1], [0], [0], [1], [0, 0, 1, 1], [], []>} : vector<80x18xbf16>, vector<18x20xbf16>, vector<80x20xf32> -> vector<80x20xf32>
      %28 = arith.addf %13, %27 : vector<80x20xf32>
      %c1_i32_23 = arith.constant 1 : i32
      %29 = arith.addi %3, %c1_i32_23 : i32
      %c1_i32_24 = arith.constant 1 : i32
      %30 = arith.addi %29, %c1_i32_24 : i32
      %31 = arith.index_cast %30 : i32 to index
      %c0_25 = arith.constant 0 : index
      %c0_26 = arith.constant 0 : index
      %32 = vector.load %arg1[%31, %c0_25, %c0_26] : memref<152x80x18xbf16, #tpu.memory_space<vmem>>, vector<1x80x18xbf16>
      %33 = vector.shape_cast %32 : vector<1x80x18xbf16> to vector<80x18xbf16>
      %cst_27 = arith.constant dense<0.000000e+00> : vector<80x20xf32>
      %34 = tpu.matmul %33, %22, %cst_27 {dimension_numbers = #tpu.dot_dimension_numbers<[1], [0], [0], [1], [0, 0, 1, 1], [], []>} : vector<80x18xbf16>, vector<18x20xbf16>, vector<80x20xf32> -> vector<80x20xf32>
      %35 = arith.addf %20, %34 : vector<80x20xf32>
      %c2 = arith.constant 2 : index
      %c0_28 = arith.constant 0 : index
      %c0_29 = arith.constant 0 : index
      %36 = vector.load %arg2[%c2, %c0_28, %c0_29] : memref<5x18x20xbf16, #tpu.memory_space<vmem>>, vector<1x18x20xbf16>
      %37 = vector.shape_cast %36 : vector<1x18x20xbf16> to vector<18x20xbf16>
      %c2_i32_30 = arith.constant 2 : i32
      %38 = arith.addi %3, %c2_i32_30 : i32
      %39 = arith.index_cast %38 : i32 to index
      %c0_31 = arith.constant 0 : index
      %c0_32 = arith.constant 0 : index
      %40 = vector.load %arg1[%39, %c0_31, %c0_32] : memref<152x80x18xbf16, #tpu.memory_space<vmem>>, vector<1x80x18xbf16>
      %41 = vector.shape_cast %40 : vector<1x80x18xbf16> to vector<80x18xbf16>
      %cst_33 = arith.constant dense<0.000000e+00> : vector<80x20xf32>
      %42 = tpu.matmul %41, %37, %cst_33 {dimension_numbers = #tpu.dot_dimension_numbers<[1], [0], [0], [1], [0, 0, 1, 1], [], []>} : vector<80x18xbf16>, vector<18x20xbf16>, vector<80x20xf32> -> vector<80x20xf32>
      %43 = arith.addf %28, %42 : vector<80x20xf32>
      %c2_i32_34 = arith.constant 2 : i32
      %44 = arith.addi %3, %c2_i32_34 : i32
      %c1_i32_35 = arith.constant 1 : i32
      %45 = arith.addi %44, %c1_i32_35 : i32
      %46 = arith.index_cast %45 : i32 to index
      %c0_36 = arith.constant 0 : index
      %c0_37 = arith.constant 0 : index
      %47 = vector.load %arg1[%46, %c0_36, %c0_37] : memref<152x80x18xbf16, #tpu.memory_space<vmem>>, vector<1x80x18xbf16>
      %48 = vector.shape_cast %47 : vector<1x80x18xbf16> to vector<80x18xbf16>
      %cst_38 = arith.constant dense<0.000000e+00> : vector<80x20xf32>
      %49 = tpu.matmul %48, %37, %cst_38 {dimension_numbers = #tpu.dot_dimension_numbers<[1], [0], [0], [1], [0, 0, 1, 1], [], []>} : vector<80x18xbf16>, vector<18x20xbf16>, vector<80x20xf32> -> vector<80x20xf32>
      %50 = arith.addf %35, %49 : vector<80x20xf32>
      %c3 = arith.constant 3 : index
      %c0_39 = arith.constant 0 : index
      %c0_40 = arith.constant 0 : index
      %51 = vector.load %arg2[%c3, %c0_39, %c0_40] : memref<5x18x20xbf16, #tpu.memory_space<vmem>>, vector<1x18x20xbf16>
      %52 = vector.shape_cast %51 : vector<1x18x20xbf16> to vector<18x20xbf16>
      %c3_i32 = arith.constant 3 : i32
      %53 = arith.addi %3, %c3_i32 : i32
      %54 = arith.index_cast %53 : i32 to index
      %c0_41 = arith.constant 0 : index
      %c0_42 = arith.constant 0 : index
      %55 = vector.load %arg1[%54, %c0_41, %c0_42] : memref<152x80x18xbf16, #tpu.memory_space<vmem>>, vector<1x80x18xbf16>
      %56 = vector.shape_cast %55 : vector<1x80x18xbf16> to vector<80x18xbf16>
      %cst_43 = arith.constant dense<0.000000e+00> : vector<80x20xf32>
      %57 = tpu.matmul %56, %52, %cst_43 {dimension_numbers = #tpu.dot_dimension_numbers<[1], [0], [0], [1], [0, 0, 1, 1], [], []>} : vector<80x18xbf16>, vector<18x20xbf16>, vector<80x20xf32> -> vector<80x20xf32>
      %58 = arith.addf %43, %57 : vector<80x20xf32>
      %c3_i32_44 = arith.constant 3 : i32
      %59 = arith.addi %3, %c3_i32_44 : i32
      %c1_i32_45 = arith.constant 1 : i32
      %60 = arith.addi %59, %c1_i32_45 : i32
      %61 = arith.index_cast %60 : i32 to index
      %c0_46 = arith.constant 0 : index
      %c0_47 = arith.constant 0 : index
      %62 = vector.load %arg1[%61, %c0_46, %c0_47] : memref<152x80x18xbf16, #tpu.memory_space<vmem>>, vector<1x80x18xbf16>
      %63 = vector.shape_cast %62 : vector<1x80x18xbf16> to vector<80x18xbf16>
      %cst_48 = arith.constant dense<0.000000e+00> : vector<80x20xf32>
      %64 = tpu.matmul %63, %52, %cst_48 {dimension_numbers = #tpu.dot_dimension_numbers<[1], [0], [0], [1], [0, 0, 1, 1], [], []>} : vector<80x18xbf16>, vector<18x20xbf16>, vector<80x20xf32> -> vector<80x20xf32>
      %65 = arith.addf %50, %64 : vector<80x20xf32>
      %c4 = arith.constant 4 : index
      %c0_49 = arith.constant 0 : index
      %c0_50 = arith.constant 0 : index
      %66 = vector.load %arg2[%c4, %c0_49, %c0_50] : memref<5x18x20xbf16, #tpu.memory_space<vmem>>, vector<1x18x20xbf16>
      %67 = vector.shape_cast %66 : vector<1x18x20xbf16> to vector<18x20xbf16>
      %c4_i32 = arith.constant 4 : i32
      %68 = arith.addi %3, %c4_i32 : i32
      %69 = arith.index_cast %68 : i32 to index
      %c0_51 = arith.constant 0 : index
      %c0_52 = arith.constant 0 : index
      %70 = vector.load %arg1[%69, %c0_51, %c0_52] : memref<152x80x18xbf16, #tpu.memory_space<vmem>>, vector<1x80x18xbf16>
      %71 = vector.shape_cast %70 : vector<1x80x18xbf16> to vector<80x18xbf16>
      %cst_53 = arith.constant dense<0.000000e+00> : vector<80x20xf32>
      %72 = tpu.matmul %71, %67, %cst_53 {dimension_numbers = #tpu.dot_dimension_numbers<[1], [0], [0], [1], [0, 0, 1, 1], [], []>} : vector<80x18xbf16>, vector<18x20xbf16>, vector<80x20xf32> -> vector<80x20xf32>
      %73 = arith.addf %58, %72 : vector<80x20xf32>
      %c4_i32_54 = arith.constant 4 : i32
      %74 = arith.addi %3, %c4_i32_54 : i32
      %c1_i32_55 = arith.constant 1 : i32
      %75 = arith.addi %74, %c1_i32_55 : i32
      %76 = arith.index_cast %75 : i32 to index
      %c0_56 = arith.constant 0 : index
      %c0_57 = arith.constant 0 : index
      %77 = vector.load %arg1[%76, %c0_56, %c0_57] : memref<152x80x18xbf16, #tpu.memory_space<vmem>>, vector<1x80x18xbf16>
      %78 = vector.shape_cast %77 : vector<1x80x18xbf16> to vector<80x18xbf16>
      %cst_58 = arith.constant dense<0.000000e+00> : vector<80x20xf32>
      %79 = tpu.matmul %78, %67, %cst_58 {dimension_numbers = #tpu.dot_dimension_numbers<[1], [0], [0], [1], [0, 0, 1, 1], [], []>} : vector<80x18xbf16>, vector<18x20xbf16>, vector<80x20xf32> -> vector<80x20xf32>
      %80 = arith.addf %65, %79 : vector<80x20xf32>
      %81 = vector.broadcast %0 : vector<1x20xf32> to vector<80x20xf32>
      %82 = arith.mulf %73, %81 : vector<80x20xf32>
      %83 = vector.broadcast %1 : vector<1x20xf32> to vector<80x20xf32>
      %84 = arith.addf %82, %83 : vector<80x20xf32>
      %cst_59 = arith.constant 0.000000e+00 : f32
      %85 = vector.broadcast %cst_59 : f32 to vector<80x20xf32>
      %86 = arith.maximumf %84, %85 : vector<80x20xf32>
      %87 = vector.broadcast %0 : vector<1x20xf32> to vector<80x20xf32>
      %88 = arith.mulf %80, %87 : vector<80x20xf32>
      %89 = vector.broadcast %1 : vector<1x20xf32> to vector<80x20xf32>
      %90 = arith.addf %88, %89 : vector<80x20xf32>
      %cst_60 = arith.constant 0.000000e+00 : f32
      %91 = vector.broadcast %cst_60 : f32 to vector<80x20xf32>
      %92 = arith.maximumf %90, %91 : vector<80x20xf32>
      %93 = arith.maximumf %86, %92 : vector<80x20xf32>
      %94 = vector.extract_strided_slice %93 {offsets = [0, 0], sizes = [80, 10], strides = [1, 1]} : vector<80x20xf32> to vector<80x10xf32>
      %95 = vector.extract_strided_slice %93 {offsets = [0, 10], sizes = [80, 10], strides = [1, 1]} : vector<80x20xf32> to vector<80x10xf32>
      %96 = arith.maximumf %94, %95 : vector<80x10xf32>
      %97 = vector.extract_strided_slice %96 {offsets = [0, 0], sizes = [74, 10], strides = [1, 1]} : vector<80x10xf32> to vector<74x10xf32>
      %98 = arith.truncf %97 : vector<74x10xf32> to vector<74x10xbf16>
      %99 = arith.index_cast %arg6 : i32 to index
      %c0_61 = arith.constant 0 : index
      %c0_62 = arith.constant 0 : index
      %100 = vector.load %arg5[%99, %c0_61, %c0_62] : memref<74x74x10xbf16, #tpu.memory_space<vmem>>, vector<1x74x10xbf16>
      %101 = vector.shape_cast %100 : vector<1x74x10xbf16> to vector<74x10xbf16>
      %102 = vector.shape_cast %98 : vector<74x10xbf16> to vector<1x74x10xbf16>
      tpu.vector_store %arg5[%99, %c0_61, %c0_62], %102 {strides = array<i32>} : memref<74x74x10xbf16, #tpu.memory_space<vmem>>, vector<1x74x10xbf16>,
    }
    %c74_i32_3 = arith.constant 74 : i32
    return
  }
  func.func @transform_0(%arg0: i32) -> (i32, i32, i32) {
    %c0_i32 = arith.constant 0 : i32
    %c0_i32_0 = arith.constant 0 : i32
    %c0_i32_1 = arith.constant 0 : i32
    return %arg0, %c0_i32, %c0_i32_0 : i32, i32, i32
  }
  func.func @transform_1(%arg0: i32) -> (i32, i32, i32) {
    %c0_i32 = arith.constant 0 : i32
    %c0_i32_0 = arith.constant 0 : i32
    %c0_i32_1 = arith.constant 0 : i32
    %c0_i32_2 = arith.constant 0 : i32
    return %c0_i32, %c0_i32_0, %c0_i32_1 : i32, i32, i32
  }
  func.func @transform_2(%arg0: i32) -> (i32, i32) {
    %c0_i32 = arith.constant 0 : i32
    %c0_i32_0 = arith.constant 0 : i32
    %c0_i32_1 = arith.constant 0 : i32
    return %c0_i32, %c0_i32_0 : i32, i32
  }
  func.func @transform_3(%arg0: i32) -> (i32, i32) {
    %c0_i32 = arith.constant 0 : i32
    %c0_i32_0 = arith.constant 0 : i32
    %c0_i32_1 = arith.constant 0 : i32
    return %c0_i32, %c0_i32_0 : i32, i32
  }
  func.func @transform_4(%arg0: i32) -> (i32, i32, i32) {
    %c0_i32 = arith.constant 0 : i32
    %c0_i32_0 = arith.constant 0 : i32
    %c0_i32_1 = arith.constant 0 : i32
    return %arg0, %c0_i32, %c0_i32_0 : i32, i32, i32
  }
}

module attributes {stable_mosaic.version = 11 : i64} {
  func.func @_conv_pool_kernel(%arg0: i32, %arg1: memref<76x40x60xbf16, #tpu.memory_space<vmem>>, %arg2: memref<5x60x40xbf16, #tpu.memory_space<vmem>>, %arg3: memref<1x40xf32, #tpu.memory_space<vmem>>, %arg4: memref<1x40xf32, #tpu.memory_space<vmem>>, %arg5: memref<36x36x20xbf16, #tpu.memory_space<vmem>>) attributes {dimension_semantics = [#tpu.dimension_semantics<parallel>], iteration_bounds = array<i64: 2>, scalar_prefetch = 0 : i64, scratch_operands = 0 : i64, tpu.core_type = #tpu.core_type<tc>, window_params = [{transform_indices = @transform_0, window_bounds = array<i64: 76, 40, 60>}, {pipeline_mode = #tpu.pipeline_mode<synchronous>, transform_indices = @transform_1, window_bounds = array<i64: 5, 60, 40>}, {pipeline_mode = #tpu.pipeline_mode<synchronous>, transform_indices = @transform_2, window_bounds = array<i64: 1, 40>}, {pipeline_mode = #tpu.pipeline_mode<synchronous>, transform_indices = @transform_3, window_bounds = array<i64: 1, 40>}, {transform_indices = @transform_4, window_bounds = array<i64: 36, 36, 20>}]} {
    %c0 = arith.constant 0 : index
    %c0_0 = arith.constant 0 : index
    %0 = vector.load %arg3[%c0, %c0_0] : memref<1x40xf32, #tpu.memory_space<vmem>>, vector<1x40xf32>
    %c0_1 = arith.constant 0 : index
    %c0_2 = arith.constant 0 : index
    %1 = vector.load %arg4[%c0_1, %c0_2] : memref<1x40xf32, #tpu.memory_space<vmem>>, vector<1x40xf32>
    %c0_i32 = arith.constant 0 : i32
    %c36_i32 = arith.constant 36 : i32
    %2 = arith.addi %c0_i32, %c36_i32 : i32
    %c1_i32 = arith.constant 1 : i32
    scf.for %arg6 = %c0_i32 to %2 step %c1_i32  : i32 {
      %c2_i32 = arith.constant 2 : i32
      %3 = arith.muli %c2_i32, %arg6 : i32
      %cst = arith.constant 0.000000e+00 : f32
      %4 = vector.broadcast %cst : f32 to vector<40x40xf32>
      %cst_4 = arith.constant 0.000000e+00 : f32
      %5 = vector.broadcast %cst_4 : f32 to vector<40x40xf32>
      %c0_5 = arith.constant 0 : index
      %c0_6 = arith.constant 0 : index
      %c0_7 = arith.constant 0 : index
      %6 = vector.load %arg2[%c0_5, %c0_6, %c0_7] : memref<5x60x40xbf16, #tpu.memory_space<vmem>>, vector<1x60x40xbf16>
      %7 = vector.shape_cast %6 : vector<1x60x40xbf16> to vector<60x40xbf16>
      %c0_i32_8 = arith.constant 0 : i32
      %8 = arith.addi %3, %c0_i32_8 : i32
      %9 = arith.index_cast %8 : i32 to index
      %c0_9 = arith.constant 0 : index
      %c0_10 = arith.constant 0 : index
      %10 = vector.load %arg1[%9, %c0_9, %c0_10] : memref<76x40x60xbf16, #tpu.memory_space<vmem>>, vector<1x40x60xbf16>
      %11 = vector.shape_cast %10 : vector<1x40x60xbf16> to vector<40x60xbf16>
      %cst_11 = arith.constant dense<0.000000e+00> : vector<40x40xf32>
      %12 = tpu.matmul %11, %7, %cst_11 {dimension_numbers = #tpu.dot_dimension_numbers<[1], [0], [0], [1], [0, 0, 1, 1], [], []>} : vector<40x60xbf16>, vector<60x40xbf16>, vector<40x40xf32> -> vector<40x40xf32>
      %13 = arith.addf %4, %12 : vector<40x40xf32>
      %c0_i32_12 = arith.constant 0 : i32
      %14 = arith.addi %3, %c0_i32_12 : i32
      %c1_i32_13 = arith.constant 1 : i32
      %15 = arith.addi %14, %c1_i32_13 : i32
      %16 = arith.index_cast %15 : i32 to index
      %c0_14 = arith.constant 0 : index
      %c0_15 = arith.constant 0 : index
      %17 = vector.load %arg1[%16, %c0_14, %c0_15] : memref<76x40x60xbf16, #tpu.memory_space<vmem>>, vector<1x40x60xbf16>
      %18 = vector.shape_cast %17 : vector<1x40x60xbf16> to vector<40x60xbf16>
      %cst_16 = arith.constant dense<0.000000e+00> : vector<40x40xf32>
      %19 = tpu.matmul %18, %7, %cst_16 {dimension_numbers = #tpu.dot_dimension_numbers<[1], [0], [0], [1], [0, 0, 1, 1], [], []>} : vector<40x60xbf16>, vector<60x40xbf16>, vector<40x40xf32> -> vector<40x40xf32>
      %20 = arith.addf %5, %19 : vector<40x40xf32>
      %c1 = arith.constant 1 : index
      %c0_17 = arith.constant 0 : index
      %c0_18 = arith.constant 0 : index
      %21 = vector.load %arg2[%c1, %c0_17, %c0_18] : memref<5x60x40xbf16, #tpu.memory_space<vmem>>, vector<1x60x40xbf16>
      %22 = vector.shape_cast %21 : vector<1x60x40xbf16> to vector<60x40xbf16>
      %c1_i32_19 = arith.constant 1 : i32
      %23 = arith.addi %3, %c1_i32_19 : i32
      %24 = arith.index_cast %23 : i32 to index
      %c0_20 = arith.constant 0 : index
      %c0_21 = arith.constant 0 : index
      %25 = vector.load %arg1[%24, %c0_20, %c0_21] : memref<76x40x60xbf16, #tpu.memory_space<vmem>>, vector<1x40x60xbf16>
      %26 = vector.shape_cast %25 : vector<1x40x60xbf16> to vector<40x60xbf16>
      %cst_22 = arith.constant dense<0.000000e+00> : vector<40x40xf32>
      %27 = tpu.matmul %26, %22, %cst_22 {dimension_numbers = #tpu.dot_dimension_numbers<[1], [0], [0], [1], [0, 0, 1, 1], [], []>} : vector<40x60xbf16>, vector<60x40xbf16>, vector<40x40xf32> -> vector<40x40xf32>
      %28 = arith.addf %13, %27 : vector<40x40xf32>
      %c1_i32_23 = arith.constant 1 : i32
      %29 = arith.addi %3, %c1_i32_23 : i32
      %c1_i32_24 = arith.constant 1 : i32
      %30 = arith.addi %29, %c1_i32_24 : i32
      %31 = arith.index_cast %30 : i32 to index
      %c0_25 = arith.constant 0 : index
      %c0_26 = arith.constant 0 : index
      %32 = vector.load %arg1[%31, %c0_25, %c0_26] : memref<76x40x60xbf16, #tpu.memory_space<vmem>>, vector<1x40x60xbf16>
      %33 = vector.shape_cast %32 : vector<1x40x60xbf16> to vector<40x60xbf16>
      %cst_27 = arith.constant dense<0.000000e+00> : vector<40x40xf32>
      %34 = tpu.matmul %33, %22, %cst_27 {dimension_numbers = #tpu.dot_dimension_numbers<[1], [0], [0], [1], [0, 0, 1, 1], [], []>} : vector<40x60xbf16>, vector<60x40xbf16>, vector<40x40xf32> -> vector<40x40xf32>
      %35 = arith.addf %20, %34 : vector<40x40xf32>
      %c2 = arith.constant 2 : index
      %c0_28 = arith.constant 0 : index
      %c0_29 = arith.constant 0 : index
      %36 = vector.load %arg2[%c2, %c0_28, %c0_29] : memref<5x60x40xbf16, #tpu.memory_space<vmem>>, vector<1x60x40xbf16>
      %37 = vector.shape_cast %36 : vector<1x60x40xbf16> to vector<60x40xbf16>
      %c2_i32_30 = arith.constant 2 : i32
      %38 = arith.addi %3, %c2_i32_30 : i32
      %39 = arith.index_cast %38 : i32 to index
      %c0_31 = arith.constant 0 : index
      %c0_32 = arith.constant 0 : index
      %40 = vector.load %arg1[%39, %c0_31, %c0_32] : memref<76x40x60xbf16, #tpu.memory_space<vmem>>, vector<1x40x60xbf16>
      %41 = vector.shape_cast %40 : vector<1x40x60xbf16> to vector<40x60xbf16>
      %cst_33 = arith.constant dense<0.000000e+00> : vector<40x40xf32>
      %42 = tpu.matmul %41, %37, %cst_33 {dimension_numbers = #tpu.dot_dimension_numbers<[1], [0], [0], [1], [0, 0, 1, 1], [], []>} : vector<40x60xbf16>, vector<60x40xbf16>, vector<40x40xf32> -> vector<40x40xf32>
      %43 = arith.addf %28, %42 : vector<40x40xf32>
      %c2_i32_34 = arith.constant 2 : i32
      %44 = arith.addi %3, %c2_i32_34 : i32
      %c1_i32_35 = arith.constant 1 : i32
      %45 = arith.addi %44, %c1_i32_35 : i32
      %46 = arith.index_cast %45 : i32 to index
      %c0_36 = arith.constant 0 : index
      %c0_37 = arith.constant 0 : index
      %47 = vector.load %arg1[%46, %c0_36, %c0_37] : memref<76x40x60xbf16, #tpu.memory_space<vmem>>, vector<1x40x60xbf16>
      %48 = vector.shape_cast %47 : vector<1x40x60xbf16> to vector<40x60xbf16>
      %cst_38 = arith.constant dense<0.000000e+00> : vector<40x40xf32>
      %49 = tpu.matmul %48, %37, %cst_38 {dimension_numbers = #tpu.dot_dimension_numbers<[1], [0], [0], [1], [0, 0, 1, 1], [], []>} : vector<40x60xbf16>, vector<60x40xbf16>, vector<40x40xf32> -> vector<40x40xf32>
      %50 = arith.addf %35, %49 : vector<40x40xf32>
      %c3 = arith.constant 3 : index
      %c0_39 = arith.constant 0 : index
      %c0_40 = arith.constant 0 : index
      %51 = vector.load %arg2[%c3, %c0_39, %c0_40] : memref<5x60x40xbf16, #tpu.memory_space<vmem>>, vector<1x60x40xbf16>
      %52 = vector.shape_cast %51 : vector<1x60x40xbf16> to vector<60x40xbf16>
      %c3_i32 = arith.constant 3 : i32
      %53 = arith.addi %3, %c3_i32 : i32
      %54 = arith.index_cast %53 : i32 to index
      %c0_41 = arith.constant 0 : index
      %c0_42 = arith.constant 0 : index
      %55 = vector.load %arg1[%54, %c0_41, %c0_42] : memref<76x40x60xbf16, #tpu.memory_space<vmem>>, vector<1x40x60xbf16>
      %56 = vector.shape_cast %55 : vector<1x40x60xbf16> to vector<40x60xbf16>
      %cst_43 = arith.constant dense<0.000000e+00> : vector<40x40xf32>
      %57 = tpu.matmul %56, %52, %cst_43 {dimension_numbers = #tpu.dot_dimension_numbers<[1], [0], [0], [1], [0, 0, 1, 1], [], []>} : vector<40x60xbf16>, vector<60x40xbf16>, vector<40x40xf32> -> vector<40x40xf32>
      %58 = arith.addf %43, %57 : vector<40x40xf32>
      %c3_i32_44 = arith.constant 3 : i32
      %59 = arith.addi %3, %c3_i32_44 : i32
      %c1_i32_45 = arith.constant 1 : i32
      %60 = arith.addi %59, %c1_i32_45 : i32
      %61 = arith.index_cast %60 : i32 to index
      %c0_46 = arith.constant 0 : index
      %c0_47 = arith.constant 0 : index
      %62 = vector.load %arg1[%61, %c0_46, %c0_47] : memref<76x40x60xbf16, #tpu.memory_space<vmem>>, vector<1x40x60xbf16>
      %63 = vector.shape_cast %62 : vector<1x40x60xbf16> to vector<40x60xbf16>
      %cst_48 = arith.constant dense<0.000000e+00> : vector<40x40xf32>
      %64 = tpu.matmul %63, %52, %cst_48 {dimension_numbers = #tpu.dot_dimension_numbers<[1], [0], [0], [1], [0, 0, 1, 1], [], []>} : vector<40x60xbf16>, vector<60x40xbf16>, vector<40x40xf32> -> vector<40x40xf32>
      %65 = arith.addf %50, %64 : vector<40x40xf32>
      %c4 = arith.constant 4 : index
      %c0_49 = arith.constant 0 : index
      %c0_50 = arith.constant 0 : index
      %66 = vector.load %arg2[%c4, %c0_49, %c0_50] : memref<5x60x40xbf16, #tpu.memory_space<vmem>>, vector<1x60x40xbf16>
      %67 = vector.shape_cast %66 : vector<1x60x40xbf16> to vector<60x40xbf16>
      %c4_i32 = arith.constant 4 : i32
      %68 = arith.addi %3, %c4_i32 : i32
      %69 = arith.index_cast %68 : i32 to index
      %c0_51 = arith.constant 0 : index
      %c0_52 = arith.constant 0 : index
      %70 = vector.load %arg1[%69, %c0_51, %c0_52] : memref<76x40x60xbf16, #tpu.memory_space<vmem>>, vector<1x40x60xbf16>
      %71 = vector.shape_cast %70 : vector<1x40x60xbf16> to vector<40x60xbf16>
      %cst_53 = arith.constant dense<0.000000e+00> : vector<40x40xf32>
      %72 = tpu.matmul %71, %67, %cst_53 {dimension_numbers = #tpu.dot_dimension_numbers<[1], [0], [0], [1], [0, 0, 1, 1], [], []>} : vector<40x60xbf16>, vector<60x40xbf16>, vector<40x40xf32> -> vector<40x40xf32>
      %73 = arith.addf %58, %72 : vector<40x40xf32>
      %c4_i32_54 = arith.constant 4 : i32
      %74 = arith.addi %3, %c4_i32_54 : i32
      %c1_i32_55 = arith.constant 1 : i32
      %75 = arith.addi %74, %c1_i32_55 : i32
      %76 = arith.index_cast %75 : i32 to index
      %c0_56 = arith.constant 0 : index
      %c0_57 = arith.constant 0 : index
      %77 = vector.load %arg1[%76, %c0_56, %c0_57] : memref<76x40x60xbf16, #tpu.memory_space<vmem>>, vector<1x40x60xbf16>
      %78 = vector.shape_cast %77 : vector<1x40x60xbf16> to vector<40x60xbf16>
      %cst_58 = arith.constant dense<0.000000e+00> : vector<40x40xf32>
      %79 = tpu.matmul %78, %67, %cst_58 {dimension_numbers = #tpu.dot_dimension_numbers<[1], [0], [0], [1], [0, 0, 1, 1], [], []>} : vector<40x60xbf16>, vector<60x40xbf16>, vector<40x40xf32> -> vector<40x40xf32>
      %80 = arith.addf %65, %79 : vector<40x40xf32>
      %81 = vector.broadcast %0 : vector<1x40xf32> to vector<40x40xf32>
      %82 = arith.mulf %73, %81 : vector<40x40xf32>
      %83 = vector.broadcast %1 : vector<1x40xf32> to vector<40x40xf32>
      %84 = arith.addf %82, %83 : vector<40x40xf32>
      %cst_59 = arith.constant 0.000000e+00 : f32
      %85 = vector.broadcast %cst_59 : f32 to vector<40x40xf32>
      %86 = arith.maximumf %84, %85 : vector<40x40xf32>
      %87 = vector.broadcast %0 : vector<1x40xf32> to vector<40x40xf32>
      %88 = arith.mulf %80, %87 : vector<40x40xf32>
      %89 = vector.broadcast %1 : vector<1x40xf32> to vector<40x40xf32>
      %90 = arith.addf %88, %89 : vector<40x40xf32>
      %cst_60 = arith.constant 0.000000e+00 : f32
      %91 = vector.broadcast %cst_60 : f32 to vector<40x40xf32>
      %92 = arith.maximumf %90, %91 : vector<40x40xf32>
      %93 = arith.maximumf %86, %92 : vector<40x40xf32>
      %94 = vector.extract_strided_slice %93 {offsets = [0, 0], sizes = [40, 20], strides = [1, 1]} : vector<40x40xf32> to vector<40x20xf32>
      %95 = vector.extract_strided_slice %93 {offsets = [0, 20], sizes = [40, 20], strides = [1, 1]} : vector<40x40xf32> to vector<40x20xf32>
      %96 = arith.maximumf %94, %95 : vector<40x20xf32>
      %97 = vector.extract_strided_slice %96 {offsets = [0, 0], sizes = [36, 20], strides = [1, 1]} : vector<40x20xf32> to vector<36x20xf32>
      %98 = arith.truncf %97 : vector<36x20xf32> to vector<36x20xbf16>
      %99 = arith.index_cast %arg6 : i32 to index
      %c0_61 = arith.constant 0 : index
      %c0_62 = arith.constant 0 : index
      %100 = vector.load %arg5[%99, %c0_61, %c0_62] : memref<36x36x20xbf16, #tpu.memory_space<vmem>>, vector<1x36x20xbf16>
      %101 = vector.shape_cast %100 : vector<1x36x20xbf16> to vector<36x20xbf16>
      %102 = vector.shape_cast %98 : vector<36x20xbf16> to vector<1x36x20xbf16>
      tpu.vector_store %arg5[%99, %c0_61, %c0_62], %102 {strides = array<i32>} : memref<36x36x20xbf16, #tpu.memory_space<vmem>>, vector<1x36x20xbf16>,
    }
    %c36_i32_3 = arith.constant 36 : i32
    return
  }
  func.func @transform_0(%arg0: i32) -> (i32, i32, i32) {
    %c0_i32 = arith.constant 0 : i32
    %c0_i32_0 = arith.constant 0 : i32
    %c0_i32_1 = arith.constant 0 : i32
    return %arg0, %c0_i32, %c0_i32_0 : i32, i32, i32
  }
  func.func @transform_1(%arg0: i32) -> (i32, i32, i32) {
    %c0_i32 = arith.constant 0 : i32
    %c0_i32_0 = arith.constant 0 : i32
    %c0_i32_1 = arith.constant 0 : i32
    %c0_i32_2 = arith.constant 0 : i32
    return %c0_i32, %c0_i32_0, %c0_i32_1 : i32, i32, i32
  }
  func.func @transform_2(%arg0: i32) -> (i32, i32) {
    %c0_i32 = arith.constant 0 : i32
    %c0_i32_0 = arith.constant 0 : i32
    %c0_i32_1 = arith.constant 0 : i32
    return %c0_i32, %c0_i32_0 : i32, i32
  }
  func.func @transform_3(%arg0: i32) -> (i32, i32) {
    %c0_i32 = arith.constant 0 : i32
    %c0_i32_0 = arith.constant 0 : i32
    %c0_i32_1 = arith.constant 0 : i32
    return %c0_i32, %c0_i32_0 : i32, i32
  }
  func.func @transform_4(%arg0: i32) -> (i32, i32, i32) {
    %c0_i32 = arith.constant 0 : i32
    %c0_i32_0 = arith.constant 0 : i32
    %c0_i32_1 = arith.constant 0 : i32
    return %arg0, %c0_i32, %c0_i32_0 : i32, i32, i32
  }
}

module attributes {stable_mosaic.version = 11 : i64} {
  func.func @_conv_pool_kernel(%arg0: i32, %arg1: memref<36x16x160xbf16, #tpu.memory_space<vmem>>, %arg2: memref<7x160x20xbf16, #tpu.memory_space<vmem>>, %arg3: memref<1x20xf32, #tpu.memory_space<vmem>>, %arg4: memref<1x20xf32, #tpu.memory_space<vmem>>, %arg5: memref<15x15x10xbf16, #tpu.memory_space<vmem>>) attributes {dimension_semantics = [#tpu.dimension_semantics<parallel>], iteration_bounds = array<i64: 2>, scalar_prefetch = 0 : i64, scratch_operands = 0 : i64, tpu.core_type = #tpu.core_type<tc>, window_params = [{transform_indices = @transform_0, window_bounds = array<i64: 36, 16, 160>}, {pipeline_mode = #tpu.pipeline_mode<synchronous>, transform_indices = @transform_1, window_bounds = array<i64: 7, 160, 20>}, {pipeline_mode = #tpu.pipeline_mode<synchronous>, transform_indices = @transform_2, window_bounds = array<i64: 1, 20>}, {pipeline_mode = #tpu.pipeline_mode<synchronous>, transform_indices = @transform_3, window_bounds = array<i64: 1, 20>}, {transform_indices = @transform_4, window_bounds = array<i64: 15, 15, 10>}]} {
    %c0 = arith.constant 0 : index
    %c0_0 = arith.constant 0 : index
    %0 = vector.load %arg3[%c0, %c0_0] : memref<1x20xf32, #tpu.memory_space<vmem>>, vector<1x20xf32>
    %c0_1 = arith.constant 0 : index
    %c0_2 = arith.constant 0 : index
    %1 = vector.load %arg4[%c0_1, %c0_2] : memref<1x20xf32, #tpu.memory_space<vmem>>, vector<1x20xf32>
    %c0_i32 = arith.constant 0 : i32
    %c15_i32 = arith.constant 15 : i32
    %2 = arith.addi %c0_i32, %c15_i32 : i32
    %c1_i32 = arith.constant 1 : i32
    scf.for %arg6 = %c0_i32 to %2 step %c1_i32  : i32 {
      %c2_i32 = arith.constant 2 : i32
      %3 = arith.muli %c2_i32, %arg6 : i32
      %cst = arith.constant 0.000000e+00 : f32
      %4 = vector.broadcast %cst : f32 to vector<16x20xf32>
      %cst_4 = arith.constant 0.000000e+00 : f32
      %5 = vector.broadcast %cst_4 : f32 to vector<16x20xf32>
      %c0_5 = arith.constant 0 : index
      %c0_6 = arith.constant 0 : index
      %c0_7 = arith.constant 0 : index
      %6 = vector.load %arg2[%c0_5, %c0_6, %c0_7] : memref<7x160x20xbf16, #tpu.memory_space<vmem>>, vector<1x160x20xbf16>
      %7 = vector.shape_cast %6 : vector<1x160x20xbf16> to vector<160x20xbf16>
      %c0_i32_8 = arith.constant 0 : i32
      %8 = arith.addi %3, %c0_i32_8 : i32
      %9 = arith.index_cast %8 : i32 to index
      %c0_9 = arith.constant 0 : index
      %c0_10 = arith.constant 0 : index
      %10 = vector.load %arg1[%9, %c0_9, %c0_10] : memref<36x16x160xbf16, #tpu.memory_space<vmem>>, vector<1x16x160xbf16>
      %11 = vector.shape_cast %10 : vector<1x16x160xbf16> to vector<16x160xbf16>
      %cst_11 = arith.constant dense<0.000000e+00> : vector<16x20xf32>
      %12 = tpu.matmul %11, %7, %cst_11 {dimension_numbers = #tpu.dot_dimension_numbers<[1], [0], [0], [1], [0, 0, 1, 1], [], []>} : vector<16x160xbf16>, vector<160x20xbf16>, vector<16x20xf32> -> vector<16x20xf32>
      %13 = arith.addf %4, %12 : vector<16x20xf32>
      %c0_i32_12 = arith.constant 0 : i32
      %14 = arith.addi %3, %c0_i32_12 : i32
      %c1_i32_13 = arith.constant 1 : i32
      %15 = arith.addi %14, %c1_i32_13 : i32
      %16 = arith.index_cast %15 : i32 to index
      %c0_14 = arith.constant 0 : index
      %c0_15 = arith.constant 0 : index
      %17 = vector.load %arg1[%16, %c0_14, %c0_15] : memref<36x16x160xbf16, #tpu.memory_space<vmem>>, vector<1x16x160xbf16>
      %18 = vector.shape_cast %17 : vector<1x16x160xbf16> to vector<16x160xbf16>
      %cst_16 = arith.constant dense<0.000000e+00> : vector<16x20xf32>
      %19 = tpu.matmul %18, %7, %cst_16 {dimension_numbers = #tpu.dot_dimension_numbers<[1], [0], [0], [1], [0, 0, 1, 1], [], []>} : vector<16x160xbf16>, vector<160x20xbf16>, vector<16x20xf32> -> vector<16x20xf32>
      %20 = arith.addf %5, %19 : vector<16x20xf32>
      %c1 = arith.constant 1 : index
      %c0_17 = arith.constant 0 : index
      %c0_18 = arith.constant 0 : index
      %21 = vector.load %arg2[%c1, %c0_17, %c0_18] : memref<7x160x20xbf16, #tpu.memory_space<vmem>>, vector<1x160x20xbf16>
      %22 = vector.shape_cast %21 : vector<1x160x20xbf16> to vector<160x20xbf16>
      %c1_i32_19 = arith.constant 1 : i32
      %23 = arith.addi %3, %c1_i32_19 : i32
      %24 = arith.index_cast %23 : i32 to index
      %c0_20 = arith.constant 0 : index
      %c0_21 = arith.constant 0 : index
      %25 = vector.load %arg1[%24, %c0_20, %c0_21] : memref<36x16x160xbf16, #tpu.memory_space<vmem>>, vector<1x16x160xbf16>
      %26 = vector.shape_cast %25 : vector<1x16x160xbf16> to vector<16x160xbf16>
      %cst_22 = arith.constant dense<0.000000e+00> : vector<16x20xf32>
      %27 = tpu.matmul %26, %22, %cst_22 {dimension_numbers = #tpu.dot_dimension_numbers<[1], [0], [0], [1], [0, 0, 1, 1], [], []>} : vector<16x160xbf16>, vector<160x20xbf16>, vector<16x20xf32> -> vector<16x20xf32>
      %28 = arith.addf %13, %27 : vector<16x20xf32>
      %c1_i32_23 = arith.constant 1 : i32
      %29 = arith.addi %3, %c1_i32_23 : i32
      %c1_i32_24 = arith.constant 1 : i32
      %30 = arith.addi %29, %c1_i32_24 : i32
      %31 = arith.index_cast %30 : i32 to index
      %c0_25 = arith.constant 0 : index
      %c0_26 = arith.constant 0 : index
      %32 = vector.load %arg1[%31, %c0_25, %c0_26] : memref<36x16x160xbf16, #tpu.memory_space<vmem>>, vector<1x16x160xbf16>
      %33 = vector.shape_cast %32 : vector<1x16x160xbf16> to vector<16x160xbf16>
      %cst_27 = arith.constant dense<0.000000e+00> : vector<16x20xf32>
      %34 = tpu.matmul %33, %22, %cst_27 {dimension_numbers = #tpu.dot_dimension_numbers<[1], [0], [0], [1], [0, 0, 1, 1], [], []>} : vector<16x160xbf16>, vector<160x20xbf16>, vector<16x20xf32> -> vector<16x20xf32>
      %35 = arith.addf %20, %34 : vector<16x20xf32>
      %c2 = arith.constant 2 : index
      %c0_28 = arith.constant 0 : index
      %c0_29 = arith.constant 0 : index
      %36 = vector.load %arg2[%c2, %c0_28, %c0_29] : memref<7x160x20xbf16, #tpu.memory_space<vmem>>, vector<1x160x20xbf16>
      %37 = vector.shape_cast %36 : vector<1x160x20xbf16> to vector<160x20xbf16>
      %c2_i32_30 = arith.constant 2 : i32
      %38 = arith.addi %3, %c2_i32_30 : i32
      %39 = arith.index_cast %38 : i32 to index
      %c0_31 = arith.constant 0 : index
      %c0_32 = arith.constant 0 : index
      %40 = vector.load %arg1[%39, %c0_31, %c0_32] : memref<36x16x160xbf16, #tpu.memory_space<vmem>>, vector<1x16x160xbf16>
      %41 = vector.shape_cast %40 : vector<1x16x160xbf16> to vector<16x160xbf16>
      %cst_33 = arith.constant dense<0.000000e+00> : vector<16x20xf32>
      %42 = tpu.matmul %41, %37, %cst_33 {dimension_numbers = #tpu.dot_dimension_numbers<[1], [0], [0], [1], [0, 0, 1, 1], [], []>} : vector<16x160xbf16>, vector<160x20xbf16>, vector<16x20xf32> -> vector<16x20xf32>
      %43 = arith.addf %28, %42 : vector<16x20xf32>
      %c2_i32_34 = arith.constant 2 : i32
      %44 = arith.addi %3, %c2_i32_34 : i32
      %c1_i32_35 = arith.constant 1 : i32
      %45 = arith.addi %44, %c1_i32_35 : i32
      %46 = arith.index_cast %45 : i32 to index
      %c0_36 = arith.constant 0 : index
      %c0_37 = arith.constant 0 : index
      %47 = vector.load %arg1[%46, %c0_36, %c0_37] : memref<36x16x160xbf16, #tpu.memory_space<vmem>>, vector<1x16x160xbf16>
      %48 = vector.shape_cast %47 : vector<1x16x160xbf16> to vector<16x160xbf16>
      %cst_38 = arith.constant dense<0.000000e+00> : vector<16x20xf32>
      %49 = tpu.matmul %48, %37, %cst_38 {dimension_numbers = #tpu.dot_dimension_numbers<[1], [0], [0], [1], [0, 0, 1, 1], [], []>} : vector<16x160xbf16>, vector<160x20xbf16>, vector<16x20xf32> -> vector<16x20xf32>
      %50 = arith.addf %35, %49 : vector<16x20xf32>
      %c3 = arith.constant 3 : index
      %c0_39 = arith.constant 0 : index
      %c0_40 = arith.constant 0 : index
      %51 = vector.load %arg2[%c3, %c0_39, %c0_40] : memref<7x160x20xbf16, #tpu.memory_space<vmem>>, vector<1x160x20xbf16>
      %52 = vector.shape_cast %51 : vector<1x160x20xbf16> to vector<160x20xbf16>
      %c3_i32 = arith.constant 3 : i32
      %53 = arith.addi %3, %c3_i32 : i32
      %54 = arith.index_cast %53 : i32 to index
      %c0_41 = arith.constant 0 : index
      %c0_42 = arith.constant 0 : index
      %55 = vector.load %arg1[%54, %c0_41, %c0_42] : memref<36x16x160xbf16, #tpu.memory_space<vmem>>, vector<1x16x160xbf16>
      %56 = vector.shape_cast %55 : vector<1x16x160xbf16> to vector<16x160xbf16>
      %cst_43 = arith.constant dense<0.000000e+00> : vector<16x20xf32>
      %57 = tpu.matmul %56, %52, %cst_43 {dimension_numbers = #tpu.dot_dimension_numbers<[1], [0], [0], [1], [0, 0, 1, 1], [], []>} : vector<16x160xbf16>, vector<160x20xbf16>, vector<16x20xf32> -> vector<16x20xf32>
      %58 = arith.addf %43, %57 : vector<16x20xf32>
      %c3_i32_44 = arith.constant 3 : i32
      %59 = arith.addi %3, %c3_i32_44 : i32
      %c1_i32_45 = arith.constant 1 : i32
      %60 = arith.addi %59, %c1_i32_45 : i32
      %61 = arith.index_cast %60 : i32 to index
      %c0_46 = arith.constant 0 : index
      %c0_47 = arith.constant 0 : index
      %62 = vector.load %arg1[%61, %c0_46, %c0_47] : memref<36x16x160xbf16, #tpu.memory_space<vmem>>, vector<1x16x160xbf16>
      %63 = vector.shape_cast %62 : vector<1x16x160xbf16> to vector<16x160xbf16>
      %cst_48 = arith.constant dense<0.000000e+00> : vector<16x20xf32>
      %64 = tpu.matmul %63, %52, %cst_48 {dimension_numbers = #tpu.dot_dimension_numbers<[1], [0], [0], [1], [0, 0, 1, 1], [], []>} : vector<16x160xbf16>, vector<160x20xbf16>, vector<16x20xf32> -> vector<16x20xf32>
      %65 = arith.addf %50, %64 : vector<16x20xf32>
      %c4 = arith.constant 4 : index
      %c0_49 = arith.constant 0 : index
      %c0_50 = arith.constant 0 : index
      %66 = vector.load %arg2[%c4, %c0_49, %c0_50] : memref<7x160x20xbf16, #tpu.memory_space<vmem>>, vector<1x160x20xbf16>
      %67 = vector.shape_cast %66 : vector<1x160x20xbf16> to vector<160x20xbf16>
      %c4_i32 = arith.constant 4 : i32
      %68 = arith.addi %3, %c4_i32 : i32
      %69 = arith.index_cast %68 : i32 to index
      %c0_51 = arith.constant 0 : index
      %c0_52 = arith.constant 0 : index
      %70 = vector.load %arg1[%69, %c0_51, %c0_52] : memref<36x16x160xbf16, #tpu.memory_space<vmem>>, vector<1x16x160xbf16>
      %71 = vector.shape_cast %70 : vector<1x16x160xbf16> to vector<16x160xbf16>
      %cst_53 = arith.constant dense<0.000000e+00> : vector<16x20xf32>
      %72 = tpu.matmul %71, %67, %cst_53 {dimension_numbers = #tpu.dot_dimension_numbers<[1], [0], [0], [1], [0, 0, 1, 1], [], []>} : vector<16x160xbf16>, vector<160x20xbf16>, vector<16x20xf32> -> vector<16x20xf32>
      %73 = arith.addf %58, %72 : vector<16x20xf32>
      %c4_i32_54 = arith.constant 4 : i32
      %74 = arith.addi %3, %c4_i32_54 : i32
      %c1_i32_55 = arith.constant 1 : i32
      %75 = arith.addi %74, %c1_i32_55 : i32
      %76 = arith.index_cast %75 : i32 to index
      %c0_56 = arith.constant 0 : index
      %c0_57 = arith.constant 0 : index
      %77 = vector.load %arg1[%76, %c0_56, %c0_57] : memref<36x16x160xbf16, #tpu.memory_space<vmem>>, vector<1x16x160xbf16>
      %78 = vector.shape_cast %77 : vector<1x16x160xbf16> to vector<16x160xbf16>
      %cst_58 = arith.constant dense<0.000000e+00> : vector<16x20xf32>
      %79 = tpu.matmul %78, %67, %cst_58 {dimension_numbers = #tpu.dot_dimension_numbers<[1], [0], [0], [1], [0, 0, 1, 1], [], []>} : vector<16x160xbf16>, vector<160x20xbf16>, vector<16x20xf32> -> vector<16x20xf32>
      %80 = arith.addf %65, %79 : vector<16x20xf32>
      %c5 = arith.constant 5 : index
      %c0_59 = arith.constant 0 : index
      %c0_60 = arith.constant 0 : index
      %81 = vector.load %arg2[%c5, %c0_59, %c0_60] : memref<7x160x20xbf16, #tpu.memory_space<vmem>>, vector<1x160x20xbf16>
      %82 = vector.shape_cast %81 : vector<1x160x20xbf16> to vector<160x20xbf16>
      %c5_i32 = arith.constant 5 : i32
      %83 = arith.addi %3, %c5_i32 : i32
      %84 = arith.index_cast %83 : i32 to index
      %c0_61 = arith.constant 0 : index
      %c0_62 = arith.constant 0 : index
      %85 = vector.load %arg1[%84, %c0_61, %c0_62] : memref<36x16x160xbf16, #tpu.memory_space<vmem>>, vector<1x16x160xbf16>
      %86 = vector.shape_cast %85 : vector<1x16x160xbf16> to vector<16x160xbf16>
      %cst_63 = arith.constant dense<0.000000e+00> : vector<16x20xf32>
      %87 = tpu.matmul %86, %82, %cst_63 {dimension_numbers = #tpu.dot_dimension_numbers<[1], [0], [0], [1], [0, 0, 1, 1], [], []>} : vector<16x160xbf16>, vector<160x20xbf16>, vector<16x20xf32> -> vector<16x20xf32>
      %88 = arith.addf %73, %87 : vector<16x20xf32>
      %c5_i32_64 = arith.constant 5 : i32
      %89 = arith.addi %3, %c5_i32_64 : i32
      %c1_i32_65 = arith.constant 1 : i32
      %90 = arith.addi %89, %c1_i32_65 : i32
      %91 = arith.index_cast %90 : i32 to index
      %c0_66 = arith.constant 0 : index
      %c0_67 = arith.constant 0 : index
      %92 = vector.load %arg1[%91, %c0_66, %c0_67] : memref<36x16x160xbf16, #tpu.memory_space<vmem>>, vector<1x16x160xbf16>
      %93 = vector.shape_cast %92 : vector<1x16x160xbf16> to vector<16x160xbf16>
      %cst_68 = arith.constant dense<0.000000e+00> : vector<16x20xf32>
      %94 = tpu.matmul %93, %82, %cst_68 {dimension_numbers = #tpu.dot_dimension_numbers<[1], [0], [0], [1], [0, 0, 1, 1], [], []>} : vector<16x160xbf16>, vector<160x20xbf16>, vector<16x20xf32> -> vector<16x20xf32>
      %95 = arith.addf %80, %94 : vector<16x20xf32>
      %c6 = arith.constant 6 : index
      %c0_69 = arith.constant 0 : index
      %c0_70 = arith.constant 0 : index
      %96 = vector.load %arg2[%c6, %c0_69, %c0_70] : memref<7x160x20xbf16, #tpu.memory_space<vmem>>, vector<1x160x20xbf16>
      %97 = vector.shape_cast %96 : vector<1x160x20xbf16> to vector<160x20xbf16>
      %c6_i32 = arith.constant 6 : i32
      %98 = arith.addi %3, %c6_i32 : i32
      %99 = arith.index_cast %98 : i32 to index
      %c0_71 = arith.constant 0 : index
      %c0_72 = arith.constant 0 : index
      %100 = vector.load %arg1[%99, %c0_71, %c0_72] : memref<36x16x160xbf16, #tpu.memory_space<vmem>>, vector<1x16x160xbf16>
      %101 = vector.shape_cast %100 : vector<1x16x160xbf16> to vector<16x160xbf16>
      %cst_73 = arith.constant dense<0.000000e+00> : vector<16x20xf32>
      %102 = tpu.matmul %101, %97, %cst_73 {dimension_numbers = #tpu.dot_dimension_numbers<[1], [0], [0], [1], [0, 0, 1, 1], [], []>} : vector<16x160xbf16>, vector<160x20xbf16>, vector<16x20xf32> -> vector<16x20xf32>
      %103 = arith.addf %88, %102 : vector<16x20xf32>
      %c6_i32_74 = arith.constant 6 : i32
      %104 = arith.addi %3, %c6_i32_74 : i32
      %c1_i32_75 = arith.constant 1 : i32
      %105 = arith.addi %104, %c1_i32_75 : i32
      %106 = arith.index_cast %105 : i32 to index
      %c0_76 = arith.constant 0 : index
      %c0_77 = arith.constant 0 : index
      %107 = vector.load %arg1[%106, %c0_76, %c0_77] : memref<36x16x160xbf16, #tpu.memory_space<vmem>>, vector<1x16x160xbf16>
      %108 = vector.shape_cast %107 : vector<1x16x160xbf16> to vector<16x160xbf16>
      %cst_78 = arith.constant dense<0.000000e+00> : vector<16x20xf32>
      %109 = tpu.matmul %108, %97, %cst_78 {dimension_numbers = #tpu.dot_dimension_numbers<[1], [0], [0], [1], [0, 0, 1, 1], [], []>} : vector<16x160xbf16>, vector<160x20xbf16>, vector<16x20xf32> -> vector<16x20xf32>
      %110 = arith.addf %95, %109 : vector<16x20xf32>
      %111 = vector.broadcast %0 : vector<1x20xf32> to vector<16x20xf32>
      %112 = arith.mulf %103, %111 : vector<16x20xf32>
      %113 = vector.broadcast %1 : vector<1x20xf32> to vector<16x20xf32>
      %114 = arith.addf %112, %113 : vector<16x20xf32>
      %cst_79 = arith.constant 0.000000e+00 : f32
      %115 = vector.broadcast %cst_79 : f32 to vector<16x20xf32>
      %116 = arith.maximumf %114, %115 : vector<16x20xf32>
      %117 = vector.broadcast %0 : vector<1x20xf32> to vector<16x20xf32>
      %118 = arith.mulf %110, %117 : vector<16x20xf32>
      %119 = vector.broadcast %1 : vector<1x20xf32> to vector<16x20xf32>
      %120 = arith.addf %118, %119 : vector<16x20xf32>
      %cst_80 = arith.constant 0.000000e+00 : f32
      %121 = vector.broadcast %cst_80 : f32 to vector<16x20xf32>
      %122 = arith.maximumf %120, %121 : vector<16x20xf32>
      %123 = arith.maximumf %116, %122 : vector<16x20xf32>
      %124 = vector.extract_strided_slice %123 {offsets = [0, 0], sizes = [16, 10], strides = [1, 1]} : vector<16x20xf32> to vector<16x10xf32>
      %125 = vector.extract_strided_slice %123 {offsets = [0, 10], sizes = [16, 10], strides = [1, 1]} : vector<16x20xf32> to vector<16x10xf32>
      %126 = arith.maximumf %124, %125 : vector<16x10xf32>
      %127 = vector.extract_strided_slice %126 {offsets = [0, 0], sizes = [15, 10], strides = [1, 1]} : vector<16x10xf32> to vector<15x10xf32>
      %128 = arith.truncf %127 : vector<15x10xf32> to vector<15x10xbf16>
      %129 = arith.index_cast %arg6 : i32 to index
      %c0_81 = arith.constant 0 : index
      %c0_82 = arith.constant 0 : index
      %130 = vector.load %arg5[%129, %c0_81, %c0_82] : memref<15x15x10xbf16, #tpu.memory_space<vmem>>, vector<1x15x10xbf16>
      %131 = vector.shape_cast %130 : vector<1x15x10xbf16> to vector<15x10xbf16>
      %132 = vector.shape_cast %128 : vector<15x10xbf16> to vector<1x15x10xbf16>
      tpu.vector_store %arg5[%129, %c0_81, %c0_82], %132 {strides = array<i32>} : memref<15x15x10xbf16, #tpu.memory_space<vmem>>, vector<1x15x10xbf16>,
    }
    %c15_i32_3 = arith.constant 15 : i32
    return
  }
  func.func @transform_0(%arg0: i32) -> (i32, i32, i32) {
    %c0_i32 = arith.constant 0 : i32
    %c0_i32_0 = arith.constant 0 : i32
    %c0_i32_1 = arith.constant 0 : i32
    return %arg0, %c0_i32, %c0_i32_0 : i32, i32, i32
  }
  func.func @transform_1(%arg0: i32) -> (i32, i32, i32) {
    %c0_i32 = arith.constant 0 : i32
    %c0_i32_0 = arith.constant 0 : i32
    %c0_i32_1 = arith.constant 0 : i32
    %c0_i32_2 = arith.constant 0 : i32
    return %c0_i32, %c0_i32_0, %c0_i32_1 : i32, i32, i32
  }
  func.func @transform_2(%arg0: i32) -> (i32, i32) {
    %c0_i32 = arith.constant 0 : i32
    %c0_i32_0 = arith.constant 0 : i32
    %c0_i32_1 = arith.constant 0 : i32
    return %c0_i32, %c0_i32_0 : i32, i32
  }
  func.func @transform_3(%arg0: i32) -> (i32, i32) {
    %c0_i32 = arith.constant 0 : i32
    %c0_i32_0 = arith.constant 0 : i32
    %c0_i32_1 = arith.constant 0 : i32
    return %c0_i32, %c0_i32_0 : i32, i32
  }
  func.func @transform_4(%arg0: i32) -> (i32, i32, i32) {
    %c0_i32 = arith.constant 0 : i32
    %c0_i32_0 = arith.constant 0 : i32
    %c0_i32_1 = arith.constant 0 : i32
    return %arg0, %c0_i32, %c0_i32_0 : i32, i32, i32
  }
}

module attributes {stable_mosaic.version = 11 : i64} {
  func.func @_linear_kernel(%arg0: i32, %arg1: memref<16x2304xbf16, #tpu.memory_space<vmem>>, %arg2: memref<2304x512xbf16, #tpu.memory_space<vmem>>, %arg3: memref<1x512xf32, #tpu.memory_space<vmem>>, %arg4: memref<16x512xbf16, #tpu.memory_space<vmem>>) attributes {dimension_semantics = [#tpu.dimension_semantics<parallel>], iteration_bounds = array<i64: 2>, scalar_prefetch = 0 : i64, scratch_operands = 0 : i64, tpu.core_type = #tpu.core_type<tc>, window_params = [{pipeline_mode = #tpu.pipeline_mode<synchronous>, transform_indices = @transform_0, window_bounds = array<i64: 16, 2304>}, {transform_indices = @transform_1, window_bounds = array<i64: 2304, 512>}, {transform_indices = @transform_2, window_bounds = array<i64: 1, 512>}, {transform_indices = @transform_3, window_bounds = array<i64: 16, 512>}]} {
    %c0 = arith.constant 0 : index
    %c0_0 = arith.constant 0 : index
    %0 = vector.load %arg1[%c0, %c0_0] : memref<16x2304xbf16, #tpu.memory_space<vmem>>, vector<16x2304xbf16>
    %c0_1 = arith.constant 0 : index
    %c0_2 = arith.constant 0 : index
    %1 = vector.load %arg2[%c0_1, %c0_2] : memref<2304x512xbf16, #tpu.memory_space<vmem>>, vector<2304x512xbf16>
    %cst = arith.constant dense<0.000000e+00> : vector<16x512xf32>
    %2 = tpu.matmul %0, %1, %cst {dimension_numbers = #tpu.dot_dimension_numbers<[1], [0], [0], [1], [0, 0, 1, 1], [], []>} : vector<16x2304xbf16>, vector<2304x512xbf16>, vector<16x512xf32> -> vector<16x512xf32>
    %c0_3 = arith.constant 0 : index
    %c0_4 = arith.constant 0 : index
    %3 = vector.load %arg3[%c0_3, %c0_4] : memref<1x512xf32, #tpu.memory_space<vmem>>, vector<1x512xf32>
    %4 = vector.broadcast %3 : vector<1x512xf32> to vector<16x512xf32>
    %5 = arith.addf %2, %4 : vector<16x512xf32>
    %cst_5 = arith.constant 0.000000e+00 : f32
    %6 = vector.broadcast %cst_5 : f32 to vector<16x512xf32>
    %7 = arith.maximumf %5, %6 : vector<16x512xf32>
    %8 = arith.truncf %7 : vector<16x512xf32> to vector<16x512xbf16>
    %c0_6 = arith.constant 0 : index
    %c0_7 = arith.constant 0 : index
    %9 = vector.load %arg4[%c0_6, %c0_7] : memref<16x512xbf16, #tpu.memory_space<vmem>>, vector<16x512xbf16>
    tpu.vector_store %arg4[%c0_6, %c0_7], %8 {strides = array<i32>} : memref<16x512xbf16, #tpu.memory_space<vmem>>, vector<16x512xbf16>,
    return
  }
  func.func @transform_0(%arg0: i32) -> (i32, i32) {
    %c0_i32 = arith.constant 0 : i32
    %c0_i32_0 = arith.constant 0 : i32
    %c0_i32_1 = arith.constant 0 : i32
    return %c0_i32, %c0_i32_0 : i32, i32
  }
  func.func @transform_1(%arg0: i32) -> (i32, i32) {
    %c0_i32 = arith.constant 0 : i32
    %c0_i32_0 = arith.constant 0 : i32
    return %c0_i32, %arg0 : i32, i32
  }
  func.func @transform_2(%arg0: i32) -> (i32, i32) {
    %c0_i32 = arith.constant 0 : i32
    %c0_i32_0 = arith.constant 0 : i32
    return %c0_i32, %arg0 : i32, i32
  }
  func.func @transform_3(%arg0: i32) -> (i32, i32) {
    %c0_i32 = arith.constant 0 : i32
    %c0_i32_0 = arith.constant 0 : i32
    return %c0_i32, %arg0 : i32, i32
  }
}

module attributes {stable_mosaic.version = 11 : i64} {
  func.func @_linear_kernel(%arg0: i32, %arg1: memref<16x1024xbf16, #tpu.memory_space<vmem>>, %arg2: memref<1024x256xbf16, #tpu.memory_space<vmem>>, %arg3: memref<1x256xf32, #tpu.memory_space<vmem>>, %arg4: memref<16x256xbf16, #tpu.memory_space<vmem>>) attributes {dimension_semantics = [#tpu.dimension_semantics<parallel>], iteration_bounds = array<i64: 2>, scalar_prefetch = 0 : i64, scratch_operands = 0 : i64, tpu.core_type = #tpu.core_type<tc>, window_params = [{pipeline_mode = #tpu.pipeline_mode<synchronous>, transform_indices = @transform_0, window_bounds = array<i64: 16, 1024>}, {transform_indices = @transform_1, window_bounds = array<i64: 1024, 256>}, {transform_indices = @transform_2, window_bounds = array<i64: 1, 256>}, {transform_indices = @transform_3, window_bounds = array<i64: 16, 256>}]} {
    %c0 = arith.constant 0 : index
    %c0_0 = arith.constant 0 : index
    %0 = vector.load %arg1[%c0, %c0_0] : memref<16x1024xbf16, #tpu.memory_space<vmem>>, vector<16x1024xbf16>
    %c0_1 = arith.constant 0 : index
    %c0_2 = arith.constant 0 : index
    %1 = vector.load %arg2[%c0_1, %c0_2] : memref<1024x256xbf16, #tpu.memory_space<vmem>>, vector<1024x256xbf16>
    %cst = arith.constant dense<0.000000e+00> : vector<16x256xf32>
    %2 = tpu.matmul %0, %1, %cst {dimension_numbers = #tpu.dot_dimension_numbers<[1], [0], [0], [1], [0, 0, 1, 1], [], []>} : vector<16x1024xbf16>, vector<1024x256xbf16>, vector<16x256xf32> -> vector<16x256xf32>
    %c0_3 = arith.constant 0 : index
    %c0_4 = arith.constant 0 : index
    %3 = vector.load %arg3[%c0_3, %c0_4] : memref<1x256xf32, #tpu.memory_space<vmem>>, vector<1x256xf32>
    %4 = vector.broadcast %3 : vector<1x256xf32> to vector<16x256xf32>
    %5 = arith.addf %2, %4 : vector<16x256xf32>
    %cst_5 = arith.constant 0.000000e+00 : f32
    %6 = vector.broadcast %cst_5 : f32 to vector<16x256xf32>
    %7 = arith.maximumf %5, %6 : vector<16x256xf32>
    %8 = arith.truncf %7 : vector<16x256xf32> to vector<16x256xbf16>
    %c0_6 = arith.constant 0 : index
    %c0_7 = arith.constant 0 : index
    %9 = vector.load %arg4[%c0_6, %c0_7] : memref<16x256xbf16, #tpu.memory_space<vmem>>, vector<16x256xbf16>
    tpu.vector_store %arg4[%c0_6, %c0_7], %8 {strides = array<i32>} : memref<16x256xbf16, #tpu.memory_space<vmem>>, vector<16x256xbf16>,
    return
  }
  func.func @transform_0(%arg0: i32) -> (i32, i32) {
    %c0_i32 = arith.constant 0 : i32
    %c0_i32_0 = arith.constant 0 : i32
    %c0_i32_1 = arith.constant 0 : i32
    return %c0_i32, %c0_i32_0 : i32, i32
  }
  func.func @transform_1(%arg0: i32) -> (i32, i32) {
    %c0_i32 = arith.constant 0 : i32
    %c0_i32_0 = arith.constant 0 : i32
    return %c0_i32, %arg0 : i32, i32
  }
  func.func @transform_2(%arg0: i32) -> (i32, i32) {
    %c0_i32 = arith.constant 0 : i32
    %c0_i32_0 = arith.constant 0 : i32
    return %c0_i32, %arg0 : i32, i32
  }
  func.func @transform_3(%arg0: i32) -> (i32, i32) {
    %c0_i32 = arith.constant 0 : i32
    %c0_i32_0 = arith.constant 0 : i32
    return %c0_i32, %arg0 : i32, i32
  }
}

module attributes {stable_mosaic.version = 11 : i64} {
  func.func @_linear_kernel(%arg0: i32, %arg1: memref<16x512xbf16, #tpu.memory_space<vmem>>, %arg2: memref<512x128xbf16, #tpu.memory_space<vmem>>, %arg3: memref<1x128xf32, #tpu.memory_space<vmem>>, %arg4: memref<16x6xf32, #tpu.memory_space<vmem>>) attributes {dimension_semantics = [#tpu.dimension_semantics<parallel>], iteration_bounds = array<i64: 1>, scalar_prefetch = 0 : i64, scratch_operands = 0 : i64, tpu.core_type = #tpu.core_type<tc>, window_params = [{pipeline_mode = #tpu.pipeline_mode<synchronous>, transform_indices = @transform_0, window_bounds = array<i64: 16, 512>}, {transform_indices = @transform_1, window_bounds = array<i64: 512, 128>}, {transform_indices = @transform_2, window_bounds = array<i64: 1, 128>}, {transform_indices = @transform_3, window_bounds = array<i64: 16, 6>}]} {
    %c0 = arith.constant 0 : index
    %c0_0 = arith.constant 0 : index
    %0 = vector.load %arg1[%c0, %c0_0] : memref<16x512xbf16, #tpu.memory_space<vmem>>, vector<16x512xbf16>
    %c0_1 = arith.constant 0 : index
    %c0_2 = arith.constant 0 : index
    %1 = vector.load %arg2[%c0_1, %c0_2] : memref<512x128xbf16, #tpu.memory_space<vmem>>, vector<512x128xbf16>
    %cst = arith.constant dense<0.000000e+00> : vector<16x128xf32>
    %2 = tpu.matmul %0, %1, %cst {dimension_numbers = #tpu.dot_dimension_numbers<[1], [0], [0], [1], [0, 0, 1, 1], [], []>} : vector<16x512xbf16>, vector<512x128xbf16>, vector<16x128xf32> -> vector<16x128xf32>
    %3 = vector.extract_strided_slice %2 {offsets = [0, 0], sizes = [16, 6], strides = [1, 1]} : vector<16x128xf32> to vector<16x6xf32>
    %c0_3 = arith.constant 0 : index
    %c0_4 = arith.constant 0 : index
    %4 = vector.load %arg3[%c0_3, %c0_4] : memref<1x128xf32, #tpu.memory_space<vmem>>, vector<1x6xf32>
    %5 = vector.broadcast %4 : vector<1x6xf32> to vector<16x6xf32>
    %6 = arith.addf %3, %5 : vector<16x6xf32>
    %c0_5 = arith.constant 0 : index
    %c0_6 = arith.constant 0 : index
    %7 = vector.load %arg4[%c0_5, %c0_6] : memref<16x6xf32, #tpu.memory_space<vmem>>, vector<16x6xf32>
    tpu.vector_store %arg4[%c0_5, %c0_6], %6 {strides = array<i32>} : memref<16x6xf32, #tpu.memory_space<vmem>>, vector<16x6xf32>,
    return
  }
  func.func @transform_0(%arg0: i32) -> (i32, i32) {
    %c0_i32 = arith.constant 0 : i32
    %c0_i32_0 = arith.constant 0 : i32
    %c0_i32_1 = arith.constant 0 : i32
    return %c0_i32, %c0_i32_0 : i32, i32
  }
  func.func @transform_1(%arg0: i32) -> (i32, i32) {
    %c0_i32 = arith.constant 0 : i32
    %c0_i32_0 = arith.constant 0 : i32
    return %c0_i32, %arg0 : i32, i32
  }
  func.func @transform_2(%arg0: i32) -> (i32, i32) {
    %c0_i32 = arith.constant 0 : i32
    %c0_i32_0 = arith.constant 0 : i32
    return %c0_i32, %arg0 : i32, i32
  }
  func.func @transform_3(%arg0: i32) -> (i32, i32) {
    %c0_i32 = arith.constant 0 : i32
    %c0_i32_0 = arith.constant 0 : i32
    return %c0_i32, %arg0 : i32, i32
  }
}

</mosaic_0001>

<bundles_post_ra>
// kernel: custom_cnn_forward.6
= control target key start
LH: loop header
LB: loop body
LE: loop exit
PB: predicated region body
PF: predicated region fallthrough
CT: control target
= control target key end

     0   :  { %s1660_s15 = smov 0   ;;  %s2004_s0 = inlined_call_operand.vmem [shape: bf16[304,80,18], index: 0, kind: input, shape index: {}]   ;;  %s2005_s1 = inlined_call_operand.vmem [shape: bf16[5,18,20], index: 1, kind: input, shape index: {}]   ;;  %s2006_s2 = inlined_call_operand.vmem [shape: f32[1,20], index: 2, kind: input, shape index: {}]   ;;  %s2007_s3 = inlined_call_operand.vmem [shape: f32[1,20], index: 3, kind: input, shape index: {}]   ;;  %s2008_s4 = inlined_call_operand.vmem [shape: bf16[148,74,10], index: 4, kind: output, shape index: {}]  }
   0x1 LB: > { %s1258_s16 = sadd.s32 4294967295, %s1628_s15   ;;  %p1262_p0 = scmp.ge.s32.totalorder %s1628_s15, 1  ;;  %s1628_s15 = sphi %s1660_s15, %s14_s15  }
   0x2   : > { %p164_p1 = scmp.lt.s32.totalorder %s1628_s15, 3 }
   0x4   : > { %p165_p2 = pnand %p1262_p0, %p164_p1 }
   0x5   : > { %s192_s17 = smul.u32 (!%p165_p2), 152, %s1258_s16  ;;  %s1688_s5 = smov (!%p165_p2), 0  }
   0x6   : > { %168 = sbr.rel (%p165_p2) target bundleno = 475 (0x1db), region = 36 }
   0x7   : > { %s199_s22 = smul.u32 (!%p165_p2), 74, %s1258_s16  ;;  %p193_p3 = scmp.lt.s32.totalorder (!%p165_p2), %s192_s17, 303 }
   0x9   : > { %p200_p4 = scmp.lt.s32.totalorder (!%p165_p2), %s199_s22, 147 }
   0xb   : > { %v1671_v0 = vld [vmem:[%s2006_s2] sm:$0x1]  ;;  %s2010_s17 = smov (!%p193_p3, %s192_s17), 303  ;;  %s2012_s22 = smov (!%p200_p4, %s199_s22), 147 }
   0xc   : > { %v1676_v1 = vld [vmem:[%s2007_s3] sm:$0x1]  ;;  %s1574_s23 = smul.u32 40, %s2010_s17 }
   0xd   : > { %s1575_s24 = smul.u32 40, %s2012_s22 }
   0xe   : > { %s1681_s27 = scalar_lea.vmem %s2004_s0, %s1574_s23 }
   0xf   : > { %s1686_s30 = scalar_lea.vmem %s2008_s4, %s1575_s24 }
  0x10 LB: >> { %v1282_v2 = vld [vmem:[%s2005_s1 + $0x14] sm:$0x1]  ;;  %v218_v3 = vld [vmem:[%s2005_s1 + $0x8] sm:$0x1]  ;;  %v1385_v6 = vld [vmem:[%s2005_s1 + $0x20] sm:$0x1]  ;;  %s1632_s5 = sphi %s1688_s5, %s214_s5  }
  0x11   : >> { %v280_v4 = vunpack.c.l.b16 %v1282_v2  ;;  %v368_v5 = vunpack.c.l.b16 %v218_v3  ;;  %vm300_vm0 = vcmask 1040384   ;;  %s1534_s12 = smul.u32 80, %s1632_s5  ;;  %v555_v7 = vunpack.c.l.b16 %v1385_v6  ;;  %v1545_v13 = vld [vmem:[%s2005_s1 + $0xc] sm:$0xff]  ;;  %v1533_v14 = vld [vmem:[%s2005_s1] sm:$0xff]  ;;  %v1551_v20 = vld [vmem:[%s2005_s1 + $0x18] sm:$0xff]  ;;  %s1634_s6 = smov 118  }
  0x12   : >> { %vm284_vm1 = vcmask 146432   ;;  %v1434_v21 = vld [vmem:[%s2005_s1 + $0x2c] sm:$0x1]  ;;  %v1483_v29 = vld [vmem:[%s2005_s1 + $0x38] sm:$0x1]  ;;  %v1557_v38 = vld [vmem:[%s2005_s1 + $0x24] sm:$0xff] }
  0x13   : >> { %v282_v8 = vpack.c.b16 %v280_v4, %v280_v4  ;;  %v370_v9 = vpack.c.b16 %v368_v5, %v368_v5  ;;  %v557_v12 = vpack.c.b16 %v555_v7, %v555_v7  ;;  %s1709_s16 = scalar_lea.vmem %s1681_s27, %s1534_s12  ;;  %v713_v22 = vunpack.c.l.b16 %v1434_v21  ;;  %v1563_v39 = vld [vmem:[%s2005_s1 + $0x30] sm:$0xff]  ;;  %s1569_s7 = smul.u32 40, %s1632_s5 }
  0x14   : >> { %v1540_v15 = vld [vmem:[%s1709_s16 + $0x28] sm:$0xff]  ;;  %v1716_v16 = vld [vmem:[%s1709_s16 + $0x40] sm:$0xff]  ;;  %v1538_v19 = vld [vmem:[%s1709_s16 + $0x18] sm:$0xff]  ;;  %v871_v30 = vunpack.c.l.b16 %v1483_v29  ;;  %vm1159_vm2 = vcmask 76800   ;;  %vm1169_vm3 = vcmask 73728   ;;  %s214_s5 = sadd.s32 1, %s1632_s5  }
  0x15   : >> { %v302_v10 = vsel %vm300_vm0, %v282_v8, 0  ;;  %v388_v11 = vsel %vm300_vm0, %v370_v9, 0  ;;  %v560_v17 = vsel %vm300_vm0, %v557_v12, 0  ;;  %v1535_v18 = vld [vmem:[%s1709_s16] sm:$0xff]  ;;  %v715_v23 = vpack.c.b16 %v713_v22, %v713_v22  ;;  %v1541_v25 = vld [vmem:[%s1709_s16 + $0x30] sm:$0xff]  ;;  %v1544_v26 = vld [vmem:[%s1709_s16 + $0x48] sm:$0xff]  ;;  %s1971_s8 = scalar_lea.vmem %s1686_s30, %s1569_s7 }
  0x16   : >> { %310 = vmatpush.bf16.msra.mxu0 %v302_v10  ;;  %1570 = vmatpush.bf16.msra.mxu2 %v302_v10  ;;  %v1536_v27 = vld [vmem:[%s1709_s16 + $0x8] sm:$0xff]  ;;  %v1539_v28 = vld [vmem:[%s1709_s16 + $0x20] sm:$0xff]  ;;  %v873_v31 = vpack.c.b16 %v871_v30, %v871_v30  ;;  %v1542_v33 = vld [vmem:[%s1709_s16 + $0x38] sm:$0xff]  ;;  %p211_p5 = scmp.ge.s32.totalorder %s214_s5, 74  }
  0x17   : >> { %396 = vmatpush.bf16.msra.mxu1 %v388_v11  ;;  %1572 = vmatpush.bf16.msra.mxu3 %v388_v11  ;;  %v718_v24 = vsel %vm300_vm0, %v715_v23, 0  ;;  %v1546_v34 = vld [vmem:[%s1709_s16 + $0x50] sm:$0xff]  ;;  %v1547_v36 = vld [vmem:[%s1709_s16 + $0x58] sm:$0xff]  ;;  %v1548_v40 = vld [vmem:[%s1709_s16 + $0x60] sm:$0xff] }
  0x18   : >> { %v876_v32 = vsel %vm300_vm0, %v873_v31, 0  ;;  %v1537_v35 = vld [vmem:[%s1709_s16 + $0x10] sm:$0xff]  ;;  %v1552_v37 = vld [vmem:[%s1709_s16 + $0x78] sm:$0xff]  ;;  %v1553_v41 = vld [vmem:[%s1709_s16 + $0x80] sm:$0xff] }
  0x19   : >> { %v1549_v42 = vld [vmem:[%s1709_s16 + $0x68] sm:$0xff]  ;;  %v1550_v44 = vld [vmem:[%s1709_s16 + $0x70] sm:$0xff]  ;;  %v1784_v46 = vld [vmem:[%s1709_s16 + $0x98] sm:$0xff] }
  0x1a   : >> { %311 = vmatpush.bf16.msra.mxu0 %v1545_v13  ;;  %1571 = vmatpush.bf16.msra.mxu2 %v1545_v13  ;;  %v1554_v43 = vld [vmem:[%s1709_s16 + $0x88] sm:$0xff]  ;;  %v1555_v45 = vld [vmem:[%s1709_s16 + $0x90] sm:$0xff]  ;;  %v1558_v47 = vld [vmem:[%s1709_s16 + $0xa0] sm:$0xff] }
  0x1b   : >> { %397 = vmatpush.bf16.msra.mxu1 %v1533_v14  ;;  %1573 = vmatpush.bf16.msra.mxu3 %v1533_v14  ;;  %v1559_v49 = vld [vmem:[%s1709_s16 + $0xa8] sm:$0xff]  ;;  %v1560_v63 = vld [vmem:[%s1709_s16 + $0xb0] sm:$0xff]  ;;  %v1562_v29 = vld [vmem:[%s1709_s16 + $0xc0] sm:$0xff] }
  0x1c   : >> { %v1564_v50 = vld [vmem:[%s1709_s16 + $0xc8] sm:$0xff]  ;;  %v1565_v2 = vld [vmem:[%s1709_s16 + $0xd0] sm:$0xff]  ;;  %v1567_v30 = vld [vmem:[%s1709_s16 + $0xe0] sm:$0xff] }
  0x1d   : >> { %1307 = vmatmul.msk.bf16.vlgmr.msra.gmra.mxu0 %vm284_vm1, %v1540_v15  ;;  %1310 = vmatmul.msk.bf16.vlgmr.msra.gmra.mxu2 %vm284_vm1, %v1716_v16 }
  0x1e   : >> { %568 = vmatpush.bf16.msrb.mxu0 %v560_v17  ;;  %1336 = vmatmul.msk.bf16.vlgmr.msra.gmra.mxu1 %vm284_vm1, %v1535_v18 }
  0x1f   : >> { %666 = vmatpush.bf16.msrb.mxu1 %v560_v17  ;;  %1339 = vmatmul.msk.bf16.vlgmr.msra.gmra.mxu3 %vm284_vm1, %v1538_v19 }
  0x20   : >> { %484 = vmatpush.bf16.msrb.mxu2 %v302_v10  ;;  %518 = vmatpush.bf16.msrb.mxu3 %v388_v11 }
  0x22   : >> { %569 = vmatpush.bf16.msrb.mxu0 %v1551_v20 }
  0x23   : >> { %667 = vmatpush.bf16.msrb.mxu1 %v1551_v20 }
  0x24   : >> { %485 = vmatpush.bf16.msrb.mxu2 %v1545_v13  ;;  %519 = vmatpush.bf16.msrb.mxu3 %v1533_v14 }
  0x26   : >> { %884 = vmatpush.bf16.msra.mxu0 %v876_v32 }
  0x27   : >> { %982 = vmatpush.bf16.msra.mxu1 %v876_v32 }
  0x28   : >> { %726 = vmatpush.bf16.msra.mxu2 %v718_v24  ;;  %824 = vmatpush.bf16.msra.mxu3 %v718_v24 }
  0x2a   : >> { %885 = vmatpush.bf16.msra.mxu0 %v1563_v39 }
  0x2b   : >> { %983 = vmatpush.bf16.msra.mxu1 %v1563_v39 }
  0x2c   : >> { %727 = vmatpush.bf16.msra.mxu2 %v1557_v38  ;;  %825 = vmatpush.bf16.msra.mxu3 %v1557_v38 }
  0x2d   : >> { %1308 = vmatmul.msk.bf16.gmra.mxu0 %vm284_vm1, %v1541_v25  ;;  %1311 = vmatmul.msk.bf16.gmra.mxu2 %vm284_vm1, %v1544_v26 }
  0x2e   : >> { %1337 = vmatmul.msk.bf16.gmra.mxu1 %vm284_vm1, %v1536_v27 }
  0x2f   : >> { %1340 = vmatmul.msk.bf16.gmra.mxu3 %vm284_vm1, %v1539_v28 }
  0x3d   : >> { %1309 = vmatmul.msk.bf16.gmra.mxu0 %vm284_vm1, %v1542_v33  ;;  %1373 = vmatmul.msk.bf16.vlgmr.msrb.gmra.mxu2 %vm284_vm1, %v1546_v34 }
  0x3e   : >> { %1338 = vmatmul.msk.bf16.gmra.mxu1 %vm284_vm1, %v1537_v35 }
  0x3f   : >> { %1378 = vmatmul.msk.bf16.vlgmr.msrb.gmra.mxu3 %vm284_vm1, %v1540_v15  ;;  %v1561_v15 = vld [vmem:[%s1709_s16 + $0xb8] sm:$0xff] }
  0x4d   : >> { %1374 = vmatmul.msk.bf16.gmra.mxu2 %vm284_vm1, %v1547_v36  ;;  %1390 = vmatmul.msk.bf16.vlgmr.msrb.gmra.mxu0 %vm284_vm1, %v1546_v34 }
  0x4e   : >> { %1427 = vmatmul.msk.bf16.vlgmr.msrb.gmra.mxu1 %vm284_vm1, %v1552_v37 }
  0x4f   : >> { %1379 = vmatmul.msk.bf16.gmra.mxu3 %vm284_vm1, %v1541_v25 }
  0x5d   : >> { %1375 = vmatmul.msk.bf16.gmra.mxu2 %vm284_vm1, %v1548_v40  ;;  %1391 = vmatmul.msk.bf16.gmra.mxu0 %vm284_vm1, %v1547_v36 }
  0x5e   : >> { %1428 = vmatmul.msk.bf16.gmra.mxu1 %vm284_vm1, %v1553_v41 }
  0x5f   : >> { %1380 = vmatmul.msk.bf16.gmra.mxu3 %vm284_vm1, %v1542_v33 }
  0x6d   : >> { %1376 = vmatmul.msk.bf16.gmra.mxu2 %vm284_vm1, %v1549_v42  ;;  %1392 = vmatmul.msk.bf16.gmra.mxu0 %vm284_vm1, %v1548_v40 }
  0x6e   : >> { %1429 = vmatmul.msk.bf16.gmra.mxu1 %vm284_vm1, %v1554_v43 }
  0x6f   : >> { %1381 = vmatmul.msk.bf16.gmra.mxu3 %vm284_vm1, %v1716_v16  ;;  %v1566_v16 = vld [vmem:[%s1709_s16 + $0xd8] sm:$0xff] }
  0x7d   : >> { %1377 = vmatmul.msk.bf16.gmra.mxu2 %vm284_vm1, %v1550_v44  ;;  %1393 = vmatmul.msk.bf16.gmra.mxu0 %vm284_vm1, %v1549_v42 }
  0x7e   : >> { %1430 = vmatmul.msk.bf16.gmra.mxu1 %vm284_vm1, %v1555_v45 }
  0x7f   : >> { %1382 = vmatmul.msk.bf16.gmra.mxu3 %vm284_vm1, %v1544_v26 }
  0x8d   : >> { %1394 = vmatmul.msk.bf16.gmra.mxu0 %vm284_vm1, %v1550_v44  ;;  %1439 = vmatmul.msk.bf16.vlgmr.msra.gmra.mxu2 %vm284_vm1, %v1552_v37 }
  0x8e   : >> { %1431 = vmatmul.msk.bf16.gmra.mxu1 %vm284_vm1, %v1784_v46 }
  0x8f   : >> { %1476 = vmatmul.msk.bf16.vlgmr.msra.gmra.mxu3 %vm284_vm1, %v1558_v47 }
  0x9a   : >> { %v313_v48 = vpop.f32.mrf.mxu0 }
  0x9b   : >> { %v399_v51 = vpop.f32.mrf.mxu1 }
  0x9c   : >> { %v400_v52 = vadd.f32 %v399_v51, %v313_v48 }
  0x9d   : >> { %1440 = vmatmul.msk.bf16.gmra.mxu2 %vm284_vm1, %v1553_v41  ;;  %1488 = vmatmul.msk.bf16.vlgmr.msra.gmra.mxu0 %vm284_vm1, %v1558_v47 }
  0x9e   : >> { %1525 = vmatmul.msk.bf16.vlgmr.msra.gmra.mxu1 %vm284_vm1, %v1564_v50 }
  0x9f   : >> { %1477 = vmatmul.msk.bf16.gmra.mxu3 %vm284_vm1, %v1559_v49 }
  0xa0   : >> { %v328_v53 = vpop.f32.mrf.mxu2 }
  0xa2   : >> { %v414_v54 = vpop.f32.mrf.mxu3  ;;  %v315_v56 = vpop.f32.mrf.mxu0 }
  0xa3   : >> { %v1798_v55 = vadd.f32 %v414_v54, %v328_v53  ;;  %v401_v57 = vpop.f32.mrf.mxu1 }
  0xa4   : >> { %v402_v58 = vadd.f32 %v401_v57, %v315_v56 }
  0xa8   : >> { %v330_v59 = vpop.f32.mrf.mxu2 }
  0xaa   : >> { %v416_v60 = vpop.f32.mrf.mxu3  ;;  %v318_v62 = vpop.f32.mrf.mxu0 }
  0xab   : >> { %v1800_v61 = vadd.f32 %v416_v60, %v330_v59  ;;  %v404_v3 = vpop.f32.mrf.mxu1 }
  0xac   : >> { %v405_v4 = vadd.f32 %v404_v3, %v318_v62 }
  0xad   : >> { %1441 = vmatmul.msk.bf16.gmra.mxu2 %vm284_vm1, %v1554_v43  ;;  %1489 = vmatmul.msk.bf16.gmra.mxu0 %vm284_vm1, %v1559_v49 }
  0xae   : >> { %1526 = vmatmul.msk.bf16.gmra.mxu1 %vm284_vm1, %v1565_v2 }
  0xaf   : >> { %1478 = vmatmul.msk.bf16.gmra.mxu3 %vm284_vm1, %v1560_v63 }
  0xb0   : >> { %v333_v5 = vpop.f32.mrf.mxu2 }
  0xb2   : >> { %v419_v6 = vpop.f32.mrf.mxu3  ;;  %v320_v8 = vpop.f32.mrf.mxu0 }
  0xb3   : >> { %v1808_v7 = vadd.f32 %v419_v6, %v333_v5  ;;  %v406_v9 = vpop.f32.mrf.mxu1 }
  0xb4   : >> { %v407_v10 = vadd.f32 %v406_v9, %v320_v8 }
  0xb8   : >> { %v335_v11 = vpop.f32.mrf.mxu2 }
  0xba   : >> { %v421_v12 = vpop.f32.mrf.mxu3  ;;  %v323_v14 = vpop.f32.mrf.mxu0 }
  0xbb   : >> { %v1810_v13 = vadd.f32 %v421_v12, %v335_v11  ;;  %v409_v17 = vpop.f32.mrf.mxu1 }
  0xbc   : >> { %v410_v18 = vadd.f32 %v409_v17, %v323_v14 }
  0xbd   : >> { %1442 = vmatmul.msk.bf16.gmra.mxu2 %vm284_vm1, %v1555_v45  ;;  %1490 = vmatmul.msk.bf16.gmra.mxu0 %vm284_vm1, %v1560_v63  ;;  %v1568_v45 = vld [vmem:[%s1709_s16 + $0xe8] sm:$0xff] }
  0xbe   : >> { %1527 = vmatmul.msk.bf16.gmra.mxu1 %vm284_vm1, %v1566_v16 }
  0xbf   : >> { %1479 = vmatmul.msk.bf16.gmra.mxu3 %vm284_vm1, %v1561_v15 }
  0xc0   : >> { %v487_v19 = vpop.f32.mrf.mxu2 }
  0xc2   : >> { %v521_v20 = vpop.f32.mrf.mxu3  ;;  %v325_v22 = vpop.f32.mrf.mxu0 }
  0xc3   : >> { %v522_v21 = vadd.f32 %v521_v20, %v487_v19  ;;  %v411_v23 = vpop.f32.mrf.mxu1 }
  0xc4   : >> { %v412_v24 = vadd.f32 %v411_v23, %v325_v22 }
  0xc8   : >> { %v489_v25 = vpop.f32.mrf.mxu2 }
  0xca   : >> { %v523_v26 = vpop.f32.mrf.mxu3  ;;  %v571_v28 = vpop.f32.mrf.mxu0 }
  0xcb   : >> { %v524_v27 = vadd.f32 %v523_v26, %v489_v25  ;;  %v1820_v31 = vadd.f32 %v571_v28, %v400_v52  ;;  %v669_v32 = vpop.f32.mrf.mxu1 }
  0xcc   : >> { %v1822_v33 = vadd.f32 %v669_v32, %v522_v21 }
  0xcd   : >> { %1443 = vmatmul.msk.bf16.gmra.mxu2 %vm284_vm1, %v1784_v46  ;;  %1491 = vmatmul.msk.bf16.gmra.mxu0 %vm284_vm1, %v1561_v15 }
  0xce   : >> { %1528 = vmatmul.msk.bf16.gmra.mxu1 %vm284_vm1, %v1567_v30 }
  0xcf   : >> { %1480 = vmatmul.msk.bf16.gmra.mxu3 %vm284_vm1, %v1562_v29 }
  0xd0   : >> { %v492_v34 = vpop.f32.mrf.mxu2 }
  0xd2   : >> { %v526_v35 = vpop.f32.mrf.mxu3  ;;  %v573_v37 = vpop.f32.mrf.mxu0 }
  0xd3   : >> { %v527_v36 = vadd.f32 %v526_v35, %v492_v34  ;;  %v1829_v38 = vadd.f32 %v573_v37, %v402_v58  ;;  %v671_v39 = vpop.f32.mrf.mxu1 }
  0xd4   : >> { %v1831_v40 = vadd.f32 %v671_v39, %v524_v27 }
  0xd8   : >> { %v494_v41 = vpop.f32.mrf.mxu2 }
  0xda   : >> { %v528_v42 = vpop.f32.mrf.mxu3  ;;  %v576_v44 = vpop.f32.mrf.mxu0 }
  0xdb   : >> { %v529_v43 = vadd.f32 %v528_v42, %v494_v41  ;;  %v1834_v46 = vadd.f32 %v576_v44, %v405_v4  ;;  %v674_v47 = vpop.f32.mrf.mxu1  ;;  %v1874_v44 = vperm.slane %v1671_v0, 0 }
  0xdc   : >> { %v1836_v48 = vadd.f32 %v674_v47, %v527_v36 }
  0xdd   : >> { %1492 = vmatmul.msk.bf16.gmra.mxu0 %vm284_vm1, %v1562_v29 }
  0xde   : >> { %1529 = vmatmul.msk.bf16.gmra.mxu1 %vm284_vm1, %v1568_v45 }
  0xe0   : >> { %v497_v49 = vpop.f32.mrf.mxu2 }
  0xe2   : >> { %v531_v50 = vpop.f32.mrf.mxu3  ;;  %v578_v52 = vpop.f32.mrf.mxu0 }
  0xe3   : >> { %v532_v51 = vadd.f32 %v531_v50, %v497_v49  ;;  %v1840_v53 = vadd.f32 %v578_v52, %v407_v10  ;;  %v676_v54 = vpop.f32.mrf.mxu1  ;;  %v1878_v49 = vperm.slane %v1676_v1, 0 }
  0xe4   : >> { %v1842_v56 = vadd.f32 %v676_v54, %v529_v43 }
  0xe8   : >> { %v499_v57 = vpop.f32.mrf.mxu2 }
  0xea   : >> { %v533_v58 = vpop.f32.mrf.mxu3  ;;  %v581_v60 = vpop.f32.mrf.mxu0 }
  0xeb   : >> { %v534_v59 = vadd.f32 %v533_v58, %v499_v57  ;;  %v1844_v62 = vadd.f32 %v581_v60, %v410_v18  ;;  %v679_v63 = vpop.f32.mrf.mxu1 }
  0xec   : >> { %v1846_v2 = vadd.f32 %v679_v63, %v532_v51 }
  0xf0   : >> { %v502_v3 = vpop.f32.mrf.mxu2 }
  0xf2   : >> { %v536_v4 = vpop.f32.mrf.mxu3  ;;  %v583_v6 = vpop.f32.mrf.mxu0 }
  0xf3   : >> { %v537_v5 = vadd.f32 %v536_v4, %v502_v3  ;;  %v1848_v8 = vadd.f32 %v583_v6, %v412_v24  ;;  %v681_v9 = vpop.f32.mrf.mxu1 }
  0xf4   : >> { %v1850_v10 = vadd.f32 %v681_v9, %v534_v59 }
  0xf8   : >> { %v504_v11 = vpop.f32.mrf.mxu2 }
  0xfa   : >> { %v538_v12 = vpop.f32.mrf.mxu3  ;;  %v586_v15 = vpop.f32.mrf.mxu0 }
  0xfb   : >> { %v539_v14 = vadd.f32 %v538_v12, %v504_v11  ;;  %v1853_v16 = vadd.f32 %v586_v15, %v1798_v55  ;;  %v684_v17 = vpop.f32.mrf.mxu1 }
  0xfc   : >> { %v1855_v18 = vadd.f32 %v684_v17, %v537_v5 }
 0x100   : >> { %v507_v19 = vpop.f32.mrf.mxu2 }
 0x102   : >> { %v541_v20 = vpop.f32.mrf.mxu3  ;;  %v588_v22 = vpop.f32.mrf.mxu0 }
 0x103   : >> { %v542_v21 = vadd.f32 %v541_v20, %v507_v19  ;;  %v1858_v23 = vadd.f32 %v588_v22, %v1800_v61  ;;  %v686_v24 = vpop.f32.mrf.mxu1 }
 0x104   : >> { %v1860_v25 = vadd.f32 %v686_v24, %v539_v14 }
 0x108   : >> { %v509_v26 = vpop.f32.mrf.mxu2 }
 0x10a   : >> { %v543_v27 = vpop.f32.mrf.mxu3  ;;  %v591_v29 = vpop.f32.mrf.mxu0 }
 0x10b   : >> { %v544_v28 = vadd.f32 %v543_v27, %v509_v26  ;;  %v1863_v55 = vadd.f32 %v591_v29, %v1808_v7  ;;  %v689_v30 = vpop.f32.mrf.mxu1 }
 0x10c   : >> { %v1865_v32 = vadd.f32 %v689_v30, %v542_v21 }
 0x110   : >> { %v729_v34 = vpop.f32.mrf.mxu2 }
 0x111   : >> { %v754_v42 = vadd.f32 %v729_v34, %v1820_v31 }
 0x112   : >> { %v827_v35 = vpop.f32.mrf.mxu3  ;;  %v593_v36 = vpop.f32.mrf.mxu0 }
 0x113   : >> { %v1868_v37 = vadd.f32 %v593_v36, %v1810_v13  ;;  %v691_v61 = vpop.f32.mrf.mxu1  ;;  %v852_v7 = vadd.f32 %v827_v35, %v1822_v33 }
 0x114   : >> { %v1870_v39 = vadd.f32 %v691_v61, %v544_v28 }
 0x118   : >> { %v731_v41 = vpop.f32.mrf.mxu2 }
 0x119   : >> { %v755_v58 = vadd.f32 %v731_v41, %v1829_v38 }
 0x11a   : >> { %v829_v43 = vpop.f32.mrf.mxu3  ;;  %v887_v45 = vpop.f32.mrf.mxu0 }
 0x11b   : >> { %v912_v47 = vadd.f32 %v887_v45, %v754_v42  ;;  %v985_v50 = vpop.f32.mrf.mxu1  ;;  %v853_v60 = vadd.f32 %v829_v43, %v1831_v40 }
 0x11c   : >> { %v1010_v13 = vadd.f32 %v985_v50, %v852_v7 }
 0x11d   : >> { %v1023_v51 = vmul.f32 %v1874_v44, %v912_v47 }
 0x11e   : >> { %v1056_v52 = vmul.f32 %v1874_v44, %v1010_v13 }
 0x11f   : >> { %v1036_v54 = vadd.f32 %v1878_v49, %v1023_v51 }
 0x120   : >> { %v1066_v31 = vadd.f32 %v1056_v52, %v1878_v49  ;;  %v734_v57 = vpop.f32.mrf.mxu2 }
 0x121   : >> { %v1046_v59 = vmax.f32 %v1036_v54, 0.0  ;;  %v756_v17 = vadd.f32 %v734_v57, %v1834_v46 }
 0x122   : >> { %v832_v33 = vpop.f32.mrf.mxu3  ;;  %v1076_v63 = vmax.f32 %v1066_v31, 0.0  ;;  %v889_v3 = vpop.f32.mrf.mxu0 }
 0x123   : >> { %v913_v4 = vadd.f32 %v889_v3, %v755_v58  ;;  %v987_v5 = vpop.f32.mrf.mxu1  ;;  %v854_v20 = vadd.f32 %v832_v33, %v1836_v48 }
 0x124   : >> { %v1011_v6 = vadd.f32 %v987_v5, %v853_v60  ;;  %v1886_v9 = vmax.f32 %v1046_v59, %v1076_v63 }
 0x125   : >> { %v1024_v11 = vmul.f32 %v1874_v44, %v913_v4 }
 0x126   : >> { %v1057_v12 = vmul.f32 %v1874_v44, %v1011_v6 }
 0x127   : >> { %v1037_v14 = vadd.f32 %v1878_v49, %v1024_v11 }
 0x128   : >> { %v1067_v15 = vadd.f32 %v1057_v12, %v1878_v49  ;;  %v736_v38 = vpop.f32.mrf.mxu2 }
 0x129   : >> { %v1047_v19 = vmax.f32 %v1037_v14, 0.0  ;;  %v757_v36 = vadd.f32 %v736_v38, %v1840_v53 }
 0x12a   : >> { %v834_v40 = vpop.f32.mrf.mxu3  ;;  %v1077_v21 = vmax.f32 %v1067_v15, 0.0  ;;  %v892_v22 = vpop.f32.mrf.mxu0 }
 0x12b   : >> { %v914_v24 = vadd.f32 %v892_v22, %v756_v17  ;;  %v990_v26 = vpop.f32.mrf.mxu1  ;;  %v855_v42 = vadd.f32 %v834_v40, %v1842_v56 }
 0x12c   : >> { %v1012_v27 = vadd.f32 %v990_v26, %v854_v20  ;;  %v1894_v28 = vmax.f32 %v1047_v19, %v1077_v21 }
 0x12d   : >> { %v1025_v29 = vmul.f32 %v1874_v44, %v914_v24 }
 0x12e   : >> { %v1058_v30 = vmul.f32 %v1874_v44, %v1012_v27  ;;  %v1593_v34 = vpack.i.bf16 %v1894_v28, %v1886_v9 }
 0x12f   : >> { %v1038_v46 = vadd.f32 %v1878_v49, %v1025_v29 }
 0x130   : >> { %v1068_v35 = vadd.f32 %v1058_v30, %v1878_v49  ;;  %1594 = vrot.lane.b32.xlu0 %v1593_v34, %s1634_s6  ;;  %v739_v48 = vpop.f32.mrf.mxu2 }
 0x131   : >> { %v1048_v61 = vmax.f32 %v1038_v46, 0.0  ;;  %v758_v57 = vadd.f32 %v739_v48, %v1844_v62 }
 0x132   : >> { %v837_v41 = vpop.f32.mrf.mxu3  ;;  %v1078_v43 = vmax.f32 %v1068_v35, 0.0  ;;  %v894_v7 = vpop.f32.mrf.mxu0 }
 0x133   : >> { %v915_v45 = vadd.f32 %v894_v7, %v757_v36  ;;  %v992_v47 = vpop.f32.mrf.mxu1  ;;  %v856_v59 = vadd.f32 %v837_v41, %v1846_v2 }
 0x134   : >> { %v1013_v50 = vadd.f32 %v992_v47, %v855_v42  ;;  %v1905_v13 = vmax.f32 %v1048_v61, %v1078_v43 }
 0x135   : >> { %v1026_v51 = vmul.f32 %v1874_v44, %v915_v45 }
 0x136   : >> { %v1059_v52 = vmul.f32 %v1874_v44, %v1013_v50 }
 0x137   : >> { %v1039_v54 = vadd.f32 %v1878_v49, %v1026_v51 }
 0x138   : >> { %v1069_v31 = vadd.f32 %v1059_v52, %v1878_v49  ;;  %v741_v53 = vpop.f32.mrf.mxu2 }
 0x139   : >> { %v1049_v58 = vmax.f32 %v1039_v54, 0.0  ;;  %v759_v15 = vadd.f32 %v741_v53, %v1848_v8 }
 0x13a   : >> { %v839_v56 = vpop.f32.mrf.mxu3  ;;  %v1079_v33 = vmax.f32 %v1069_v31, 0.0  ;;  %v897_v60 = vpop.f32.mrf.mxu0 }
 0x13b   : >> { %v916_v63 = vadd.f32 %v897_v60, %v758_v57  ;;  %v995_v3 = vpop.f32.mrf.mxu1  ;;  %v857_v19 = vadd.f32 %v839_v56, %v1850_v10 }
 0x13c   : >> { %v1014_v4 = vadd.f32 %v995_v3, %v856_v59  ;;  %v1913_v5 = vmax.f32 %v1049_v58, %v1079_v33 }
 0x13d   : >> { %v1027_v6 = vmul.f32 %v1874_v44, %v916_v63 }
 0x13e   : >> { %v1060_v11 = vmul.f32 %v1874_v44, %v1014_v4  ;;  %v1598_v12 = vpack.i.bf16 %v1913_v5, %v1905_v13 }
 0x13f   : >> { %v1040_v62 = vadd.f32 %v1878_v49, %v1027_v6 }
 0x140   : >> { %v1070_v14 = vadd.f32 %v1060_v11, %v1878_v49  ;;  %1599 = vrot.lane.b32.xlu0 %v1598_v12, %s1634_s6  ;;  %v744_v2 = vpop.f32.mrf.mxu2 }
 0x141   : >> { %v1050_v38 = vmax.f32 %v1040_v62, 0.0  ;;  %v760_v8 = vadd.f32 %v744_v2, %v1853_v16 }
 0x142   : >> { %v842_v17 = vpop.f32.mrf.mxu3  ;;  %v1080_v40 = vmax.f32 %v1070_v14, 0.0  ;;  %v899_v20 = vpop.f32.mrf.mxu0 }
 0x143   : >> { %v917_v21 = vadd.f32 %v899_v20, %v759_v15  ;;  %v997_v22 = vpop.f32.mrf.mxu1  ;;  %v858_v10 = vadd.f32 %v842_v17, %v1855_v18 }
 0x144   : >> { %v1015_v24 = vadd.f32 %v997_v22, %v857_v19  ;;  %v1924_v26 = vmax.f32 %v1050_v38, %v1080_v40 }
 0x145   : >> { %v1028_v27 = vmul.f32 %v1874_v44, %v917_v21 }
 0x146   : >> { %v1061_v29 = vmul.f32 %v1874_v44, %v1015_v24 }
 0x147   : >> { %v1041_v30 = vadd.f32 %v1878_v49, %v1028_v27 }
 0x148   : >> { %v1071_v34 = vadd.f32 %v1061_v29, %v1878_v49  ;;  %v746_v48 = vpop.f32.mrf.mxu2 }
 0x149   : >> { %v1051_v46 = vmax.f32 %v1041_v30, 0.0  ;;  %v761_v51 = vadd.f32 %v746_v48, %v1858_v23 }
 0x14a   : >> { %v1081_v35 = vmax.f32 %v1071_v34, 0.0  ;;  %v902_v36 = vpop.f32.mrf.mxu0  ;;  %v844_v61 = vpop.f32.mrf.mxu3 }
 0x14b   : >> { %v918_v41 = vadd.f32 %v902_v36, %v760_v8  ;;  %v1000_v42 = vpop.f32.mrf.mxu1  ;;  %v859_v54 = vadd.f32 %v844_v61, %v1860_v25 }
 0x14c   : >> { %v1016_v43 = vadd.f32 %v1000_v42, %v858_v10  ;;  %v1932_v7 = vmax.f32 %v1051_v46, %v1081_v35 }
 0x14d   : >> { %v1029_v45 = vmul.f32 %v1874_v44, %v918_v41 }
 0x14e   : >> { %v1062_v47 = vmul.f32 %v1874_v44, %v1016_v43  ;;  %v1603_v50 = vpack.i.bf16 %v1932_v7, %v1924_v26 }
 0x14f   : >> { %v1042_v16 = vadd.f32 %v1878_v49, %v1029_v45 }
 0x150   : >> { %v1072_v18 = vadd.f32 %v1062_v47, %v1878_v49  ;;  %1604 = vrot.lane.b32.xlu1 %v1603_v50, %s1634_s6  ;;  %v749_v56 = vpop.f32.mrf.mxu2 }
 0x151   : >> { %v1052_v52 = vmax.f32 %v1042_v16, 0.0  ;;  %v762_v6 = vadd.f32 %v749_v56, %v1863_v55 }
 0x152   : >> { %v1082_v31 = vmax.f32 %v1072_v18, 0.0  ;;  %v904_v53 = vpop.f32.mrf.mxu0  ;;  %v847_v60 = vpop.f32.mrf.mxu3 }
 0x153   : >> { %v919_v57 = vadd.f32 %v904_v53, %v761_v51  ;;  %v1002_v58 = vpop.f32.mrf.mxu1  ;;  %v860_v11 = vadd.f32 %v847_v60, %v1865_v32 }
 0x154   : >> { %v1017_v59 = vadd.f32 %v1002_v58, %v859_v54  ;;  %v1943_v33 = vmax.f32 %v1052_v52, %v1082_v31 }
 0x155   : >> { %v1030_v63 = vmul.f32 %v1874_v44, %v919_v57 }
 0x156   : >> { %v1063_v3 = vmul.f32 %v1874_v44, %v1017_v59 }
 0x157   : >> { %v1043_v4 = vadd.f32 %v1878_v49, %v1030_v63 }
 0x158   : >> { %v1073_v23 = vadd.f32 %v1063_v3, %v1878_v49  ;;  %v751_v19 = vpop.f32.mrf.mxu2 }
 0x159   : >> { %v1053_v25 = vmax.f32 %v1043_v4, 0.0  ;;  %v763_v22 = vadd.f32 %v751_v19, %v1868_v37 }
 0x15a   : >> { %v1083_v12 = vmax.f32 %v1073_v23, 0.0  ;;  %v907_v62 = vpop.f32.mrf.mxu0  ;;  %v849_v21 = vpop.f32.mrf.mxu3 }
 0x15b   : >> { %v920_v14 = vadd.f32 %v907_v62, %v762_v6  ;;  %v1005_v2 = vpop.f32.mrf.mxu1  ;;  %v861_v27 = vadd.f32 %v849_v21, %v1870_v39 }
 0x15c   : >> { %v1018_v15 = vadd.f32 %v1005_v2, %v860_v11  ;;  %v1951_v38 = vmax.f32 %v1053_v25, %v1083_v12 }
 0x15d   : >> { %v1031_v17 = vmul.f32 %v1874_v44, %v920_v14 }
 0x15e   : >> { %v1064_v40 = vmul.f32 %v1874_v44, %v1018_v15  ;;  %v1608_v20 = vpack.i.bf16 %v1951_v38, %v1943_v33 }
 0x15f   : >> { %v1044_v55 = vadd.f32 %v1878_v49, %v1031_v17 }
 0x160   : >> { %v1074_v32 = vadd.f32 %v1064_v40, %v1878_v49  ;;  %1609 = vrot.lane.b32.xlu1 %v1608_v20, %s1634_s6 }
 0x161   : >> { %v1054_v24 = vmax.f32 %v1044_v55, 0.0 }
 0x162   : >> { %v1084_v29 = vmax.f32 %v1074_v32, 0.0  ;;  %v909_v30 = vpop.f32.mrf.mxu0 }
 0x163   : >> { %v921_v34 = vadd.f32 %v909_v30, %v763_v22  ;;  %v1007_v8 = vpop.f32.mrf.mxu1 }
 0x164   : >> { %v1019_v46 = vadd.f32 %v1007_v8, %v861_v27  ;;  %v1094_v10 = vmax.f32 %v1054_v24, %v1084_v29 }
 0x165   : >> { %v1032_v35 = vmul.f32 %v1874_v44, %v921_v34 }
 0x166   : >> { %v1065_v48 = vmul.f32 %v1874_v44, %v1019_v46 }
 0x167   : >> { %v1045_v36 = vadd.f32 %v1878_v49, %v1032_v35 }
 0x168   : >> { %v1075_v61 = vadd.f32 %v1065_v48, %v1878_v49 }
 0x169   : >> { %v1055_v37 = vmax.f32 %v1045_v36, 0.0 }
 0x16a   : >> { %v1085_v41 = vmax.f32 %v1075_v61, 0.0 }
 0x16c   : >> { %v1095_v42 = vmax.f32 %v1055_v37, %v1085_v41 }
 0x16e   : >> { %v1613_v39 = vpack.i.bf16 %v1095_v42, %v1094_v10 }
 0x170   : >> { %1614 = vrot.lane.b32.xlu2 %v1613_v39, %s1634_s6 }
 0x1a2   : >> { %v1595_v43 = vpop.permute.xlu0 %1594 }
 0x1a3   : >> { %v1597_v45 = vunpack.i.h.bf16 %v1595_v43  ;;  %v1596_v47 = vunpack.i.l.bf16 %v1595_v43 }
 0x1a5   : >> { %v1137_v50 = vmax.f32 %v1894_v28, %v1597_v45  ;;  %v1136_v16 = vmax.f32 %v1886_v9, %v1596_v47 }
 0x1a7   : >> { %v1147_v44 = vpack.c.bf16 %v1137_v50, %v1137_v50  ;;  %v1146_v49 = vpack.c.bf16 %v1136_v16, %v1136_v16 }
 0x1a9   : >> { %1161 = vst.msk [vmem:[%s1971_s8 + $0x4] sm:$0xf] %vm1159_vm2, %v1147_v44 }
 0x1aa   : >> { %1160 = vst.msk [vmem:[%s1971_s8] sm:$0xf] %vm1159_vm2, %v1146_v49 }
 0x1b2   : >> { %v1600_v18 = vpop.permute.xlu0 %1599 }
 0x1b3   : >> { %v1602_v51 = vunpack.i.h.bf16 %v1600_v18  ;;  %v1601_v28 = vunpack.i.l.bf16 %v1600_v18 }
 0x1b5   : >> { %v1139_v9 = vmax.f32 %v1913_v5, %v1602_v51  ;;  %v1138_v52 = vmax.f32 %v1905_v13, %v1601_v28 }
 0x1b7   : >> { %v1149_v54 = vpack.c.bf16 %v1139_v9, %v1139_v9  ;;  %v1148_v31 = vpack.c.bf16 %v1138_v52, %v1138_v52 }
 0x1b9   : >> { %1163 = vst.msk [vmem:[%s1971_s8 + $0xc] sm:$0xf] %vm1159_vm2, %v1149_v54 }
 0x1ba   : >> { %1162 = vst.msk [vmem:[%s1971_s8 + $0x8] sm:$0xf] %vm1159_vm2, %v1148_v31 }
 0x1c2   : >> { %v1605_v53 = vpop.permute.xlu1 %1604 }
 0x1c3   : >> { %v1607_v57 = vunpack.i.h.bf16 %v1605_v53  ;;  %v1606_v58 = vunpack.i.l.bf16 %v1605_v53 }
 0x1c5   : >> { %v1141_v56 = vmax.f32 %v1932_v7, %v1607_v57  ;;  %v1140_v59 = vmax.f32 %v1924_v26, %v1606_v58 }
 0x1c7   : >> { %v1151_v60 = vpack.c.bf16 %v1141_v56, %v1141_v56  ;;  %v1150_v63 = vpack.c.bf16 %v1140_v59, %v1140_v59 }
 0x1c9   : >> { %1165 = vst.msk [vmem:[%s1971_s8 + $0x14] sm:$0xf] %vm1159_vm2, %v1151_v60 }
 0x1ca   : >> { %1164 = vst.msk [vmem:[%s1971_s8 + $0x10] sm:$0xf] %vm1159_vm2, %v1150_v63  ;;  %v1615_v13 = vpop.permute.xlu2 %1614 }
 0x1cb   : >> { %v1617_v5 = vunpack.i.h.bf16 %v1615_v13  ;;  %v1616_v3 = vunpack.i.l.bf16 %v1615_v13 }
 0x1cd   : >> { %v1145_v4 = vmax.f32 %v1095_v42, %v1617_v5  ;;  %v1144_v23 = vmax.f32 %v1094_v10, %v1616_v3 }
 0x1cf   : >> { %v1155_v6 = vpack.c.bf16 %v1145_v4, %v1145_v4  ;;  %v1154_v25 = vpack.c.bf16 %v1144_v23, %v1144_v23 }
 0x1d1   : >> { %1170 = vst.msk [vmem:[%s1971_s8 + $0x24] sm:$0x1] %vm1169_vm3, %v1155_v6 }
 0x1d2   : >> { %1168 = vst.msk [vmem:[%s1971_s8 + $0x20] sm:$0xf] %vm1159_vm2, %v1154_v25  ;;  %v1610_v26 = vpop.permute.xlu1 %1609 }
 0x1d3   : >> { %v1612_v7 = vunpack.i.h.bf16 %v1610_v26  ;;  %v1611_v11 = vunpack.i.l.bf16 %v1610_v26 }
 0x1d5   : >> { %v1143_v12 = vmax.f32 %v1951_v38, %v1612_v7  ;;  %v1142_v62 = vmax.f32 %v1943_v33, %v1611_v11 }
 0x1d6   : > { %213 = sbr.rel (!%p211_p5) target bundleno = 16 (0x10), region = 84 }
 0x1d7   : >> { %v1153_v14 = vpack.c.bf16 %v1143_v12, %v1143_v12  ;;  %v1152_v2 = vpack.c.bf16 %v1142_v62, %v1142_v62 }
 0x1d9   : >> { %1167 = vst.msk [vmem:[%s1971_s8 + $0x1c] sm:$0xf] %vm1159_vm2, %v1153_v14 }
 0x1da   : >> { %1166 = vst.msk [vmem:[%s1971_s8 + $0x18] sm:$0xf] %vm1159_vm2, %v1152_v2 }
 0x1db PF: > { %s14_s15 = sadd.s32 1, %s1628_s15  }
 0x1dc   : > { %p11_p6 = scmp.ge.s32.totalorder %s14_s15, 4  }
 0x1de   :  { %13 = sbr.rel (!%p11_p6) target bundleno = 1 (0x1), region = 95 }

// kernel: custom_cnn_forward.7
= control target key start
LH: loop header
LB: loop body
LE: loop exit
PB: predicated region body
PF: predicated region fallthrough
CT: control target
= control target key end

     0   :  { %s1356_s15 = smov 0   ;;  %s1591_s0 = inlined_call_operand.vmem [shape: bf16[152,40,60], index: 0, kind: input, shape index: {}]   ;;  %s1592_s1 = inlined_call_operand.vmem [shape: bf16[5,60,40], index: 1, kind: input, shape index: {}]   ;;  %s1593_s2 = inlined_call_operand.vmem [shape: f32[1,40], index: 2, kind: input, shape index: {}]   ;;  %s1594_s3 = inlined_call_operand.vmem [shape: f32[1,40], index: 3, kind: input, shape index: {}]   ;;  %s1595_s4 = inlined_call_operand.vmem [shape: bf16[72,36,20], index: 4, kind: output, shape index: {}]  }
   0x1 LB: > { %s1005_s16 = sadd.s32 4294967295, %s1324_s15   ;;  %p1009_p0 = scmp.ge.s32.totalorder %s1324_s15, 1  ;;  %s1324_s15 = sphi %s1356_s15, %s14_s15  }
   0x2   : > { %p164_p1 = scmp.lt.s32.totalorder %s1324_s15, 3 }
   0x4   : > { %p165_p2 = pnand %p1009_p0, %p164_p1 }
   0x5   : > { %s192_s17 = smul.u32 (!%p165_p2), 76, %s1005_s16  ;;  %s1384_s5 = smov (!%p165_p2), 0  }
   0x6   : > { %168 = sbr.rel (%p165_p2) target bundleno = 414 (0x19e), region = 36 }
   0x7   : > { %s199_s22 = smul.u32 (!%p165_p2), 36, %s1005_s16  ;;  %p193_p3 = scmp.lt.s32.totalorder (!%p165_p2), %s192_s17, 151 }
   0x9   : > { %p200_p4 = scmp.lt.s32.totalorder (!%p165_p2), %s199_s22, 71 }
   0xb   : > { %v1367_v0 = vld [vmem:[%s1593_s2] sm:$0x1]  ;;  %s1597_s17 = smov (!%p193_p3, %s192_s17), 151  ;;  %s1599_s22 = smov (!%p200_p4, %s199_s22), 71 }
   0xc   : > { %v1372_v1 = vld [vmem:[%s1594_s3] sm:$0x1]  ;;  %s1285_s23 = smul.u32 20, %s1597_s17 }
   0xd   : > { %s1286_s24 = smul.u32 20, %s1599_s22 }
   0xe   : > { %s1377_s27 = scalar_lea.vmem %s1591_s0, %s1285_s23 }
   0xf   : > { %s1382_s30 = scalar_lea.vmem %s1595_s4, %s1286_s24 }
  0x10 LB: >> { %v1052_v2 = vld [vmem:[%s1592_s1 + $0x38] sm:$0xf]  ;;  %v1255_v3 = vld [vmem:[%s1592_s1 + $0x38] sm:$0x30]  ;;  %vm296_vm0 = vcmask 1045504   ;;  %v1254_v10 = vld [vmem:[%s1592_s1 + $0x30] sm:$0xff]  ;;  %s1328_s5 = sphi %s1384_s5, %s214_s5  }
  0x11   : >> { %v1053_v4 = vor.u32 %v1255_v3, %v1052_v2  ;;  %v1079_v5 = vld [vmem:[%s1592_s1 + $0x18] sm:$0xf]  ;;  %v1246_v6 = vld [vmem:[%s1592_s1 + $0x18] sm:$0x30]  ;;  %v1245_v11 = vld [vmem:[%s1592_s1 + $0x10] sm:$0xff]  ;;  %s1247_s21 = smul.u32 40, %s1328_s5 }
  0x12   : >> { %v1080_v7 = vor.u32 %v1246_v6, %v1079_v5  ;;  %v1253_v12 = vld [vmem:[%s1592_s1 + $0x28] sm:$0xff]  ;;  %v1127_v13 = vld [vmem:[%s1592_s1 + $0x58] sm:$0xf]  ;;  %v1261_v14 = vld [vmem:[%s1592_s1 + $0x58] sm:$0x30]  ;;  %vm286_vm1 = vcmask 490496  }
  0x13   : >> { %v298_v8 = vsel %vm296_vm0, %v1053_v4, 0  ;;  %v1244_v15 = vld [vmem:[%s1592_s1 + $0x8] sm:$0xff]  ;;  %v1128_v16 = vor.u32 %v1261_v14, %v1127_v13  ;;  %v1252_v17 = vld [vmem:[%s1592_s1 + $0x20] sm:$0xff]  ;;  %s1426_s7 = scalar_lea.vmem %s1377_s27, %s1247_s21  ;;  %v1260_v23 = vld [vmem:[%s1592_s1 + $0x50] sm:$0xff]  ;;  %s1276_s16 = smul.u32 20, %s1328_s5  ;;  %vm911_vm2 = vcmask 158720  }
  0x14   : >> { %304 = vmatpush.bf16.msra.mxu0 %v298_v8  ;;  %1277 = vmatpush.bf16.msra.mxu2 %v298_v8  ;;  %v369_v9 = vsel %vm296_vm0, %v1080_v7, 0  ;;  %v1243_v18 = vld [vmem:[%s1592_s1] sm:$0xff]  ;;  %v1432_v19 = vld [vmem:[%s1426_s7 + $0x14] sm:$0xff]  ;;  %v1249_v22 = vld [vmem:[%s1426_s7 + $0x8] sm:$0xff]  ;;  %vm916_vm3 = vcmask 156672   ;;  %s214_s5 = sadd.s32 1, %s1328_s5  }
  0x15   : >> { %1281 = vmatpush.bf16.msra.mxu3 %v369_v9  ;;  %375 = vmatpush.bf16.msra.mxu1 %v369_v9  ;;  %v1435_v20 = vld [vmem:[%s1426_s7 + $0x1c] sm:$0xff]  ;;  %v504_v21 = vsel %vm296_vm0, %v1128_v16, 0  ;;  %v1172_v25 = vld [vmem:[%s1592_s1 + $0x78] sm:$0xf]  ;;  %v1259_v27 = vld [vmem:[%s1592_s1 + $0x48] sm:$0xff]  ;;  %s910_s17 = scalar_lea.vmem %s1382_s30, %s1276_s16  ;;  %p211_p5 = scmp.ge.s32.totalorder %s214_s5, 36  }
  0x16   : >> { %v1248_v24 = vld [vmem:[%s1426_s7] sm:$0xff]  ;;  %v1267_v26 = vld [vmem:[%s1592_s1 + $0x78] sm:$0x30]  ;;  %v1217_v28 = vld [vmem:[%s1592_s1 + $0x98] sm:$0xf] }
  0x17   : >> { %v1273_v29 = vld [vmem:[%s1592_s1 + $0x98] sm:$0x30]  ;;  %v1021_v30 = vld [vmem:[%s1426_s7 + $0x24] sm:$0xf]  ;;  %v1173_v31 = vor.u32 %v1267_v26, %v1172_v25  ;;  %v231_v32 = vld [vmem:[%s1426_s7 + $0x10] sm:$0xf] }
  0x18   : >> { %305 = vmatpush.bf16.msra.mxu0 %v1254_v10  ;;  %1278 = vmatpush.bf16.msra.mxu2 %v1254_v10  ;;  %v1218_v33 = vor.u32 %v1273_v29, %v1217_v28  ;;  %v1258_v34 = vld [vmem:[%s1592_s1 + $0x40] sm:$0xff]  ;;  %v259_v35 = vunpack.c.l.b16 %v1021_v30  ;;  %v332_v36 = vunpack.c.l.b16 %v231_v32  ;;  %v1256_v40 = vld [vmem:[%s1426_s7 + $0x28] sm:$0xff]  ;;  %v1266_v42 = vld [vmem:[%s1592_s1 + $0x70] sm:$0xff] }
  0x19   : >> { %1282 = vmatpush.bf16.msra.mxu3 %v1245_v11  ;;  %376 = vmatpush.bf16.msra.mxu1 %v1245_v11  ;;  %v626_v37 = vsel %vm296_vm0, %v1173_v31, 0  ;;  %v1262_v43 = vld [vmem:[%s1426_s7 + $0x3c] sm:$0xff]  ;;  %v1272_v44 = vld [vmem:[%s1592_s1 + $0x90] sm:$0xff]  ;;  %v1265_v45 = vld [vmem:[%s1592_s1 + $0x68] sm:$0xff] }
  0x1a   : >> { %v748_v38 = vsel %vm296_vm0, %v1218_v33, 0  ;;  %v262_v39 = vpack.c.b16 %v259_v35, %v259_v35  ;;  %v335_v41 = vpack.c.b16 %v332_v36, %v332_v36  ;;  %v1257_v46 = vld [vmem:[%s1426_s7 + $0x30] sm:$0xff]  ;;  %v1263_v47 = vld [vmem:[%s1426_s7 + $0x44] sm:$0xff]  ;;  %v1090_v51 = vld [vmem:[%s1426_s7 + $0x38] sm:$0xf] }
  0x1b   : >> { %v1271_v48 = vld [vmem:[%s1592_s1 + $0x88] sm:$0xff]  ;;  %v1264_v49 = vld [vmem:[%s1592_s1 + $0x60] sm:$0xff]  ;;  %v412_v52 = vunpack.c.l.b16 %v1090_v51  ;;  %v1268_v57 = vld [vmem:[%s1426_s7 + $0x50] sm:$0xff] }
  0x1c   : >> { %306 = vmatpush.bf16.msra.mxu0 %v1253_v12  ;;  %1279 = vmatpush.bf16.msra.mxu2 %v1253_v12  ;;  %v1270_v50 = vld [vmem:[%s1592_s1 + $0x80] sm:$0xff]  ;;  %v1138_v53 = vld [vmem:[%s1426_s7 + $0x4c] sm:$0xf]  ;;  %v1269_v59 = vld [vmem:[%s1426_s7 + $0x58] sm:$0xff] }
  0x1d   : >> { %1283 = vmatpush.bf16.msra.mxu3 %v1244_v15  ;;  %377 = vmatpush.bf16.msra.mxu1 %v1244_v15  ;;  %v415_v54 = vpack.c.b16 %v412_v52, %v412_v52  ;;  %v552_v55 = vunpack.c.l.b16 %v1138_v53  ;;  %v1274_v58 = vld [vmem:[%s1426_s7 + $0x64] sm:$0xff]  ;;  %v1275_v60 = vld [vmem:[%s1426_s7 + $0x6c] sm:$0xff]  ;;  %v1183_v61 = vld [vmem:[%s1426_s7 + $0x60] sm:$0xf] }
  0x1e   : >> { %v674_v62 = vunpack.c.l.b16 %v1183_v61  ;;  %v1228_v63 = vld [vmem:[%s1426_s7 + $0x74] sm:$0xf]  ;;  %v1544_v61 = vperm.slane %v1367_v0, 0  ;;  %s1330_s7 = smov 108  }
  0x1f   : >> { %v555_v56 = vpack.c.b16 %v552_v55, %v552_v55  ;;  %v796_v3 = vunpack.c.l.b16 %v1228_v63 }
  0x20   : >> { %307 = vmatpush.bf16.msra.mxu0 %v1252_v17  ;;  %1280 = vmatpush.bf16.msra.mxu2 %v1252_v17  ;;  %v677_v2 = vpack.c.b16 %v674_v62, %v674_v62 }
  0x21   : >> { %1284 = vmatpush.bf16.msra.mxu3 %v1243_v18  ;;  %378 = vmatpush.bf16.msra.mxu1 %v1243_v18  ;;  %v799_v4 = vpack.c.b16 %v796_v3, %v796_v3 }
  0x23   : >> { %1054 = vmatmul.msk.bf16.vlgmr.msra.gmra.mxu0 %vm286_vm1, %v1432_v19  ;;  %1055 = vmatmul.msk.bf16.vlgmr.msra.gmra.mxu2 %vm286_vm1, %v1435_v20 }
  0x24   : >> { %429 = vmatpush.bf16.msrb.mxu2 %v298_v8  ;;  %510 = vmatpush.bf16.msrb.mxu0 %v504_v21 }
  0x25   : >> { %452 = vmatpush.bf16.msrb.mxu3 %v369_v9  ;;  %569 = vmatpush.bf16.msrb.mxu1 %v504_v21 }
  0x26   : >> { %1082 = vmatmul.msk.bf16.vlgmr.msra.gmra.mxu3 %vm286_vm1, %v1249_v22  ;;  %1081 = vmatmul.msk.bf16.vlgmr.msra.gmra.mxu1 %vm286_vm1, %v1248_v24 }
  0x28   : >> { %430 = vmatpush.bf16.msrb.mxu2 %v1254_v10  ;;  %511 = vmatpush.bf16.msrb.mxu0 %v1260_v23 }
  0x29   : >> { %453 = vmatpush.bf16.msrb.mxu3 %v1245_v11  ;;  %570 = vmatpush.bf16.msrb.mxu1 %v1260_v23 }
  0x2c   : >> { %431 = vmatpush.bf16.msrb.mxu2 %v1253_v12  ;;  %512 = vmatpush.bf16.msrb.mxu0 %v1259_v27 }
  0x2d   : >> { %454 = vmatpush.bf16.msrb.mxu3 %v1244_v15  ;;  %571 = vmatpush.bf16.msrb.mxu1 %v1259_v27 }
  0x30   : >> { %432 = vmatpush.bf16.msrb.mxu2 %v1252_v17  ;;  %513 = vmatpush.bf16.msrb.mxu0 %v1258_v34 }
  0x31   : >> { %455 = vmatpush.bf16.msrb.mxu3 %v1243_v18  ;;  %572 = vmatpush.bf16.msrb.mxu1 %v1258_v34 }
  0x33   : >> { %1056 = vmatmul.msk.bf16.gmra.mxu2 %vm286_vm1, %v262_v39  ;;  %1129 = vmatmul.msk.bf16.vlgmr.msrb.gmra.mxu0 %vm286_vm1, %v1256_v40 }
  0x34   : >> { %632 = vmatpush.bf16.msra.mxu2 %v626_v37  ;;  %754 = vmatpush.bf16.msra.mxu0 %v748_v38 }
  0x35   : >> { %691 = vmatpush.bf16.msra.mxu3 %v626_v37  ;;  %813 = vmatpush.bf16.msra.mxu1 %v748_v38 }
  0x36   : >> { %1083 = vmatmul.msk.bf16.gmra.mxu3 %vm286_vm1, %v335_v41  ;;  %1147 = vmatmul.msk.bf16.vlgmr.msrb.gmra.mxu1 %vm286_vm1, %v1262_v43 }
  0x38   : >> { %633 = vmatpush.bf16.msra.mxu2 %v1266_v42  ;;  %755 = vmatpush.bf16.msra.mxu0 %v1272_v44 }
  0x39   : >> { %692 = vmatpush.bf16.msra.mxu3 %v1266_v42  ;;  %814 = vmatpush.bf16.msra.mxu1 %v1272_v44 }
  0x3c   : >> { %634 = vmatpush.bf16.msra.mxu2 %v1265_v45  ;;  %756 = vmatpush.bf16.msra.mxu0 %v1271_v48 }
  0x3d   : >> { %693 = vmatpush.bf16.msra.mxu3 %v1265_v45  ;;  %815 = vmatpush.bf16.msra.mxu1 %v1271_v48 }
  0x40   : >> { %635 = vmatpush.bf16.msra.mxu2 %v1264_v49  ;;  %757 = vmatpush.bf16.msra.mxu0 %v1270_v50 }
  0x41   : >> { %694 = vmatpush.bf16.msra.mxu3 %v1264_v49  ;;  %816 = vmatpush.bf16.msra.mxu1 %v1270_v50 }
  0x43   : >> { %1099 = vmatmul.msk.bf16.vlgmr.msrb.gmra.mxu2 %vm286_vm1, %v1256_v40  ;;  %1130 = vmatmul.msk.bf16.gmra.mxu0 %vm286_vm1, %v1257_v46 }
  0x46   : >> { %1102 = vmatmul.msk.bf16.vlgmr.msrb.gmra.mxu3 %vm286_vm1, %v1432_v19  ;;  %1148 = vmatmul.msk.bf16.gmra.mxu1 %vm286_vm1, %v1263_v47 }
  0x53   : >> { %1100 = vmatmul.msk.bf16.gmra.mxu2 %vm286_vm1, %v1257_v46  ;;  %1131 = vmatmul.msk.bf16.gmra.mxu0 %vm286_vm1, %v415_v54 }
  0x56   : >> { %1103 = vmatmul.msk.bf16.gmra.mxu3 %vm286_vm1, %v1435_v20  ;;  %1149 = vmatmul.msk.bf16.gmra.mxu1 %vm286_vm1, %v555_v56 }
  0x63   : >> { %1101 = vmatmul.msk.bf16.gmra.mxu2 %vm286_vm1, %v415_v54  ;;  %1219 = vmatmul.msk.bf16.vlgmr.msra.gmra.mxu0 %vm286_vm1, %v1268_v57 }
  0x66   : >> { %1104 = vmatmul.msk.bf16.gmra.mxu3 %vm286_vm1, %v262_v39  ;;  %1237 = vmatmul.msk.bf16.vlgmr.msra.gmra.mxu1 %vm286_vm1, %v1274_v58 }
  0x73   : >> { %1174 = vmatmul.msk.bf16.vlgmr.msra.gmra.mxu2 %vm286_vm1, %v1262_v43  ;;  %1220 = vmatmul.msk.bf16.gmra.mxu0 %vm286_vm1, %v1269_v59 }
  0x76   : >> { %1192 = vmatmul.msk.bf16.vlgmr.msra.gmra.mxu3 %vm286_vm1, %v1268_v57  ;;  %1238 = vmatmul.msk.bf16.gmra.mxu1 %vm286_vm1, %v1275_v60 }
  0x83   : >> { %1175 = vmatmul.msk.bf16.gmra.mxu2 %vm286_vm1, %v1263_v47  ;;  %1221 = vmatmul.msk.bf16.gmra.mxu0 %vm286_vm1, %v677_v2 }
  0x86   : >> { %1193 = vmatmul.msk.bf16.gmra.mxu3 %vm286_vm1, %v1269_v59  ;;  %1239 = vmatmul.msk.bf16.gmra.mxu1 %vm286_vm1, %v799_v4  ;;  %v1547_v4 = vperm.slane %v1372_v1, 0 }
  0x93   : >> { %1176 = vmatmul.msk.bf16.gmra.mxu2 %vm286_vm1, %v555_v56 }
  0x96   : >> { %1194 = vmatmul.msk.bf16.gmra.mxu3 %vm286_vm1, %v677_v2 }
  0xa0   : >> { %v309_v5 = vpop.f32.mrf.mxu0 }
  0xa3   : >> { %v380_v6 = vpop.f32.mrf.mxu1 }
  0xa4   : >> { %v381_v7 = vadd.f32 %v380_v6, %v309_v5 }
  0xa6   : >> { %v314_v8 = vpop.f32.mrf.mxu2 }
  0xa8   : >> { %v311_v11 = vpop.f32.mrf.mxu0 }
  0xa9   : >> { %v385_v9 = vpop.f32.mrf.mxu3 }
  0xaa   : >> { %v386_v10 = vadd.f32 %v385_v9, %v314_v8 }
  0xab   : >> { %v382_v12 = vpop.f32.mrf.mxu1 }
  0xac   : >> { %v383_v13 = vadd.f32 %v382_v12, %v311_v11 }
  0xae   : >> { %v316_v14 = vpop.f32.mrf.mxu2 }
  0xb0   : >> { %v515_v17 = vpop.f32.mrf.mxu0 }
  0xb1   : >> { %v387_v15 = vpop.f32.mrf.mxu3  ;;  %v529_v18 = vadd.f32 %v515_v17, %v381_v7 }
  0xb2   : >> { %v388_v16 = vadd.f32 %v387_v15, %v316_v14 }
  0xb3   : >> { %v574_v19 = vpop.f32.mrf.mxu1 }
  0xb6   : >> { %v319_v20 = vpop.f32.mrf.mxu2 }
  0xb8   : >> { %v517_v23 = vpop.f32.mrf.mxu0 }
  0xb9   : >> { %v390_v21 = vpop.f32.mrf.mxu3  ;;  %v530_v24 = vadd.f32 %v517_v23, %v383_v13 }
  0xba   : >> { %v391_v22 = vadd.f32 %v390_v21, %v319_v20 }
  0xbb   : >> { %v576_v25 = vpop.f32.mrf.mxu1 }
  0xbe   : >> { %v321_v26 = vpop.f32.mrf.mxu2 }
  0xc0   : >> { %v520_v28 = vpop.f32.mrf.mxu0 }
  0xc1   : >> { %v392_v27 = vpop.f32.mrf.mxu3  ;;  %v1529_v29 = vadd.f32 %v520_v28, %v386_v10 }
  0xc3   : >> { %v579_v30 = vpop.f32.mrf.mxu1 }
  0xc6   : >> { %v434_v31 = vpop.f32.mrf.mxu2 }
  0xc8   : >> { %v522_v33 = vpop.f32.mrf.mxu0 }
  0xc9   : >> { %v457_v32 = vpop.f32.mrf.mxu3  ;;  %v1531_v34 = vadd.f32 %v522_v33, %v388_v16 }
  0xca   : >> { %v458_v56 = vadd.f32 %v457_v32, %v434_v31 }
  0xcb   : >> { %v1533_v35 = vpop.f32.mrf.mxu1 }
  0xcc   : >> { %v588_v59 = vadd.f32 %v574_v19, %v458_v56 }
  0xce   : >> { %v436_v36 = vpop.f32.mrf.mxu2 }
  0xd0   : >> { %v525_v38 = vpop.f32.mrf.mxu0 }
  0xd1   : >> { %v459_v37 = vpop.f32.mrf.mxu3  ;;  %v1535_v39 = vadd.f32 %v525_v38, %v391_v22 }
  0xd2   : >> { %v460_v5 = vadd.f32 %v459_v37, %v436_v36 }
  0xd3   : >> { %v1537_v40 = vpop.f32.mrf.mxu1 }
  0xd4   : >> { %v589_v12 = vadd.f32 %v576_v25, %v460_v5 }
  0xd6   : >> { %v439_v41 = vpop.f32.mrf.mxu2 }
  0xd8   : >> { %v527_v43 = vpop.f32.mrf.mxu0 }
  0xd9   : >> { %v462_v42 = vpop.f32.mrf.mxu3 }
  0xda   : >> { %v463_v21 = vadd.f32 %v462_v42, %v439_v41 }
  0xdb   : >> { %v586_v44 = vpop.f32.mrf.mxu1 }
  0xdc   : >> { %v590_v32 = vadd.f32 %v579_v30, %v463_v21 }
  0xde   : >> { %v441_v45 = vpop.f32.mrf.mxu2 }
  0xe0   : >> { %v759_v47 = vpop.f32.mrf.mxu0 }
  0xe1   : >> { %v464_v46 = vpop.f32.mrf.mxu3 }
  0xe2   : >> { %v465_v44 = vadd.f32 %v464_v46, %v441_v45 }
  0xe3   : >> { %v818_v48 = vpop.f32.mrf.mxu1 }
  0xe6   : >> { %v1539_v49 = vpop.f32.mrf.mxu2 }
  0xe8   : >> { %v761_v51 = vpop.f32.mrf.mxu0 }
  0xe9   : >> { %v1541_v50 = vpop.f32.mrf.mxu3 }
  0xeb   : >> { %v820_v52 = vpop.f32.mrf.mxu1 }
  0xee   : >> { %v446_v53 = vpop.f32.mrf.mxu2 }
  0xf0   : >> { %v764_v55 = vpop.f32.mrf.mxu0 }
  0xf1   : >> { %v469_v54 = vpop.f32.mrf.mxu3 }
  0xf3   : >> { %v823_v57 = vpop.f32.mrf.mxu1 }
  0xf6   : >> { %v637_v58 = vpop.f32.mrf.mxu2 }
  0xf7   : >> { %v651_v60 = vadd.f32 %v637_v58, %v529_v18 }
  0xf8   : >> { %v766_v2 = vpop.f32.mrf.mxu0 }
  0xf9   : >> { %v696_v62 = vpop.f32.mrf.mxu3  ;;  %v773_v3 = vadd.f32 %v759_v47, %v651_v60 }
  0xfa   : >> { %v710_v63 = vadd.f32 %v696_v62, %v588_v59  ;;  %v468_v62 = vadd.f32 %v1541_v50, %v1539_v49 }
  0xfb   : >> { %v840_v7 = vmul.f32 %v1544_v61, %v773_v3  ;;  %v825_v9 = vpop.f32.mrf.mxu1 }
  0xfc   : >> { %v832_v6 = vadd.f32 %v818_v48, %v710_v63 }
  0xfd   : >> { %v848_v10 = vadd.f32 %v1547_v4, %v840_v7 }
  0xfe   : >> { %v858_v8 = vmul.f32 %v1544_v61, %v832_v6  ;;  %v639_v11 = vpop.f32.mrf.mxu2 }
  0xff   : >> { %v652_v14 = vadd.f32 %v639_v11, %v530_v24  ;;  %v853_v16 = vmax.f32 %v848_v10, 0.0 }
 0x100   : >> { %v863_v13 = vadd.f32 %v858_v8, %v1547_v4  ;;  %v769_v19 = vpop.f32.mrf.mxu0 }
 0x101   : >> { %v698_v15 = vpop.f32.mrf.mxu3  ;;  %v774_v20 = vadd.f32 %v761_v51, %v652_v14 }
 0x102   : >> { %v711_v17 = vadd.f32 %v698_v15, %v589_v12  ;;  %v868_v18 = vmax.f32 %v863_v13, 0.0 }
 0x103   : >> { %v841_v26 = vmul.f32 %v1544_v61, %v774_v20  ;;  %v828_v28 = vpop.f32.mrf.mxu1 }
 0x104   : >> { %v833_v22 = vadd.f32 %v820_v52, %v711_v17  ;;  %v1553_v23 = vmax.f32 %v853_v16, %v868_v18 }
 0x105   : >> { %v849_v25 = vadd.f32 %v1547_v4, %v841_v26 }
 0x106   : >> { %v859_v27 = vmul.f32 %v1544_v61, %v833_v22  ;;  %v642_v31 = vpop.f32.mrf.mxu2 }
 0x107   : >> { %v653_v33 = vadd.f32 %v642_v31, %v1529_v29  ;;  %v854_v37 = vmax.f32 %v849_v25, 0.0 }
 0x108   : >> { %v864_v24 = vadd.f32 %v859_v27, %v1547_v4  ;;  %v771_v42 = vpop.f32.mrf.mxu0 }
 0x109   : >> { %v701_v36 = vpop.f32.mrf.mxu3  ;;  %v775_v43 = vadd.f32 %v764_v55, %v653_v33  ;;  %v591_v55 = vadd.f32 %v1533_v35, %v465_v44 }
 0x10a   : >> { %v712_v38 = vadd.f32 %v701_v36, %v590_v32  ;;  %v869_v41 = vmax.f32 %v864_v24, 0.0 }
 0x10b   : >> { %v842_v51 = vmul.f32 %v1544_v61, %v775_v43  ;;  %v830_v30 = vpop.f32.mrf.mxu1 }
 0x10c   : >> { %v834_v47 = vadd.f32 %v823_v57, %v712_v38  ;;  %v874_v48 = vmax.f32 %v854_v37, %v869_v41 }
 0x10d   : >> { %v850_v54 = vadd.f32 %v1547_v4, %v842_v51 }
 0x10e   : >> { %v860_v52 = vmul.f32 %v1544_v61, %v834_v47  ;;  %v1304_v53 = vpack.i.bf16 %v874_v48, %v1553_v23  ;;  %v644_v56 = vpop.f32.mrf.mxu2 }
 0x10f   : >> { %v855_v45 = vmax.f32 %v850_v54, 0.0  ;;  %v654_v46 = vadd.f32 %v644_v56, %v1531_v34  ;;  %v592_v34 = vadd.f32 %v1537_v40, %v468_v62 }
 0x110   : >> { %v865_v29 = vadd.f32 %v860_v52, %v1547_v4  ;;  %1305 = vrot.lane.b32.xlu0 %v1304_v53, %s1330_s7 }
 0x111   : >> { %v703_v57 = vpop.f32.mrf.mxu3  ;;  %v776_v60 = vadd.f32 %v766_v2, %v654_v46 }
 0x112   : >> { %v870_v58 = vmax.f32 %v865_v29, 0.0  ;;  %v713_v59 = vadd.f32 %v703_v57, %v591_v55 }
 0x113   : >> { %v843_v5 = vmul.f32 %v1544_v61, %v776_v60 }
 0x114   : >> { %v835_v63 = vadd.f32 %v825_v9, %v713_v59  ;;  %v875_v3 = vmax.f32 %v855_v45, %v870_v58 }
 0x115   : >> { %v851_v7 = vadd.f32 %v1547_v4, %v843_v5 }
 0x116   : >> { %v861_v6 = vmul.f32 %v1544_v61, %v835_v63  ;;  %v647_v8 = vpop.f32.mrf.mxu2 }
 0x117   : >> { %v856_v10 = vmax.f32 %v851_v7, 0.0  ;;  %v655_v11 = vadd.f32 %v647_v8, %v1535_v39 }
 0x118   : >> { %v866_v35 = vadd.f32 %v861_v6, %v1547_v4 }
 0x119   : >> { %v706_v2 = vpop.f32.mrf.mxu3  ;;  %v777_v49 = vadd.f32 %v769_v19, %v655_v11 }
 0x11a   : >> { %v871_v12 = vmax.f32 %v866_v35, 0.0  ;;  %v714_v13 = vadd.f32 %v706_v2, %v592_v34 }
 0x11b   : >> { %v844_v14 = vmul.f32 %v1544_v61, %v777_v49 }
 0x11c   : >> { %v836_v50 = vadd.f32 %v828_v28, %v714_v13  ;;  %v876_v9 = vmax.f32 %v856_v10, %v871_v12 }
 0x11d   : >> { %v852_v17 = vadd.f32 %v1547_v4, %v844_v14 }
 0x11e   : >> { %v862_v15 = vmul.f32 %v1544_v61, %v836_v50  ;;  %v1309_v16 = vpack.i.bf16 %v876_v9, %v875_v3  ;;  %v649_v40 = vpop.f32.mrf.mxu2 }
 0x11f   : >> { %v857_v20 = vmax.f32 %v852_v17, 0.0 }
 0x120   : >> { %1310 = vrot.lane.b32.xlu0 %v1309_v16, %s1330_s7  ;;  %v867_v39 = vadd.f32 %v862_v15, %v1547_v4 }
 0x121   : >> { %v708_v18 = vpop.f32.mrf.mxu3 }
 0x122   : >> { %v872_v21 = vmax.f32 %v867_v39, 0.0 }
 0x124   : >> { %v877_v22 = vmax.f32 %v857_v20, %v872_v21 }
 0x126   : >> { %891 = vrot.lane.b32.xlu1 %v877_v22, %s1330_s7 }
 0x182   : >> { %v1306_v19 = vpop.permute.xlu0 %1305 }
 0x183   : >> { %v1308_v26 = vunpack.i.h.bf16 %v1306_v19  ;;  %v1307_v27 = vunpack.i.l.bf16 %v1306_v19 }
 0x185   : >> { %v899_v61 = vmax.f32 %v874_v48, %v1308_v26  ;;  %v898_v28 = vmax.f32 %v1553_v23, %v1307_v27 }
 0x187   : >> { %v904_v25 = vpack.c.bf16 %v899_v61, %v899_v61  ;;  %v903_v31 = vpack.c.bf16 %v898_v28, %v898_v28 }
 0x189   : >> { %913 = vst.msk [vmem:[%s910_s17 + $0x4] sm:$0xf] %vm911_vm2, %v904_v25 }
 0x18a   : >> { %912 = vst.msk [vmem:[%s910_s17] sm:$0xf] %vm911_vm2, %v903_v31 }
 0x192   : >> { %v1311_v4 = vpop.permute.xlu0 %1310 }
 0x193   : >> { %v1313_v32 = vunpack.i.h.bf16 %v1311_v4  ;;  %v1312_v24 = vunpack.i.l.bf16 %v1311_v4 }
 0x195   : >> { %v901_v33 = vmax.f32 %v876_v9, %v1313_v32  ;;  %v900_v36 = vmax.f32 %v875_v3, %v1312_v24 }
 0x197   : >> { %v906_v37 = vpack.c.bf16 %v901_v33, %v901_v33  ;;  %v905_v38 = vpack.c.bf16 %v900_v36, %v900_v36 }
 0x198   : >> { %v892_v41 = vpop.permute.xlu1 %891 }
 0x199   : >> { %915 = vst.msk [vmem:[%s910_s17 + $0xc] sm:$0xf] %vm911_vm2, %v906_v37  ;;  %v902_v42 = vmax.f32 %v877_v22, %v892_v41  ;;  %213 = sbr.rel (!%p211_p5) target bundleno = 16 (0x10), region = 84 }
 0x19a   : >> { %914 = vst.msk [vmem:[%s910_s17 + $0x8] sm:$0xf] %vm911_vm2, %v905_v38 }
 0x19b   : >> { %v907_v43 = vpack.c.bf16 %v902_v42, %v902_v42 }
 0x19d   : >> { %917 = vst.msk [vmem:[%s910_s17 + $0x10] sm:$0x3] %vm916_vm3, %v907_v43 }
 0x19e PF: > { %s14_s15 = sadd.s32 1, %s1324_s15  }
 0x19f   : > { %p11_p6 = scmp.ge.s32.totalorder %s14_s15, 4  }
 0x1a1   :  { %13 = sbr.rel (!%p11_p6) target bundleno = 1 (0x1), region = 95 }

// kernel: custom_cnn_forward.8
= control target key start
LH: loop header
LB: loop body
LE: loop exit
PB: predicated region body
PF: predicated region fallthrough
CT: control target
= control target key end

     0   :  { %s2158_s15 = smov 0   ;;  %s2477_s0 = inlined_call_operand.vmem [shape: bf16[72,16,160], index: 0, kind: input, shape index: {}]   ;;  %s2478_s1 = inlined_call_operand.vmem [shape: bf16[7,160,20], index: 1, kind: input, shape index: {}]   ;;  %s2479_s2 = inlined_call_operand.vmem [shape: f32[1,20], index: 2, kind: input, shape index: {}]   ;;  %s2480_s3 = inlined_call_operand.vmem [shape: f32[1,20], index: 3, kind: input, shape index: {}]   ;;  %s2481_s4 = inlined_call_operand.vmem [shape: bf16[30,15,10], index: 4, kind: output, shape index: {}]  }
   0x1 LB: > { %s1475_s16 = sadd.s32 4294967295, %s2126_s15   ;;  %p1479_p0 = scmp.ge.s32.totalorder %s2126_s15, 1  ;;  %s2126_s15 = sphi %s2158_s15, %s14_s15  }
   0x2   : > { %p164_p1 = scmp.lt.s32.totalorder %s2126_s15, 3 }
   0x4   : > { %p165_p2 = pnand %p1479_p0, %p164_p1 }
   0x5   : > { %s192_s17 = smul.u32 (!%p165_p2), 36, %s1475_s16  ;;  %s2186_s5 = smov (!%p165_p2), 0  }
   0x6   : > { %168 = sbr.rel (%p165_p2) target bundleno = 437 (0x1b5), region = 36 }
   0x7   : > { %s199_s22 = smul.u32 (!%p165_p2), 15, %s1475_s16  ;;  %p193_p3 = scmp.lt.s32.totalorder (!%p165_p2), %s192_s17, 71 }
   0x9   : > { %p200_p4 = scmp.lt.s32.totalorder (!%p165_p2), %s199_s22, 29 }
   0xb   : > { %v2169_v0 = vld [vmem:[%s2479_s2] sm:$0x1]  ;;  %s2483_s17 = smov (!%p193_p3, %s192_s17), 71  ;;  %s2485_s22 = smov (!%p200_p4, %s199_s22), 29 }
   0xc   : > { %v2174_v1 = vld [vmem:[%s2480_s3] sm:$0x1]  ;;  %s1996_s23 = sshll.u32 %s2483_s17, 4  ;;  %s1997_s27 = sshll.u32 %s2485_s22, 3 }
   0xd   : > { %s2179_s26 = scalar_lea.vmem %s2477_s0, %s1996_s23  ;;  %s2184_s30 = scalar_lea.vmem %s2481_s4, %s1997_s27 }
   0xe LB: >> { %v2022_v2 = vld [vmem:[%s2478_s1 + $0x88] sm:$0xff]  ;;  %v2024_v3 = vld [vmem:[%s2478_s1 + $0x98] sm:$0xff]  ;;  %v2021_v6 = vld [vmem:[%s2478_s1 + $0x80] sm:$0xff]  ;;  %s2009_s19 = sshll.u32 %s2130_s5, 5  ;;  %vm337_vm0 = vcmask 261120   ;;  %s2093_s22 = sshll.u32 %s2130_s5, 3  ;;  %s2130_s5 = sphi %s2186_s5, %s214_s5  }
   0xf   : >> { %v2005_v4 = vld [vmem:[%s2478_s1 + $0x38] sm:$0xff]  ;;  %v2203_v5 = vld [vmem:[%s2478_s1 + $0x48] sm:$0xff]  ;;  %341 = vmatpush.bf16.msra.mxu0 %v2022_v2  ;;  %361 = vmatpush.bf16.msra.mxu1 %v2024_v3  ;;  %v2023_v7 = vld [vmem:[%s2478_s1 + $0x90] sm:$0xff]  ;;  %s2222_s24 = scalar_lea.vmem %s2179_s26, %s2009_s19  ;;  %s1371_s23 = scalar_lea.vmem %s2184_s30, %s2093_s22  ;;  %vm1372_vm1 = vcmask 76800   ;;  %vm1375_vm2 = vsmask.f32 3328 }
  0x10   : >> { %441 = vmatpush.bf16.msra.mxu2 %v2005_v4  ;;  %461 = vmatpush.bf16.msra.mxu3 %v2203_v5  ;;  %v2004_v8 = vld [vmem:[%s2478_s1 + $0x30] sm:$0xff]  ;;  %v2219_v9 = vld [vmem:[%s2478_s1 + $0x40] sm:$0xff]  ;;  %v1564_v11 = vld [vmem:[%s2222_s24 + $0x8] sm:$0xf0]  ;;  %s214_s5 = sadd.s32 1, %s2130_s5  }
  0x11   : >> { %v2010_v10 = vld [vmem:[%s2222_s24 + $0x4] sm:$0xf]  ;;  %v2013_v12 = vld [vmem:[%s2222_s24 + $0x14] sm:$0xf]  ;;  %v1515_v13 = vld [vmem:[%s2222_s24 + $0x18] sm:$0xf0] }
  0x12   : >> { %v1567_v14 = vor.u32 %v2010_v10, %v1564_v11  ;;  %v2020_v15 = vld [vmem:[%s2478_s1 + $0x78] sm:$0xff]  ;;  %v2231_v16 = vor.u32 %v2013_v12, %v1515_v13  ;;  %v2003_v17 = vld [vmem:[%s2478_s1 + $0x28] sm:$0xff]  ;;  %v2019_v18 = vld [vmem:[%s2478_s1 + $0x70] sm:$0xff]  ;;  %p211_p5 = scmp.ge.s32.totalorder %s214_s5, 15  }
  0x13   : >> { %342 = vmatpush.bf16.msra.mxu0 %v2021_v6  ;;  %362 = vmatpush.bf16.msra.mxu1 %v2023_v7  ;;  %v2002_v19 = vld [vmem:[%s2478_s1 + $0x20] sm:$0xff]  ;;  %v2018_v20 = vld [vmem:[%s2478_s1 + $0x68] sm:$0xff]  ;;  %v2001_v21 = vld [vmem:[%s2478_s1 + $0x18] sm:$0xff] }
  0x14   : >> { %442 = vmatpush.bf16.msra.mxu2 %v2004_v8  ;;  %462 = vmatpush.bf16.msra.mxu3 %v2219_v9  ;;  %v2017_v22 = vld [vmem:[%s2478_s1 + $0x60] sm:$0xff]  ;;  %v2000_v23 = vld [vmem:[%s2478_s1 + $0x10] sm:$0xff]  ;;  %v1617_v25 = vld [vmem:[%s2222_s24 + $0x28] sm:$0xf0] }
  0x15   : >> { %v2026_v24 = vld [vmem:[%s2222_s24 + $0x24] sm:$0xf]  ;;  %v2016_v27 = vld [vmem:[%s2478_s1 + $0x58] sm:$0xff]  ;;  %v1999_v28 = vld [vmem:[%s2478_s1 + $0x8] sm:$0xff] }
  0x16   : >> { %1559 = vmatmul.msk.bf16.vlgmr.msra.gmra.mxu1 %vm337_vm0, %v2231_v16  ;;  %v2260_v26 = vor.u32 %v2026_v24, %v1617_v25  ;;  %v2015_v29 = vld [vmem:[%s2478_s1 + $0x50] sm:$0xff]  ;;  %v1998_v30 = vld [vmem:[%s2478_s1] sm:$0xff]  ;;  %v2014_v32 = vld [vmem:[%s2222_s24 + $0x14] sm:$0xf0] }
  0x17   : >> { %487 = vmatpush.bf16.msrb.mxu1 %v2022_v2  ;;  %1608 = vmatmul.msk.bf16.vlgmr.msra.gmra.mxu3 %vm337_vm0, %v1567_v14  ;;  %v1513_v31 = vld [vmem:[%s2222_s24 + $0x10] sm:$0xf]  ;;  %v2035_v33 = vld [vmem:[%s2478_s1 + $0xd8] sm:$0xff]  ;;  %v1562_v34 = vld [vmem:[%s2222_s24] sm:$0xf] }
  0x18   : >> { %507 = vmatpush.bf16.msrb.mxu3 %v2024_v3  ;;  %343 = vmatpush.bf16.msra.mxu0 %v2020_v15  ;;  %v2011_v35 = vld [vmem:[%s2222_s24 + $0x4] sm:$0xf0]  ;;  %v1514_v36 = vor.u32 %v2014_v32, %v1513_v31  ;;  %v2034_v38 = vld [vmem:[%s2478_s1 + $0xd0] sm:$0xff]  ;;  %v1615_v39 = vld [vmem:[%s2222_s24 + $0x20] sm:$0xf] }
  0x19   : >> { %443 = vmatpush.bf16.msra.mxu2 %v2003_v17  ;;  %v1563_v37 = vor.u32 %v2011_v35, %v1562_v34  ;;  %v2027_v40 = vld [vmem:[%s2222_s24 + $0x24] sm:$0xf0]  ;;  %v2036_v44 = vld [vmem:[%s2478_s1 + $0xe0] sm:$0xff]  ;;  %v2031_v47 = vld [vmem:[%s2478_s1 + $0xb8] sm:$0xff] }
  0x1a   : >> { %v2037_v41 = vld [vmem:[%s2478_s1 + $0xe8] sm:$0xff]  ;;  %v1616_v42 = vor.u32 %v2027_v40, %v1615_v39  ;;  %v2032_v45 = vld [vmem:[%s2478_s1 + $0xc0] sm:$0xff]  ;;  %v2030_v49 = vld [vmem:[%s2478_s1 + $0xb0] sm:$0xff] }
  0x1b   : >> { %488 = vmatpush.bf16.msrb.mxu1 %v2021_v6  ;;  %v2033_v43 = vld [vmem:[%s2478_s1 + $0xc8] sm:$0xff]  ;;  %v2047_v48 = vld [vmem:[%s2478_s1 + $0x120] sm:$0xff]  ;;  %v2046_v50 = vld [vmem:[%s2478_s1 + $0x118] sm:$0xff] }
  0x1c   : >> { %508 = vmatpush.bf16.msrb.mxu3 %v2023_v7  ;;  %344 = vmatpush.bf16.msra.mxu0 %v2019_v18  ;;  %v2048_v46 = vld [vmem:[%s2478_s1 + $0x128] sm:$0xff]  ;;  %v2045_v52 = vld [vmem:[%s2478_s1 + $0x110] sm:$0xff]  ;;  %v2028_v53 = vld [vmem:[%s2478_s1 + $0xa0] sm:$0xff] }
  0x1d   : >> { %444 = vmatpush.bf16.msra.mxu2 %v2002_v19  ;;  %v2029_v51 = vld [vmem:[%s2478_s1 + $0xa8] sm:$0xff]  ;;  %v2050_v54 = vld [vmem:[%s2478_s1 + $0x138] sm:$0xff]  ;;  %v1690_v55 = vld [vmem:[%s2222_s24 + $0x30] sm:$0xf] }
  0x1e   : >> { %v2040_v56 = vld [vmem:[%s2222_s24 + $0x34] sm:$0xf0]  ;;  %v2044_v57 = vld [vmem:[%s2478_s1 + $0x108] sm:$0xff]  ;;  %v2049_v59 = vld [vmem:[%s2478_s1 + $0x130] sm:$0xff] }
  0x1f   : >> { %489 = vmatpush.bf16.msrb.mxu1 %v2020_v15  ;;  %v1691_v58 = vor.u32 %v2040_v56, %v1690_v55  ;;  %v2061_v60 = vld [vmem:[%s2478_s1 + $0x178] sm:$0xff]  ;;  %v2043_v61 = vld [vmem:[%s2478_s1 + $0x100] sm:$0xff]  ;;  %v2039_v62 = vld [vmem:[%s2222_s24 + $0x34] sm:$0xf] }
  0x20   : >> { %515 = vmatpush.bf16.msra.mxu3 %v2005_v4  ;;  %345 = vmatpush.bf16.msra.mxu0 %v2018_v20  ;;  %v1692_v63 = vld [vmem:[%s2222_s24 + $0x38] sm:$0xf0]  ;;  %v2060_v2 = vld [vmem:[%s2478_s1 + $0x170] sm:$0xff]  ;;  %v2063_v7 = vld [vmem:[%s2478_s1 + $0x188] sm:$0xff] }
  0x21   : >> { %445 = vmatpush.bf16.msra.mxu2 %v2001_v21  ;;  %v1695_v3 = vor.u32 %v2039_v62, %v1692_v63  ;;  %v2042_v4 = vld [vmem:[%s2478_s1 + $0xf8] sm:$0xff]  ;;  %v2041_v6 = vld [vmem:[%s2478_s1 + $0xf0] sm:$0xff]  ;;  %v1766_v10 = vld [vmem:[%s2222_s24 + $0x48] sm:$0xf0] }
  0x22   : >> { %v2062_v11 = vld [vmem:[%s2478_s1 + $0x180] sm:$0xff]  ;;  %v2074_v13 = vld [vmem:[%s2478_s1 + $0x1c8] sm:$0xff]  ;;  %v2057_v14 = vld [vmem:[%s2478_s1 + $0x158] sm:$0xff] }
  0x23   : >> { %490 = vmatpush.bf16.msrb.mxu1 %v2019_v18  ;;  %v1764_v15 = vld [vmem:[%s2222_s24 + $0x40] sm:$0xf]  ;;  %v2056_v18 = vld [vmem:[%s2478_s1 + $0x150] sm:$0xff]  ;;  %v2066_v25 = vld [vmem:[%s2222_s24 + $0x54] sm:$0xf0] }
  0x24   : >> { %516 = vmatpush.bf16.msra.mxu3 %v2004_v8  ;;  %346 = vmatpush.bf16.msra.mxu0 %v2017_v22  ;;  %v2058_v8 = vld [vmem:[%s2478_s1 + $0x160] sm:$0xff]  ;;  %v1838_v24 = vld [vmem:[%s2222_s24 + $0x50] sm:$0xf]  ;;  %v1840_v31 = vld [vmem:[%s2222_s24 + $0x58] sm:$0xf0] }
  0x25   : >> { %446 = vmatpush.bf16.msra.mxu2 %v2000_v23  ;;  %v2087_v32 = vld [vmem:[%s2478_s1 + $0x218] sm:$0xff]  ;;  %v2086_v35 = vld [vmem:[%s2478_s1 + $0x210] sm:$0xff]  ;;  %v2089_v39 = vld [vmem:[%s2478_s1 + $0x228] sm:$0xff] }
  0x26   : >> { %v2078_v40 = vld [vmem:[%s2222_s24 + $0x64] sm:$0xf]  ;;  %v2091_v55 = vld [vmem:[%s2222_s24 + $0x74] sm:$0xf]  ;;  %v1988_v56 = vld [vmem:[%s2222_s24 + $0x78] sm:$0xf0] }
  0x27   : >> { %491 = vmatpush.bf16.msrb.mxu1 %v2018_v20  ;;  %1621 = vmatmul.msk.bf16.vlgmr.msrb.gmra.mxu3 %vm337_vm0, %v2260_v26  ;;  %v2072_v20 = vld [vmem:[%s2478_s1 + $0x1b8] sm:$0xff]  ;;  %vm1376_vm3 = vmand %vm1372_vm1, %vm1375_vm2 }
  0x28   : >> { %517 = vmatpush.bf16.msra.mxu3 %v2003_v17  ;;  %347 = vmatpush.bf16.msra.mxu0 %v2016_v27  ;;  %v2073_v17 = vld [vmem:[%s2478_s1 + $0x1c0] sm:$0xff] }
  0x29   : >> { %447 = vmatpush.bf16.msra.mxu2 %v1999_v28 }
  0x2b   : >> { %492 = vmatpush.bf16.msrb.mxu1 %v2017_v22  ;;  %v2071_v22 = vld [vmem:[%s2478_s1 + $0x1b0] sm:$0xff] }
  0x2c   : >> { %518 = vmatpush.bf16.msra.mxu3 %v2002_v19  ;;  %348 = vmatpush.bf16.msra.mxu0 %v2015_v29 }
  0x2d   : >> { %448 = vmatpush.bf16.msra.mxu2 %v1998_v30 }
  0x2f   : >> { %493 = vmatpush.bf16.msrb.mxu1 %v2016_v27  ;;  %349 = vmatmul.bf16.vlgmr.msra.gmra.mxu0 %v1514_v36  ;;  %v2070_v27 = vld [vmem:[%s2478_s1 + $0x1a8] sm:$0xff] }
  0x30   : >> { %519 = vmatpush.bf16.msra.mxu3 %v2001_v21  ;;  %672 = vmatpush.bf16.msrb.mxu0 %v2035_v33  ;;  %v2055_v21 = vld [vmem:[%s2478_s1 + $0x148] sm:$0xff] }
  0x31   : >> { %624 = vmatpush.bf16.msrb.mxu2 %v2035_v33  ;;  %v2069_v33 = vld [vmem:[%s2478_s1 + $0x1a0] sm:$0xff] }
  0x32   : >> { %449 = vmatmul.bf16.vlgmr.msra.gmra.mxu2 %v1563_v37  ;;  %v2085_v37 = vld [vmem:[%s2478_s1 + $0x208] sm:$0xff] }
  0x33   : >> { %494 = vmatpush.bf16.msrb.mxu1 %v2015_v29  ;;  %v2075_v29 = vld [vmem:[%s2478_s1 + $0x1d0] sm:$0xff] }
  0x34   : >> { %520 = vmatpush.bf16.msra.mxu3 %v2000_v23  ;;  %673 = vmatpush.bf16.msrb.mxu0 %v2034_v38  ;;  %v2054_v23 = vld [vmem:[%s2478_s1 + $0x140] sm:$0xff] }
  0x35   : >> { %625 = vmatpush.bf16.msrb.mxu2 %v2034_v38  ;;  %v2067_v38 = vld [vmem:[%s2478_s1 + $0x190] sm:$0xff] }
  0x36   : >> { %495 = vmatmul.bf16.vlgmr.msrb.gmra.mxu1 %v1616_v42 }
  0x37   : >> { %644 = vmatpush.bf16.msra.mxu1 %v2037_v41 }
  0x38   : >> { %521 = vmatpush.bf16.msra.mxu3 %v1999_v28  ;;  %674 = vmatpush.bf16.msrb.mxu0 %v2033_v43  ;;  %v1839_v28 = vor.u32 %v2066_v25, %v1838_v24 }
  0x39   : >> { %626 = vmatpush.bf16.msrb.mxu2 %v2033_v43 }
  0x3b   : >> { %645 = vmatpush.bf16.msra.mxu1 %v2036_v44 }
  0x3c   : >> { %522 = vmatpush.bf16.msra.mxu3 %v1998_v30  ;;  %675 = vmatpush.bf16.msrb.mxu0 %v2032_v45  ;;  %v2065_v30 = vld [vmem:[%s2222_s24 + $0x54] sm:$0xf] }
  0x3d   : >> { %627 = vmatpush.bf16.msrb.mxu2 %v2032_v45  ;;  %v1843_v34 = vor.u32 %v2065_v30, %v1840_v31  ;;  %v2083_v45 = vld [vmem:[%s2478_s1 + $0x1f8] sm:$0xff] }
  0x3f   : >> { %692 = vmatpush.bf16.msrb.mxu1 %v2037_v41  ;;  %523 = vmatmul.bf16.vlgmr.msra.gmra.mxu3 %v1514_v36  ;;  %v2068_v36 = vld [vmem:[%s2478_s1 + $0x198] sm:$0xff]  ;;  %v1914_v41 = vld [vmem:[%s2222_s24 + $0x68] sm:$0xf0] }
  0x40   : >> { %535 = vmatpush.bf16.msrb.mxu3 %v2203_v5  ;;  %676 = vmatpush.bf16.msrb.mxu0 %v2031_v47  ;;  %v2059_v5 = vld [vmem:[%s2478_s1 + $0x168] sm:$0xff]  ;;  %v1917_v43 = vor.u32 %v2078_v40, %v1914_v41 }
  0x41   : >> { %628 = vmatpush.bf16.msrb.mxu2 %v2031_v47  ;;  %v2079_v47 = vld [vmem:[%s2222_s24 + $0x64] sm:$0xf0] }
  0x43   : >> { %693 = vmatpush.bf16.msrb.mxu1 %v2036_v44  ;;  %v2088_v44 = vld [vmem:[%s2478_s1 + $0x220] sm:$0xff] }
  0x44   : >> { %536 = vmatpush.bf16.msrb.mxu3 %v2219_v9  ;;  %677 = vmatpush.bf16.msrb.mxu0 %v2030_v49  ;;  %v2052_v9 = vld [vmem:[%s2222_s24 + $0x44] sm:$0xf] }
  0x45   : >> { %629 = vmatpush.bf16.msrb.mxu2 %v2030_v49  ;;  %v1769_v12 = vor.u32 %v2052_v9, %v1766_v10 }
  0x46   : >> { %1683 = vmatmul.msk.bf16.vlgmr.msra.gmra.mxu1 %vm337_vm0, %v2260_v26  ;;  %v2076_v26 = vld [vmem:[%s2478_s1 + $0x1d8] sm:$0xff] }
  0x47   : >> { %831 = vmatpush.bf16.msra.mxu1 %v2048_v46 }
  0x48   : >> { %783 = vmatpush.bf16.msra.mxu3 %v2048_v46  ;;  %678 = vmatpush.bf16.msrb.mxu0 %v2029_v51  ;;  %v1912_v46 = vld [vmem:[%s2222_s24 + $0x60] sm:$0xf] }
  0x49   : >> { %630 = vmatpush.bf16.msrb.mxu2 %v2029_v51  ;;  %v1913_v49 = vor.u32 %v2079_v47, %v1912_v46  ;;  %v2080_v51 = vld [vmem:[%s2478_s1 + $0x1e0] sm:$0xff] }
  0x4b   : >> { %832 = vmatpush.bf16.msra.mxu1 %v2047_v48 }
  0x4c   : >> { %784 = vmatpush.bf16.msra.mxu3 %v2047_v48  ;;  %679 = vmatpush.bf16.msrb.mxu0 %v2028_v53  ;;  %v2082_v48 = vld [vmem:[%s2478_s1 + $0x1f0] sm:$0xff] }
  0x4d   : >> { %631 = vmatpush.bf16.msrb.mxu2 %v2028_v53  ;;  %v2092_v53 = vld [vmem:[%s2222_s24 + $0x74] sm:$0xf0] }
  0x4f   : >> { %1622 = vmatmul.msk.bf16.vlgmr.msrb.gmra.mxu3 %vm337_vm0, %v2231_v16  ;;  %833 = vmatpush.bf16.msra.mxu1 %v2046_v50  ;;  %v2053_v16 = vld [vmem:[%s2222_s24 + $0x44] sm:$0xf0] }
  0x50   : >> { %785 = vmatpush.bf16.msra.mxu3 %v2046_v50  ;;  %851 = vmatpush.bf16.msra.mxu0 %v2050_v54  ;;  %v1765_v19 = vor.u32 %v2053_v16, %v1764_v15  ;;  %v2081_v50 = vld [vmem:[%s2478_s1 + $0x1e8] sm:$0xff] }
  0x51   : >> { %803 = vmatpush.bf16.msra.mxu2 %v2050_v54  ;;  %680 = vmatmul.bf16.vlgmr.msrb.gmra.mxu0 %v1691_v58 }
  0x52   : >> { %632 = vmatmul.bf16.vlgmr.msrb.gmra.mxu2 %v1616_v42  ;;  %v2084_v42 = vld [vmem:[%s2478_s1 + $0x200] sm:$0xff] }
  0x53   : >> { %834 = vmatpush.bf16.msra.mxu1 %v2045_v52 }
  0x54   : >> { %786 = vmatpush.bf16.msra.mxu3 %v2045_v52  ;;  %852 = vmatpush.bf16.msra.mxu0 %v2049_v59  ;;  %v1986_v52 = vld [vmem:[%s2222_s24 + $0x70] sm:$0xf]  ;;  %s2132_s24 = smov 118  }
  0x55   : >> { %804 = vmatpush.bf16.msra.mxu2 %v2049_v59  ;;  %v1987_v54 = vor.u32 %v2092_v53, %v1986_v52 }
  0x56   : >> { %1696 = vmatmul.msk.bf16.vlgmr.msrb.gmra.mxu1 %vm337_vm0, %v1695_v3 }
  0x57   : >> { %835 = vmatpush.bf16.msra.mxu1 %v2044_v57 }
  0x58   : >> { %787 = vmatpush.bf16.msra.mxu3 %v2044_v57  ;;  %990 = vmatpush.bf16.msrb.mxu0 %v2061_v60  ;;  %v1991_v57 = vor.u32 %v2091_v55, %v1988_v56 }
  0x59   : >> { %942 = vmatpush.bf16.msrb.mxu2 %v2061_v60 }
  0x5b   : >> { %836 = vmatpush.bf16.msra.mxu1 %v2043_v61 }
  0x5c   : >> { %788 = vmatpush.bf16.msra.mxu3 %v2043_v61  ;;  %991 = vmatpush.bf16.msrb.mxu0 %v2060_v2 }
  0x5d   : >> { %943 = vmatpush.bf16.msrb.mxu2 %v2060_v2 }
  0x5f   : >> { %837 = vmatpush.bf16.msra.mxu1 %v2042_v4 }
  0x60   : >> { %789 = vmatpush.bf16.msra.mxu3 %v2042_v4  ;;  %992 = vmatpush.bf16.msrb.mxu0 %v2059_v5 }
  0x61   : >> { %944 = vmatpush.bf16.msrb.mxu2 %v2059_v5  ;;  %1770 = vmatmul.msk.bf16.vlgmr.msra.gmra.mxu0 %vm337_vm0, %v1769_v12 }
  0x62   : >> { %1757 = vmatmul.msk.bf16.vlgmr.msra.gmra.mxu2 %vm337_vm0, %v1695_v3 }
  0x63   : >> { %838 = vmatpush.bf16.msra.mxu1 %v2041_v6 }
  0x64   : >> { %790 = vmatpush.bf16.msra.mxu3 %v2041_v6  ;;  %993 = vmatpush.bf16.msrb.mxu0 %v2058_v8 }
  0x65   : >> { %945 = vmatpush.bf16.msrb.mxu2 %v2058_v8 }
  0x66   : >> { %839 = vmatmul.bf16.vlgmr.msra.gmra.mxu1 %v1765_v19 }
  0x67   : >> { %791 = vmatmul.bf16.vlgmr.msra.gmra.mxu3 %v1691_v58  ;;  %1010 = vmatpush.bf16.msrb.mxu1 %v2063_v7 }
  0x68   : >> { %962 = vmatpush.bf16.msrb.mxu3 %v2063_v7  ;;  %994 = vmatpush.bf16.msrb.mxu0 %v2057_v14 }
  0x69   : >> { %946 = vmatpush.bf16.msrb.mxu2 %v2057_v14 }
  0x6b   : >> { %1011 = vmatpush.bf16.msrb.mxu1 %v2062_v11 }
  0x6c   : >> { %963 = vmatpush.bf16.msrb.mxu3 %v2062_v11  ;;  %995 = vmatpush.bf16.msrb.mxu0 %v2056_v18 }
  0x6d   : >> { %947 = vmatpush.bf16.msrb.mxu2 %v2056_v18 }
  0x6f   : >> { %1149 = vmatpush.bf16.msra.mxu1 %v2074_v13 }
  0x70   : >> { %1101 = vmatpush.bf16.msra.mxu3 %v2074_v13  ;;  %996 = vmatpush.bf16.msrb.mxu0 %v2055_v21 }
  0x71   : >> { %948 = vmatpush.bf16.msrb.mxu2 %v2055_v21 }
  0x73   : >> { %1150 = vmatpush.bf16.msra.mxu1 %v2073_v17 }
  0x74   : >> { %1102 = vmatpush.bf16.msra.mxu3 %v2073_v17  ;;  %997 = vmatpush.bf16.msrb.mxu0 %v2054_v23 }
  0x75   : >> { %949 = vmatpush.bf16.msrb.mxu2 %v2054_v23 }
  0x76   : >> { %1844 = vmatmul.msk.bf16.vlgmr.msrb.gmra.mxu1 %vm337_vm0, %v1843_v34 }
  0x77   : >> { %1831 = vmatmul.msk.bf16.vlgmr.msrb.gmra.mxu3 %vm337_vm0, %v1769_v12  ;;  %998 = vmatmul.bf16.vlgmr.msrb.gmra.mxu0 %v1839_v28 }
  0x78   : >> { %1103 = vmatpush.bf16.msra.mxu3 %v2072_v20  ;;  %1169 = vmatpush.bf16.msra.mxu0 %v2076_v26 }
  0x79   : >> { %1121 = vmatpush.bf16.msra.mxu2 %v2076_v26  ;;  %1151 = vmatpush.bf16.msra.mxu1 %v2072_v20 }
  0x7a   : >> { %950 = vmatmul.bf16.vlgmr.msrb.gmra.mxu2 %v1765_v19 }
  0x7c   : >> { %1104 = vmatpush.bf16.msra.mxu3 %v2071_v22  ;;  %1170 = vmatpush.bf16.msra.mxu0 %v2075_v29 }
  0x7d   : >> { %1122 = vmatpush.bf16.msra.mxu2 %v2075_v29  ;;  %1152 = vmatpush.bf16.msra.mxu1 %v2071_v22 }
  0x80   : >> { %1105 = vmatpush.bf16.msra.mxu3 %v2070_v27  ;;  %1308 = vmatpush.bf16.msrb.mxu0 %v2087_v32 }
  0x81   : >> { %1260 = vmatpush.bf16.msrb.mxu2 %v2087_v32  ;;  %1153 = vmatpush.bf16.msra.mxu1 %v2070_v27 }
  0x84   : >> { %1106 = vmatpush.bf16.msra.mxu3 %v2069_v33  ;;  %1309 = vmatpush.bf16.msrb.mxu0 %v2086_v35 }
  0x85   : >> { %1261 = vmatpush.bf16.msrb.mxu2 %v2086_v35  ;;  %1154 = vmatpush.bf16.msra.mxu1 %v2069_v33 }
  0x87   : >> { %1918 = vmatmul.msk.bf16.vlgmr.msra.gmra.mxu0 %vm337_vm0, %v1917_v43 }
  0x88   : >> { %1107 = vmatpush.bf16.msra.mxu3 %v2068_v36  ;;  %1310 = vmatpush.bf16.msrb.mxu0 %v2085_v37 }
  0x89   : >> { %1262 = vmatpush.bf16.msrb.mxu2 %v2085_v37  ;;  %1155 = vmatpush.bf16.msra.mxu1 %v2068_v36 }
  0x8a   : >> { %1905 = vmatmul.msk.bf16.vlgmr.msra.gmra.mxu2 %vm337_vm0, %v1843_v34 }
  0x8c   : >> { %1108 = vmatpush.bf16.msra.mxu3 %v2067_v38  ;;  %1311 = vmatpush.bf16.msrb.mxu0 %v2084_v42 }
  0x8d   : >> { %1263 = vmatpush.bf16.msrb.mxu2 %v2084_v42  ;;  %1156 = vmatpush.bf16.msra.mxu1 %v2067_v38 }
  0x8f   : >> { %1109 = vmatmul.bf16.vlgmr.msra.gmra.mxu3 %v1839_v28 }
  0x90   : >> { %1280 = vmatpush.bf16.msrb.mxu3 %v2089_v39  ;;  %1312 = vmatpush.bf16.msrb.mxu0 %v2083_v45 }
  0x91   : >> { %1264 = vmatpush.bf16.msrb.mxu2 %v2083_v45  ;;  %1328 = vmatpush.bf16.msrb.mxu1 %v2089_v39 }
  0x92   : >> { %1157 = vmatmul.bf16.vlgmr.msra.gmra.mxu1 %v1913_v49 }
  0x93   : >> { %v364_v59 = vpop.f32.mrf.mxu1 }
  0x94   : >> { %1281 = vmatpush.bf16.msrb.mxu3 %v2088_v44  ;;  %1313 = vmatpush.bf16.msrb.mxu0 %v2082_v48 }
  0x95   : >> { %1265 = vmatpush.bf16.msrb.mxu2 %v2082_v48  ;;  %1329 = vmatpush.bf16.msrb.mxu1 %v2088_v44 }
  0x98   : >> { %1314 = vmatpush.bf16.msrb.mxu0 %v2081_v50 }
  0x99   : >> { %1266 = vmatpush.bf16.msrb.mxu2 %v2081_v50 }
  0x9a   : >> { %v464_v58 = vpop.f32.mrf.mxu3 }
  0x9b   : >> { %v366_v61 = vpop.f32.mrf.mxu1 }
  0x9c   : >> { %1315 = vmatpush.bf16.msrb.mxu0 %v2080_v51 }
  0x9d   : >> { %1267 = vmatpush.bf16.msrb.mxu2 %v2080_v51 }
  0x9f   : >> { %1979 = vmatmul.msk.bf16.vlgmr.msrb.gmra.mxu3 %vm337_vm0, %v1917_v43  ;;  %1316 = vmatmul.bf16.vlgmr.msrb.gmra.mxu0 %v1987_v54 }
  0xa0   : >> { %1268 = vmatmul.bf16.vlgmr.msrb.gmra.mxu2 %v1913_v49 }
  0xa2   : >> { %1992 = vmatmul.msk.bf16.vlgmr.msrb.gmra.mxu1 %vm337_vm0, %v1991_v57  ;;  %v466_v60 = vpop.f32.mrf.mxu3 }
  0xaa   : >> { %v510_v62 = vpop.f32.mrf.mxu3 }
  0xac   : >> { %v350_v63 = vpop.f32.mrf.mxu0 }
  0xad   : >> { %v365_v2 = vadd.f32 %v364_v59, %v350_v63 }
  0xb2   : >> { %v512_v8 = vpop.f32.mrf.mxu3 }
  0xb3   : >> { %v496_v3 = vpop.f32.mrf.mxu1 }
  0xb4   : >> { %v511_v4 = vadd.f32 %v510_v62, %v496_v3  ;;  %v352_v7 = vpop.f32.mrf.mxu0 }
  0xb5   : >> { %v450_v5 = vpop.f32.mrf.mxu2  ;;  %v367_v9 = vadd.f32 %v366_v61, %v352_v7 }
  0xb6   : >> { %v451_v6 = vadd.f32 %v450_v5, %v365_v2 }
  0xb8   : >> { %v465_v10 = vadd.f32 %v464_v58, %v451_v6 }
  0xbb   : >> { %v498_v11 = vpop.f32.mrf.mxu1 }
  0xbc   : >> { %v513_v12 = vadd.f32 %v512_v8, %v498_v11 }
  0xbd   : >> { %v452_v13 = vpop.f32.mrf.mxu2 }
  0xbe   : >> { %v453_v14 = vadd.f32 %v452_v13, %v367_v9 }
  0xc0   : >> { %v467_v16 = vadd.f32 %v466_v60, %v453_v14 }
  0xc2   : >> { %v524_v15 = vpop.f32.mrf.mxu3 }
  0xc3   : >> { %v525_v17 = vadd.f32 %v524_v15, %v511_v4  ;;  %v647_v18 = vpop.f32.mrf.mxu1 }
  0xca   : >> { %v526_v19 = vpop.f32.mrf.mxu3 }
  0xcb   : >> { %v527_v20 = vadd.f32 %v526_v19, %v513_v12  ;;  %v649_v21 = vpop.f32.mrf.mxu1 }
  0xce   : >> { %v681_v22 = vpop.f32.mrf.mxu0 }
  0xd2   : >> { %v538_v23 = vpop.f32.mrf.mxu3 }
  0xd3   : >> { %v539_v24 = vadd.f32 %v538_v23, %v525_v17  ;;  %v695_v27 = vpop.f32.mrf.mxu1 }
  0xd4   : >> { %v696_v29 = vadd.f32 %v695_v27, %v681_v22 }
  0xd5   : >> { %v633_v25 = vpop.f32.mrf.mxu2 }
  0xd6   : >> { %v648_v26 = vadd.f32 %v647_v18, %v633_v25  ;;  %v683_v30 = vpop.f32.mrf.mxu0  ;;  %v700_v31 = vadd.f32 %v696_v29, %v539_v24 }
  0xd8   : >> { %v652_v28 = vadd.f32 %v648_v26, %v465_v10 }
  0xda   : >> { %v540_v32 = vpop.f32.mrf.mxu3 }
  0xdb   : >> { %v697_v35 = vpop.f32.mrf.mxu1  ;;  %v541_v12 = vadd.f32 %v540_v32, %v527_v20 }
  0xdc   : >> { %v698_v9 = vadd.f32 %v697_v35, %v683_v30 }
  0xdd   : >> { %v635_v33 = vpop.f32.mrf.mxu2 }
  0xde   : >> { %v650_v34 = vadd.f32 %v649_v21, %v635_v33  ;;  %v854_v37 = vpop.f32.mrf.mxu0  ;;  %v701_v23 = vadd.f32 %v698_v9, %v541_v12 }
  0xe0   : >> { %v653_v36 = vadd.f32 %v650_v34, %v467_v16  ;;  %v1339_v16 = vperm.slane %v2169_v0, 0 }
  0xe3   : >> { %v840_v40 = vpop.f32.mrf.mxu1 }
  0xe4   : >> { %v855_v62 = vadd.f32 %v854_v37, %v840_v40 }
  0xe5   : >> { %v806_v39 = vpop.f32.mrf.mxu2 }
  0xe6   : >> { %v856_v41 = vpop.f32.mrf.mxu0  ;;  %v859_v4 = vadd.f32 %v855_v62, %v700_v31 }
  0xea   : >> { %v792_v38 = vpop.f32.mrf.mxu3 }
  0xeb   : >> { %v842_v44 = vpop.f32.mrf.mxu1  ;;  %v807_v61 = vadd.f32 %v806_v39, %v792_v38 }
  0xec   : >> { %v857_v14 = vadd.f32 %v856_v41, %v842_v44 }
  0xed   : >> { %v808_v43 = vpop.f32.mrf.mxu2  ;;  %v811_v3 = vadd.f32 %v807_v61, %v652_v28  ;;  %v1344_v28 = vperm.slane %v2174_v1, 0 }
  0xee   : >> { %v860_v30 = vadd.f32 %v857_v14, %v701_v23 }
  0xf2   : >> { %v794_v42 = vpop.f32.mrf.mxu3 }
  0xf3   : >> { %v1013_v48 = vpop.f32.mrf.mxu1  ;;  %v809_v13 = vadd.f32 %v808_v43, %v794_v42 }
  0xf4   : >> { %v999_v45 = vpop.f32.mrf.mxu0 }
  0xf5   : >> { %v1014_v2 = vadd.f32 %v1013_v48, %v999_v45  ;;  %v812_v29 = vadd.f32 %v809_v13, %v653_v36 }
  0xf7   : >> { %v1018_v11 = vadd.f32 %v1014_v2, %v859_v4  ;;  %v1377_v2 = vld [vmem:[%s1371_s23 + $0x4] sm:$0xf] }
  0xfa   : >> { %v965_v46 = vpop.f32.mrf.mxu3 }
  0xfb   : >> { %v1015_v52 = vpop.f32.mrf.mxu1 }
  0xfc   : >> { %v1001_v49 = vpop.f32.mrf.mxu0 }
  0xfd   : >> { %v951_v47 = vpop.f32.mrf.mxu2  ;;  %v1016_v25 = vadd.f32 %v1015_v52, %v1001_v49 }
  0xfe   : >> { %v966_v63 = vadd.f32 %v965_v46, %v951_v47 }
  0xff   : >> { %v1019_v35 = vadd.f32 %v1016_v25, %v860_v30 }
 0x100   : >> { %v970_v10 = vadd.f32 %v966_v63, %v811_v3 }
 0x102   : >> { %v967_v50 = vpop.f32.mrf.mxu3 }
 0x104   : >> { %v1172_v53 = vpop.f32.mrf.mxu0 }
 0x105   : >> { %v953_v51 = vpop.f32.mrf.mxu2 }
 0x106   : >> { %v968_v24 = vadd.f32 %v967_v50, %v953_v51 }
 0x108   : >> { %v971_v34 = vadd.f32 %v968_v24, %v812_v29 }
 0x10c   : >> { %v1174_v57 = vpop.f32.mrf.mxu0 }
 0x10d   : >> { %v1124_v55 = vpop.f32.mrf.mxu2 }
 0x10f   : >> { %v1158_v56 = vpop.f32.mrf.mxu1 }
 0x110   : >> { %v1173_v6 = vadd.f32 %v1172_v53, %v1158_v56 }
 0x112   : >> { %v1110_v54 = vpop.f32.mrf.mxu3  ;;  %v1177_v19 = vadd.f32 %v1173_v6, %v1018_v11 }
 0x113   : >> { %v1125_v5 = vadd.f32 %v1124_v55, %v1110_v54 }
 0x115   : >> { %v1126_v59 = vpop.f32.mrf.mxu2  ;;  %v1129_v18 = vadd.f32 %v1125_v5, %v970_v10 }
 0x117   : >> { %v1160_v60 = vpop.f32.mrf.mxu1 }
 0x118   : >> { %v1175_v31 = vadd.f32 %v1174_v57, %v1160_v60 }
 0x11a   : >> { %v1112_v58 = vpop.f32.mrf.mxu3  ;;  %v1178_v42 = vadd.f32 %v1175_v31, %v1019_v35 }
 0x11b   : >> { %v1127_v20 = vadd.f32 %v1126_v59, %v1112_v58 }
 0x11c   : >> { %v1317_v7 = vpop.f32.mrf.mxu0 }
 0x11d   : >> { %v1130_v41 = vadd.f32 %v1127_v20, %v971_v34 }
 0x11f   : >> { %v1331_v15 = vpop.f32.mrf.mxu1 }
 0x120   : >> { %v1332_v21 = vadd.f32 %v1331_v15, %v1317_v7 }
 0x122   : >> { %v1283_v8 = vpop.f32.mrf.mxu3  ;;  %v1336_v26 = vadd.f32 %v1332_v21, %v1177_v19 }
 0x123   : >> { %v1269_v17 = vpop.f32.mrf.mxu2 }
 0x124   : >> { %v1284_v22 = vadd.f32 %v1283_v8, %v1269_v17  ;;  %v1350_v32 = vmul.f32 %v1339_v16, %v1336_v26  ;;  %v1319_v37 = vpop.f32.mrf.mxu0 }
 0x126   : >> { %v1288_v27 = vadd.f32 %v1284_v22, %v1129_v18  ;;  %v1352_v40 = vadd.f32 %v1350_v32, %v1344_v28 }
 0x127   : >> { %v1333_v43 = vpop.f32.mrf.mxu1 }
 0x128   : >> { %v1341_v33 = vmul.f32 %v1339_v16, %v1288_v27  ;;  %v1334_v45 = vadd.f32 %v1333_v43, %v1319_v37  ;;  %v1354_v36 = vmax.f32 %v1352_v40, 0.0 }
 0x12a   : >> { %v1285_v38 = vpop.f32.mrf.mxu3  ;;  %v1346_v39 = vadd.f32 %v1344_v28, %v1341_v33  ;;  %v1337_v48 = vadd.f32 %v1334_v45, %v1178_v42 }
 0x12b   : >> { %v1271_v44 = vpop.f32.mrf.mxu2 }
 0x12c   : >> { %v1286_v46 = vadd.f32 %v1285_v38, %v1271_v44  ;;  %v1348_v47 = vmax.f32 %v1346_v39, 0.0  ;;  %v1351_v51 = vmul.f32 %v1339_v16, %v1337_v48 }
 0x12e   : >> { %v1289_v49 = vadd.f32 %v1286_v46, %v1130_v41  ;;  %v1356_v50 = vmax.f32 %v1348_v47, %v1354_v36  ;;  %v1353_v54 = vadd.f32 %v1351_v51, %v1344_v28 }
 0x130   : >> { %v1342_v52 = vmul.f32 %v1339_v16, %v1289_v49  ;;  %v1355_v56 = vmax.f32 %v1353_v54, 0.0 }
 0x132   : >> { %v1347_v53 = vadd.f32 %v1344_v28, %v1342_v52 }
 0x134   : >> { %v1349_v55 = vmax.f32 %v1347_v53, 0.0 }
 0x136   : >> { %v1357_v57 = vmax.f32 %v1349_v55, %v1355_v56 }
 0x138   : >> { %v2111_v58 = vpack.i.bf16 %v1356_v50, %v1357_v57 }
 0x13a   : >> { %2112 = vrot.lane.b32.xlu0 %v2111_v58, %s2132_s24 }
 0x1ac   : >> { %v2113_v59 = vpop.permute.xlu0 %2112 }
 0x1ad   : >> { %v2115_v60 = vunpack.i.h.bf16 %v2113_v59  ;;  %v2114_v61 = vunpack.i.l.bf16 %v2113_v59 }
 0x1af   : >> { %v1366_v62 = vmax.f32 %v1356_v50, %v2115_v60  ;;  %v1367_v63 = vmax.f32 %v1357_v57, %v2114_v61 }
 0x1b0   : > { %213 = sbr.rel (!%p211_p5) target bundleno = 14 (0xe), region = 88 }
 0x1b1   : >> { %v1368_v3 = vpack.c.bf16 %v1366_v62, %v1366_v62  ;;  %v1369_v4 = vpack.c.bf16 %v1367_v63, %v1367_v63 }
 0x1b3   : >> { %1373 = vst.msk [vmem:[%s1371_s23] sm:$0xf] %vm1372_vm1, %v1368_v3  ;;  %v1378_v5 = vsel %vm1376_vm3, %v1369_v4, %v1377_v2 }
 0x1b4   : >> { %1379 = vst [vmem:[%s1371_s23 + $0x4] sm:$0xf] %v1378_v5 }
 0x1b5 PF: > { %s14_s15 = sadd.s32 1, %s2126_s15  }
 0x1b6   : > { %p11_p6 = scmp.ge.s32.totalorder %s14_s15, 4  }
 0x1b8   :  { %13 = sbr.rel (!%p11_p6) target bundleno = 1 (0x1), region = 99 }

// kernel: custom_cnn_forward.10
= control target key start
LH: loop header
LB: loop body
LE: loop exit
PB: predicated region body
PF: predicated region fallthrough
CT: control target
= control target key end

     0   :  { %s2662_s12 = smov 0   ;;  %s2664_s13 = smov 0   ;;  %s3328_s0 = inlined_call_operand.vmem [shape: bf16[16,1024], index: 0, kind: input, shape index: {}]   ;;  %s3329_s1 = inlined_call_operand.vmem [shape: bf16[1024,512], index: 1, kind: input, shape index: {}]   ;;  %s3330_s2 = inlined_call_operand.vmem [shape: f32[1,512], index: 2, kind: input, shape index: {}]   ;;  %s3331_s3 = inlined_call_operand.vmem [shape: bf16[16,512], index: 3, kind: output, shape index: {}]  }
   0x1   :  { %s2666_s14 = smov 0  }
   0x2 LB: > { %s2678_s15 = sadd.s32 4294967295, %s2640_s14   ;;  %s2681_s16 = sadd.s32 1, %s2640_s14   ;;  %s2640_s14 = sphi %s2666_s14, %s3335_s14   ;;  %s2636_s13 = sphi %s2664_s13, %s3334_s13   ;;  %s2632_s12 = sphi %s2662_s12, %s3333_s12  }
   0x3   : > { %s38_s17 = ssub.s32 %s2640_s14, %s2681_s16  ;;  %s41_s18 = sadd.s32 1, %s2636_s13 }
   0x4   : > { %p39_p0 = scmp.eq.s32.totalorder %s38_s17, 0  ;;  %p48_p1 = scmp.ne.s32.totalorder %s2636_s13, %s2632_s12 }
   0x5   : > { %p49_p2 = scmp.eq.s32.totalorder %s2640_s14, 0  ;;  %p104_p3 = scmp.eq.s32.totalorder %s2678_s15, 1 }
   0x6   : > { %s2691_s19 = scalar_select %p39_p0, %s2636_s13, %s41_s18  }
   0x7   : > { %p50_p4 = por %p49_p2, %p48_p1  ;;  %p2693_p5 = por %p104_p3, %p48_p1 }
   0x8   : > { %p1899_p6 = scmp.ge.s32.totalorder %s2640_s14, 2 }
   0xa   : > { %129 = sbr.rel (%p1899_p6) target bundleno = 147 (0x93), region = 20 }
   0xf   : > { %132 = sbr.rel (!%p50_p4) target bundleno = 147 (0x93), region = 24  ;;  %s134_s21 = sand.u32 (%p50_p4), 1, %s2636_s13  }
  0x10   : > { %s2456_s22 = sshll.u32 (%p50_p4), %s2640_s14, 3  ;;  %s1900_s23 = sshll.u32 (%p50_p4), %s134_s21, 10 }
  0x11   : > { %s2703_s26 = scalar_lea.vmem (%p50_p4), %s3329_s1, %s2456_s22  ;;  %s2708_s27 = scalar_lea.vmem (%p50_p4), [#allocation2], %s1900_s23 }
  0x12   : > { %v422_v0 = vld [vmem:[%s2703_s26] sm:$0xff] (%p50_p4)  ;;  %v424_v1 = vld [vmem:[%s2703_s26 + $0x10] sm:$0xff] (%p50_p4) }
  0x13   : > { %v426_v2 = vld [vmem:[%s2703_s26 + $0x20] sm:$0xff] (%p50_p4)  ;;  %423 = vst [vmem:[%s2708_s27] sm:$0xff] (%p50_p4), %v422_v0  ;;  %v428_v3 = vld [vmem:[%s2703_s26 + $0x30] sm:$0xff] (%p50_p4) }
  0x14   : > { %425 = vst [vmem:[%s2708_s27 + $0x8] sm:$0xff] %v424_v1  ;;  %v430_v4 = vld [vmem:[%s2703_s26 + $0x40] sm:$0xff]  ;;  %v432_v5 = vld [vmem:[%s2703_s26 + $0x50] sm:$0xff] }
  0x15   : > { %427 = vst [vmem:[%s2708_s27 + $0x10] sm:$0xff] %v426_v2  ;;  %v434_v6 = vld [vmem:[%s2703_s26 + $0x60] sm:$0xff]  ;;  %v436_v7 = vld [vmem:[%s2703_s26 + $0x70] sm:$0xff] }
  0x16   : > { %429 = vst [vmem:[%s2708_s27 + $0x18] sm:$0xff] %v428_v3  ;;  %v438_v8 = vld [vmem:[%s2703_s26 + $0x80] sm:$0xff]  ;;  %v440_v9 = vld [vmem:[%s2703_s26 + $0x90] sm:$0xff] }
  0x17   : > { %431 = vst [vmem:[%s2708_s27 + $0x20] sm:$0xff] %v430_v4  ;;  %v442_v10 = vld [vmem:[%s2703_s26 + $0xa0] sm:$0xff]  ;;  %v444_v11 = vld [vmem:[%s2703_s26 + $0xb0] sm:$0xff] }
  0x18   : > { %433 = vst [vmem:[%s2708_s27 + $0x28] sm:$0xff] %v432_v5  ;;  %v446_v12 = vld [vmem:[%s2703_s26 + $0xc0] sm:$0xff]  ;;  %v448_v13 = vld [vmem:[%s2703_s26 + $0xd0] sm:$0xff] }
  0x19   : > { %435 = vst [vmem:[%s2708_s27 + $0x30] sm:$0xff] %v434_v6  ;;  %v450_v14 = vld [vmem:[%s2703_s26 + $0xe0] sm:$0xff]  ;;  %v452_v15 = vld [vmem:[%s2703_s26 + $0xf0] sm:$0xff] }
  0x1a   : > { %437 = vst [vmem:[%s2708_s27 + $0x38] sm:$0xff] %v436_v7  ;;  %v454_v16 = vld [vmem:[%s2703_s26 + $0x100] sm:$0xff]  ;;  %v456_v17 = vld [vmem:[%s2703_s26 + $0x110] sm:$0xff] }
  0x1b   : > { %439 = vst [vmem:[%s2708_s27 + $0x40] sm:$0xff] %v438_v8  ;;  %v458_v18 = vld [vmem:[%s2703_s26 + $0x120] sm:$0xff]  ;;  %v460_v19 = vld [vmem:[%s2703_s26 + $0x130] sm:$0xff] }
  0x1c   : > { %441 = vst [vmem:[%s2708_s27 + $0x48] sm:$0xff] %v440_v9  ;;  %v462_v20 = vld [vmem:[%s2703_s26 + $0x140] sm:$0xff]  ;;  %v464_v21 = vld [vmem:[%s2703_s26 + $0x150] sm:$0xff] }
  0x1d   : > { %443 = vst [vmem:[%s2708_s27 + $0x50] sm:$0xff] %v442_v10  ;;  %v466_v22 = vld [vmem:[%s2703_s26 + $0x160] sm:$0xff]  ;;  %v468_v23 = vld [vmem:[%s2703_s26 + $0x170] sm:$0xff] }
  0x1e   : > { %445 = vst [vmem:[%s2708_s27 + $0x58] sm:$0xff] %v444_v11  ;;  %v470_v24 = vld [vmem:[%s2703_s26 + $0x180] sm:$0xff]  ;;  %v472_v25 = vld [vmem:[%s2703_s26 + $0x190] sm:$0xff] }
  0x1f   : > { %447 = vst [vmem:[%s2708_s27 + $0x60] sm:$0xff] %v446_v12  ;;  %v474_v26 = vld [vmem:[%s2703_s26 + $0x1a0] sm:$0xff]  ;;  %v476_v27 = vld [vmem:[%s2703_s26 + $0x1b0] sm:$0xff] }
  0x20   : > { %449 = vst [vmem:[%s2708_s27 + $0x68] sm:$0xff] %v448_v13  ;;  %v478_v28 = vld [vmem:[%s2703_s26 + $0x1c0] sm:$0xff]  ;;  %v480_v29 = vld [vmem:[%s2703_s26 + $0x1d0] sm:$0xff] }
  0x21   : > { %451 = vst [vmem:[%s2708_s27 + $0x70] sm:$0xff] %v450_v14  ;;  %v482_v30 = vld [vmem:[%s2703_s26 + $0x1e0] sm:$0xff]  ;;  %v484_v31 = vld [vmem:[%s2703_s26 + $0x1f0] sm:$0xff] }
  0x22   : > { %453 = vst [vmem:[%s2708_s27 + $0x78] sm:$0xff] %v452_v15  ;;  %v486_v32 = vld [vmem:[%s2703_s26 + $0x200] sm:$0xff]  ;;  %v488_v33 = vld [vmem:[%s2703_s26 + $0x210] sm:$0xff] }
  0x23   : > { %455 = vst [vmem:[%s2708_s27 + $0x80] sm:$0xff] %v454_v16  ;;  %v490_v34 = vld [vmem:[%s2703_s26 + $0x220] sm:$0xff]  ;;  %v492_v35 = vld [vmem:[%s2703_s26 + $0x230] sm:$0xff] }
  0x24   : > { %457 = vst [vmem:[%s2708_s27 + $0x88] sm:$0xff] %v456_v17  ;;  %v494_v36 = vld [vmem:[%s2703_s26 + $0x240] sm:$0xff]  ;;  %v496_v37 = vld [vmem:[%s2703_s26 + $0x250] sm:$0xff] }
  0x25   : > { %459 = vst [vmem:[%s2708_s27 + $0x90] sm:$0xff] %v458_v18  ;;  %v498_v38 = vld [vmem:[%s2703_s26 + $0x260] sm:$0xff]  ;;  %v500_v39 = vld [vmem:[%s2703_s26 + $0x270] sm:$0xff] }
  0x26   : > { %461 = vst [vmem:[%s2708_s27 + $0x98] sm:$0xff] %v460_v19  ;;  %v502_v40 = vld [vmem:[%s2703_s26 + $0x280] sm:$0xff]  ;;  %v504_v41 = vld [vmem:[%s2703_s26 + $0x290] sm:$0xff] }
  0x27   : > { %463 = vst [vmem:[%s2708_s27 + $0xa0] sm:$0xff] %v462_v20  ;;  %v506_v42 = vld [vmem:[%s2703_s26 + $0x2a0] sm:$0xff]  ;;  %v508_v43 = vld [vmem:[%s2703_s26 + $0x2b0] sm:$0xff] }
  0x28   : > { %465 = vst [vmem:[%s2708_s27 + $0xa8] sm:$0xff] %v464_v21  ;;  %v510_v44 = vld [vmem:[%s2703_s26 + $0x2c0] sm:$0xff]  ;;  %v512_v45 = vld [vmem:[%s2703_s26 + $0x2d0] sm:$0xff] }
  0x29   : > { %467 = vst [vmem:[%s2708_s27 + $0xb0] sm:$0xff] %v466_v22  ;;  %v514_v46 = vld [vmem:[%s2703_s26 + $0x2e0] sm:$0xff]  ;;  %v516_v47 = vld [vmem:[%s2703_s26 + $0x2f0] sm:$0xff] }
  0x2a   : > { %469 = vst [vmem:[%s2708_s27 + $0xb8] sm:$0xff] %v468_v23  ;;  %v518_v48 = vld [vmem:[%s2703_s26 + $0x300] sm:$0xff]  ;;  %v520_v49 = vld [vmem:[%s2703_s26 + $0x310] sm:$0xff] }
  0x2b   : > { %471 = vst [vmem:[%s2708_s27 + $0xc0] sm:$0xff] %v470_v24  ;;  %v522_v50 = vld [vmem:[%s2703_s26 + $0x320] sm:$0xff]  ;;  %v524_v51 = vld [vmem:[%s2703_s26 + $0x330] sm:$0xff] }
  0x2c   : > { %473 = vst [vmem:[%s2708_s27 + $0xc8] sm:$0xff] %v472_v25  ;;  %v526_v52 = vld [vmem:[%s2703_s26 + $0x340] sm:$0xff]  ;;  %v528_v53 = vld [vmem:[%s2703_s26 + $0x350] sm:$0xff] }
  0x2d   : > { %475 = vst [vmem:[%s2708_s27 + $0xd0] sm:$0xff] %v474_v26  ;;  %v530_v54 = vld [vmem:[%s2703_s26 + $0x360] sm:$0xff]  ;;  %v532_v55 = vld [vmem:[%s2703_s26 + $0x370] sm:$0xff] }
  0x2e   : > { %477 = vst [vmem:[%s2708_s27 + $0xd8] sm:$0xff] %v476_v27  ;;  %v534_v56 = vld [vmem:[%s2703_s26 + $0x380] sm:$0xff]  ;;  %v536_v57 = vld [vmem:[%s2703_s26 + $0x390] sm:$0xff] }
  0x2f   : > { %479 = vst [vmem:[%s2708_s27 + $0xe0] sm:$0xff] %v478_v28  ;;  %v538_v58 = vld [vmem:[%s2703_s26 + $0x3a0] sm:$0xff]  ;;  %v540_v59 = vld [vmem:[%s2703_s26 + $0x3b0] sm:$0xff] }
  0x30   : > { %481 = vst [vmem:[%s2708_s27 + $0xe8] sm:$0xff] %v480_v29  ;;  %v542_v60 = vld [vmem:[%s2703_s26 + $0x3c0] sm:$0xff]  ;;  %v544_v61 = vld [vmem:[%s2703_s26 + $0x3d0] sm:$0xff] }
  0x31   : > { %483 = vst [vmem:[%s2708_s27 + $0xf0] sm:$0xff] %v482_v30  ;;  %v546_v62 = vld [vmem:[%s2703_s26 + $0x3e0] sm:$0xff]  ;;  %v548_v63 = vld [vmem:[%s2703_s26 + $0x3f0] sm:$0xff] }
  0x32   : > { %485 = vst [vmem:[%s2708_s27 + $0xf8] sm:$0xff] %v484_v31  ;;  %v550_v0 = vld [vmem:[%s2703_s26 + $0x400] sm:$0xff]  ;;  %v552_v1 = vld [vmem:[%s2703_s26 + $0x410] sm:$0xff] }
  0x33   : > { %487 = vst [vmem:[%s2708_s27 + $0x100] sm:$0xff] %v486_v32  ;;  %v554_v2 = vld [vmem:[%s2703_s26 + $0x420] sm:$0xff]  ;;  %v556_v3 = vld [vmem:[%s2703_s26 + $0x430] sm:$0xff] }
  0x34   : > { %489 = vst [vmem:[%s2708_s27 + $0x108] sm:$0xff] %v488_v33  ;;  %v558_v4 = vld [vmem:[%s2703_s26 + $0x440] sm:$0xff]  ;;  %v560_v5 = vld [vmem:[%s2703_s26 + $0x450] sm:$0xff] }
  0x35   : > { %491 = vst [vmem:[%s2708_s27 + $0x110] sm:$0xff] %v490_v34  ;;  %v562_v6 = vld [vmem:[%s2703_s26 + $0x460] sm:$0xff]  ;;  %v564_v7 = vld [vmem:[%s2703_s26 + $0x470] sm:$0xff] }
  0x36   : > { %493 = vst [vmem:[%s2708_s27 + $0x118] sm:$0xff] %v492_v35  ;;  %v566_v8 = vld [vmem:[%s2703_s26 + $0x480] sm:$0xff]  ;;  %v568_v9 = vld [vmem:[%s2703_s26 + $0x490] sm:$0xff] }
  0x37   : > { %495 = vst [vmem:[%s2708_s27 + $0x120] sm:$0xff] %v494_v36  ;;  %v570_v10 = vld [vmem:[%s2703_s26 + $0x4a0] sm:$0xff]  ;;  %v572_v11 = vld [vmem:[%s2703_s26 + $0x4b0] sm:$0xff] }
  0x38   : > { %497 = vst [vmem:[%s2708_s27 + $0x128] sm:$0xff] %v496_v37  ;;  %v574_v12 = vld [vmem:[%s2703_s26 + $0x4c0] sm:$0xff]  ;;  %v576_v13 = vld [vmem:[%s2703_s26 + $0x4d0] sm:$0xff] }
  0x39   : > { %499 = vst [vmem:[%s2708_s27 + $0x130] sm:$0xff] %v498_v38  ;;  %v578_v14 = vld [vmem:[%s2703_s26 + $0x4e0] sm:$0xff]  ;;  %v580_v15 = vld [vmem:[%s2703_s26 + $0x4f0] sm:$0xff] }
  0x3a   : > { %501 = vst [vmem:[%s2708_s27 + $0x138] sm:$0xff] %v500_v39  ;;  %v582_v16 = vld [vmem:[%s2703_s26 + $0x500] sm:$0xff]  ;;  %v584_v17 = vld [vmem:[%s2703_s26 + $0x510] sm:$0xff] }
  0x3b   : > { %503 = vst [vmem:[%s2708_s27 + $0x140] sm:$0xff] %v502_v40  ;;  %v586_v18 = vld [vmem:[%s2703_s26 + $0x520] sm:$0xff]  ;;  %v588_v19 = vld [vmem:[%s2703_s26 + $0x530] sm:$0xff] }
  0x3c   : > { %505 = vst [vmem:[%s2708_s27 + $0x148] sm:$0xff] %v504_v41  ;;  %v590_v20 = vld [vmem:[%s2703_s26 + $0x540] sm:$0xff]  ;;  %v592_v21 = vld [vmem:[%s2703_s26 + $0x550] sm:$0xff] }
  0x3d   : > { %507 = vst [vmem:[%s2708_s27 + $0x150] sm:$0xff] %v506_v42  ;;  %v594_v22 = vld [vmem:[%s2703_s26 + $0x560] sm:$0xff]  ;;  %v596_v23 = vld [vmem:[%s2703_s26 + $0x570] sm:$0xff] }
  0x3e   : > { %509 = vst [vmem:[%s2708_s27 + $0x158] sm:$0xff] %v508_v43  ;;  %v598_v24 = vld [vmem:[%s2703_s26 + $0x580] sm:$0xff]  ;;  %v600_v25 = vld [vmem:[%s2703_s26 + $0x590] sm:$0xff] }
  0x3f   : > { %511 = vst [vmem:[%s2708_s27 + $0x160] sm:$0xff] %v510_v44  ;;  %v602_v26 = vld [vmem:[%s2703_s26 + $0x5a0] sm:$0xff]  ;;  %v604_v27 = vld [vmem:[%s2703_s26 + $0x5b0] sm:$0xff] }
  0x40   : > { %513 = vst [vmem:[%s2708_s27 + $0x168] sm:$0xff] %v512_v45  ;;  %v606_v28 = vld [vmem:[%s2703_s26 + $0x5c0] sm:$0xff]  ;;  %v608_v29 = vld [vmem:[%s2703_s26 + $0x5d0] sm:$0xff] }
  0x41   : > { %515 = vst [vmem:[%s2708_s27 + $0x170] sm:$0xff] %v514_v46  ;;  %v610_v30 = vld [vmem:[%s2703_s26 + $0x5e0] sm:$0xff]  ;;  %v612_v31 = vld [vmem:[%s2703_s26 + $0x5f0] sm:$0xff] }
  0x42   : > { %517 = vst [vmem:[%s2708_s27 + $0x178] sm:$0xff] %v516_v47  ;;  %v614_v32 = vld [vmem:[%s2703_s26 + $0x600] sm:$0xff]  ;;  %v616_v33 = vld [vmem:[%s2703_s26 + $0x610] sm:$0xff] }
  0x43   : > { %519 = vst [vmem:[%s2708_s27 + $0x180] sm:$0xff] %v518_v48  ;;  %v618_v34 = vld [vmem:[%s2703_s26 + $0x620] sm:$0xff]  ;;  %v620_v35 = vld [vmem:[%s2703_s26 + $0x630] sm:$0xff] }
  0x44   : > { %521 = vst [vmem:[%s2708_s27 + $0x188] sm:$0xff] %v520_v49  ;;  %v622_v36 = vld [vmem:[%s2703_s26 + $0x640] sm:$0xff]  ;;  %v624_v37 = vld [vmem:[%s2703_s26 + $0x650] sm:$0xff] }
  0x45   : > { %523 = vst [vmem:[%s2708_s27 + $0x190] sm:$0xff] %v522_v50  ;;  %v626_v38 = vld [vmem:[%s2703_s26 + $0x660] sm:$0xff]  ;;  %v628_v39 = vld [vmem:[%s2703_s26 + $0x670] sm:$0xff] }
  0x46   : > { %525 = vst [vmem:[%s2708_s27 + $0x198] sm:$0xff] %v524_v51  ;;  %v630_v40 = vld [vmem:[%s2703_s26 + $0x680] sm:$0xff]  ;;  %v632_v41 = vld [vmem:[%s2703_s26 + $0x690] sm:$0xff] }
  0x47   : > { %527 = vst [vmem:[%s2708_s27 + $0x1a0] sm:$0xff] %v526_v52  ;;  %v634_v42 = vld [vmem:[%s2703_s26 + $0x6a0] sm:$0xff]  ;;  %v636_v43 = vld [vmem:[%s2703_s26 + $0x6b0] sm:$0xff] }
  0x48   : > { %529 = vst [vmem:[%s2708_s27 + $0x1a8] sm:$0xff] %v528_v53  ;;  %v638_v44 = vld [vmem:[%s2703_s26 + $0x6c0] sm:$0xff]  ;;  %v640_v45 = vld [vmem:[%s2703_s26 + $0x6d0] sm:$0xff] }
  0x49   : > { %531 = vst [vmem:[%s2708_s27 + $0x1b0] sm:$0xff] %v530_v54  ;;  %v642_v46 = vld [vmem:[%s2703_s26 + $0x6e0] sm:$0xff]  ;;  %v644_v47 = vld [vmem:[%s2703_s26 + $0x6f0] sm:$0xff] }
  0x4a   : > { %533 = vst [vmem:[%s2708_s27 + $0x1b8] sm:$0xff] %v532_v55  ;;  %v646_v48 = vld [vmem:[%s2703_s26 + $0x700] sm:$0xff]  ;;  %v648_v49 = vld [vmem:[%s2703_s26 + $0x710] sm:$0xff] }
  0x4b   : > { %535 = vst [vmem:[%s2708_s27 + $0x1c0] sm:$0xff] %v534_v56  ;;  %v650_v50 = vld [vmem:[%s2703_s26 + $0x720] sm:$0xff]  ;;  %v652_v51 = vld [vmem:[%s2703_s26 + $0x730] sm:$0xff] }
  0x4c   : > { %537 = vst [vmem:[%s2708_s27 + $0x1c8] sm:$0xff] %v536_v57  ;;  %v654_v52 = vld [vmem:[%s2703_s26 + $0x740] sm:$0xff]  ;;  %v656_v53 = vld [vmem:[%s2703_s26 + $0x750] sm:$0xff] }
  0x4d   : > { %539 = vst [vmem:[%s2708_s27 + $0x1d0] sm:$0xff] %v538_v58  ;;  %v658_v54 = vld [vmem:[%s2703_s26 + $0x760] sm:$0xff]  ;;  %v660_v55 = vld [vmem:[%s2703_s26 + $0x770] sm:$0xff] }
  0x4e   : > { %541 = vst [vmem:[%s2708_s27 + $0x1d8] sm:$0xff] %v540_v59  ;;  %v662_v56 = vld [vmem:[%s2703_s26 + $0x780] sm:$0xff]  ;;  %v664_v57 = vld [vmem:[%s2703_s26 + $0x790] sm:$0xff] }
  0x4f   : > { %543 = vst [vmem:[%s2708_s27 + $0x1e0] sm:$0xff] %v542_v60  ;;  %v666_v58 = vld [vmem:[%s2703_s26 + $0x7a0] sm:$0xff]  ;;  %v668_v59 = vld [vmem:[%s2703_s26 + $0x7b0] sm:$0xff] }
  0x50   : > { %545 = vst [vmem:[%s2708_s27 + $0x1e8] sm:$0xff] %v544_v61  ;;  %v670_v60 = vld [vmem:[%s2703_s26 + $0x7c0] sm:$0xff]  ;;  %v672_v61 = vld [vmem:[%s2703_s26 + $0x7d0] sm:$0xff] }
  0x51   : > { %547 = vst [vmem:[%s2708_s27 + $0x1f0] sm:$0xff] %v546_v62  ;;  %v674_v62 = vld [vmem:[%s2703_s26 + $0x7e0] sm:$0xff] }
  0x52   : > { %549 = vst [vmem:[%s2708_s27 + $0x1f8] sm:$0xff] %v548_v63  ;;  %v676_v63 = vld [vmem:[%s2703_s26 + $0x7f0] sm:$0xff] }
  0x53   : > { %551 = vst [vmem:[%s2708_s27 + $0x200] sm:$0xff] %v550_v0 }
  0x54   : > { %553 = vst [vmem:[%s2708_s27 + $0x208] sm:$0xff] %v552_v1 }
  0x55   : > { %555 = vst [vmem:[%s2708_s27 + $0x210] sm:$0xff] %v554_v2 }
  0x56   : > { %557 = vst [vmem:[%s2708_s27 + $0x218] sm:$0xff] %v556_v3 }
  0x57   : > { %559 = vst [vmem:[%s2708_s27 + $0x220] sm:$0xff] %v558_v4 }
  0x58   : > { %561 = vst [vmem:[%s2708_s27 + $0x228] sm:$0xff] %v560_v5 }
  0x59   : > { %563 = vst [vmem:[%s2708_s27 + $0x230] sm:$0xff] %v562_v6 }
  0x5a   : > { %565 = vst [vmem:[%s2708_s27 + $0x238] sm:$0xff] %v564_v7 }
  0x5b   : > { %567 = vst [vmem:[%s2708_s27 + $0x240] sm:$0xff] %v566_v8 }
  0x5c   : > { %569 = vst [vmem:[%s2708_s27 + $0x248] sm:$0xff] %v568_v9 }
  0x5d   : > { %571 = vst [vmem:[%s2708_s27 + $0x250] sm:$0xff] %v570_v10 }
  0x5e   : > { %573 = vst [vmem:[%s2708_s27 + $0x258] sm:$0xff] %v572_v11 }
  0x5f   : > { %575 = vst [vmem:[%s2708_s27 + $0x260] sm:$0xff] %v574_v12 }
  0x60   : > { %577 = vst [vmem:[%s2708_s27 + $0x268] sm:$0xff] %v576_v13 }
  0x61   : > { %579 = vst [vmem:[%s2708_s27 + $0x270] sm:$0xff] %v578_v14 }
  0x62   : > { %581 = vst [vmem:[%s2708_s27 + $0x278] sm:$0xff] %v580_v15 }
  0x63   : > { %583 = vst [vmem:[%s2708_s27 + $0x280] sm:$0xff] %v582_v16 }
  0x64   : > { %585 = vst [vmem:[%s2708_s27 + $0x288] sm:$0xff] %v584_v17 }
  0x65   : > { %587 = vst [vmem:[%s2708_s27 + $0x290] sm:$0xff] %v586_v18 }
  0x66   : > { %589 = vst [vmem:[%s2708_s27 + $0x298] sm:$0xff] %v588_v19 }
  0x67   : > { %591 = vst [vmem:[%s2708_s27 + $0x2a0] sm:$0xff] %v590_v20 }
  0x68   : > { %593 = vst [vmem:[%s2708_s27 + $0x2a8] sm:$0xff] %v592_v21 }
  0x69   : > { %595 = vst [vmem:[%s2708_s27 + $0x2b0] sm:$0xff] %v594_v22 }
  0x6a   : > { %597 = vst [vmem:[%s2708_s27 + $0x2b8] sm:$0xff] %v596_v23 }
  0x6b   : > { %599 = vst [vmem:[%s2708_s27 + $0x2c0] sm:$0xff] %v598_v24 }
  0x6c   : > { %601 = vst [vmem:[%s2708_s27 + $0x2c8] sm:$0xff] %v600_v25 }
  0x6d   : > { %603 = vst [vmem:[%s2708_s27 + $0x2d0] sm:$0xff] %v602_v26 }
  0x6e   : > { %605 = vst [vmem:[%s2708_s27 + $0x2d8] sm:$0xff] %v604_v27 }
  0x6f   : > { %607 = vst [vmem:[%s2708_s27 + $0x2e0] sm:$0xff] %v606_v28 }
  0x70   : > { %609 = vst [vmem:[%s2708_s27 + $0x2e8] sm:$0xff] %v608_v29 }
  0x71   : > { %611 = vst [vmem:[%s2708_s27 + $0x2f0] sm:$0xff] %v610_v30 }
  0x72   : > { %613 = vst [vmem:[%s2708_s27 + $0x2f8] sm:$0xff] %v612_v31 }
  0x73   : > { %615 = vst [vmem:[%s2708_s27 + $0x300] sm:$0xff] %v614_v32 }
  0x74   : > { %617 = vst [vmem:[%s2708_s27 + $0x308] sm:$0xff] %v616_v33 }
  0x75   : > { %619 = vst [vmem:[%s2708_s27 + $0x310] sm:$0xff] %v618_v34 }
  0x76   : > { %621 = vst [vmem:[%s2708_s27 + $0x318] sm:$0xff] %v620_v35 }
  0x77   : > { %623 = vst [vmem:[%s2708_s27 + $0x320] sm:$0xff] %v622_v36 }
  0x78   : > { %625 = vst [vmem:[%s2708_s27 + $0x328] sm:$0xff] %v624_v37 }
  0x79   : > { %627 = vst [vmem:[%s2708_s27 + $0x330] sm:$0xff] %v626_v38 }
  0x7a   : > { %629 = vst [vmem:[%s2708_s27 + $0x338] sm:$0xff] %v628_v39 }
  0x7b   : > { %631 = vst [vmem:[%s2708_s27 + $0x340] sm:$0xff] %v630_v40 }
  0x7c   : > { %633 = vst [vmem:[%s2708_s27 + $0x348] sm:$0xff] %v632_v41 }
  0x7d   : > { %635 = vst [vmem:[%s2708_s27 + $0x350] sm:$0xff] %v634_v42 }
  0x7e   : > { %637 = vst [vmem:[%s2708_s27 + $0x358] sm:$0xff] %v636_v43 }
  0x7f   : > { %639 = vst [vmem:[%s2708_s27 + $0x360] sm:$0xff] %v638_v44 }
  0x80   : > { %641 = vst [vmem:[%s2708_s27 + $0x368] sm:$0xff] %v640_v45 }
  0x81   : > { %643 = vst [vmem:[%s2708_s27 + $0x370] sm:$0xff] %v642_v46 }
  0x82   : > { %645 = vst [vmem:[%s2708_s27 + $0x378] sm:$0xff] %v644_v47 }
  0x83   : > { %647 = vst [vmem:[%s2708_s27 + $0x380] sm:$0xff] %v646_v48 }
  0x84   : > { %649 = vst [vmem:[%s2708_s27 + $0x388] sm:$0xff] %v648_v49 }
  0x85   : > { %651 = vst [vmem:[%s2708_s27 + $0x390] sm:$0xff] %v650_v50 }
  0x86   : > { %653 = vst [vmem:[%s2708_s27 + $0x398] sm:$0xff] %v652_v51 }
  0x87   : > { %655 = vst [vmem:[%s2708_s27 + $0x3a0] sm:$0xff] %v654_v52 }
  0x88   : > { %657 = vst [vmem:[%s2708_s27 + $0x3a8] sm:$0xff] %v656_v53 }
  0x89   : > { %659 = vst [vmem:[%s2708_s27 + $0x3b0] sm:$0xff] %v658_v54 }
  0x8a   : > { %661 = vst [vmem:[%s2708_s27 + $0x3b8] sm:$0xff] %v660_v55 }
  0x8b   : > { %663 = vst [vmem:[%s2708_s27 + $0x3c0] sm:$0xff] %v662_v56 }
  0x8c   : > { %665 = vst [vmem:[%s2708_s27 + $0x3c8] sm:$0xff] %v664_v57 }
  0x8d   : > { %667 = vst [vmem:[%s2708_s27 + $0x3d0] sm:$0xff] %v666_v58 }
  0x8e   : > { %669 = vst [vmem:[%s2708_s27 + $0x3d8] sm:$0xff] %v668_v59 }
  0x8f   : > { %671 = vst [vmem:[%s2708_s27 + $0x3e0] sm:$0xff] %v670_v60 }
  0x90   : > { %673 = vst [vmem:[%s2708_s27 + $0x3e8] sm:$0xff] %v672_v61 }
  0x91   : > { %675 = vst [vmem:[%s2708_s27 + $0x3f0] sm:$0xff] %v674_v62 }
  0x92   : > { %677 = vst [vmem:[%s2708_s27 + $0x3f8] sm:$0xff] %v676_v63 }
  0x93 PF: > { %p1903_p7 = scmp.ge.s32.totalorder %s2640_s14, 1  ;;  %p690_p8 = scmp.lt.s32.totalorder %s2640_s14, 3 }
  0x95   : > { %p691_p9 = pnand %p1903_p7, %p690_p8 }
  0x96   : > { %s697_s28 = sand.u32 (!%p691_p9), 1, %s2632_s12  }
  0x97   : > { %694 = sbr.rel (%p691_p9) target bundleno = 445 (0x1bd), region = 66  ;;  %s1904_s29 = sshll.u32 (!%p691_p9), %s697_s28, 10 }
  0x98   : > { %s2968_s30 = scalar_lea.vmem (!%p691_p9), [#allocation2], %s1904_s29  ;;  %s1905_s26 = sshll.u32 (!%p691_p9), %s697_s28, 4 }
  0x99   : > { %s722_s27 = scalar_lea.vmem (!%p691_p9), [#allocation3], %s1905_s26 }
  0x9c   : > { %v1997_v0 = vld [vmem:[%s2968_s30 + $0x70] sm:$0xf]  ;;  %v2480_v1 = vld [vmem:[%s2968_s30 + $0x74] sm:$0xf0]  ;;  %v1989_v11 = vld [vmem:[%s2968_s30 + $0x60] sm:$0xf] }
  0x9d   : > { %v2061_v2 = vld [vmem:[%s2968_s30 + $0xf0] sm:$0xf]  ;;  %v1998_v3 = vor.u32 %v2480_v1, %v1997_v0  ;;  %v2496_v4 = vld [vmem:[%s2968_s30 + $0xf4] sm:$0xf0]  ;;  %v2478_v13 = vld [vmem:[%s2968_s30 + $0x64] sm:$0xf0] }
  0x9e   : > { %v2125_v5 = vld [vmem:[%s2968_s30 + $0x170] sm:$0xf]  ;;  %v2512_v6 = vld [vmem:[%s2968_s30 + $0x174] sm:$0xf0]  ;;  %v2062_v7 = vor.u32 %v2496_v4, %v2061_v2  ;;  %v2053_v14 = vld [vmem:[%s2968_s30 + $0xe0] sm:$0xf]  ;;  %v1990_v16 = vor.u32 %v2478_v13, %v1989_v11 }
  0x9f   : > { %v2126_v8 = vor.u32 %v2512_v6, %v2125_v5  ;;  %v2189_v9 = vld [vmem:[%s2968_s30 + $0x1f0] sm:$0xf]  ;;  %v2528_v10 = vld [vmem:[%s2968_s30 + $0x1f4] sm:$0xf0]  ;;  %1552 = vmatpush.bf16.msra.mxu0 %v1998_v3  ;;  %v2494_v15 = vld [vmem:[%s2968_s30 + $0xe4] sm:$0xf0] }
  0xa0   : > { %v2190_v12 = vor.u32 %v2528_v10, %v2189_v9  ;;  %1566 = vmatpush.bf16.msra.mxu1 %v2062_v7  ;;  %v2054_v17 = vor.u32 %v2494_v15, %v2053_v14  ;;  %v2117_v18 = vld [vmem:[%s2968_s30 + $0x160] sm:$0xf]  ;;  %v2510_v19 = vld [vmem:[%s2968_s30 + $0x164] sm:$0xf0]  ;;  %v1981_v23 = vld [vmem:[%s2968_s30 + $0x50] sm:$0xf] }
  0xa1   : > { %1580 = vmatpush.bf16.msra.mxu2 %v2126_v8  ;;  %v2181_v20 = vld [vmem:[%s2968_s30 + $0x1e0] sm:$0xf]  ;;  %v2118_v21 = vor.u32 %v2510_v19, %v2117_v18  ;;  %v2526_v22 = vld [vmem:[%s2968_s30 + $0x1e4] sm:$0xf0]  ;;  %v2476_v24 = vld [vmem:[%s2968_s30 + $0x54] sm:$0xf0] }
  0xa2   : > { %1594 = vmatpush.bf16.msra.mxu3 %v2190_v12  ;;  %v2182_v25 = vor.u32 %v2526_v22, %v2181_v20  ;;  %v2045_v26 = vld [vmem:[%s2968_s30 + $0xd0] sm:$0xf]  ;;  %v2492_v27 = vld [vmem:[%s2968_s30 + $0xd4] sm:$0xf0]  ;;  %v1982_v29 = vor.u32 %v2476_v24, %v1981_v23  ;;  %v1973_v35 = vld [vmem:[%s2968_s30 + $0x40] sm:$0xf] }
  0xa3   : > { %v2109_v28 = vld [vmem:[%s2968_s30 + $0x150] sm:$0xf]  ;;  %1553 = vmatpush.bf16.msra.mxu0 %v1990_v16  ;;  %v2508_v30 = vld [vmem:[%s2968_s30 + $0x154] sm:$0xf0]  ;;  %v2046_v33 = vor.u32 %v2492_v27, %v2045_v26  ;;  %v2474_v36 = vld [vmem:[%s2968_s30 + $0x44] sm:$0xf0] }
  0xa4   : > { %v2173_v31 = vld [vmem:[%s2968_s30 + $0x1d0] sm:$0xf]  ;;  %v2524_v32 = vld [vmem:[%s2968_s30 + $0x1d4] sm:$0xf0]  ;;  %1567 = vmatpush.bf16.msra.mxu1 %v2054_v17  ;;  %v2110_v34 = vor.u32 %v2508_v30, %v2109_v28  ;;  %v2037_v37 = vld [vmem:[%s2968_s30 + $0xc0] sm:$0xf]  ;;  %v1974_v44 = vor.u32 %v2474_v36, %v1973_v35 }
  0xa5   : > { %1581 = vmatpush.bf16.msra.mxu2 %v2118_v21  ;;  %v2174_v38 = vor.u32 %v2524_v32, %v2173_v31  ;;  %v2490_v39 = vld [vmem:[%s2968_s30 + $0xc4] sm:$0xf0]  ;;  %v2101_v40 = vld [vmem:[%s2968_s30 + $0x140] sm:$0xf]  ;;  %v1965_v47 = vld [vmem:[%s2968_s30 + $0x30] sm:$0xf] }
  0xa6   : > { %1595 = vmatpush.bf16.msra.mxu3 %v2182_v25  ;;  %v2506_v41 = vld [vmem:[%s2968_s30 + $0x144] sm:$0xf0]  ;;  %v2165_v42 = vld [vmem:[%s2968_s30 + $0x1c0] sm:$0xf]  ;;  %v2038_v45 = vor.u32 %v2490_v39, %v2037_v37  ;;  %v2472_v48 = vld [vmem:[%s2968_s30 + $0x34] sm:$0xf0] }
  0xa7   : > { %v2522_v43 = vld [vmem:[%s2968_s30 + $0x1c4] sm:$0xf0]  ;;  %1554 = vmatpush.bf16.msra.mxu0 %v1982_v29  ;;  %v2102_v46 = vor.u32 %v2506_v41, %v2101_v40  ;;  %v2029_v49 = vld [vmem:[%s2968_s30 + $0xb0] sm:$0xf]  ;;  %v2488_v51 = vld [vmem:[%s2968_s30 + $0xb4] sm:$0xf0]  ;;  %v1966_v56 = vor.u32 %v2472_v48, %v1965_v47 }
  0xa8   : > { %1568 = vmatpush.bf16.msra.mxu1 %v2046_v33  ;;  %v2166_v50 = vor.u32 %v2522_v43, %v2165_v42  ;;  %v2093_v52 = vld [vmem:[%s2968_s30 + $0x130] sm:$0xf]  ;;  %v2504_v53 = vld [vmem:[%s2968_s30 + $0x134] sm:$0xf0]  ;;  %v2030_v57 = vor.u32 %v2488_v51, %v2029_v49  ;;  %v1957_v59 = vld [vmem:[%s2968_s30 + $0x20] sm:$0xf] }
  0xa9   : > { %1582 = vmatpush.bf16.msra.mxu2 %v2110_v34  ;;  %v2157_v54 = vld [vmem:[%s2968_s30 + $0x1b0] sm:$0xf]  ;;  %v2520_v55 = vld [vmem:[%s2968_s30 + $0x1b4] sm:$0xf0]  ;;  %v2094_v58 = vor.u32 %v2504_v53, %v2093_v52  ;;  %v2470_v60 = vld [vmem:[%s2968_s30 + $0x24] sm:$0xf0] }
  0xaa   : > { %1596 = vmatpush.bf16.msra.mxu3 %v2174_v38  ;;  %v2021_v61 = vld [vmem:[%s2968_s30 + $0xa0] sm:$0xf]  ;;  %v2158_v62 = vor.u32 %v2520_v55, %v2157_v54  ;;  %v2486_v63 = vld [vmem:[%s2968_s30 + $0xa4] sm:$0xf0]  ;;  %v1958_v4 = vor.u32 %v2470_v60, %v1957_v59  ;;  %v1949_v7 = vld [vmem:[%s2968_s30 + $0x10] sm:$0xf] }
  0xab   : > { %1555 = vmatpush.bf16.msra.mxu0 %v1974_v44  ;;  %v2085_v0 = vld [vmem:[%s2968_s30 + $0x120] sm:$0xf]  ;;  %v2502_v1 = vld [vmem:[%s2968_s30 + $0x124] sm:$0xf0]  ;;  %v2022_v5 = vor.u32 %v2486_v63, %v2021_v61  ;;  %v2468_v8 = vld [vmem:[%s2968_s30 + $0x14] sm:$0xf0] }
  0xac   : > { %1569 = vmatpush.bf16.msra.mxu1 %v2038_v45  ;;  %v2149_v2 = vld [vmem:[%s2968_s30 + $0x1a0] sm:$0xf]  ;;  %v2518_v3 = vld [vmem:[%s2968_s30 + $0x1a4] sm:$0xf0]  ;;  %v2086_v6 = vor.u32 %v2502_v1, %v2085_v0  ;;  %v2013_v9 = vld [vmem:[%s2968_s30 + $0x90] sm:$0xf]  ;;  %v1950_v16 = vor.u32 %v2468_v8, %v1949_v7 }
  0xad   : > { %1583 = vmatpush.bf16.msra.mxu2 %v2102_v46  ;;  %v2150_v10 = vor.u32 %v2518_v3, %v2149_v2  ;;  %v2484_v11 = vld [vmem:[%s2968_s30 + $0x94] sm:$0xf0]  ;;  %v2077_v12 = vld [vmem:[%s2968_s30 + $0x110] sm:$0xf]  ;;  %v1941_v17 = vld [vmem:[%s2968_s30] sm:$0xf] }
  0xae   : > { %1597 = vmatpush.bf16.msra.mxu3 %v2166_v50  ;;  %v2500_v13 = vld [vmem:[%s2968_s30 + $0x114] sm:$0xf0]  ;;  %v2141_v14 = vld [vmem:[%s2968_s30 + $0x190] sm:$0xf]  ;;  %v2466_v18 = vld [vmem:[%s2968_s30 + $0x4] sm:$0xf0]  ;;  %v2014_v19 = vor.u32 %v2484_v11, %v2013_v9 }
  0xaf   : > { %1556 = vmatpush.bf16.msra.mxu0 %v1966_v56  ;;  %v2516_v15 = vld [vmem:[%s2968_s30 + $0x194] sm:$0xf0]  ;;  %v2078_v20 = vor.u32 %v2500_v13, %v2077_v12  ;;  %v2005_v21 = vld [vmem:[%s2968_s30 + $0x80] sm:$0xf]  ;;  %v2482_v22 = vld [vmem:[%s2968_s30 + $0x84] sm:$0xf0]  ;;  %v1942_v31 = vor.u32 %v2466_v18, %v1941_v17 }
  0xb0   : > { %1570 = vmatpush.bf16.msra.mxu1 %v2030_v57  ;;  %v2069_v23 = vld [vmem:[%s2968_s30 + $0x100] sm:$0xf]  ;;  %v2142_v24 = vor.u32 %v2516_v15, %v2141_v14  ;;  %v2498_v25 = vld [vmem:[%s2968_s30 + $0x104] sm:$0xf0]  ;;  %v2253_v28 = vld [vmem:[%s2968_s30 + $0x270] sm:$0xf]  ;;  %v2006_v35 = vor.u32 %v2482_v22, %v2005_v21 }
  0xb1   : > { %1584 = vmatpush.bf16.msra.mxu2 %v2094_v58  ;;  %v2133_v26 = vld [vmem:[%s2968_s30 + $0x180] sm:$0xf]  ;;  %v2514_v27 = vld [vmem:[%s2968_s30 + $0x184] sm:$0xf0]  ;;  %v2544_v29 = vld [vmem:[%s2968_s30 + $0x274] sm:$0xf0]  ;;  %v2070_v36 = vor.u32 %v2498_v25, %v2069_v23 }
  0xb2   : > { %1598 = vmatpush.bf16.msra.mxu3 %v2158_v62  ;;  %v2317_v30 = vld [vmem:[%s2968_s30 + $0x2f0] sm:$0xf]  ;;  %v2560_v32 = vld [vmem:[%s2968_s30 + $0x2f4] sm:$0xf0]  ;;  %v2134_v39 = vor.u32 %v2514_v27, %v2133_v26  ;;  %v2254_v40 = vor.u32 %v2544_v29, %v2253_v28  ;;  %v2245_v41 = vld [vmem:[%s2968_s30 + $0x260] sm:$0xf] }
  0xb3   : > { %1557 = vmatpush.bf16.msra.mxu0 %v1958_v4  ;;  %v2381_v33 = vld [vmem:[%s2968_s30 + $0x370] sm:$0xf]  ;;  %v2576_v34 = vld [vmem:[%s2968_s30 + $0x374] sm:$0xf0]  ;;  %v2542_v42 = vld [vmem:[%s2968_s30 + $0x264] sm:$0xf0]  ;;  %v2318_v43 = vor.u32 %v2560_v32, %v2317_v30 }
  0xb4   : > { %1571 = vmatpush.bf16.msra.mxu1 %v2022_v5  ;;  %v2445_v37 = vld [vmem:[%s2968_s30 + $0x3f0] sm:$0xf]  ;;  %v2592_v38 = vld [vmem:[%s2968_s30 + $0x3f4] sm:$0xf0]  ;;  %v2382_v44 = vor.u32 %v2576_v34, %v2381_v33  ;;  %v2309_v45 = vld [vmem:[%s2968_s30 + $0x2e0] sm:$0xf]  ;;  %v2246_v55 = vor.u32 %v2542_v42, %v2245_v41 }
  0xb5   : > { %1585 = vmatpush.bf16.msra.mxu2 %v2086_v6  ;;  %v2558_v46 = vld [vmem:[%s2968_s30 + $0x2e4] sm:$0xf0]  ;;  %v2373_v47 = vld [vmem:[%s2968_s30 + $0x360] sm:$0xf]  ;;  %v2446_v48 = vor.u32 %v2592_v38, %v2445_v37  ;;  %v2237_v56 = vld [vmem:[%s2968_s30 + $0x250] sm:$0xf] }
  0xb6   : > { %1599 = vmatpush.bf16.msra.mxu3 %v2150_v10  ;;  %v2574_v49 = vld [vmem:[%s2968_s30 + $0x364] sm:$0xf0]  ;;  %v2437_v50 = vld [vmem:[%s2968_s30 + $0x3e0] sm:$0xf]  ;;  %v2540_v57 = vld [vmem:[%s2968_s30 + $0x254] sm:$0xf0]  ;;  %v2310_v60 = vor.u32 %v2558_v46, %v2309_v45 }
  0xb7   : > { %1558 = vmatpush.bf16.msra.mxu0 %v1950_v16  ;;  %v2590_v51 = vld [vmem:[%s2968_s30 + $0x3e4] sm:$0xf0]  ;;  %v1909_v52 = vld [vmem:[%s3328_s0] sm:$0xf]  ;;  %v2374_v61 = vor.u32 %v2574_v49, %v2373_v47  ;;  %v2301_v62 = vld [vmem:[%s2968_s30 + $0x2d0] sm:$0xf]  ;;  %v2238_v9 = vor.u32 %v2540_v57, %v2237_v56 }
  0xb8   : > { %1572 = vmatpush.bf16.msra.mxu1 %v2014_v19  ;;  %v2461_v53 = vld [vmem:[%s3328_s0 + $0x1c] sm:$0xf0]  ;;  %v1917_v54 = vld [vmem:[%s3328_s0 + $0x8] sm:$0xf]  ;;  %v2556_v63 = vld [vmem:[%s2968_s30 + $0x2d4] sm:$0xf0]  ;;  %v2438_v2 = vor.u32 %v2590_v51, %v2437_v50 }
  0xb9   : > { %1586 = vmatpush.bf16.msra.mxu2 %v2078_v20  ;;  %v3061_v58 = vor.u32 %v2461_v53, %v1909_v52  ;;  %v2462_v59 = vld [vmem:[%s3328_s0 + $0x24] sm:$0xf0]  ;;  %v2365_v0 = vld [vmem:[%s2968_s30 + $0x350] sm:$0xf]  ;;  %v2572_v3 = vld [vmem:[%s2968_s30 + $0x354] sm:$0xf0]  ;;  %v2302_v12 = vor.u32 %v2556_v63, %v2301_v62 }
  0xba   : > { %1600 = vmatpush.bf16.msra.mxu3 %v2142_v24  ;;  %v3069_v1 = vor.u32 %v2462_v59, %v1917_v54  ;;  %v2429_v4 = vld [vmem:[%s2968_s30 + $0x3d0] sm:$0xf]  ;;  %v2588_v5 = vld [vmem:[%s2968_s30 + $0x3d4] sm:$0xf0]  ;;  %v2457_v6 = vld [vmem:[%s3328_s0 + $0x4] sm:$0xf]  ;;  %v2366_v13 = vor.u32 %v2572_v3, %v2365_v0 }
  0xbb   : > { %1559 = vmatpush.bf16.msra.mxu0 %v1942_v31  ;;  %v1911_v7 = vld [vmem:[%s3328_s0 + $0x20] sm:$0xf0]  ;;  %v2458_v8 = vld [vmem:[%s3328_s0 + $0xc] sm:$0xf]  ;;  %v2229_v14 = vld [vmem:[%s2968_s30 + $0x240] sm:$0xf]  ;;  %v2430_v18 = vor.u32 %v2588_v5, %v2429_v4 }
  0xbc   : > { %1573 = vmatpush.bf16.msra.mxu1 %v2006_v35  ;;  %v3085_v10 = vor.u32 %v2457_v6, %v1911_v7  ;;  %v1919_v11 = vld [vmem:[%s3328_s0 + $0x28] sm:$0xf0]  ;;  %v2538_v15 = vld [vmem:[%s2968_s30 + $0x244] sm:$0xf0]  ;;  %v2293_v16 = vld [vmem:[%s2968_s30 + $0x2c0] sm:$0xf] }
  0xbd   : > { %1587 = vmatpush.bf16.msra.mxu2 %v2070_v36  ;;  %v3093_v17 = vor.u32 %v2458_v8, %v1919_v11  ;;  %v2554_v19 = vld [vmem:[%s2968_s30 + $0x2c4] sm:$0xf0]  ;;  %v2357_v20 = vld [vmem:[%s2968_s30 + $0x340] sm:$0xf]  ;;  %v2230_v24 = vor.u32 %v2538_v15, %v2229_v14  ;;  %v2221_v27 = vld [vmem:[%s2968_s30 + $0x230] sm:$0xf] }
  0xbe   : > { %1601 = vmatpush.bf16.msra.mxu3 %v2134_v39  ;;  %1560 = vmatmul.bf16.vlgmr.msra.gmra.mxu0 %v3061_v58  ;;  %v2570_v21 = vld [vmem:[%s2968_s30 + $0x344] sm:$0xf0]  ;;  %v2421_v22 = vld [vmem:[%s2968_s30 + $0x3c0] sm:$0xf]  ;;  %v2294_v25 = vor.u32 %v2554_v19, %v2293_v16  ;;  %v2536_v28 = vld [vmem:[%s2968_s30 + $0x234] sm:$0xf0] }
  0xbf   : > { %1608 = vmatpush.bf16.msrb.mxu0 %v2254_v40  ;;  %1574 = vmatmul.bf16.vlgmr.msra.gmra.mxu1 %v3085_v10  ;;  %v2586_v23 = vld [vmem:[%s2968_s30 + $0x3c4] sm:$0xf0]  ;;  %v2358_v26 = vor.u32 %v2570_v21, %v2357_v20  ;;  %v2285_v29 = vld [vmem:[%s2968_s30 + $0x2b0] sm:$0xf]  ;;  %v2552_v31 = vld [vmem:[%s2968_s30 + $0x2b4] sm:$0xf0]  ;;  %v2222_v36 = vor.u32 %v2536_v28, %v2221_v27 }
  0xc0   : > { %1622 = vmatpush.bf16.msrb.mxu1 %v2318_v43  ;;  %1588 = vmatmul.bf16.vlgmr.msra.gmra.mxu2 %v3069_v1  ;;  %v2422_v30 = vor.u32 %v2586_v23, %v2421_v22  ;;  %v2349_v32 = vld [vmem:[%s2968_s30 + $0x330] sm:$0xf]  ;;  %v2568_v33 = vld [vmem:[%s2968_s30 + $0x334] sm:$0xf0]  ;;  %v2286_v37 = vor.u32 %v2552_v31, %v2285_v29  ;;  %v2213_v39 = vld [vmem:[%s2968_s30 + $0x220] sm:$0xf] }
  0xc1   : > { %1636 = vmatpush.bf16.msrb.mxu2 %v2382_v44  ;;  %1602 = vmatmul.bf16.vlgmr.msra.gmra.mxu3 %v3093_v17  ;;  %v2413_v34 = vld [vmem:[%s2968_s30 + $0x3b0] sm:$0xf]  ;;  %v2584_v35 = vld [vmem:[%s2968_s30 + $0x3b4] sm:$0xf0]  ;;  %v2350_v38 = vor.u32 %v2568_v33, %v2349_v32  ;;  %v2534_v40 = vld [vmem:[%s2968_s30 + $0x224] sm:$0xf0] }
  0xc2   : > { %1650 = vmatpush.bf16.msrb.mxu3 %v2446_v48  ;;  %v2277_v41 = vld [vmem:[%s2968_s30 + $0x2a0] sm:$0xf]  ;;  %v2414_v42 = vor.u32 %v2584_v35, %v2413_v34  ;;  %v2550_v43 = vld [vmem:[%s2968_s30 + $0x2a4] sm:$0xf0]  ;;  %v2214_v48 = vor.u32 %v2534_v40, %v2213_v39  ;;  %v2205_v49 = vld [vmem:[%s2968_s30 + $0x210] sm:$0xf] }
  0xc3   : > { %1609 = vmatpush.bf16.msrb.mxu0 %v2246_v55  ;;  %v2341_v44 = vld [vmem:[%s2968_s30 + $0x320] sm:$0xf]  ;;  %v2566_v45 = vld [vmem:[%s2968_s30 + $0x324] sm:$0xf0]  ;;  %v2278_v50 = vor.u32 %v2550_v43, %v2277_v41  ;;  %v2532_v52 = vld [vmem:[%s2968_s30 + $0x214] sm:$0xf0] }
  0xc4   : > { %1623 = vmatpush.bf16.msrb.mxu1 %v2310_v60  ;;  %v2405_v46 = vld [vmem:[%s2968_s30 + $0x3a0] sm:$0xf]  ;;  %v2582_v47 = vld [vmem:[%s2968_s30 + $0x3a4] sm:$0xf0]  ;;  %v2342_v51 = vor.u32 %v2566_v45, %v2341_v44  ;;  %v2269_v53 = vld [vmem:[%s2968_s30 + $0x290] sm:$0xf]  ;;  %v2206_v63 = vor.u32 %v2532_v52, %v2205_v49 }
  0xc5   : > { %1637 = vmatpush.bf16.msrb.mxu2 %v2374_v61  ;;  %v2548_v54 = vld [vmem:[%s2968_s30 + $0x294] sm:$0xf0]  ;;  %v2406_v55 = vor.u32 %v2582_v47, %v2405_v46  ;;  %v2333_v56 = vld [vmem:[%s2968_s30 + $0x310] sm:$0xf]  ;;  %v2197_v61 = vld [vmem:[%s2968_s30 + $0x200] sm:$0xf] }
  0xc6   : > { %1651 = vmatpush.bf16.msrb.mxu3 %v2438_v2  ;;  %v2564_v57 = vld [vmem:[%s2968_s30 + $0x314] sm:$0xf0]  ;;  %v2397_v59 = vld [vmem:[%s2968_s30 + $0x390] sm:$0xf]  ;;  %v2530_v62 = vld [vmem:[%s2968_s30 + $0x204] sm:$0xf0]  ;;  %v2270_v5 = vor.u32 %v2548_v54, %v2269_v53 }
  0xc7   : > { %1610 = vmatpush.bf16.msrb.mxu0 %v2238_v9  ;;  %v2580_v60 = vld [vmem:[%s2968_s30 + $0x394] sm:$0xf0]  ;;  %v2261_v0 = vld [vmem:[%s2968_s30 + $0x280] sm:$0xf]  ;;  %v2546_v2 = vld [vmem:[%s2968_s30 + $0x284] sm:$0xf0]  ;;  %v2334_v6 = vor.u32 %v2564_v57, %v2333_v56  ;;  %v2198_v19 = vor.u32 %v2530_v62, %v2197_v61 }
  0xc8   : > { %1624 = vmatpush.bf16.msrb.mxu1 %v2302_v12  ;;  %v2325_v3 = vld [vmem:[%s2968_s30 + $0x300] sm:$0xf]  ;;  %v2562_v4 = vld [vmem:[%s2968_s30 + $0x304] sm:$0xf0]  ;;  %v2479_v9 = vld [vmem:[%s2968_s30 + $0x74] sm:$0xf]  ;;  %v2398_v11 = vor.u32 %v2580_v60, %v2397_v59  ;;  %v2262_v23 = vor.u32 %v2546_v2, %v2261_v0 }
  0xc9   : > { %1638 = vmatpush.bf16.msrb.mxu2 %v2366_v13  ;;  %v2389_v7 = vld [vmem:[%s2968_s30 + $0x380] sm:$0xf]  ;;  %v2578_v8 = vld [vmem:[%s2968_s30 + $0x384] sm:$0xf0]  ;;  %v1999_v12 = vld [vmem:[%s2968_s30 + $0x78] sm:$0xf0] }
  0xca   : > { %1652 = vmatpush.bf16.msrb.mxu3 %v2430_v18  ;;  %v2495_v13 = vld [vmem:[%s2968_s30 + $0xf4] sm:$0xf]  ;;  %v2063_v14 = vld [vmem:[%s2968_s30 + $0xf8] sm:$0xf0]  ;;  %v1925_v21 = vld [vmem:[%s3328_s0 + $0x10] sm:$0xf]  ;;  %v2390_v28 = vor.u32 %v2578_v8, %v2389_v7  ;;  %v2002_v29 = vor.u32 %v2479_v9, %v1999_v12 }
  0xcb   : > { %1611 = vmatpush.bf16.msrb.mxu0 %v2230_v24  ;;  %v2511_v15 = vld [vmem:[%s2968_s30 + $0x174] sm:$0xf]  ;;  %v2127_v16 = vld [vmem:[%s2968_s30 + $0x178] sm:$0xf0]  ;;  %v2463_v22 = vld [vmem:[%s3328_s0 + $0x2c] sm:$0xf0]  ;;  %v2326_v24 = vor.u32 %v2562_v4, %v2325_v3  ;;  %v2066_v33 = vor.u32 %v2495_v13, %v2063_v14 }
  0xcc   : > { %1625 = vmatpush.bf16.msrb.mxu1 %v2294_v25  ;;  %v2527_v18 = vld [vmem:[%s2968_s30 + $0x1f4] sm:$0xf]  ;;  %v2191_v20 = vld [vmem:[%s2968_s30 + $0x1f8] sm:$0xf0]  ;;  %v1933_v25 = vld [vmem:[%s3328_s0 + $0x18] sm:$0xf]  ;;  %v2130_v34 = vor.u32 %v2511_v15, %v2127_v16  ;;  %v3169_v39 = vor.u32 %v2463_v22, %v1925_v21 }
  0xcd   : > { %1639 = vmatpush.bf16.msrb.mxu2 %v2358_v26  ;;  %v2464_v26 = vld [vmem:[%s3328_s0 + $0x34] sm:$0xf0]  ;;  %v2459_v27 = vld [vmem:[%s3328_s0 + $0x14] sm:$0xf]  ;;  %v2460_v31 = vld [vmem:[%s3328_s0 + $0x1c] sm:$0xf] }
  0xce   : > { %1653 = vmatpush.bf16.msrb.mxu3 %v2422_v30  ;;  %v1927_v30 = vld [vmem:[%s3328_s0 + $0x30] sm:$0xf0]  ;;  %v1935_v32 = vld [vmem:[%s3328_s0 + $0x38] sm:$0xf0]  ;;  %v2477_v35 = vld [vmem:[%s2968_s30 + $0x64] sm:$0xf]  ;;  %v3174_v43 = vor.u32 %v2464_v26, %v1933_v25 }
  0xcf   : > { %1612 = vmatpush.bf16.msrb.mxu0 %v2222_v36  ;;  %v1991_v36 = vld [vmem:[%s2968_s30 + $0x68] sm:$0xf0]  ;;  %v2509_v41 = vld [vmem:[%s2968_s30 + $0x164] sm:$0xf]  ;;  %v3176_v44 = vor.u32 %v2459_v27, %v1927_v30  ;;  %v3180_v47 = vor.u32 %v2460_v31, %v1935_v32  ;;  %v1983_v52 = vld [vmem:[%s2968_s30 + $0x58] sm:$0xf0] }
  0xd0   : > { %1626 = vmatpush.bf16.msrb.mxu1 %v2286_v37  ;;  %v2493_v37 = vld [vmem:[%s2968_s30 + $0xe4] sm:$0xf]  ;;  %v2055_v40 = vld [vmem:[%s2968_s30 + $0xe8] sm:$0xf0]  ;;  %v2491_v53 = vld [vmem:[%s2968_s30 + $0xd4] sm:$0xf] }
  0xd1   : > { %1640 = vmatpush.bf16.msrb.mxu2 %v2350_v38  ;;  %v2194_v38 = vor.u32 %v2527_v18, %v2191_v20  ;;  %v2525_v45 = vld [vmem:[%s2968_s30 + $0x1e4] sm:$0xf]  ;;  %v2183_v46 = vld [vmem:[%s2968_s30 + $0x1e8] sm:$0xf0]  ;;  %v2058_v49 = vor.u32 %v2493_v37, %v2055_v40  ;;  %v2507_v56 = vld [vmem:[%s2968_s30 + $0x154] sm:$0xf] }
  0xd2   : > { %1654 = vmatpush.bf16.msrb.mxu3 %v2414_v42  ;;  %v2119_v42 = vld [vmem:[%s2968_s30 + $0x168] sm:$0xf0]  ;;  %v2186_v54 = vor.u32 %v2525_v45, %v2183_v46  ;;  %v2111_v57 = vld [vmem:[%s2968_s30 + $0x158] sm:$0xf0]  ;;  %v2523_v59 = vld [vmem:[%s2968_s30 + $0x1d4] sm:$0xf] }
  0xd3   : > { %1613 = vmatpush.bf16.msrb.mxu0 %v2214_v48  ;;  %v1994_v48 = vor.u32 %v2477_v35, %v1991_v36  ;;  %v2175_v60 = vld [vmem:[%s2968_s30 + $0x1d8] sm:$0xf0]  ;;  %v2473_v0 = vld [vmem:[%s2968_s30 + $0x44] sm:$0xf]  ;;  %v1975_v2 = vld [vmem:[%s2968_s30 + $0x48] sm:$0xf0] }
  0xd4   : > { %1627 = vmatpush.bf16.msrb.mxu1 %v2278_v50  ;;  %v2122_v50 = vor.u32 %v2509_v41, %v2119_v42  ;;  %v2489_v3 = vld [vmem:[%s2968_s30 + $0xc4] sm:$0xf]  ;;  %v2178_v4 = vor.u32 %v2523_v59, %v2175_v60  ;;  %v2103_v7 = vld [vmem:[%s2968_s30 + $0x148] sm:$0xf0]  ;;  %v2471_v14 = vld [vmem:[%s2968_s30 + $0x34] sm:$0xf] }
  0xd5   : > { %1641 = vmatpush.bf16.msrb.mxu2 %v2342_v51  ;;  %v2475_v51 = vld [vmem:[%s2968_s30 + $0x54] sm:$0xf]  ;;  %v2521_v8 = vld [vmem:[%s2968_s30 + $0x1c4] sm:$0xf]  ;;  %v2167_v9 = vld [vmem:[%s2968_s30 + $0x1c8] sm:$0xf0] }
  0xd6   : > { %1655 = vmatpush.bf16.msrb.mxu3 %v2406_v55  ;;  %v2047_v55 = vld [vmem:[%s2968_s30 + $0xd8] sm:$0xf0]  ;;  %v1986_v61 = vor.u32 %v2475_v51, %v1983_v52  ;;  %v2487_v16 = vld [vmem:[%s2968_s30 + $0xb4] sm:$0xf]  ;;  %v2170_v18 = vor.u32 %v2521_v8, %v2167_v9  ;;  %v2469_v27 = vld [vmem:[%s2968_s30 + $0x24] sm:$0xf] }
  0xd7   : > { %1614 = vmatpush.bf16.msrb.mxu0 %v2206_v63  ;;  %v2050_v62 = vor.u32 %v2491_v53, %v2047_v55  ;;  %v2114_v63 = vor.u32 %v2507_v56, %v2111_v57  ;;  %v1967_v15 = vld [vmem:[%s2968_s30 + $0x38] sm:$0xf0]  ;;  %v2503_v20 = vld [vmem:[%s2968_s30 + $0x134] sm:$0xf]  ;;  %v2023_v31 = vld [vmem:[%s2968_s30 + $0xa8] sm:$0xf0] }
  0xd8   : > { %1628 = vmatpush.bf16.msrb.mxu1 %v2270_v5  ;;  %v2039_v5 = vld [vmem:[%s2968_s30 + $0xc8] sm:$0xf0]  ;;  %v2095_v21 = vld [vmem:[%s2968_s30 + $0x138] sm:$0xf0]  ;;  %v2519_v22 = vld [vmem:[%s2968_s30 + $0x1b4] sm:$0xf] }
  0xd9   : > { %1642 = vmatpush.bf16.msrb.mxu2 %v2334_v6  ;;  %v2505_v6 = vld [vmem:[%s2968_s30 + $0x144] sm:$0xf]  ;;  %v2042_v12 = vor.u32 %v2489_v3, %v2039_v5  ;;  %v2098_v26 = vor.u32 %v2503_v20, %v2095_v21  ;;  %v2151_v35 = vld [vmem:[%s2968_s30 + $0x1a8] sm:$0xf0]  ;;  %v2467_v40 = vld [vmem:[%s2968_s30 + $0x14] sm:$0xf] }
  0xda   : > { %1656 = vmatpush.bf16.msrb.mxu3 %v2398_v11  ;;  %v1978_v11 = vor.u32 %v2473_v0, %v1975_v2  ;;  %v2106_v13 = vor.u32 %v2505_v6, %v2103_v7  ;;  %v2501_v32 = vld [vmem:[%s2968_s30 + $0x124] sm:$0xf]  ;;  %v1951_v41 = vld [vmem:[%s2968_s30 + $0x18] sm:$0xf0]  ;;  %v2483_v42 = vld [vmem:[%s2968_s30 + $0x94] sm:$0xf] }
  0xdb   : > { %1615 = vmatpush.bf16.msrb.mxu0 %v2198_v19  ;;  %v2031_v19 = vld [vmem:[%s2968_s30 + $0xb8] sm:$0xf0]  ;;  %v1954_v52 = vor.u32 %v2467_v40, %v1951_v41  ;;  %v2465_v53 = vld [vmem:[%s2968_s30 + $0x4] sm:$0xf]  ;;  %v2007_v59 = vld [vmem:[%s2968_s30 + $0x88] sm:$0xf0] }
  0xdc   : > { %1629 = vmatpush.bf16.msrb.mxu1 %v2262_v23  ;;  %v2159_v23 = vld [vmem:[%s2968_s30 + $0x1b8] sm:$0xf0]  ;;  %v2034_v25 = vor.u32 %v2487_v16, %v2031_v19  ;;  %v2481_v57 = vld [vmem:[%s2968_s30 + $0x84] sm:$0xf]  ;;  %v2135_v0 = vld [vmem:[%s2968_s30 + $0x188] sm:$0xf0] }
  0xdd   : > { %1643 = vmatpush.bf16.msrb.mxu2 %v2326_v24  ;;  %v1970_v24 = vor.u32 %v2471_v14, %v1967_v15  ;;  %v2162_v30 = vor.u32 %v2519_v22, %v2159_v23  ;;  %v2015_v46 = vld [vmem:[%s2968_s30 + $0x98] sm:$0xf0]  ;;  %v2497_v60 = vld [vmem:[%s2968_s30 + $0x104] sm:$0xf]  ;;  %v2543_v2 = vld [vmem:[%s2968_s30 + $0x274] sm:$0xf]  ;;  %v2010_v9 = vor.u32 %v2481_v57, %v2007_v59 }
  0xde   : > { %1657 = vmatpush.bf16.msrb.mxu3 %v2390_v28  ;;  %1616 = vmatmul.bf16.vlgmr.msrb.gmra.mxu0 %v3169_v39  ;;  %v1959_v28 = vld [vmem:[%s2968_s30 + $0x28] sm:$0xf0]  ;;  %v2143_v51 = vld [vmem:[%s2968_s30 + $0x198] sm:$0xf0]  ;;  %v2018_v55 = vor.u32 %v2483_v42, %v2015_v46  ;;  %v2575_v7 = vld [vmem:[%s2968_s30 + $0x374] sm:$0xf] }
  0xdf   : > { %1664 = vmatpush.bf16.msra.mxu0 %v2002_v29  ;;  %1630 = vmatmul.bf16.vlgmr.msrb.gmra.mxu1 %v3176_v44  ;;  %v2485_v29 = vld [vmem:[%s2968_s30 + $0xa4] sm:$0xf]  ;;  %v1962_v36 = vor.u32 %v2469_v27, %v1959_v28  ;;  %v2255_v3 = vld [vmem:[%s2968_s30 + $0x278] sm:$0xf0]  ;;  %v2247_v20 = vld [vmem:[%s2968_s30 + $0x268] sm:$0xf0] }
  0xe0   : > { %1678 = vmatpush.bf16.msra.mxu1 %v2066_v33  ;;  %1644 = vmatmul.bf16.vlgmr.msrb.gmra.mxu2 %v3174_v43  ;;  %v2087_v33 = vld [vmem:[%s2968_s30 + $0x128] sm:$0xf0]  ;;  %v2026_v37 = vor.u32 %v2485_v29, %v2023_v31  ;;  %v2319_v6 = vld [vmem:[%s2968_s30 + $0x2f8] sm:$0xf0]  ;;  %v2258_v15 = vor.u32 %v2543_v2, %v2255_v3  ;;  %v2541_v19 = vld [vmem:[%s2968_s30 + $0x264] sm:$0xf] }
  0xe1   : > { %1692 = vmatpush.bf16.msra.mxu2 %v2130_v34  ;;  %1658 = vmatmul.bf16.vlgmr.msrb.gmra.mxu3 %v3180_v47  ;;  %v2517_v34 = vld [vmem:[%s2968_s30 + $0x1a4] sm:$0xf]  ;;  %v2383_v8 = vld [vmem:[%s2968_s30 + $0x378] sm:$0xf0]  ;;  %v2311_v23 = vld [vmem:[%s2968_s30 + $0x2e8] sm:$0xf0]  ;;  %v2250_v28 = vor.u32 %v2541_v19, %v2247_v20 }
  0xe2   : > { %1706 = vmatpush.bf16.msra.mxu3 %v2194_v38  ;;  %v2090_v38 = vor.u32 %v2501_v32, %v2087_v33  ;;  %v2154_v45 = vor.u32 %v2517_v34, %v2151_v35  ;;  %v2557_v21 = vld [vmem:[%s2968_s30 + $0x2e4] sm:$0xf]  ;;  %v2439_v27 = vld [vmem:[%s2968_s30 + $0x3e8] sm:$0xf0]  ;;  %v2539_v31 = vld [vmem:[%s2968_s30 + $0x254] sm:$0xf] }
  0xe3   : > { %1665 = vmatpush.bf16.msra.mxu0 %v1994_v48  ;;  %v2499_v48 = vld [vmem:[%s2968_s30 + $0x114] sm:$0xf]  ;;  %v2314_v29 = vor.u32 %v2557_v21, %v2311_v23  ;;  %v2239_v32 = vld [vmem:[%s2968_s30 + $0x258] sm:$0xf0]  ;;  %v2231_v46 = vld [vmem:[%s2968_s30 + $0x248] sm:$0xf0] }
  0xe4   : > { %1679 = vmatpush.bf16.msra.mxu1 %v2058_v49  ;;  %v2079_v49 = vld [vmem:[%s2968_s30 + $0x118] sm:$0xf0]  ;;  %v2555_v33 = vld [vmem:[%s2968_s30 + $0x2d4] sm:$0xf]  ;;  %v2242_v41 = vor.u32 %v2539_v31, %v2239_v32  ;;  %v2529_v31 = vld [vmem:[%s2968_s30 + $0x204] sm:$0xf] }
  0xe5   : > { %1693 = vmatpush.bf16.msra.mxu2 %v2122_v50  ;;  %v2515_v50 = vld [vmem:[%s2968_s30 + $0x194] sm:$0xf]  ;;  %v2082_v56 = vor.u32 %v2499_v48, %v2079_v49  ;;  %v2303_v35 = vld [vmem:[%s2968_s30 + $0x2d8] sm:$0xf0]  ;;  %v2553_v48 = vld [vmem:[%s2968_s30 + $0x2c4] sm:$0xf] }
  0xe6   : > { %1707 = vmatpush.bf16.msra.mxu3 %v2186_v54  ;;  %v1943_v54 = vld [vmem:[%s2968_s30 + $0x8] sm:$0xf0]  ;;  %v2431_v40 = vld [vmem:[%s2968_s30 + $0x3d8] sm:$0xf0]  ;;  %v2551_v57 = vld [vmem:[%s2968_s30 + $0x2b4] sm:$0xf] }
  0xe7   : > { %1666 = vmatpush.bf16.msra.mxu0 %v1986_v61  ;;  %v2146_v61 = vor.u32 %v2515_v50, %v2143_v51  ;;  %v1946_v5 = vor.u32 %v2465_v53, %v1943_v54  ;;  %v2295_v49 = vld [vmem:[%s2968_s30 + $0x2c8] sm:$0xf0]  ;;  %v2585_v51 = vld [vmem:[%s2968_s30 + $0x3c4] sm:$0xf]  ;;  %v2531_v19 = vld [vmem:[%s2968_s30 + $0x214] sm:$0xf] }
  0xe8   : > { %1680 = vmatpush.bf16.msra.mxu1 %v2050_v62  ;;  %v2071_v62 = vld [vmem:[%s2968_s30 + $0x108] sm:$0xf0]  ;;  %v2298_v53 = vor.u32 %v2553_v48, %v2295_v49  ;;  %v2207_v20 = vld [vmem:[%s2968_s30 + $0x218] sm:$0xf0]  ;;  %v2547_v21 = vld [vmem:[%s2968_s30 + $0x294] sm:$0xf] }
  0xe9   : > { %1694 = vmatpush.bf16.msra.mxu2 %v2114_v63  ;;  %v2513_v63 = vld [vmem:[%s2968_s30 + $0x184] sm:$0xf]  ;;  %v2359_v50 = vld [vmem:[%s2968_s30 + $0x348] sm:$0xf0]  ;;  %v2271_v23 = vld [vmem:[%s2968_s30 + $0x298] sm:$0xf0] }
  0xea   : > { %1708 = vmatpush.bf16.msra.mxu3 %v2178_v4  ;;  %v2559_v4 = vld [vmem:[%s2968_s30 + $0x2f4] sm:$0xf]  ;;  %v2138_v14 = vor.u32 %v2513_v63, %v2135_v0  ;;  %v2415_v0 = vld [vmem:[%s2968_s30 + $0x3b8] sm:$0xf0]  ;;  %v2199_v32 = vld [vmem:[%s2968_s30 + $0x208] sm:$0xf0] }
  0xeb   : > { %1667 = vmatpush.bf16.msra.mxu0 %v1978_v11  ;;  %v2074_v11 = vor.u32 %v2497_v60, %v2071_v62  ;;  %v2322_v16 = vor.u32 %v2559_v4, %v2319_v6  ;;  %v2287_v60 = vld [vmem:[%s2968_s30 + $0x2b8] sm:$0xf0]  ;;  %v2583_v63 = vld [vmem:[%s2968_s30 + $0x3b4] sm:$0xf]  ;;  %v2215_v6 = vld [vmem:[%s2968_s30 + $0x228] sm:$0xf0] }
  0xec   : > { %1681 = vmatpush.bf16.msra.mxu1 %v2042_v12  ;;  %v2591_v12 = vld [vmem:[%s2968_s30 + $0x3f4] sm:$0xf]  ;;  %v2351_v62 = vld [vmem:[%s2968_s30 + $0x338] sm:$0xf0]  ;;  %v2290_v3 = vor.u32 %v2551_v57, %v2287_v60  ;;  %s2593_s12 = sshll.u32 (%p2693_p5), %s2678_s15, 3 }
  0xed   : > { %1695 = vmatpush.bf16.msra.mxu2 %v2106_v13  ;;  %v2447_v13 = vld [vmem:[%s2968_s30 + $0x3f8] sm:$0xf0]  ;;  %s1793_s4 = scalar_lea.vmem (%p2693_p5), %s3331_s3, %s2593_s12 }
  0xee   : > { %1709 = vmatpush.bf16.msra.mxu3 %v2170_v18  ;;  %v2386_v18 = vor.u32 %v2575_v7, %v2383_v8  ;;  %v2450_v22 = vor.u32 %v2591_v12, %v2447_v13  ;;  %v2549_v7 = vld [vmem:[%s2968_s30 + $0x2a4] sm:$0xf]  ;;  %v2418_v8 = vor.u32 %v2583_v63, %v2415_v0  ;;  %v2343_v12 = vld [vmem:[%s2968_s30 + $0x328] sm:$0xf0] }
  0xef   : > { %1668 = vmatpush.bf16.msra.mxu0 %v1970_v24  ;;  %v2573_v24 = vld [vmem:[%s2968_s30 + $0x364] sm:$0xf] }
  0xf0   : > { %1682 = vmatpush.bf16.msra.mxu1 %v2034_v25  ;;  %v2375_v25 = vld [vmem:[%s2968_s30 + $0x368] sm:$0xf0]  ;;  %v2581_v13 = vld [vmem:[%s2968_s30 + $0x3a4] sm:$0xf] }
  0xf1   : > { %1696 = vmatpush.bf16.msra.mxu2 %v2098_v26  ;;  %v2589_v26 = vld [vmem:[%s2968_s30 + $0x3e4] sm:$0xf] }
  0xf2   : > { %1710 = vmatpush.bf16.msra.mxu3 %v2162_v30  ;;  %v2378_v30 = vor.u32 %v2573_v24, %v2375_v25  ;;  %v2442_v34 = vor.u32 %v2589_v26, %v2439_v27  ;;  %v2563_v24 = vld [vmem:[%s2968_s30 + $0x314] sm:$0xf]  ;;  %v2335_v25 = vld [vmem:[%s2968_s30 + $0x318] sm:$0xf0] }
  0xf3   : > { %1669 = vmatpush.bf16.msra.mxu0 %v1962_v36  ;;  %v2571_v36 = vld [vmem:[%s2968_s30 + $0x354] sm:$0xf]  ;;  %v2399_v27 = vld [vmem:[%s2968_s30 + $0x398] sm:$0xf0] }
  0xf4   : > { %1683 = vmatpush.bf16.msra.mxu1 %v2026_v37  ;;  %v2367_v37 = vld [vmem:[%s2968_s30 + $0x358] sm:$0xf0]  ;;  %v2579_v26 = vld [vmem:[%s2968_s30 + $0x394] sm:$0xf] }
  0xf5   : > { %1697 = vmatpush.bf16.msra.mxu2 %v2090_v38  ;;  %v2587_v38 = vld [vmem:[%s2968_s30 + $0x3d4] sm:$0xf]  ;;  %v2370_v42 = vor.u32 %v2571_v36, %v2367_v37  ;;  %v2561_v36 = vld [vmem:[%s2968_s30 + $0x304] sm:$0xf]  ;;  %v2327_v37 = vld [vmem:[%s2968_s30 + $0x308] sm:$0xf0] }
  0xf6   : > { %1711 = vmatpush.bf16.msra.mxu3 %v2154_v45  ;;  %v2537_v45 = vld [vmem:[%s2968_s30 + $0x244] sm:$0xf] }
  0xf7   : > { %1670 = vmatpush.bf16.msra.mxu0 %v1954_v52  ;;  %v2234_v52 = vor.u32 %v2537_v45, %v2231_v46 }
  0xf8   : > { %1684 = vmatpush.bf16.msra.mxu1 %v2018_v55  ;;  %v2535_v55 = vld [vmem:[%s2968_s30 + $0x234] sm:$0xf] }
  0xf9   : > { %1698 = vmatpush.bf16.msra.mxu2 %v2082_v56  ;;  %v2223_v56 = vld [vmem:[%s2968_s30 + $0x238] sm:$0xf0] }
  0xfa   : > { %1712 = vmatpush.bf16.msra.mxu3 %v2146_v61  ;;  %v2567_v61 = vld [vmem:[%s2968_s30 + $0x334] sm:$0xf]  ;;  %v2226_v2 = vor.u32 %v2535_v55, %v2223_v56 }
  0xfb   : > { %1671 = vmatpush.bf16.msra.mxu0 %v1946_v5  ;;  %v2354_v4 = vor.u32 %v2567_v61, %v2351_v62  ;;  %v2533_v5 = vld [vmem:[%s2968_s30 + $0x224] sm:$0xf] }
  0xfc   : > { %1685 = vmatpush.bf16.msra.mxu1 %v2010_v9  ;;  %v2279_v9 = vld [vmem:[%s2968_s30 + $0x2a8] sm:$0xf0] }
  0xfd   : > { %1699 = vmatpush.bf16.msra.mxu2 %v2074_v11  ;;  %v2565_v11 = vld [vmem:[%s2968_s30 + $0x324] sm:$0xf] }
  0xfe   : > { %1713 = vmatpush.bf16.msra.mxu3 %v2138_v14  ;;  %1672 = vmatmul.bf16.vlgmr.msra.gmra.mxu0 %v3061_v58  ;;  %v2434_v58 = vor.u32 %v2587_v38, %v2431_v40  ;;  %v2407_v14 = vld [vmem:[%s2968_s30 + $0x3a8] sm:$0xf0]  ;;  %v2577_v38 = vld [vmem:[%s2968_s30 + $0x384] sm:$0xf] }
  0xff   : > { %1720 = vmatpush.bf16.msrb.mxu0 %v2258_v15  ;;  %1686 = vmatmul.bf16.vlgmr.msra.gmra.mxu1 %v3085_v10  ;;  %v2423_v10 = vld [vmem:[%s2968_s30 + $0x3c8] sm:$0xf0]  ;;  %v2218_v15 = vor.u32 %v2533_v5, %v2215_v6 }
 0x100   : > { %1734 = vmatpush.bf16.msrb.mxu1 %v2322_v16  ;;  %1700 = vmatmul.bf16.vlgmr.msra.gmra.mxu2 %v3069_v1  ;;  %v2306_v1 = vor.u32 %v2555_v33, %v2303_v35  ;;  %v2426_v59 = vor.u32 %v2585_v51, %v2423_v10  ;;  %v2282_v16 = vor.u32 %v2549_v7, %v2279_v9  ;;  %v2545_v33 = vld [vmem:[%s2968_s30 + $0x284] sm:$0xf]  ;;  %v2263_v35 = vld [vmem:[%s2968_s30 + $0x288] sm:$0xf0] }
 0x101   : > { %1748 = vmatpush.bf16.msrb.mxu2 %v2386_v18  ;;  %1714 = vmatmul.bf16.vlgmr.msra.gmra.mxu3 %v3093_v17  ;;  %v2569_v17 = vld [vmem:[%s2968_s30 + $0x344] sm:$0xf]  ;;  %v2346_v18 = vor.u32 %v2565_v11, %v2343_v12  ;;  %v2391_v40 = vld [vmem:[%s2968_s30 + $0x388] sm:$0xf0]  ;;  %s1906_s30 = sshll.u32 %s2678_s15, 1 }
 0x102   : > { %1762 = vmatpush.bf16.msrb.mxu3 %v2450_v22  ;;  %v2362_v54 = vor.u32 %v2569_v17, %v2359_v50  ;;  %v2410_v22 = vor.u32 %v2581_v13, %v2407_v14  ;;  %v2394_v45 = vor.u32 %v2577_v38, %v2391_v40  ;;  %p725_p10 = scmp.lt.s32.totalorder %s1906_s30, 3 }
 0x103   : > { %1721 = vmatpush.bf16.msrb.mxu0 %v2250_v28  ;;  %v2210_v28 = vor.u32 %v2531_v19, %v2207_v20 }
 0x104   : > { %1735 = vmatpush.bf16.msrb.mxu1 %v2314_v29  ;;  %v2274_v29 = vor.u32 %v2547_v21, %v2271_v23  ;;  %s3337_s30 = smov (!%p725_p10, %s1906_s30), 3 }
 0x105   : > { %1749 = vmatpush.bf16.msrb.mxu2 %v2378_v30  ;;  %v2338_v30 = vor.u32 %v2563_v24, %v2335_v25  ;;  %s727_s25 = scalar_lea.vmem %s3330_s2, %s3337_s30 }
 0x106   : > { %1763 = vmatpush.bf16.msrb.mxu3 %v2442_v34  ;;  %v2402_v34 = vor.u32 %v2579_v26, %v2399_v27 }
 0x107   : > { %1722 = vmatpush.bf16.msrb.mxu0 %v2242_v41  ;;  %v2202_v41 = vor.u32 %v2529_v31, %v2199_v32 }
 0x108   : > { %1736 = vmatpush.bf16.msrb.mxu1 %v2306_v1  ;;  %v2266_v1 = vor.u32 %v2545_v33, %v2263_v35 }
 0x109   : > { %1750 = vmatpush.bf16.msrb.mxu2 %v2370_v42  ;;  %v2330_v42 = vor.u32 %v2561_v36, %v2327_v37 }
 0x10a   : > { %1764 = vmatpush.bf16.msrb.mxu3 %v2434_v58 }
 0x10b   : > { %1723 = vmatpush.bf16.msrb.mxu0 %v2234_v52 }
 0x10c   : > { %1737 = vmatpush.bf16.msrb.mxu1 %v2298_v53 }
 0x10d   : > { %1751 = vmatpush.bf16.msrb.mxu2 %v2362_v54 }
 0x10e   : > { %1765 = vmatpush.bf16.msrb.mxu3 %v2426_v59 }
 0x10f   : > { %1724 = vmatpush.bf16.msrb.mxu0 %v2226_v2 }
 0x110   : > { %1738 = vmatpush.bf16.msrb.mxu1 %v2290_v3 }
 0x111   : > { %1752 = vmatpush.bf16.msrb.mxu2 %v2354_v4 }
 0x112   : > { %1766 = vmatpush.bf16.msrb.mxu3 %v2418_v8 }
 0x113   : > { %1725 = vmatpush.bf16.msrb.mxu0 %v2218_v15 }
 0x114   : > { %1739 = vmatpush.bf16.msrb.mxu1 %v2282_v16 }
 0x115   : > { %1753 = vmatpush.bf16.msrb.mxu2 %v2346_v18 }
 0x116   : > { %1767 = vmatpush.bf16.msrb.mxu3 %v2410_v22 }
 0x117   : > { %1726 = vmatpush.bf16.msrb.mxu0 %v2210_v28 }
 0x118   : > { %1740 = vmatpush.bf16.msrb.mxu1 %v2274_v29 }
 0x119   : > { %1754 = vmatpush.bf16.msrb.mxu2 %v2338_v30 }
 0x11a   : > { %1768 = vmatpush.bf16.msrb.mxu3 %v2402_v34 }
 0x11b   : > { %1727 = vmatpush.bf16.msrb.mxu0 %v2202_v41 }
 0x11c   : > { %1741 = vmatpush.bf16.msrb.mxu1 %v2266_v1 }
 0x11d   : > { %1755 = vmatpush.bf16.msrb.mxu2 %v2330_v42 }
 0x11e   : > { %1769 = vmatpush.bf16.msrb.mxu3 %v2394_v45  ;;  %1728 = vmatmul.bf16.vlgmr.msrb.gmra.mxu0 %v3169_v39 }
 0x11f   : > { %1742 = vmatmul.bf16.vlgmr.msrb.gmra.mxu1 %v3176_v44  ;;  %v866_v44 = vld [vmem:[%s727_s25] sm:$0x3] }
 0x120   : > { %1756 = vmatmul.bf16.vlgmr.msrb.gmra.mxu2 %v3174_v43  ;;  %v868_v54 = vperm.slane %v866_v44, 0  ;;  %v869_v62 = vperm.slane %v866_v44, 1 }
 0x121   : > { %1770 = vmatmul.bf16.vlgmr.msrb.gmra.mxu3 %v3180_v47 }
 0x13b   : > { %v1561_v46 = vpop.f32.mrf.mxu0 }
 0x13c   : > { %v1575_v48 = vpop.f32.mrf.mxu1  ;;  %v1562_v56 = vadd.f32 %v1561_v46, %v868_v54 }
 0x13e   : > { %v1576_v61 = vadd.f32 %v1575_v48, %v1562_v56 }
 0x143   : > { %v1589_v58 = vpop.f32.mrf.mxu2  ;;  %v1563_v17 = vpop.f32.mrf.mxu0 }
 0x144   : > { %v1603_v49 = vpop.f32.mrf.mxu3  ;;  %v1577_v50 = vpop.f32.mrf.mxu1  ;;  %v1590_v0 = vadd.f32 %v1589_v58, %v1576_v61  ;;  %v1564_v4 = vadd.f32 %v1563_v17, %v868_v54 }
 0x146   : > { %v1604_v6 = vadd.f32 %v1603_v49, %v1590_v0  ;;  %v1578_v9 = vadd.f32 %v1577_v50, %v1564_v4 }
 0x14b   : > { %v1591_v51 = vpop.f32.mrf.mxu2 }
 0x14c   : > { %v1605_v10 = vpop.f32.mrf.mxu3  ;;  %v1592_v15 = vadd.f32 %v1591_v51, %v1578_v9 }
 0x14e   : > { %v1606_v23 = vadd.f32 %v1605_v10, %v1592_v15 }
 0x15b   : > { %v1617_v52 = vpop.f32.mrf.mxu0 }
 0x15c   : > { %v1631_v53 = vpop.f32.mrf.mxu1  ;;  %v1618_v12 = vadd.f32 %v1617_v52, %v1604_v6 }
 0x15e   : > { %v1632_v18 = vadd.f32 %v1631_v53, %v1618_v12 }
 0x163   : > { %v1645_v39 = vpop.f32.mrf.mxu2  ;;  %v1619_v47 = vpop.f32.mrf.mxu0 }
 0x164   : > { %v1659_v43 = vpop.f32.mrf.mxu3  ;;  %v1633_v55 = vpop.f32.mrf.mxu1  ;;  %v1646_v26 = vadd.f32 %v1645_v39, %v1632_v18  ;;  %v1620_v28 = vadd.f32 %v1619_v47, %v1606_v23 }
 0x166   : > { %v1660_v31 = vadd.f32 %v1659_v43, %v1646_v26  ;;  %v1634_v36 = vadd.f32 %v1633_v55, %v1620_v28 }
 0x168   : > { %v1776_v40 = vmax.f32 %v1660_v31, 0.0 }
 0x16b   : > { %v1647_v57 = vpop.f32.mrf.mxu2 }
 0x16c   : > { %v1661_v59 = vpop.f32.mrf.mxu3  ;;  %v1648_v41 = vadd.f32 %v1647_v57, %v1634_v36 }
 0x16e   : > { %v1662_v58 = vadd.f32 %v1661_v59, %v1648_v41 }
 0x170   : > { %v1778_v51 = vmax.f32 %v1662_v58, 0.0 }
 0x17b   : > { %v1673_v60 = vpop.f32.mrf.mxu0 }
 0x17c   : > { %v1687_v63 = vpop.f32.mrf.mxu1  ;;  %v1674_v2 = vadd.f32 %v1673_v60, %v869_v62 }
 0x17e   : > { %v1688_v7 = vadd.f32 %v1687_v63, %v1674_v2 }
 0x183   : > { %v1701_v3 = vpop.f32.mrf.mxu2  ;;  %v1675_v8 = vpop.f32.mrf.mxu0 }
 0x184   : > { %v1715_v5 = vpop.f32.mrf.mxu3  ;;  %v1689_v11 = vpop.f32.mrf.mxu1  ;;  %v1702_v13 = vadd.f32 %v1701_v3, %v1688_v7  ;;  %v1676_v14 = vadd.f32 %v1675_v8, %v869_v62 }
 0x186   : > { %v1716_v19 = vadd.f32 %v1715_v5, %v1702_v13  ;;  %v1690_v20 = vadd.f32 %v1689_v11, %v1676_v14 }
 0x18b   : > { %v1703_v16 = vpop.f32.mrf.mxu2 }
 0x18c   : > { %v1717_v21 = vpop.f32.mrf.mxu3  ;;  %v1704_v27 = vadd.f32 %v1703_v16, %v1690_v20 }
 0x18e   : > { %v1718_v32 = vadd.f32 %v1717_v21, %v1704_v27 }
 0x19b   : > { %v1729_v22 = vpop.f32.mrf.mxu0 }
 0x19c   : > { %v1730_v24 = vadd.f32 %v1729_v22, %v1716_v19  ;;  %v1743_v25 = vpop.f32.mrf.mxu1 }
 0x19e   : > { %v1744_v29 = vadd.f32 %v1743_v25, %v1730_v24 }
 0x1a3   : > { %v1757_v30 = vpop.f32.mrf.mxu2  ;;  %v1731_v35 = vpop.f32.mrf.mxu0 }
 0x1a4   : > { %v1758_v33 = vadd.f32 %v1757_v30, %v1744_v29  ;;  %v1771_v34 = vpop.f32.mrf.mxu3  ;;  %v1732_v38 = vadd.f32 %v1731_v35, %v1718_v32  ;;  %v1745_v42 = vpop.f32.mrf.mxu1 }
 0x1a6   : > { %v1772_v37 = vadd.f32 %v1771_v34, %v1758_v33  ;;  %v1746_v46 = vadd.f32 %v1745_v42, %v1732_v38 }
 0x1a8   : > { %v1777_v1 = vmax.f32 %v1772_v37, 0.0 }
 0x1aa   : > { %v1780_v45 = vpack.c.bf16 %v1777_v1, %v1776_v40 }
 0x1ab   : > { %v1759_v48 = vpop.f32.mrf.mxu2 }
 0x1ac   : > { %1782 = vst [vmem:[%s722_s27] sm:$0xff] %v1780_v45  ;;  %v1760_v49 = vadd.f32 %v1759_v48, %v1746_v46  ;;  %v1773_v17 = vpop.f32.mrf.mxu3 }
 0x1ae   : > { %v1774_v50 = vadd.f32 %v1773_v17, %v1760_v49 }
 0x1b0   : > { %v1779_v10 = vmax.f32 %v1774_v50, 0.0  ;;  %1790 = sbr.rel (!%p2693_p5) target bundleno = 445 (0x1bd), region = 74 }
 0x1b2   : > { %v1781_v52 = vpack.c.bf16 %v1779_v10, %v1778_v51 }
 0x1b3   : > { %v1824_v53 = vld [vmem:[%s722_s27] sm:$0xff] (%p2693_p5) }
 0x1b4   : > { %1783 = vst [vmem:[%s722_s27 + $0x8] sm:$0xff] %v1781_v52 }
 0x1b5   : > { %1825 = vst [vmem:[%s1793_s4] sm:$0xff] %v1824_v53 }
 0x1bb   : > { %v1826_v39 = vld [vmem:[%s722_s27 + $0x8] sm:$0xff] }
 0x1bc   : > { %1827 = vst [vmem:[%s1793_s4 + $0x10] sm:$0xff] %v1826_v39 }
 0x1bd PF: > { %p10_p11 = scmp.ge.s32.totalorder %s2681_s16, 4   ;;  %s3333_s12 = smov %s2636_s13 }
 0x1be   : > { %s3334_s13 = smov %s2691_s19  ;;  %s3335_s14 = smov %s2681_s16 }
 0x1bf   :  { %12 = sbr.rel (!%p10_p11) target bundleno = 2 (0x2), region = 146 }

// kernel: custom_cnn_forward.11
= control target key start
LH: loop header
LB: loop body
LE: loop exit
PB: predicated region body
PF: predicated region fallthrough
CT: control target
= control target key end

     0   :  { %vm356_vm0 = vcmask 48128   ;;  %s693_s1 = inlined_call_operand.vmem [shape: bf16[512,128], index: 1, kind: input, shape index: {}]   ;;  %s694_s0 = inlined_call_operand.vmem [shape: bf16[16,512], index: 0, kind: input, shape index: {}]   ;;  %s695_s2 = inlined_call_operand.vmem [shape: f32[1,128], index: 2, kind: input, shape index: {}]   ;;  %s696_s3 = inlined_call_operand.vmem [shape: f32[16,6], index: 3, kind: output, shape index: {}]  }
   0x1   :  { %v518_v0 = vld [vmem:[%s693_s1 + $0x38] sm:$0xff]  ;;  %v517_v4 = vld [vmem:[%s693_s1 + $0x30] sm:$0xff]  ;;  %v516_v8 = vld [vmem:[%s693_s1 + $0x28] sm:$0xff] }
   0x2   :  { %v526_v1 = vld [vmem:[%s693_s1 + $0x78] sm:$0xff]  ;;  %294 = vmatpush.bf16.msra.mxu0 %v518_v0  ;;  %v525_v5 = vld [vmem:[%s693_s1 + $0x70] sm:$0xff]  ;;  %v524_v9 = vld [vmem:[%s693_s1 + $0x68] sm:$0xff] }
   0x3   :  { %v534_v2 = vld [vmem:[%s693_s1 + $0xb8] sm:$0xff]  ;;  %308 = vmatpush.bf16.msra.mxu1 %v526_v1  ;;  %v533_v6 = vld [vmem:[%s693_s1 + $0xb0] sm:$0xff]  ;;  %v532_v10 = vld [vmem:[%s693_s1 + $0xa8] sm:$0xff] }
   0x4   :  { %v542_v3 = vld [vmem:[%s693_s1 + $0xf8] sm:$0xff]  ;;  %322 = vmatpush.bf16.msra.mxu2 %v534_v2  ;;  %v541_v7 = vld [vmem:[%s693_s1 + $0xf0] sm:$0xff]  ;;  %v540_v11 = vld [vmem:[%s693_s1 + $0xe8] sm:$0xff] }
   0x5   :  { %336 = vmatpush.bf16.msra.mxu3 %v542_v3  ;;  %v515_v12 = vld [vmem:[%s693_s1 + $0x20] sm:$0xff]  ;;  %v514_v16 = vld [vmem:[%s693_s1 + $0x18] sm:$0xff]  ;;  %v513_v20 = vld [vmem:[%s693_s1 + $0x10] sm:$0xff] }
   0x6   :  { %295 = vmatpush.bf16.msra.mxu0 %v517_v4  ;;  %v523_v13 = vld [vmem:[%s693_s1 + $0x60] sm:$0xff]  ;;  %v522_v17 = vld [vmem:[%s693_s1 + $0x58] sm:$0xff]  ;;  %v521_v21 = vld [vmem:[%s693_s1 + $0x50] sm:$0xff] }
   0x7   :  { %309 = vmatpush.bf16.msra.mxu1 %v525_v5  ;;  %v531_v14 = vld [vmem:[%s693_s1 + $0xa0] sm:$0xff]  ;;  %v530_v18 = vld [vmem:[%s693_s1 + $0x98] sm:$0xff]  ;;  %v529_v22 = vld [vmem:[%s693_s1 + $0x90] sm:$0xff] }
   0x8   :  { %323 = vmatpush.bf16.msra.mxu2 %v533_v6  ;;  %v539_v15 = vld [vmem:[%s693_s1 + $0xe0] sm:$0xff]  ;;  %v538_v19 = vld [vmem:[%s693_s1 + $0xd8] sm:$0xff]  ;;  %v537_v23 = vld [vmem:[%s693_s1 + $0xd0] sm:$0xff] }
   0x9   :  { %337 = vmatpush.bf16.msra.mxu3 %v541_v7  ;;  %v512_v24 = vld [vmem:[%s693_s1 + $0x8] sm:$0xff]  ;;  %v511_v28 = vld [vmem:[%s693_s1] sm:$0xff]  ;;  %v509_v33 = vld [vmem:[%s694_s0 + $0xc] sm:$0xf0] }
   0xa   :  { %296 = vmatpush.bf16.msra.mxu0 %v516_v8  ;;  %v520_v25 = vld [vmem:[%s693_s1 + $0x48] sm:$0xff]  ;;  %v519_v29 = vld [vmem:[%s693_s1 + $0x40] sm:$0xff]  ;;  %v367_v35 = vld [vmem:[%s694_s0 + $0x10] sm:$0xf0] }
   0xb   :  { %310 = vmatpush.bf16.msra.mxu1 %v524_v9  ;;  %v528_v26 = vld [vmem:[%s693_s1 + $0x88] sm:$0xff]  ;;  %v527_v30 = vld [vmem:[%s693_s1 + $0x80] sm:$0xff]  ;;  %v510_v37 = vld [vmem:[%s694_s0 + $0x14] sm:$0xf0] }
   0xc   :  { %324 = vmatpush.bf16.msra.mxu2 %v532_v10  ;;  %v536_v27 = vld [vmem:[%s693_s1 + $0xc8] sm:$0xff]  ;;  %v535_v31 = vld [vmem:[%s693_s1 + $0xc0] sm:$0xff]  ;;  %v375_v39 = vld [vmem:[%s694_s0 + $0x18] sm:$0xf0] }
   0xd   :  { %338 = vmatpush.bf16.msra.mxu3 %v540_v11  ;;  %v365_v32 = vld [vmem:[%s694_s0] sm:$0xf]  ;;  %v507_v34 = vld [vmem:[%s694_s0 + $0x4] sm:$0xf]  ;;  %v373_v36 = vld [vmem:[%s694_s0 + $0x8] sm:$0xf] }
   0xe   :  { %297 = vmatpush.bf16.msra.mxu0 %v515_v12  ;;  %v508_v38 = vld [vmem:[%s694_s0 + $0xc] sm:$0xf]  ;;  %v366_v40 = vor.u32 %v509_v33, %v365_v32  ;;  %v370_v41 = vor.u32 %v507_v34, %v367_v35  ;;  %v374_v42 = vor.u32 %v510_v37, %v373_v36  ;;  %v543_v50 = vld [vmem:[%s695_s2] ss:$0 sm:$0xff] }
   0xf   :  { %311 = vmatpush.bf16.msra.mxu1 %v523_v13  ;;  %v378_v43 = vor.u32 %v508_v38, %v375_v39 }
  0x10   :  { %325 = vmatpush.bf16.msra.mxu2 %v531_v14 }
  0x11   :  { %339 = vmatpush.bf16.msra.mxu3 %v539_v15 }
  0x12   :  { %298 = vmatpush.bf16.msra.mxu0 %v514_v16 }
  0x13   :  { %312 = vmatpush.bf16.msra.mxu1 %v522_v17 }
  0x14   :  { %326 = vmatpush.bf16.msra.mxu2 %v530_v18 }
  0x15   :  { %340 = vmatpush.bf16.msra.mxu3 %v538_v19 }
  0x16   :  { %299 = vmatpush.bf16.msra.mxu0 %v513_v20 }
  0x17   :  { %313 = vmatpush.bf16.msra.mxu1 %v521_v21 }
  0x18   :  { %327 = vmatpush.bf16.msra.mxu2 %v529_v22 }
  0x19   :  { %341 = vmatpush.bf16.msra.mxu3 %v537_v23 }
  0x1a   :  { %300 = vmatpush.bf16.msra.mxu0 %v512_v24 }
  0x1b   :  { %314 = vmatpush.bf16.msra.mxu1 %v520_v25 }
  0x1c   :  { %328 = vmatpush.bf16.msra.mxu2 %v528_v26 }
  0x1d   :  { %342 = vmatpush.bf16.msra.mxu3 %v536_v27 }
  0x1e   :  { %301 = vmatpush.bf16.msra.mxu0 %v511_v28 }
  0x1f   :  { %315 = vmatpush.bf16.msra.mxu1 %v519_v29 }
  0x20   :  { %329 = vmatpush.bf16.msra.mxu2 %v527_v30 }
  0x21   :  { %343 = vmatpush.bf16.msra.mxu3 %v535_v31  ;;  %302 = vmatmul.bf16.vlgmr.msra.gmra.mxu0 %v366_v40 }
  0x22   :  { %316 = vmatmul.bf16.vlgmr.msra.gmra.mxu1 %v370_v41 }
  0x23   :  { %330 = vmatmul.bf16.vlgmr.msra.gmra.mxu2 %v374_v42 }
  0x24   :  { %344 = vmatmul.bf16.vlgmr.msra.gmra.mxu3 %v378_v43 }
  0x9e   :  { %v303_v44 = vpop.f32.mrf.mxu0 }
  0x9f   :  { %v317_v45 = vpop.f32.mrf.mxu1 }
  0xa0   :  { %v318_v46 = vadd.f32 %v317_v45, %v303_v44 }
  0xa6   :  { %v331_v47 = vpop.f32.mrf.mxu2  ;;  %v305_v52 = vpop.f32.mrf.mxu0 }
  0xa7   :  { %v345_v48 = vpop.f32.mrf.mxu3  ;;  %v332_v49 = vadd.f32 %v331_v47, %v318_v46  ;;  %v319_v53 = vpop.f32.mrf.mxu1 }
  0xa8   :  { %v320_v55 = vadd.f32 %v319_v53, %v305_v52 }
  0xa9   :  { %v346_v51 = vadd.f32 %v345_v48, %v332_v49 }
  0xab   :  { %v354_v54 = vadd.f32 %v543_v50, %v346_v51 }
  0xad   :  { %357 = vst.msk [vmem:[%s696_s3] sm:$0xff] %vm356_vm0, %v354_v54 }
  0xae   :  { %v333_v56 = vpop.f32.mrf.mxu2 }
  0xaf   :  { %v334_v57 = vadd.f32 %v333_v56, %v320_v55  ;;  %v347_v58 = vpop.f32.mrf.mxu3 }
  0xb1   :  { %v348_v59 = vadd.f32 %v347_v58, %v334_v57 }
  0xb3   :  { %v355_v60 = vadd.f32 %v543_v50, %v348_v59 }
  0xb5   :  { %358 = vst.msk [vmem:[%s696_s3 + $0x8] sm:$0xff] %vm356_vm0, %v355_v60 }

// kernel: custom_cnn_forward.9
= control target key start
LH: loop header
LB: loop body
LE: loop exit
PB: predicated region body
PF: predicated region fallthrough
CT: control target
= control target key end

     0   :  { %s9806_s12 = smov 0   ;;  %s9808_s13 = smov 0   ;;  %s12073_s0 = inlined_call_operand.vmem [shape: bf16[16,2304], index: 0, kind: input, shape index: {}]   ;;  %s12074_s1 = inlined_call_operand.vmem [shape: bf16[2304,1024], index: 1, kind: input, shape index: {}]   ;;  %s12075_s2 = inlined_call_operand.vmem [shape: f32[1,1024], index: 2, kind: input, shape index: {}]   ;;  %s12076_s3 = inlined_call_operand.vmem [shape: bf16[16,1024], index: 3, kind: output, shape index: {}]  }
   0x1   :  { %s9810_s14 = smov 0  }
   0x2 LB: > { %s9822_s15 = sadd.s32 4294967295, %s9768_s14   ;;  %s9825_s16 = sadd.s32 1, %s9768_s14   ;;  %s9768_s14 = sphi %s9810_s14, %s12128_s14   ;;  %s9764_s13 = sphi %s9808_s13, %s12127_s13   ;;  %s9760_s12 = sphi %s9806_s12, %s12126_s12  }
   0x3   : > { %s38_s17 = ssub.s32 %s9768_s14, %s9825_s16  ;;  %s41_s18 = sadd.s32 1, %s9764_s13 }
   0x4   : > { %p39_p0 = scmp.eq.s32.totalorder %s38_s17, 0  ;;  %p48_p1 = scmp.ne.s32.totalorder %s9764_s13, %s9760_s12 }
   0x5   : > { %p49_p2 = scmp.eq.s32.totalorder %s9768_s14, 0  ;;  %p104_p3 = scmp.eq.s32.totalorder %s9822_s15, 1 }
   0x6   : > { %s9835_s19 = scalar_select %p39_p0, %s9764_s13, %s41_s18  }
   0x7   : > { %p50_p4 = por %p49_p2, %p48_p1  ;;  %p9837_p5 = por %p104_p3, %p48_p1 }
   0x8   : > { %p6685_p6 = scmp.ge.s32.totalorder %s9768_s14, 2 }
   0xa   : > { %129 = sbr.rel (%p6685_p6) target bundleno = 309 (0x135), region = 20 }
   0xf   : > { %132 = sbr.rel (!%p50_p4) target bundleno = 309 (0x135), region = 24  ;;  %s134_s21 = sand.u32 (%p50_p4), 1, %s9764_s13  }
  0x10   : > { %s9074_s22 = sshll.u32 (%p50_p4), %s9768_s14, 4  ;;  %s9844_s23 = smul.u32 (%p50_p4), 4608, %s134_s21 }
  0x11   : > { %s9849_s26 = scalar_lea.vmem (%p50_p4), %s12074_s1, %s9074_s22   ;;  %s9859_s30 = smov (%p50_p4), 0  }
  0x12   : > { %s136_s27 = scalar_lea.vmem (%p50_p4), [#allocation2], %s9844_s23   ;;  %s12092_s29 = smov (%p50_p4), %s9849_s26 }
  0x13   : > { %s12091_s28 = smov (%p50_p4), %s136_s27  ;;  %s9861_s4 = smov (%p50_p4), 0  }
  0x14 LB: >> { %v153_v0 = vld [vmem:[%s9776_s29] sm:$0xff]  ;;  %s729_s5 = sadd.s32 1, %s9780_s30  ;;  %s149_s4 = sadd.s32 1, %s9784_s4   ;;  %s9784_s4 = sphi %s9861_s4, %s149_s4   ;;  %s9780_s30 = sphi %s9859_s30, %s12095_s30   ;;  %s9776_s29 = sphi %s12092_s29, %s12094_s29   ;;  %s9772_s28 = sphi %s12091_s28, %s12093_s28  }
  0x15   : >> { %v155_v1 = vld [vmem:[%s9776_s29 + $0x20] sm:$0xff]  ;;  %154 = vst [vmem:[%s9772_s28] sm:$0xff] %v153_v0  ;;  %p730_p7 = scmp.ge.s32.totalorder %s729_s5, 2  ;;  %p146_p8 = scmp.ge.s32.totalorder %s149_s4, 2  }
  0x16   : >> { %v157_v2 = vld [vmem:[%s9776_s29 + $0x40] sm:$0xff]  ;;  %156 = vst [vmem:[%s9772_s28 + $0x10] sm:$0xff] %v155_v1 }
  0x17   : >> { %v159_v3 = vld [vmem:[%s9776_s29 + $0x60] sm:$0xff]  ;;  %158 = vst [vmem:[%s9772_s28 + $0x20] sm:$0xff] %v157_v2  ;;  %s12130_s5 = smov (%p730_p7, %s729_s5), 0 }
  0x18   : >> { %v161_v4 = vld [vmem:[%s9776_s29 + $0x80] sm:$0xff]  ;;  %160 = vst [vmem:[%s9772_s28 + $0x30] sm:$0xff] %v159_v3  ;;  %s6688_s6 = sshll.u32 %s12130_s5, 3  ;;  %s12095_s30 = smov %s12130_s5 }
  0x19   : >> { %v163_v5 = vld [vmem:[%s9776_s29 + $0xa0] sm:$0xff]  ;;  %162 = vst [vmem:[%s9772_s28 + $0x40] sm:$0xff] %v161_v4  ;;  %s10203_s7 = scalar_lea.vmem %s9849_s26, %s6688_s6   ;;  %s10207_s8 = scalar_lea.vmem %s136_s27, %s6688_s6 [#allocation2]  }
  0x1a   : >> { %v165_v6 = vld [vmem:[%s9776_s29 + $0xc0] sm:$0xff]  ;;  %164 = vst [vmem:[%s9772_s28 + $0x50] sm:$0xff] %v163_v5 }
  0x1b   : >> { %v167_v7 = vld [vmem:[%s9776_s29 + $0xe0] sm:$0xff]  ;;  %166 = vst [vmem:[%s9772_s28 + $0x60] sm:$0xff] %v165_v6 }
  0x1c   : >> { %v169_v8 = vld [vmem:[%s9776_s29 + $0x100] sm:$0xff]  ;;  %168 = vst [vmem:[%s9772_s28 + $0x70] sm:$0xff] %v167_v7 }
  0x1d   : >> { %v171_v9 = vld [vmem:[%s9776_s29 + $0x120] sm:$0xff]  ;;  %170 = vst [vmem:[%s9772_s28 + $0x80] sm:$0xff] %v169_v8 }
  0x1e   : >> { %v173_v10 = vld [vmem:[%s9776_s29 + $0x140] sm:$0xff]  ;;  %172 = vst [vmem:[%s9772_s28 + $0x90] sm:$0xff] %v171_v9 }
  0x1f   : >> { %v175_v11 = vld [vmem:[%s9776_s29 + $0x160] sm:$0xff]  ;;  %174 = vst [vmem:[%s9772_s28 + $0xa0] sm:$0xff] %v173_v10 }
  0x20   : >> { %v177_v12 = vld [vmem:[%s9776_s29 + $0x180] sm:$0xff]  ;;  %176 = vst [vmem:[%s9772_s28 + $0xb0] sm:$0xff] %v175_v11 }
  0x21   : >> { %v179_v13 = vld [vmem:[%s9776_s29 + $0x1a0] sm:$0xff]  ;;  %178 = vst [vmem:[%s9772_s28 + $0xc0] sm:$0xff] %v177_v12 }
  0x22   : >> { %v181_v14 = vld [vmem:[%s9776_s29 + $0x1c0] sm:$0xff]  ;;  %180 = vst [vmem:[%s9772_s28 + $0xd0] sm:$0xff] %v179_v13 }
  0x23   : >> { %v183_v15 = vld [vmem:[%s9776_s29 + $0x1e0] sm:$0xff]  ;;  %182 = vst [vmem:[%s9772_s28 + $0xe0] sm:$0xff] %v181_v14 }
  0x24   : >> { %v185_v16 = vld [vmem:[%s9776_s29 + $0x200] sm:$0xff]  ;;  %184 = vst [vmem:[%s9772_s28 + $0xf0] sm:$0xff] %v183_v15 }
  0x25   : >> { %v187_v17 = vld [vmem:[%s9776_s29 + $0x220] sm:$0xff]  ;;  %186 = vst [vmem:[%s9772_s28 + $0x100] sm:$0xff] %v185_v16 }
  0x26   : >> { %v189_v18 = vld [vmem:[%s9776_s29 + $0x240] sm:$0xff]  ;;  %188 = vst [vmem:[%s9772_s28 + $0x110] sm:$0xff] %v187_v17 }
  0x27   : >> { %v191_v19 = vld [vmem:[%s9776_s29 + $0x260] sm:$0xff]  ;;  %190 = vst [vmem:[%s9772_s28 + $0x120] sm:$0xff] %v189_v18 }
  0x28   : >> { %v193_v20 = vld [vmem:[%s9776_s29 + $0x280] sm:$0xff]  ;;  %192 = vst [vmem:[%s9772_s28 + $0x130] sm:$0xff] %v191_v19 }
  0x29   : >> { %v195_v21 = vld [vmem:[%s9776_s29 + $0x2a0] sm:$0xff]  ;;  %194 = vst [vmem:[%s9772_s28 + $0x140] sm:$0xff] %v193_v20 }
  0x2a   : >> { %v197_v22 = vld [vmem:[%s9776_s29 + $0x2c0] sm:$0xff]  ;;  %196 = vst [vmem:[%s9772_s28 + $0x150] sm:$0xff] %v195_v21 }
  0x2b   : >> { %v199_v23 = vld [vmem:[%s9776_s29 + $0x2e0] sm:$0xff]  ;;  %198 = vst [vmem:[%s9772_s28 + $0x160] sm:$0xff] %v197_v22 }
  0x2c   : >> { %v201_v24 = vld [vmem:[%s9776_s29 + $0x300] sm:$0xff]  ;;  %200 = vst [vmem:[%s9772_s28 + $0x170] sm:$0xff] %v199_v23 }
  0x2d   : >> { %v203_v25 = vld [vmem:[%s9776_s29 + $0x320] sm:$0xff]  ;;  %202 = vst [vmem:[%s9772_s28 + $0x180] sm:$0xff] %v201_v24 }
  0x2e   : >> { %v205_v26 = vld [vmem:[%s9776_s29 + $0x340] sm:$0xff]  ;;  %204 = vst [vmem:[%s9772_s28 + $0x190] sm:$0xff] %v203_v25 }
  0x2f   : >> { %v207_v27 = vld [vmem:[%s9776_s29 + $0x360] sm:$0xff]  ;;  %206 = vst [vmem:[%s9772_s28 + $0x1a0] sm:$0xff] %v205_v26 }
  0x30   : >> { %v209_v28 = vld [vmem:[%s9776_s29 + $0x380] sm:$0xff]  ;;  %208 = vst [vmem:[%s9772_s28 + $0x1b0] sm:$0xff] %v207_v27 }
  0x31   : >> { %v211_v29 = vld [vmem:[%s9776_s29 + $0x3a0] sm:$0xff]  ;;  %210 = vst [vmem:[%s9772_s28 + $0x1c0] sm:$0xff] %v209_v28 }
  0x32   : >> { %v213_v30 = vld [vmem:[%s9776_s29 + $0x3c0] sm:$0xff]  ;;  %212 = vst [vmem:[%s9772_s28 + $0x1d0] sm:$0xff] %v211_v29 }
  0x33   : >> { %v215_v31 = vld [vmem:[%s9776_s29 + $0x3e0] sm:$0xff]  ;;  %214 = vst [vmem:[%s9772_s28 + $0x1e0] sm:$0xff] %v213_v30 }
  0x34   : >> { %v217_v32 = vld [vmem:[%s9776_s29 + $0x400] sm:$0xff]  ;;  %216 = vst [vmem:[%s9772_s28 + $0x1f0] sm:$0xff] %v215_v31 }
  0x35   : >> { %v219_v33 = vld [vmem:[%s9776_s29 + $0x420] sm:$0xff]  ;;  %218 = vst [vmem:[%s9772_s28 + $0x200] sm:$0xff] %v217_v32 }
  0x36   : >> { %v221_v34 = vld [vmem:[%s9776_s29 + $0x440] sm:$0xff]  ;;  %220 = vst [vmem:[%s9772_s28 + $0x210] sm:$0xff] %v219_v33 }
  0x37   : >> { %v223_v35 = vld [vmem:[%s9776_s29 + $0x460] sm:$0xff]  ;;  %222 = vst [vmem:[%s9772_s28 + $0x220] sm:$0xff] %v221_v34 }
  0x38   : >> { %v225_v36 = vld [vmem:[%s9776_s29 + $0x480] sm:$0xff]  ;;  %224 = vst [vmem:[%s9772_s28 + $0x230] sm:$0xff] %v223_v35 }
  0x39   : >> { %v227_v37 = vld [vmem:[%s9776_s29 + $0x4a0] sm:$0xff]  ;;  %226 = vst [vmem:[%s9772_s28 + $0x240] sm:$0xff] %v225_v36 }
  0x3a   : >> { %v229_v38 = vld [vmem:[%s9776_s29 + $0x4c0] sm:$0xff]  ;;  %228 = vst [vmem:[%s9772_s28 + $0x250] sm:$0xff] %v227_v37 }
  0x3b   : >> { %v231_v39 = vld [vmem:[%s9776_s29 + $0x4e0] sm:$0xff]  ;;  %230 = vst [vmem:[%s9772_s28 + $0x260] sm:$0xff] %v229_v38 }
  0x3c   : >> { %v233_v40 = vld [vmem:[%s9776_s29 + $0x500] sm:$0xff]  ;;  %232 = vst [vmem:[%s9772_s28 + $0x270] sm:$0xff] %v231_v39 }
  0x3d   : >> { %v235_v41 = vld [vmem:[%s9776_s29 + $0x520] sm:$0xff]  ;;  %234 = vst [vmem:[%s9772_s28 + $0x280] sm:$0xff] %v233_v40 }
  0x3e   : >> { %v237_v42 = vld [vmem:[%s9776_s29 + $0x540] sm:$0xff]  ;;  %236 = vst [vmem:[%s9772_s28 + $0x290] sm:$0xff] %v235_v41 }
  0x3f   : >> { %v239_v43 = vld [vmem:[%s9776_s29 + $0x560] sm:$0xff]  ;;  %238 = vst [vmem:[%s9772_s28 + $0x2a0] sm:$0xff] %v237_v42 }
  0x40   : >> { %v241_v44 = vld [vmem:[%s9776_s29 + $0x580] sm:$0xff]  ;;  %240 = vst [vmem:[%s9772_s28 + $0x2b0] sm:$0xff] %v239_v43 }
  0x41   : >> { %v243_v45 = vld [vmem:[%s9776_s29 + $0x5a0] sm:$0xff]  ;;  %242 = vst [vmem:[%s9772_s28 + $0x2c0] sm:$0xff] %v241_v44 }
  0x42   : >> { %v245_v46 = vld [vmem:[%s9776_s29 + $0x5c0] sm:$0xff]  ;;  %244 = vst [vmem:[%s9772_s28 + $0x2d0] sm:$0xff] %v243_v45 }
  0x43   : >> { %v247_v47 = vld [vmem:[%s9776_s29 + $0x5e0] sm:$0xff]  ;;  %246 = vst [vmem:[%s9772_s28 + $0x2e0] sm:$0xff] %v245_v46 }
  0x44   : >> { %v249_v48 = vld [vmem:[%s9776_s29 + $0x600] sm:$0xff]  ;;  %248 = vst [vmem:[%s9772_s28 + $0x2f0] sm:$0xff] %v247_v47 }
  0x45   : >> { %v251_v49 = vld [vmem:[%s9776_s29 + $0x620] sm:$0xff]  ;;  %250 = vst [vmem:[%s9772_s28 + $0x300] sm:$0xff] %v249_v48 }
  0x46   : >> { %v253_v50 = vld [vmem:[%s9776_s29 + $0x640] sm:$0xff]  ;;  %252 = vst [vmem:[%s9772_s28 + $0x310] sm:$0xff] %v251_v49 }
  0x47   : >> { %v255_v51 = vld [vmem:[%s9776_s29 + $0x660] sm:$0xff]  ;;  %254 = vst [vmem:[%s9772_s28 + $0x320] sm:$0xff] %v253_v50 }
  0x48   : >> { %v257_v52 = vld [vmem:[%s9776_s29 + $0x680] sm:$0xff]  ;;  %256 = vst [vmem:[%s9772_s28 + $0x330] sm:$0xff] %v255_v51 }
  0x49   : >> { %v259_v53 = vld [vmem:[%s9776_s29 + $0x6a0] sm:$0xff]  ;;  %258 = vst [vmem:[%s9772_s28 + $0x340] sm:$0xff] %v257_v52 }
  0x4a   : >> { %v261_v54 = vld [vmem:[%s9776_s29 + $0x6c0] sm:$0xff]  ;;  %260 = vst [vmem:[%s9772_s28 + $0x350] sm:$0xff] %v259_v53 }
  0x4b   : >> { %v263_v55 = vld [vmem:[%s9776_s29 + $0x6e0] sm:$0xff]  ;;  %262 = vst [vmem:[%s9772_s28 + $0x360] sm:$0xff] %v261_v54 }
  0x4c   : >> { %v265_v56 = vld [vmem:[%s9776_s29 + $0x700] sm:$0xff]  ;;  %264 = vst [vmem:[%s9772_s28 + $0x370] sm:$0xff] %v263_v55 }
  0x4d   : >> { %v267_v57 = vld [vmem:[%s9776_s29 + $0x720] sm:$0xff]  ;;  %266 = vst [vmem:[%s9772_s28 + $0x380] sm:$0xff] %v265_v56 }
  0x4e   : >> { %v269_v58 = vld [vmem:[%s9776_s29 + $0x740] sm:$0xff]  ;;  %268 = vst [vmem:[%s9772_s28 + $0x390] sm:$0xff] %v267_v57 }
  0x4f   : >> { %v271_v59 = vld [vmem:[%s9776_s29 + $0x760] sm:$0xff]  ;;  %270 = vst [vmem:[%s9772_s28 + $0x3a0] sm:$0xff] %v269_v58 }
  0x50   : >> { %v273_v60 = vld [vmem:[%s9776_s29 + $0x780] sm:$0xff]  ;;  %272 = vst [vmem:[%s9772_s28 + $0x3b0] sm:$0xff] %v271_v59 }
  0x51   : >> { %v275_v61 = vld [vmem:[%s9776_s29 + $0x7a0] sm:$0xff]  ;;  %274 = vst [vmem:[%s9772_s28 + $0x3c0] sm:$0xff] %v273_v60 }
  0x52   : >> { %v277_v62 = vld [vmem:[%s9776_s29 + $0x7c0] sm:$0xff]  ;;  %276 = vst [vmem:[%s9772_s28 + $0x3d0] sm:$0xff] %v275_v61 }
  0x53   : >> { %v279_v63 = vld [vmem:[%s9776_s29 + $0x7e0] sm:$0xff]  ;;  %278 = vst [vmem:[%s9772_s28 + $0x3e0] sm:$0xff] %v277_v62 }
  0x54   : >> { %v281_v0 = vld [vmem:[%s9776_s29 + $0x800] sm:$0xff]  ;;  %280 = vst [vmem:[%s9772_s28 + $0x3f0] sm:$0xff] %v279_v63 }
  0x55   : >> { %v283_v1 = vld [vmem:[%s9776_s29 + $0x820] sm:$0xff]  ;;  %282 = vst [vmem:[%s9772_s28 + $0x400] sm:$0xff] %v281_v0 }
  0x56   : >> { %v285_v2 = vld [vmem:[%s9776_s29 + $0x840] sm:$0xff]  ;;  %284 = vst [vmem:[%s9772_s28 + $0x410] sm:$0xff] %v283_v1 }
  0x57   : >> { %v287_v3 = vld [vmem:[%s9776_s29 + $0x860] sm:$0xff]  ;;  %286 = vst [vmem:[%s9772_s28 + $0x420] sm:$0xff] %v285_v2 }
  0x58   : >> { %v289_v4 = vld [vmem:[%s9776_s29 + $0x880] sm:$0xff]  ;;  %288 = vst [vmem:[%s9772_s28 + $0x430] sm:$0xff] %v287_v3 }
  0x59   : >> { %v291_v5 = vld [vmem:[%s9776_s29 + $0x8a0] sm:$0xff]  ;;  %290 = vst [vmem:[%s9772_s28 + $0x440] sm:$0xff] %v289_v4 }
  0x5a   : >> { %v293_v6 = vld [vmem:[%s9776_s29 + $0x8c0] sm:$0xff]  ;;  %292 = vst [vmem:[%s9772_s28 + $0x450] sm:$0xff] %v291_v5 }
  0x5b   : >> { %v295_v7 = vld [vmem:[%s9776_s29 + $0x8e0] sm:$0xff]  ;;  %294 = vst [vmem:[%s9772_s28 + $0x460] sm:$0xff] %v293_v6 }
  0x5c   : >> { %v297_v8 = vld [vmem:[%s9776_s29 + $0x900] sm:$0xff]  ;;  %296 = vst [vmem:[%s9772_s28 + $0x470] sm:$0xff] %v295_v7 }
  0x5d   : >> { %v299_v9 = vld [vmem:[%s9776_s29 + $0x920] sm:$0xff]  ;;  %298 = vst [vmem:[%s9772_s28 + $0x480] sm:$0xff] %v297_v8 }
  0x5e   : >> { %v301_v10 = vld [vmem:[%s9776_s29 + $0x940] sm:$0xff]  ;;  %300 = vst [vmem:[%s9772_s28 + $0x490] sm:$0xff] %v299_v9 }
  0x5f   : >> { %v303_v11 = vld [vmem:[%s9776_s29 + $0x960] sm:$0xff]  ;;  %302 = vst [vmem:[%s9772_s28 + $0x4a0] sm:$0xff] %v301_v10 }
  0x60   : >> { %v305_v12 = vld [vmem:[%s9776_s29 + $0x980] sm:$0xff]  ;;  %304 = vst [vmem:[%s9772_s28 + $0x4b0] sm:$0xff] %v303_v11 }
  0x61   : >> { %v307_v13 = vld [vmem:[%s9776_s29 + $0x9a0] sm:$0xff]  ;;  %306 = vst [vmem:[%s9772_s28 + $0x4c0] sm:$0xff] %v305_v12 }
  0x62   : >> { %v309_v14 = vld [vmem:[%s9776_s29 + $0x9c0] sm:$0xff]  ;;  %308 = vst [vmem:[%s9772_s28 + $0x4d0] sm:$0xff] %v307_v13 }
  0x63   : >> { %v311_v15 = vld [vmem:[%s9776_s29 + $0x9e0] sm:$0xff]  ;;  %310 = vst [vmem:[%s9772_s28 + $0x4e0] sm:$0xff] %v309_v14 }
  0x64   : >> { %v313_v16 = vld [vmem:[%s9776_s29 + $0xa00] sm:$0xff]  ;;  %312 = vst [vmem:[%s9772_s28 + $0x4f0] sm:$0xff] %v311_v15 }
  0x65   : >> { %v315_v17 = vld [vmem:[%s9776_s29 + $0xa20] sm:$0xff]  ;;  %314 = vst [vmem:[%s9772_s28 + $0x500] sm:$0xff] %v313_v16 }
  0x66   : >> { %v317_v18 = vld [vmem:[%s9776_s29 + $0xa40] sm:$0xff]  ;;  %316 = vst [vmem:[%s9772_s28 + $0x510] sm:$0xff] %v315_v17 }
  0x67   : >> { %v319_v19 = vld [vmem:[%s9776_s29 + $0xa60] sm:$0xff]  ;;  %318 = vst [vmem:[%s9772_s28 + $0x520] sm:$0xff] %v317_v18 }
  0x68   : >> { %v321_v20 = vld [vmem:[%s9776_s29 + $0xa80] sm:$0xff]  ;;  %320 = vst [vmem:[%s9772_s28 + $0x530] sm:$0xff] %v319_v19 }
  0x69   : >> { %v323_v21 = vld [vmem:[%s9776_s29 + $0xaa0] sm:$0xff]  ;;  %322 = vst [vmem:[%s9772_s28 + $0x540] sm:$0xff] %v321_v20 }
  0x6a   : >> { %v325_v22 = vld [vmem:[%s9776_s29 + $0xac0] sm:$0xff]  ;;  %324 = vst [vmem:[%s9772_s28 + $0x550] sm:$0xff] %v323_v21 }
  0x6b   : >> { %v327_v23 = vld [vmem:[%s9776_s29 + $0xae0] sm:$0xff]  ;;  %326 = vst [vmem:[%s9772_s28 + $0x560] sm:$0xff] %v325_v22 }
  0x6c   : >> { %v329_v24 = vld [vmem:[%s9776_s29 + $0xb00] sm:$0xff]  ;;  %328 = vst [vmem:[%s9772_s28 + $0x570] sm:$0xff] %v327_v23 }
  0x6d   : >> { %v331_v25 = vld [vmem:[%s9776_s29 + $0xb20] sm:$0xff]  ;;  %330 = vst [vmem:[%s9772_s28 + $0x580] sm:$0xff] %v329_v24 }
  0x6e   : >> { %v333_v26 = vld [vmem:[%s9776_s29 + $0xb40] sm:$0xff]  ;;  %332 = vst [vmem:[%s9772_s28 + $0x590] sm:$0xff] %v331_v25 }
  0x6f   : >> { %v335_v27 = vld [vmem:[%s9776_s29 + $0xb60] sm:$0xff]  ;;  %334 = vst [vmem:[%s9772_s28 + $0x5a0] sm:$0xff] %v333_v26 }
  0x70   : >> { %v337_v28 = vld [vmem:[%s9776_s29 + $0xb80] sm:$0xff]  ;;  %336 = vst [vmem:[%s9772_s28 + $0x5b0] sm:$0xff] %v335_v27 }
  0x71   : >> { %v339_v29 = vld [vmem:[%s9776_s29 + $0xba0] sm:$0xff]  ;;  %338 = vst [vmem:[%s9772_s28 + $0x5c0] sm:$0xff] %v337_v28 }
  0x72   : >> { %v341_v30 = vld [vmem:[%s9776_s29 + $0xbc0] sm:$0xff]  ;;  %340 = vst [vmem:[%s9772_s28 + $0x5d0] sm:$0xff] %v339_v29 }
  0x73   : >> { %v343_v31 = vld [vmem:[%s9776_s29 + $0xbe0] sm:$0xff]  ;;  %342 = vst [vmem:[%s9772_s28 + $0x5e0] sm:$0xff] %v341_v30 }
  0x74   : >> { %v345_v32 = vld [vmem:[%s9776_s29 + $0xc00] sm:$0xff]  ;;  %344 = vst [vmem:[%s9772_s28 + $0x5f0] sm:$0xff] %v343_v31 }
  0x75   : >> { %v347_v33 = vld [vmem:[%s9776_s29 + $0xc20] sm:$0xff]  ;;  %346 = vst [vmem:[%s9772_s28 + $0x600] sm:$0xff] %v345_v32 }
  0x76   : >> { %v349_v34 = vld [vmem:[%s9776_s29 + $0xc40] sm:$0xff]  ;;  %348 = vst [vmem:[%s9772_s28 + $0x610] sm:$0xff] %v347_v33 }
  0x77   : >> { %v351_v35 = vld [vmem:[%s9776_s29 + $0xc60] sm:$0xff]  ;;  %350 = vst [vmem:[%s9772_s28 + $0x620] sm:$0xff] %v349_v34 }
  0x78   : >> { %v353_v36 = vld [vmem:[%s9776_s29 + $0xc80] sm:$0xff]  ;;  %352 = vst [vmem:[%s9772_s28 + $0x630] sm:$0xff] %v351_v35 }
  0x79   : >> { %v355_v37 = vld [vmem:[%s9776_s29 + $0xca0] sm:$0xff]  ;;  %354 = vst [vmem:[%s9772_s28 + $0x640] sm:$0xff] %v353_v36 }
  0x7a   : >> { %v357_v38 = vld [vmem:[%s9776_s29 + $0xcc0] sm:$0xff]  ;;  %356 = vst [vmem:[%s9772_s28 + $0x650] sm:$0xff] %v355_v37 }
  0x7b   : >> { %v359_v39 = vld [vmem:[%s9776_s29 + $0xce0] sm:$0xff]  ;;  %358 = vst [vmem:[%s9772_s28 + $0x660] sm:$0xff] %v357_v38 }
  0x7c   : >> { %v361_v40 = vld [vmem:[%s9776_s29 + $0xd00] sm:$0xff]  ;;  %360 = vst [vmem:[%s9772_s28 + $0x670] sm:$0xff] %v359_v39 }
  0x7d   : >> { %v363_v41 = vld [vmem:[%s9776_s29 + $0xd20] sm:$0xff]  ;;  %362 = vst [vmem:[%s9772_s28 + $0x680] sm:$0xff] %v361_v40 }
  0x7e   : >> { %v365_v42 = vld [vmem:[%s9776_s29 + $0xd40] sm:$0xff]  ;;  %364 = vst [vmem:[%s9772_s28 + $0x690] sm:$0xff] %v363_v41 }
  0x7f   : >> { %v367_v43 = vld [vmem:[%s9776_s29 + $0xd60] sm:$0xff]  ;;  %366 = vst [vmem:[%s9772_s28 + $0x6a0] sm:$0xff] %v365_v42 }
  0x80   : >> { %v369_v44 = vld [vmem:[%s9776_s29 + $0xd80] sm:$0xff]  ;;  %368 = vst [vmem:[%s9772_s28 + $0x6b0] sm:$0xff] %v367_v43 }
  0x81   : >> { %v371_v45 = vld [vmem:[%s9776_s29 + $0xda0] sm:$0xff]  ;;  %370 = vst [vmem:[%s9772_s28 + $0x6c0] sm:$0xff] %v369_v44 }
  0x82   : >> { %v373_v46 = vld [vmem:[%s9776_s29 + $0xdc0] sm:$0xff]  ;;  %372 = vst [vmem:[%s9772_s28 + $0x6d0] sm:$0xff] %v371_v45 }
  0x83   : >> { %v375_v47 = vld [vmem:[%s9776_s29 + $0xde0] sm:$0xff]  ;;  %374 = vst [vmem:[%s9772_s28 + $0x6e0] sm:$0xff] %v373_v46 }
  0x84   : >> { %v377_v48 = vld [vmem:[%s9776_s29 + $0xe00] sm:$0xff]  ;;  %376 = vst [vmem:[%s9772_s28 + $0x6f0] sm:$0xff] %v375_v47 }
  0x85   : >> { %v379_v49 = vld [vmem:[%s9776_s29 + $0xe20] sm:$0xff]  ;;  %378 = vst [vmem:[%s9772_s28 + $0x700] sm:$0xff] %v377_v48 }
  0x86   : >> { %v381_v50 = vld [vmem:[%s9776_s29 + $0xe40] sm:$0xff]  ;;  %380 = vst [vmem:[%s9772_s28 + $0x710] sm:$0xff] %v379_v49 }
  0x87   : >> { %v383_v51 = vld [vmem:[%s9776_s29 + $0xe60] sm:$0xff]  ;;  %382 = vst [vmem:[%s9772_s28 + $0x720] sm:$0xff] %v381_v50 }
  0x88   : >> { %v385_v52 = vld [vmem:[%s9776_s29 + $0xe80] sm:$0xff]  ;;  %384 = vst [vmem:[%s9772_s28 + $0x730] sm:$0xff] %v383_v51 }
  0x89   : >> { %v387_v53 = vld [vmem:[%s9776_s29 + $0xea0] sm:$0xff]  ;;  %386 = vst [vmem:[%s9772_s28 + $0x740] sm:$0xff] %v385_v52 }
  0x8a   : >> { %v389_v54 = vld [vmem:[%s9776_s29 + $0xec0] sm:$0xff]  ;;  %388 = vst [vmem:[%s9772_s28 + $0x750] sm:$0xff] %v387_v53 }
  0x8b   : >> { %v391_v55 = vld [vmem:[%s9776_s29 + $0xee0] sm:$0xff]  ;;  %390 = vst [vmem:[%s9772_s28 + $0x760] sm:$0xff] %v389_v54 }
  0x8c   : >> { %v393_v56 = vld [vmem:[%s9776_s29 + $0xf00] sm:$0xff]  ;;  %392 = vst [vmem:[%s9772_s28 + $0x770] sm:$0xff] %v391_v55 }
  0x8d   : >> { %v395_v57 = vld [vmem:[%s9776_s29 + $0xf20] sm:$0xff]  ;;  %394 = vst [vmem:[%s9772_s28 + $0x780] sm:$0xff] %v393_v56 }
  0x8e   : >> { %v397_v58 = vld [vmem:[%s9776_s29 + $0xf40] sm:$0xff]  ;;  %396 = vst [vmem:[%s9772_s28 + $0x790] sm:$0xff] %v395_v57 }
  0x8f   : >> { %v399_v59 = vld [vmem:[%s9776_s29 + $0xf60] sm:$0xff]  ;;  %398 = vst [vmem:[%s9772_s28 + $0x7a0] sm:$0xff] %v397_v58 }
  0x90   : >> { %v401_v60 = vld [vmem:[%s9776_s29 + $0xf80] sm:$0xff]  ;;  %400 = vst [vmem:[%s9772_s28 + $0x7b0] sm:$0xff] %v399_v59 }
  0x91   : >> { %v403_v61 = vld [vmem:[%s9776_s29 + $0xfa0] sm:$0xff]  ;;  %402 = vst [vmem:[%s9772_s28 + $0x7c0] sm:$0xff] %v401_v60 }
  0x92   : >> { %v405_v62 = vld [vmem:[%s9776_s29 + $0xfc0] sm:$0xff]  ;;  %404 = vst [vmem:[%s9772_s28 + $0x7d0] sm:$0xff] %v403_v61 }
  0x93   : >> { %v407_v63 = vld [vmem:[%s9776_s29 + $0xfe0] sm:$0xff]  ;;  %406 = vst [vmem:[%s9772_s28 + $0x7e0] sm:$0xff] %v405_v62 }
  0x94   : >> { %v409_v0 = vld [vmem:[%s9776_s29 + $0x1000] sm:$0xff]  ;;  %408 = vst [vmem:[%s9772_s28 + $0x7f0] sm:$0xff] %v407_v63 }
  0x95   : >> { %v411_v1 = vld [vmem:[%s9776_s29 + $0x1020] sm:$0xff]  ;;  %410 = vst [vmem:[%s9772_s28 + $0x800] sm:$0xff] %v409_v0 }
  0x96   : >> { %v413_v2 = vld [vmem:[%s9776_s29 + $0x1040] sm:$0xff]  ;;  %412 = vst [vmem:[%s9772_s28 + $0x810] sm:$0xff] %v411_v1 }
  0x97   : >> { %v415_v3 = vld [vmem:[%s9776_s29 + $0x1060] sm:$0xff]  ;;  %414 = vst [vmem:[%s9772_s28 + $0x820] sm:$0xff] %v413_v2 }
  0x98   : >> { %v417_v4 = vld [vmem:[%s9776_s29 + $0x1080] sm:$0xff]  ;;  %416 = vst [vmem:[%s9772_s28 + $0x830] sm:$0xff] %v415_v3 }
  0x99   : >> { %v419_v5 = vld [vmem:[%s9776_s29 + $0x10a0] sm:$0xff]  ;;  %418 = vst [vmem:[%s9772_s28 + $0x840] sm:$0xff] %v417_v4 }
  0x9a   : >> { %v421_v6 = vld [vmem:[%s9776_s29 + $0x10c0] sm:$0xff]  ;;  %420 = vst [vmem:[%s9772_s28 + $0x850] sm:$0xff] %v419_v5 }
  0x9b   : >> { %v423_v7 = vld [vmem:[%s9776_s29 + $0x10e0] sm:$0xff]  ;;  %422 = vst [vmem:[%s9772_s28 + $0x860] sm:$0xff] %v421_v6 }
  0x9c   : >> { %v425_v8 = vld [vmem:[%s9776_s29 + $0x1100] sm:$0xff]  ;;  %424 = vst [vmem:[%s9772_s28 + $0x870] sm:$0xff] %v423_v7 }
  0x9d   : >> { %v427_v9 = vld [vmem:[%s9776_s29 + $0x1120] sm:$0xff]  ;;  %426 = vst [vmem:[%s9772_s28 + $0x880] sm:$0xff] %v425_v8 }
  0x9e   : >> { %v429_v10 = vld [vmem:[%s9776_s29 + $0x1140] sm:$0xff]  ;;  %428 = vst [vmem:[%s9772_s28 + $0x890] sm:$0xff] %v427_v9 }
  0x9f   : >> { %v431_v11 = vld [vmem:[%s9776_s29 + $0x1160] sm:$0xff]  ;;  %430 = vst [vmem:[%s9772_s28 + $0x8a0] sm:$0xff] %v429_v10 }
  0xa0   : >> { %v433_v12 = vld [vmem:[%s9776_s29 + $0x1180] sm:$0xff]  ;;  %432 = vst [vmem:[%s9772_s28 + $0x8b0] sm:$0xff] %v431_v11 }
  0xa1   : >> { %v435_v13 = vld [vmem:[%s9776_s29 + $0x11a0] sm:$0xff]  ;;  %434 = vst [vmem:[%s9772_s28 + $0x8c0] sm:$0xff] %v433_v12 }
  0xa2   : >> { %v437_v14 = vld [vmem:[%s9776_s29 + $0x11c0] sm:$0xff]  ;;  %436 = vst [vmem:[%s9772_s28 + $0x8d0] sm:$0xff] %v435_v13 }
  0xa3   : >> { %v439_v15 = vld [vmem:[%s9776_s29 + $0x11e0] sm:$0xff]  ;;  %438 = vst [vmem:[%s9772_s28 + $0x8e0] sm:$0xff] %v437_v14 }
  0xa4   : >> { %v441_v16 = vld [vmem:[%s9776_s29 + $0x1200] sm:$0xff]  ;;  %440 = vst [vmem:[%s9772_s28 + $0x8f0] sm:$0xff] %v439_v15 }
  0xa5   : >> { %v443_v17 = vld [vmem:[%s9776_s29 + $0x1220] sm:$0xff]  ;;  %442 = vst [vmem:[%s9772_s28 + $0x900] sm:$0xff] %v441_v16 }
  0xa6   : >> { %v445_v18 = vld [vmem:[%s9776_s29 + $0x1240] sm:$0xff]  ;;  %444 = vst [vmem:[%s9772_s28 + $0x910] sm:$0xff] %v443_v17 }
  0xa7   : >> { %v447_v19 = vld [vmem:[%s9776_s29 + $0x1260] sm:$0xff]  ;;  %446 = vst [vmem:[%s9772_s28 + $0x920] sm:$0xff] %v445_v18 }
  0xa8   : >> { %v449_v20 = vld [vmem:[%s9776_s29 + $0x1280] sm:$0xff]  ;;  %448 = vst [vmem:[%s9772_s28 + $0x930] sm:$0xff] %v447_v19 }
  0xa9   : >> { %v451_v21 = vld [vmem:[%s9776_s29 + $0x12a0] sm:$0xff]  ;;  %450 = vst [vmem:[%s9772_s28 + $0x940] sm:$0xff] %v449_v20 }
  0xaa   : >> { %v453_v22 = vld [vmem:[%s9776_s29 + $0x12c0] sm:$0xff]  ;;  %452 = vst [vmem:[%s9772_s28 + $0x950] sm:$0xff] %v451_v21 }
  0xab   : >> { %v455_v23 = vld [vmem:[%s9776_s29 + $0x12e0] sm:$0xff]  ;;  %454 = vst [vmem:[%s9772_s28 + $0x960] sm:$0xff] %v453_v22 }
  0xac   : >> { %v457_v24 = vld [vmem:[%s9776_s29 + $0x1300] sm:$0xff]  ;;  %456 = vst [vmem:[%s9772_s28 + $0x970] sm:$0xff] %v455_v23 }
  0xad   : >> { %v459_v25 = vld [vmem:[%s9776_s29 + $0x1320] sm:$0xff]  ;;  %458 = vst [vmem:[%s9772_s28 + $0x980] sm:$0xff] %v457_v24 }
  0xae   : >> { %v461_v26 = vld [vmem:[%s9776_s29 + $0x1340] sm:$0xff]  ;;  %460 = vst [vmem:[%s9772_s28 + $0x990] sm:$0xff] %v459_v25 }
  0xaf   : >> { %v463_v27 = vld [vmem:[%s9776_s29 + $0x1360] sm:$0xff]  ;;  %462 = vst [vmem:[%s9772_s28 + $0x9a0] sm:$0xff] %v461_v26 }
  0xb0   : >> { %v465_v28 = vld [vmem:[%s9776_s29 + $0x1380] sm:$0xff]  ;;  %464 = vst [vmem:[%s9772_s28 + $0x9b0] sm:$0xff] %v463_v27 }
  0xb1   : >> { %v467_v29 = vld [vmem:[%s9776_s29 + $0x13a0] sm:$0xff]  ;;  %466 = vst [vmem:[%s9772_s28 + $0x9c0] sm:$0xff] %v465_v28 }
  0xb2   : >> { %v469_v30 = vld [vmem:[%s9776_s29 + $0x13c0] sm:$0xff]  ;;  %468 = vst [vmem:[%s9772_s28 + $0x9d0] sm:$0xff] %v467_v29 }
  0xb3   : >> { %v471_v31 = vld [vmem:[%s9776_s29 + $0x13e0] sm:$0xff]  ;;  %470 = vst [vmem:[%s9772_s28 + $0x9e0] sm:$0xff] %v469_v30 }
  0xb4   : >> { %v473_v32 = vld [vmem:[%s9776_s29 + $0x1400] sm:$0xff]  ;;  %472 = vst [vmem:[%s9772_s28 + $0x9f0] sm:$0xff] %v471_v31 }
  0xb5   : >> { %v475_v33 = vld [vmem:[%s9776_s29 + $0x1420] sm:$0xff]  ;;  %474 = vst [vmem:[%s9772_s28 + $0xa00] sm:$0xff] %v473_v32 }
  0xb6   : >> { %v477_v34 = vld [vmem:[%s9776_s29 + $0x1440] sm:$0xff]  ;;  %476 = vst [vmem:[%s9772_s28 + $0xa10] sm:$0xff] %v475_v33 }
  0xb7   : >> { %v479_v35 = vld [vmem:[%s9776_s29 + $0x1460] sm:$0xff]  ;;  %478 = vst [vmem:[%s9772_s28 + $0xa20] sm:$0xff] %v477_v34 }
  0xb8   : >> { %v481_v36 = vld [vmem:[%s9776_s29 + $0x1480] sm:$0xff]  ;;  %480 = vst [vmem:[%s9772_s28 + $0xa30] sm:$0xff] %v479_v35 }
  0xb9   : >> { %v483_v37 = vld [vmem:[%s9776_s29 + $0x14a0] sm:$0xff]  ;;  %482 = vst [vmem:[%s9772_s28 + $0xa40] sm:$0xff] %v481_v36 }
  0xba   : >> { %v485_v38 = vld [vmem:[%s9776_s29 + $0x14c0] sm:$0xff]  ;;  %484 = vst [vmem:[%s9772_s28 + $0xa50] sm:$0xff] %v483_v37 }
  0xbb   : >> { %v487_v39 = vld [vmem:[%s9776_s29 + $0x14e0] sm:$0xff]  ;;  %486 = vst [vmem:[%s9772_s28 + $0xa60] sm:$0xff] %v485_v38 }
  0xbc   : >> { %v489_v40 = vld [vmem:[%s9776_s29 + $0x1500] sm:$0xff]  ;;  %488 = vst [vmem:[%s9772_s28 + $0xa70] sm:$0xff] %v487_v39 }
  0xbd   : >> { %v491_v41 = vld [vmem:[%s9776_s29 + $0x1520] sm:$0xff]  ;;  %490 = vst [vmem:[%s9772_s28 + $0xa80] sm:$0xff] %v489_v40 }
  0xbe   : >> { %v493_v42 = vld [vmem:[%s9776_s29 + $0x1540] sm:$0xff]  ;;  %492 = vst [vmem:[%s9772_s28 + $0xa90] sm:$0xff] %v491_v41 }
  0xbf   : >> { %v495_v43 = vld [vmem:[%s9776_s29 + $0x1560] sm:$0xff]  ;;  %494 = vst [vmem:[%s9772_s28 + $0xaa0] sm:$0xff] %v493_v42 }
  0xc0   : >> { %v497_v44 = vld [vmem:[%s9776_s29 + $0x1580] sm:$0xff]  ;;  %496 = vst [vmem:[%s9772_s28 + $0xab0] sm:$0xff] %v495_v43 }
  0xc1   : >> { %v499_v45 = vld [vmem:[%s9776_s29 + $0x15a0] sm:$0xff]  ;;  %498 = vst [vmem:[%s9772_s28 + $0xac0] sm:$0xff] %v497_v44 }
  0xc2   : >> { %v501_v46 = vld [vmem:[%s9776_s29 + $0x15c0] sm:$0xff]  ;;  %500 = vst [vmem:[%s9772_s28 + $0xad0] sm:$0xff] %v499_v45 }
  0xc3   : >> { %v503_v47 = vld [vmem:[%s9776_s29 + $0x15e0] sm:$0xff]  ;;  %502 = vst [vmem:[%s9772_s28 + $0xae0] sm:$0xff] %v501_v46 }
  0xc4   : >> { %v505_v48 = vld [vmem:[%s9776_s29 + $0x1600] sm:$0xff]  ;;  %504 = vst [vmem:[%s9772_s28 + $0xaf0] sm:$0xff] %v503_v47 }
  0xc5   : >> { %v507_v49 = vld [vmem:[%s9776_s29 + $0x1620] sm:$0xff]  ;;  %506 = vst [vmem:[%s9772_s28 + $0xb00] sm:$0xff] %v505_v48 }
  0xc6   : >> { %v509_v50 = vld [vmem:[%s9776_s29 + $0x1640] sm:$0xff]  ;;  %508 = vst [vmem:[%s9772_s28 + $0xb10] sm:$0xff] %v507_v49 }
  0xc7   : >> { %v511_v51 = vld [vmem:[%s9776_s29 + $0x1660] sm:$0xff]  ;;  %510 = vst [vmem:[%s9772_s28 + $0xb20] sm:$0xff] %v509_v50 }
  0xc8   : >> { %v513_v52 = vld [vmem:[%s9776_s29 + $0x1680] sm:$0xff]  ;;  %512 = vst [vmem:[%s9772_s28 + $0xb30] sm:$0xff] %v511_v51 }
  0xc9   : >> { %v515_v53 = vld [vmem:[%s9776_s29 + $0x16a0] sm:$0xff]  ;;  %514 = vst [vmem:[%s9772_s28 + $0xb40] sm:$0xff] %v513_v52 }
  0xca   : >> { %v517_v54 = vld [vmem:[%s9776_s29 + $0x16c0] sm:$0xff]  ;;  %516 = vst [vmem:[%s9772_s28 + $0xb50] sm:$0xff] %v515_v53 }
  0xcb   : >> { %v519_v55 = vld [vmem:[%s9776_s29 + $0x16e0] sm:$0xff]  ;;  %518 = vst [vmem:[%s9772_s28 + $0xb60] sm:$0xff] %v517_v54 }
  0xcc   : >> { %v521_v56 = vld [vmem:[%s9776_s29 + $0x1700] sm:$0xff]  ;;  %520 = vst [vmem:[%s9772_s28 + $0xb70] sm:$0xff] %v519_v55 }
  0xcd   : >> { %v523_v57 = vld [vmem:[%s9776_s29 + $0x1720] sm:$0xff]  ;;  %522 = vst [vmem:[%s9772_s28 + $0xb80] sm:$0xff] %v521_v56 }
  0xce   : >> { %v525_v58 = vld [vmem:[%s9776_s29 + $0x1740] sm:$0xff]  ;;  %524 = vst [vmem:[%s9772_s28 + $0xb90] sm:$0xff] %v523_v57 }
  0xcf   : >> { %v527_v59 = vld [vmem:[%s9776_s29 + $0x1760] sm:$0xff]  ;;  %526 = vst [vmem:[%s9772_s28 + $0xba0] sm:$0xff] %v525_v58 }
  0xd0   : >> { %v529_v60 = vld [vmem:[%s9776_s29 + $0x1780] sm:$0xff]  ;;  %528 = vst [vmem:[%s9772_s28 + $0xbb0] sm:$0xff] %v527_v59 }
  0xd1   : >> { %v531_v61 = vld [vmem:[%s9776_s29 + $0x17a0] sm:$0xff]  ;;  %530 = vst [vmem:[%s9772_s28 + $0xbc0] sm:$0xff] %v529_v60 }
  0xd2   : >> { %v533_v62 = vld [vmem:[%s9776_s29 + $0x17c0] sm:$0xff]  ;;  %532 = vst [vmem:[%s9772_s28 + $0xbd0] sm:$0xff] %v531_v61 }
  0xd3   : >> { %v535_v63 = vld [vmem:[%s9776_s29 + $0x17e0] sm:$0xff]  ;;  %534 = vst [vmem:[%s9772_s28 + $0xbe0] sm:$0xff] %v533_v62 }
  0xd4   : >> { %v537_v0 = vld [vmem:[%s9776_s29 + $0x1800] sm:$0xff]  ;;  %536 = vst [vmem:[%s9772_s28 + $0xbf0] sm:$0xff] %v535_v63 }
  0xd5   : >> { %v539_v1 = vld [vmem:[%s9776_s29 + $0x1820] sm:$0xff]  ;;  %538 = vst [vmem:[%s9772_s28 + $0xc00] sm:$0xff] %v537_v0 }
  0xd6   : >> { %v541_v2 = vld [vmem:[%s9776_s29 + $0x1840] sm:$0xff]  ;;  %540 = vst [vmem:[%s9772_s28 + $0xc10] sm:$0xff] %v539_v1 }
  0xd7   : >> { %v543_v3 = vld [vmem:[%s9776_s29 + $0x1860] sm:$0xff]  ;;  %542 = vst [vmem:[%s9772_s28 + $0xc20] sm:$0xff] %v541_v2 }
  0xd8   : >> { %v545_v4 = vld [vmem:[%s9776_s29 + $0x1880] sm:$0xff]  ;;  %544 = vst [vmem:[%s9772_s28 + $0xc30] sm:$0xff] %v543_v3 }
  0xd9   : >> { %v547_v5 = vld [vmem:[%s9776_s29 + $0x18a0] sm:$0xff]  ;;  %546 = vst [vmem:[%s9772_s28 + $0xc40] sm:$0xff] %v545_v4 }
  0xda   : >> { %v549_v6 = vld [vmem:[%s9776_s29 + $0x18c0] sm:$0xff]  ;;  %548 = vst [vmem:[%s9772_s28 + $0xc50] sm:$0xff] %v547_v5 }
  0xdb   : >> { %v551_v7 = vld [vmem:[%s9776_s29 + $0x18e0] sm:$0xff]  ;;  %550 = vst [vmem:[%s9772_s28 + $0xc60] sm:$0xff] %v549_v6 }
  0xdc   : >> { %v553_v8 = vld [vmem:[%s9776_s29 + $0x1900] sm:$0xff]  ;;  %552 = vst [vmem:[%s9772_s28 + $0xc70] sm:$0xff] %v551_v7 }
  0xdd   : >> { %v555_v9 = vld [vmem:[%s9776_s29 + $0x1920] sm:$0xff]  ;;  %554 = vst [vmem:[%s9772_s28 + $0xc80] sm:$0xff] %v553_v8 }
  0xde   : >> { %v557_v10 = vld [vmem:[%s9776_s29 + $0x1940] sm:$0xff]  ;;  %556 = vst [vmem:[%s9772_s28 + $0xc90] sm:$0xff] %v555_v9 }
  0xdf   : >> { %v559_v11 = vld [vmem:[%s9776_s29 + $0x1960] sm:$0xff]  ;;  %558 = vst [vmem:[%s9772_s28 + $0xca0] sm:$0xff] %v557_v10 }
  0xe0   : >> { %v561_v12 = vld [vmem:[%s9776_s29 + $0x1980] sm:$0xff]  ;;  %560 = vst [vmem:[%s9772_s28 + $0xcb0] sm:$0xff] %v559_v11 }
  0xe1   : >> { %v563_v13 = vld [vmem:[%s9776_s29 + $0x19a0] sm:$0xff]  ;;  %562 = vst [vmem:[%s9772_s28 + $0xcc0] sm:$0xff] %v561_v12 }
  0xe2   : >> { %v565_v14 = vld [vmem:[%s9776_s29 + $0x19c0] sm:$0xff]  ;;  %564 = vst [vmem:[%s9772_s28 + $0xcd0] sm:$0xff] %v563_v13 }
  0xe3   : >> { %v567_v15 = vld [vmem:[%s9776_s29 + $0x19e0] sm:$0xff]  ;;  %566 = vst [vmem:[%s9772_s28 + $0xce0] sm:$0xff] %v565_v14 }
  0xe4   : >> { %v569_v16 = vld [vmem:[%s9776_s29 + $0x1a00] sm:$0xff]  ;;  %568 = vst [vmem:[%s9772_s28 + $0xcf0] sm:$0xff] %v567_v15 }
  0xe5   : >> { %v571_v17 = vld [vmem:[%s9776_s29 + $0x1a20] sm:$0xff]  ;;  %570 = vst [vmem:[%s9772_s28 + $0xd00] sm:$0xff] %v569_v16 }
  0xe6   : >> { %v573_v18 = vld [vmem:[%s9776_s29 + $0x1a40] sm:$0xff]  ;;  %572 = vst [vmem:[%s9772_s28 + $0xd10] sm:$0xff] %v571_v17 }
  0xe7   : >> { %v575_v19 = vld [vmem:[%s9776_s29 + $0x1a60] sm:$0xff]  ;;  %574 = vst [vmem:[%s9772_s28 + $0xd20] sm:$0xff] %v573_v18 }
  0xe8   : >> { %v577_v20 = vld [vmem:[%s9776_s29 + $0x1a80] sm:$0xff]  ;;  %576 = vst [vmem:[%s9772_s28 + $0xd30] sm:$0xff] %v575_v19 }
  0xe9   : >> { %v579_v21 = vld [vmem:[%s9776_s29 + $0x1aa0] sm:$0xff]  ;;  %578 = vst [vmem:[%s9772_s28 + $0xd40] sm:$0xff] %v577_v20 }
  0xea   : >> { %v581_v22 = vld [vmem:[%s9776_s29 + $0x1ac0] sm:$0xff]  ;;  %580 = vst [vmem:[%s9772_s28 + $0xd50] sm:$0xff] %v579_v21 }
  0xeb   : >> { %v583_v23 = vld [vmem:[%s9776_s29 + $0x1ae0] sm:$0xff]  ;;  %582 = vst [vmem:[%s9772_s28 + $0xd60] sm:$0xff] %v581_v22 }
  0xec   : >> { %v585_v24 = vld [vmem:[%s9776_s29 + $0x1b00] sm:$0xff]  ;;  %584 = vst [vmem:[%s9772_s28 + $0xd70] sm:$0xff] %v583_v23 }
  0xed   : >> { %v587_v25 = vld [vmem:[%s9776_s29 + $0x1b20] sm:$0xff]  ;;  %586 = vst [vmem:[%s9772_s28 + $0xd80] sm:$0xff] %v585_v24 }
  0xee   : >> { %v589_v26 = vld [vmem:[%s9776_s29 + $0x1b40] sm:$0xff]  ;;  %588 = vst [vmem:[%s9772_s28 + $0xd90] sm:$0xff] %v587_v25 }
  0xef   : >> { %v591_v27 = vld [vmem:[%s9776_s29 + $0x1b60] sm:$0xff]  ;;  %590 = vst [vmem:[%s9772_s28 + $0xda0] sm:$0xff] %v589_v26 }
  0xf0   : >> { %v593_v28 = vld [vmem:[%s9776_s29 + $0x1b80] sm:$0xff]  ;;  %592 = vst [vmem:[%s9772_s28 + $0xdb0] sm:$0xff] %v591_v27 }
  0xf1   : >> { %v595_v29 = vld [vmem:[%s9776_s29 + $0x1ba0] sm:$0xff]  ;;  %594 = vst [vmem:[%s9772_s28 + $0xdc0] sm:$0xff] %v593_v28 }
  0xf2   : >> { %v597_v30 = vld [vmem:[%s9776_s29 + $0x1bc0] sm:$0xff]  ;;  %596 = vst [vmem:[%s9772_s28 + $0xdd0] sm:$0xff] %v595_v29 }
  0xf3   : >> { %v599_v31 = vld [vmem:[%s9776_s29 + $0x1be0] sm:$0xff]  ;;  %598 = vst [vmem:[%s9772_s28 + $0xde0] sm:$0xff] %v597_v30 }
  0xf4   : >> { %v601_v32 = vld [vmem:[%s9776_s29 + $0x1c00] sm:$0xff]  ;;  %600 = vst [vmem:[%s9772_s28 + $0xdf0] sm:$0xff] %v599_v31 }
  0xf5   : >> { %v603_v33 = vld [vmem:[%s9776_s29 + $0x1c20] sm:$0xff]  ;;  %602 = vst [vmem:[%s9772_s28 + $0xe00] sm:$0xff] %v601_v32 }
  0xf6   : >> { %v605_v34 = vld [vmem:[%s9776_s29 + $0x1c40] sm:$0xff]  ;;  %604 = vst [vmem:[%s9772_s28 + $0xe10] sm:$0xff] %v603_v33 }
  0xf7   : >> { %v607_v35 = vld [vmem:[%s9776_s29 + $0x1c60] sm:$0xff]  ;;  %606 = vst [vmem:[%s9772_s28 + $0xe20] sm:$0xff] %v605_v34 }
  0xf8   : >> { %v609_v36 = vld [vmem:[%s9776_s29 + $0x1c80] sm:$0xff]  ;;  %608 = vst [vmem:[%s9772_s28 + $0xe30] sm:$0xff] %v607_v35 }
  0xf9   : >> { %v611_v37 = vld [vmem:[%s9776_s29 + $0x1ca0] sm:$0xff]  ;;  %610 = vst [vmem:[%s9772_s28 + $0xe40] sm:$0xff] %v609_v36 }
  0xfa   : >> { %v613_v38 = vld [vmem:[%s9776_s29 + $0x1cc0] sm:$0xff]  ;;  %612 = vst [vmem:[%s9772_s28 + $0xe50] sm:$0xff] %v611_v37 }
  0xfb   : >> { %v615_v39 = vld [vmem:[%s9776_s29 + $0x1ce0] sm:$0xff]  ;;  %614 = vst [vmem:[%s9772_s28 + $0xe60] sm:$0xff] %v613_v38 }
  0xfc   : >> { %v617_v40 = vld [vmem:[%s9776_s29 + $0x1d00] sm:$0xff]  ;;  %616 = vst [vmem:[%s9772_s28 + $0xe70] sm:$0xff] %v615_v39 }
  0xfd   : >> { %v619_v41 = vld [vmem:[%s9776_s29 + $0x1d20] sm:$0xff]  ;;  %618 = vst [vmem:[%s9772_s28 + $0xe80] sm:$0xff] %v617_v40 }
  0xfe   : >> { %v621_v42 = vld [vmem:[%s9776_s29 + $0x1d40] sm:$0xff]  ;;  %620 = vst [vmem:[%s9772_s28 + $0xe90] sm:$0xff] %v619_v41 }
  0xff   : >> { %v623_v43 = vld [vmem:[%s9776_s29 + $0x1d60] sm:$0xff]  ;;  %622 = vst [vmem:[%s9772_s28 + $0xea0] sm:$0xff] %v621_v42 }
 0x100   : >> { %v625_v44 = vld [vmem:[%s9776_s29 + $0x1d80] sm:$0xff]  ;;  %624 = vst [vmem:[%s9772_s28 + $0xeb0] sm:$0xff] %v623_v43 }
 0x101   : >> { %v627_v45 = vld [vmem:[%s9776_s29 + $0x1da0] sm:$0xff]  ;;  %626 = vst [vmem:[%s9772_s28 + $0xec0] sm:$0xff] %v625_v44 }
 0x102   : >> { %v629_v46 = vld [vmem:[%s9776_s29 + $0x1dc0] sm:$0xff]  ;;  %628 = vst [vmem:[%s9772_s28 + $0xed0] sm:$0xff] %v627_v45 }
 0x103   : >> { %v631_v47 = vld [vmem:[%s9776_s29 + $0x1de0] sm:$0xff]  ;;  %630 = vst [vmem:[%s9772_s28 + $0xee0] sm:$0xff] %v629_v46 }
 0x104   : >> { %v633_v48 = vld [vmem:[%s9776_s29 + $0x1e00] sm:$0xff]  ;;  %632 = vst [vmem:[%s9772_s28 + $0xef0] sm:$0xff] %v631_v47 }
 0x105   : >> { %v635_v49 = vld [vmem:[%s9776_s29 + $0x1e20] sm:$0xff]  ;;  %634 = vst [vmem:[%s9772_s28 + $0xf00] sm:$0xff] %v633_v48 }
 0x106   : >> { %v637_v50 = vld [vmem:[%s9776_s29 + $0x1e40] sm:$0xff]  ;;  %636 = vst [vmem:[%s9772_s28 + $0xf10] sm:$0xff] %v635_v49 }
 0x107   : >> { %v639_v51 = vld [vmem:[%s9776_s29 + $0x1e60] sm:$0xff]  ;;  %638 = vst [vmem:[%s9772_s28 + $0xf20] sm:$0xff] %v637_v50 }
 0x108   : >> { %v641_v52 = vld [vmem:[%s9776_s29 + $0x1e80] sm:$0xff]  ;;  %640 = vst [vmem:[%s9772_s28 + $0xf30] sm:$0xff] %v639_v51 }
 0x109   : >> { %v643_v53 = vld [vmem:[%s9776_s29 + $0x1ea0] sm:$0xff]  ;;  %642 = vst [vmem:[%s9772_s28 + $0xf40] sm:$0xff] %v641_v52 }
 0x10a   : >> { %v645_v54 = vld [vmem:[%s9776_s29 + $0x1ec0] sm:$0xff]  ;;  %644 = vst [vmem:[%s9772_s28 + $0xf50] sm:$0xff] %v643_v53 }
 0x10b   : >> { %v647_v55 = vld [vmem:[%s9776_s29 + $0x1ee0] sm:$0xff]  ;;  %646 = vst [vmem:[%s9772_s28 + $0xf60] sm:$0xff] %v645_v54 }
 0x10c   : >> { %v649_v56 = vld [vmem:[%s9776_s29 + $0x1f00] sm:$0xff]  ;;  %648 = vst [vmem:[%s9772_s28 + $0xf70] sm:$0xff] %v647_v55 }
 0x10d   : >> { %v651_v57 = vld [vmem:[%s9776_s29 + $0x1f20] sm:$0xff]  ;;  %650 = vst [vmem:[%s9772_s28 + $0xf80] sm:$0xff] %v649_v56 }
 0x10e   : >> { %v653_v58 = vld [vmem:[%s9776_s29 + $0x1f40] sm:$0xff]  ;;  %652 = vst [vmem:[%s9772_s28 + $0xf90] sm:$0xff] %v651_v57 }
 0x10f   : >> { %v655_v59 = vld [vmem:[%s9776_s29 + $0x1f60] sm:$0xff]  ;;  %654 = vst [vmem:[%s9772_s28 + $0xfa0] sm:$0xff] %v653_v58 }
 0x110   : >> { %v657_v60 = vld [vmem:[%s9776_s29 + $0x1f80] sm:$0xff]  ;;  %656 = vst [vmem:[%s9772_s28 + $0xfb0] sm:$0xff] %v655_v59 }
 0x111   : >> { %v659_v61 = vld [vmem:[%s9776_s29 + $0x1fa0] sm:$0xff]  ;;  %658 = vst [vmem:[%s9772_s28 + $0xfc0] sm:$0xff] %v657_v60 }
 0x112   : >> { %v661_v62 = vld [vmem:[%s9776_s29 + $0x1fc0] sm:$0xff]  ;;  %660 = vst [vmem:[%s9772_s28 + $0xfd0] sm:$0xff] %v659_v61 }
 0x113   : >> { %v663_v63 = vld [vmem:[%s9776_s29 + $0x1fe0] sm:$0xff]  ;;  %662 = vst [vmem:[%s9772_s28 + $0xfe0] sm:$0xff] %v661_v62 }
 0x114   : >> { %v665_v0 = vld [vmem:[%s9776_s29 + $0x2000] sm:$0xff]  ;;  %664 = vst [vmem:[%s9772_s28 + $0xff0] sm:$0xff] %v663_v63 }
 0x115   : >> { %v667_v1 = vld [vmem:[%s9776_s29 + $0x2020] sm:$0xff]  ;;  %666 = vst [vmem:[%s9772_s28 + $0x1000] sm:$0xff] %v665_v0 }
 0x116   : >> { %v669_v2 = vld [vmem:[%s9776_s29 + $0x2040] sm:$0xff]  ;;  %668 = vst [vmem:[%s9772_s28 + $0x1010] sm:$0xff] %v667_v1 }
 0x117   : >> { %v671_v3 = vld [vmem:[%s9776_s29 + $0x2060] sm:$0xff]  ;;  %670 = vst [vmem:[%s9772_s28 + $0x1020] sm:$0xff] %v669_v2 }
 0x118   : >> { %v673_v4 = vld [vmem:[%s9776_s29 + $0x2080] sm:$0xff]  ;;  %672 = vst [vmem:[%s9772_s28 + $0x1030] sm:$0xff] %v671_v3 }
 0x119   : >> { %v675_v5 = vld [vmem:[%s9776_s29 + $0x20a0] sm:$0xff]  ;;  %674 = vst [vmem:[%s9772_s28 + $0x1040] sm:$0xff] %v673_v4 }
 0x11a   : >> { %v677_v6 = vld [vmem:[%s9776_s29 + $0x20c0] sm:$0xff]  ;;  %676 = vst [vmem:[%s9772_s28 + $0x1050] sm:$0xff] %v675_v5 }
 0x11b   : >> { %v679_v7 = vld [vmem:[%s9776_s29 + $0x20e0] sm:$0xff]  ;;  %678 = vst [vmem:[%s9772_s28 + $0x1060] sm:$0xff] %v677_v6 }
 0x11c   : >> { %v681_v8 = vld [vmem:[%s9776_s29 + $0x2100] sm:$0xff]  ;;  %680 = vst [vmem:[%s9772_s28 + $0x1070] sm:$0xff] %v679_v7 }
 0x11d   : >> { %v683_v9 = vld [vmem:[%s9776_s29 + $0x2120] sm:$0xff]  ;;  %682 = vst [vmem:[%s9772_s28 + $0x1080] sm:$0xff] %v681_v8 }
 0x11e   : >> { %v685_v10 = vld [vmem:[%s9776_s29 + $0x2140] sm:$0xff]  ;;  %684 = vst [vmem:[%s9772_s28 + $0x1090] sm:$0xff] %v683_v9 }
 0x11f   : >> { %v687_v11 = vld [vmem:[%s9776_s29 + $0x2160] sm:$0xff]  ;;  %686 = vst [vmem:[%s9772_s28 + $0x10a0] sm:$0xff] %v685_v10 }
 0x120   : >> { %v689_v12 = vld [vmem:[%s9776_s29 + $0x2180] sm:$0xff]  ;;  %688 = vst [vmem:[%s9772_s28 + $0x10b0] sm:$0xff] %v687_v11 }
 0x121   : >> { %v691_v13 = vld [vmem:[%s9776_s29 + $0x21a0] sm:$0xff]  ;;  %690 = vst [vmem:[%s9772_s28 + $0x10c0] sm:$0xff] %v689_v12 }
 0x122   : >> { %v693_v14 = vld [vmem:[%s9776_s29 + $0x21c0] sm:$0xff]  ;;  %692 = vst [vmem:[%s9772_s28 + $0x10d0] sm:$0xff] %v691_v13 }
 0x123   : >> { %v695_v15 = vld [vmem:[%s9776_s29 + $0x21e0] sm:$0xff]  ;;  %694 = vst [vmem:[%s9772_s28 + $0x10e0] sm:$0xff] %v693_v14 }
 0x124   : >> { %v697_v16 = vld [vmem:[%s9776_s29 + $0x2200] sm:$0xff]  ;;  %696 = vst [vmem:[%s9772_s28 + $0x10f0] sm:$0xff] %v695_v15 }
 0x125   : >> { %v699_v17 = vld [vmem:[%s9776_s29 + $0x2220] sm:$0xff]  ;;  %698 = vst [vmem:[%s9772_s28 + $0x1100] sm:$0xff] %v697_v16 }
 0x126   : >> { %v701_v18 = vld [vmem:[%s9776_s29 + $0x2240] sm:$0xff]  ;;  %700 = vst [vmem:[%s9772_s28 + $0x1110] sm:$0xff] %v699_v17 }
 0x127   : >> { %v703_v19 = vld [vmem:[%s9776_s29 + $0x2260] sm:$0xff]  ;;  %702 = vst [vmem:[%s9772_s28 + $0x1120] sm:$0xff] %v701_v18 }
 0x128   : >> { %v705_v20 = vld [vmem:[%s9776_s29 + $0x2280] sm:$0xff]  ;;  %704 = vst [vmem:[%s9772_s28 + $0x1130] sm:$0xff] %v703_v19 }
 0x129   : >> { %v707_v21 = vld [vmem:[%s9776_s29 + $0x22a0] sm:$0xff]  ;;  %706 = vst [vmem:[%s9772_s28 + $0x1140] sm:$0xff] %v705_v20 }
 0x12a   : >> { %v709_v22 = vld [vmem:[%s9776_s29 + $0x22c0] sm:$0xff]  ;;  %708 = vst [vmem:[%s9772_s28 + $0x1150] sm:$0xff] %v707_v21 }
 0x12b   : >> { %v711_v23 = vld [vmem:[%s9776_s29 + $0x22e0] sm:$0xff]  ;;  %710 = vst [vmem:[%s9772_s28 + $0x1160] sm:$0xff] %v709_v22 }
 0x12c   : >> { %v713_v24 = vld [vmem:[%s9776_s29 + $0x2300] sm:$0xff]  ;;  %712 = vst [vmem:[%s9772_s28 + $0x1170] sm:$0xff] %v711_v23 }
 0x12d   : >> { %v715_v25 = vld [vmem:[%s9776_s29 + $0x2320] sm:$0xff]  ;;  %714 = vst [vmem:[%s9772_s28 + $0x1180] sm:$0xff] %v713_v24 }
 0x12e   : >> { %v717_v26 = vld [vmem:[%s9776_s29 + $0x2340] sm:$0xff]  ;;  %716 = vst [vmem:[%s9772_s28 + $0x1190] sm:$0xff] %v715_v25 }
 0x12f   : >> { %v719_v27 = vld [vmem:[%s9776_s29 + $0x2360] sm:$0xff]  ;;  %718 = vst [vmem:[%s9772_s28 + $0x11a0] sm:$0xff] %v717_v26 }
 0x130   : >> { %v721_v28 = vld [vmem:[%s9776_s29 + $0x2380] sm:$0xff]  ;;  %720 = vst [vmem:[%s9772_s28 + $0x11b0] sm:$0xff] %v719_v27  ;;  %148 = sbr.rel (!%p146_p8) target bundleno = 20 (0x14), region = 132 }
 0x131   : >> { %v723_v29 = vld [vmem:[%s9776_s29 + $0x23a0] sm:$0xff]  ;;  %722 = vst [vmem:[%s9772_s28 + $0x11c0] sm:$0xff] %v721_v28 }
 0x132   : >> { %v725_v30 = vld [vmem:[%s9776_s29 + $0x23c0] sm:$0xff]  ;;  %724 = vst [vmem:[%s9772_s28 + $0x11d0] sm:$0xff] %v723_v29 }
 0x133   : >> { %v727_v31 = vld [vmem:[%s9776_s29 + $0x23e0] sm:$0xff]  ;;  %726 = vst [vmem:[%s9772_s28 + $0x11e0] sm:$0xff] %v725_v30  ;;  %s12094_s29 = smov %s10203_s7 }
 0x134   : >> { %728 = vst [vmem:[%s9772_s28 + $0x11f0] sm:$0xff] %v727_v31  ;;  %s12093_s28 = smov %s10207_s8 }
 0x135 PF: > { %p6690_p9 = scmp.ge.s32.totalorder %s9768_s14, 1  ;;  %p1928_p10 = scmp.lt.s32.totalorder %s9768_s14, 3 }
 0x137   : > { %p1929_p11 = pnand %p6690_p9, %p1928_p10 }
 0x139   : > { %1932 = sbr.rel (%p1929_p11) target bundleno = 1062 (0x426), region = 65 }
 0x13e   : > { %s1935_s9 = sand.u32 1, %s9760_s12   ;;  %s6692_s25 = sshll.u32 %s9822_s15, 2 }
 0x13f   : > { %s9671_s10 = smul.u32 4608, %s1935_s9  ;;  %p10932_p12 = scmp.lt.s32.totalorder %s6692_s25, 7 }
 0x140   : > { %s11723_s17 = sshll.u32 %s1935_s9, 5  ;;  %s9669_s9 = sshll.u32 (%p9837_p5), %s9822_s15, 4 }
 0x141   : > { %s10479_s11 = scalar_lea.vmem [#allocation2], %s9671_s10  ;;  %s12132_s25 = smov (!%p10932_p12, %s6692_s25), 7 }
 0x142   : > { %v6879_v32 = vld [vmem:[%s10479_s11 + $0xe0] sm:$0xf]  ;;  %v9123_v33 = vld [vmem:[%s10479_s11 + $0xec] sm:$0xf0]  ;;  %s10990_s14 = scalar_lea.vmem %s12075_s2, %s12132_s25  ;;  %s11745_s12 = scalar_lea.vmem [#allocation3], %s11723_s17 }
 0x143   : > { %v7007_v34 = vld [vmem:[%s10479_s11 + $0x1e0] sm:$0xf]  ;;  %v6880_v35 = vor.u32 %v9123_v33, %v6879_v32  ;;  %v9155_v36 = vld [vmem:[%s10479_s11 + $0x1ec] sm:$0xf0]  ;;  %s6575_s21 = scalar_lea.vmem (%p9837_p5), %s12076_s3, %s9669_s9 }
 0x144   : > { %v7135_v37 = vld [vmem:[%s10479_s11 + $0x2e0] sm:$0xf]  ;;  %v9187_v38 = vld [vmem:[%s10479_s11 + $0x2ec] sm:$0xf0]  ;;  %v7008_v39 = vor.u32 %v9155_v36, %v7007_v34 }
 0x145   : > { %v7136_v40 = vor.u32 %v9187_v38, %v7135_v37  ;;  %v7263_v41 = vld [vmem:[%s10479_s11 + $0x3e0] sm:$0xf]  ;;  %v9219_v42 = vld [vmem:[%s10479_s11 + $0x3ec] sm:$0xf0]  ;;  %5542 = vmatpush.bf16.msra.mxu0 %v6880_v35 }
 0x146   : > { %v6863_v43 = vld [vmem:[%s10479_s11 + $0xc0] sm:$0xf]  ;;  %v7264_v44 = vor.u32 %v9219_v42, %v7263_v41  ;;  %v9119_v45 = vld [vmem:[%s10479_s11 + $0xcc] sm:$0xf0]  ;;  %5556 = vmatpush.bf16.msra.mxu1 %v7008_v39 }
 0x147   : > { %v6991_v46 = vld [vmem:[%s10479_s11 + $0x1c0] sm:$0xf]  ;;  %v9151_v47 = vld [vmem:[%s10479_s11 + $0x1cc] sm:$0xf0]  ;;  %5570 = vmatpush.bf16.msra.mxu2 %v7136_v40  ;;  %v6864_v48 = vor.u32 %v9119_v45, %v6863_v43 }
 0x148   : > { %v6992_v49 = vor.u32 %v9151_v47, %v6991_v46  ;;  %v7119_v50 = vld [vmem:[%s10479_s11 + $0x2c0] sm:$0xf]  ;;  %v9183_v51 = vld [vmem:[%s10479_s11 + $0x2cc] sm:$0xf0]  ;;  %5584 = vmatpush.bf16.msra.mxu3 %v7264_v44 }
 0x149   : > { %v7247_v52 = vld [vmem:[%s10479_s11 + $0x3c0] sm:$0xf]  ;;  %v7120_v53 = vor.u32 %v9183_v51, %v7119_v50  ;;  %v9215_v54 = vld [vmem:[%s10479_s11 + $0x3cc] sm:$0xf0]  ;;  %5543 = vmatpush.bf16.msra.mxu0 %v6864_v48 }
 0x14a   : > { %v6847_v55 = vld [vmem:[%s10479_s11 + $0xa0] sm:$0xf]  ;;  %v9115_v56 = vld [vmem:[%s10479_s11 + $0xac] sm:$0xf0]  ;;  %v7248_v57 = vor.u32 %v9215_v54, %v7247_v52  ;;  %5557 = vmatpush.bf16.msra.mxu1 %v6992_v49 }
 0x14b   : > { %v6975_v58 = vld [vmem:[%s10479_s11 + $0x1a0] sm:$0xf]  ;;  %v9147_v59 = vld [vmem:[%s10479_s11 + $0x1ac] sm:$0xf0]  ;;  %v6848_v61 = vor.u32 %v9115_v56, %v6847_v55  ;;  %5571 = vmatpush.bf16.msra.mxu2 %v7120_v53 }
 0x14c   : > { %v7103_v60 = vld [vmem:[%s10479_s11 + $0x2a0] sm:$0xf]  ;;  %v9179_v62 = vld [vmem:[%s10479_s11 + $0x2ac] sm:$0xf0]  ;;  %v6976_v1 = vor.u32 %v9147_v59, %v6975_v58  ;;  %5585 = vmatpush.bf16.msra.mxu3 %v7248_v57 }
 0x14d   : > { %v7231_v63 = vld [vmem:[%s10479_s11 + $0x3a0] sm:$0xf]  ;;  %v9211_v0 = vld [vmem:[%s10479_s11 + $0x3ac] sm:$0xf0]  ;;  %v7104_v2 = vor.u32 %v9179_v62, %v7103_v60  ;;  %5544 = vmatpush.bf16.msra.mxu0 %v6848_v61 }
 0x14e   : > { %v6831_v3 = vld [vmem:[%s10479_s11 + $0x80] sm:$0xf]  ;;  %v9111_v4 = vld [vmem:[%s10479_s11 + $0x8c] sm:$0xf0]  ;;  %v7232_v6 = vor.u32 %v9211_v0, %v7231_v63  ;;  %5558 = vmatpush.bf16.msra.mxu1 %v6976_v1 }
 0x14f   : > { %v6959_v5 = vld [vmem:[%s10479_s11 + $0x180] sm:$0xf]  ;;  %v9143_v7 = vld [vmem:[%s10479_s11 + $0x18c] sm:$0xf0]  ;;  %v6832_v12 = vor.u32 %v9111_v4, %v6831_v3  ;;  %5572 = vmatpush.bf16.msra.mxu2 %v7104_v2 }
 0x150   : > { %v7087_v8 = vld [vmem:[%s10479_s11 + $0x280] sm:$0xf]  ;;  %v9175_v9 = vld [vmem:[%s10479_s11 + $0x28c] sm:$0xf0]  ;;  %v6960_v13 = vor.u32 %v9143_v7, %v6959_v5  ;;  %5586 = vmatpush.bf16.msra.mxu3 %v7232_v6 }
 0x151   : > { %v7215_v10 = vld [vmem:[%s10479_s11 + $0x380] sm:$0xf]  ;;  %v9207_v11 = vld [vmem:[%s10479_s11 + $0x38c] sm:$0xf0]  ;;  %v7088_v14 = vor.u32 %v9175_v9, %v7087_v8  ;;  %5545 = vmatpush.bf16.msra.mxu0 %v6832_v12 }
 0x152   : > { %v6815_v15 = vld [vmem:[%s10479_s11 + $0x60] sm:$0xf]  ;;  %v9107_v16 = vld [vmem:[%s10479_s11 + $0x6c] sm:$0xf0]  ;;  %v7216_v18 = vor.u32 %v9207_v11, %v7215_v10  ;;  %5559 = vmatpush.bf16.msra.mxu1 %v6960_v13 }
 0x153   : > { %v6943_v17 = vld [vmem:[%s10479_s11 + $0x160] sm:$0xf]  ;;  %v9139_v19 = vld [vmem:[%s10479_s11 + $0x16c] sm:$0xf0]  ;;  %v6816_v24 = vor.u32 %v9107_v16, %v6815_v15  ;;  %5573 = vmatpush.bf16.msra.mxu2 %v7088_v14 }
 0x154   : > { %v7071_v20 = vld [vmem:[%s10479_s11 + $0x260] sm:$0xf]  ;;  %v9171_v21 = vld [vmem:[%s10479_s11 + $0x26c] sm:$0xf0]  ;;  %v6944_v25 = vor.u32 %v9139_v19, %v6943_v17  ;;  %5587 = vmatpush.bf16.msra.mxu3 %v7216_v18 }
 0x155   : > { %v7199_v22 = vld [vmem:[%s10479_s11 + $0x360] sm:$0xf]  ;;  %v9203_v23 = vld [vmem:[%s10479_s11 + $0x36c] sm:$0xf0]  ;;  %v7072_v26 = vor.u32 %v9171_v21, %v7071_v20  ;;  %5546 = vmatpush.bf16.msra.mxu0 %v6816_v24  ;;  %v9084_v21 = vld [vmem:[%s12073_s0 + $0x44] sm:$0xf0] }
 0x156   : > { %v6799_v27 = vld [vmem:[%s10479_s11 + $0x40] sm:$0xf]  ;;  %v9103_v28 = vld [vmem:[%s10479_s11 + $0x4c] sm:$0xf0]  ;;  %v7200_v30 = vor.u32 %v9203_v23, %v7199_v22  ;;  %5560 = vmatpush.bf16.msra.mxu1 %v6944_v25  ;;  %v6703_v22 = vld [vmem:[%s12073_s0 + $0x8] sm:$0xf] }
 0x157   : > { %v6927_v29 = vld [vmem:[%s10479_s11 + $0x140] sm:$0xf]  ;;  %v9135_v31 = vld [vmem:[%s10479_s11 + $0x14c] sm:$0xf0]  ;;  %v6800_v36 = vor.u32 %v9103_v28, %v6799_v27  ;;  %5574 = vmatpush.bf16.msra.mxu2 %v7072_v26 }
 0x158   : > { %v7055_v32 = vld [vmem:[%s10479_s11 + $0x240] sm:$0xf]  ;;  %v9167_v33 = vld [vmem:[%s10479_s11 + $0x24c] sm:$0xf0]  ;;  %v6928_v37 = vor.u32 %v9135_v31, %v6927_v29  ;;  %5588 = vmatpush.bf16.msra.mxu3 %v7200_v30 }
 0x159   : > { %v7183_v34 = vld [vmem:[%s10479_s11 + $0x340] sm:$0xf]  ;;  %v9199_v35 = vld [vmem:[%s10479_s11 + $0x34c] sm:$0xf0]  ;;  %v7056_v38 = vor.u32 %v9167_v33, %v7055_v32  ;;  %5547 = vmatpush.bf16.msra.mxu0 %v6800_v36 }
 0x15a   : > { %v6783_v39 = vld [vmem:[%s10479_s11 + $0x20] sm:$0xf]  ;;  %v9099_v40 = vld [vmem:[%s10479_s11 + $0x2c] sm:$0xf0]  ;;  %v7184_v42 = vor.u32 %v9199_v35, %v7183_v34  ;;  %5561 = vmatpush.bf16.msra.mxu1 %v6928_v37 }
 0x15b   : > { %v6911_v41 = vld [vmem:[%s10479_s11 + $0x120] sm:$0xf]  ;;  %v9131_v43 = vld [vmem:[%s10479_s11 + $0x12c] sm:$0xf0]  ;;  %v6784_v48 = vor.u32 %v9099_v40, %v6783_v39  ;;  %5575 = vmatpush.bf16.msra.mxu2 %v7056_v38  ;;  %v9075_v38 = vld [vmem:[%s12073_s0 + $0x4] sm:$0xf] }
 0x15c   : > { %v7039_v44 = vld [vmem:[%s10479_s11 + $0x220] sm:$0xf]  ;;  %v9163_v45 = vld [vmem:[%s10479_s11 + $0x22c] sm:$0xf0]  ;;  %v6912_v51 = vor.u32 %v9131_v43, %v6911_v41  ;;  %5589 = vmatpush.bf16.msra.mxu3 %v7184_v42  ;;  %v6697_v39 = vld [vmem:[%s12073_s0 + $0x48] sm:$0xf0] }
 0x15d   : > { %v7167_v46 = vld [vmem:[%s10479_s11 + $0x320] sm:$0xf]  ;;  %v9195_v47 = vld [vmem:[%s10479_s11 + $0x32c] sm:$0xf0]  ;;  %v7040_v52 = vor.u32 %v9163_v45, %v7039_v44  ;;  %5548 = vmatpush.bf16.msra.mxu0 %v6784_v48  ;;  %v9076_v40 = vld [vmem:[%s12073_s0 + $0xc] sm:$0xf]  ;;  %v10596_v42 = vor.u32 %v9075_v38, %v6697_v39 }
 0x15e   : > { %v6767_v49 = vld [vmem:[%s10479_s11] sm:$0xf]  ;;  %v9095_v50 = vld [vmem:[%s10479_s11 + $0xc] sm:$0xf0]  ;;  %v7168_v56 = vor.u32 %v9195_v47, %v7167_v46  ;;  %5562 = vmatpush.bf16.msra.mxu1 %v6912_v51  ;;  %v6705_v43 = vld [vmem:[%s12073_s0 + $0x50] sm:$0xf0] }
 0x15f   : > { %v6895_v53 = vld [vmem:[%s10479_s11 + $0x100] sm:$0xf]  ;;  %v9127_v54 = vld [vmem:[%s10479_s11 + $0x10c] sm:$0xf0]  ;;  %v6768_v63 = vor.u32 %v9095_v50, %v6767_v49  ;;  %5576 = vmatpush.bf16.msra.mxu2 %v7040_v52  ;;  %12098 = vst [vmem:[#allocation6_spill] sm:$0xff] %v10596_v42  ;;  %v10604_v49 = vor.u32 %v9076_v40, %v6705_v43 }
 0x160   : > { %v7023_v55 = vld [vmem:[%s10479_s11 + $0x200] sm:$0xf]  ;;  %v9159_v57 = vld [vmem:[%s10479_s11 + $0x20c] sm:$0xf0]  ;;  %v6896_v3 = vor.u32 %v9127_v54, %v6895_v53  ;;  %5590 = vmatpush.bf16.msra.mxu3 %v7168_v56 }
 0x161   : > { %v7151_v58 = vld [vmem:[%s10479_s11 + $0x300] sm:$0xf]  ;;  %v9191_v59 = vld [vmem:[%s10479_s11 + $0x30c] sm:$0xf0]  ;;  %v7024_v4 = vor.u32 %v9159_v57, %v7023_v55  ;;  %5549 = vmatpush.bf16.msra.mxu0 %v6768_v63  ;;  %12099 = vst [vmem:[#allocation7_spill] sm:$0xff] %v10604_v49 }
 0x162   : > { %v7391_v60 = vld [vmem:[%s10479_s11 + $0x4e0] sm:$0xf]  ;;  %v9251_v61 = vld [vmem:[%s10479_s11 + $0x4ec] sm:$0xf0]  ;;  %v7152_v7 = vor.u32 %v9191_v59, %v7151_v58  ;;  %5563 = vmatpush.bf16.msra.mxu1 %v6896_v3 }
 0x163   : > { %v7519_v62 = vld [vmem:[%s10479_s11 + $0x5e0] sm:$0xf]  ;;  %v9283_v0 = vld [vmem:[%s10479_s11 + $0x5ec] sm:$0xf0]  ;;  %v7392_v8 = vor.u32 %v9251_v61, %v7391_v60  ;;  %5577 = vmatpush.bf16.msra.mxu2 %v7024_v4 }
 0x164   : > { %v7647_v1 = vld [vmem:[%s10479_s11 + $0x6e0] sm:$0xf]  ;;  %v9315_v2 = vld [vmem:[%s10479_s11 + $0x6ec] sm:$0xf0]  ;;  %v7520_v11 = vor.u32 %v9283_v0, %v7519_v62  ;;  %5591 = vmatpush.bf16.msra.mxu3 %v7152_v7 }
 0x165   : > { %v7775_v5 = vld [vmem:[%s10479_s11 + $0x7e0] sm:$0xf]  ;;  %v9347_v6 = vld [vmem:[%s10479_s11 + $0x7ec] sm:$0xf0]  ;;  %v7648_v12 = vor.u32 %v9315_v2, %v7647_v1  ;;  %5598 = vmatpush.bf16.msrb.mxu0 %v7392_v8  ;;  %5564 = vmatmul.bf16.vlgmr.msra.gmra.mxu1 %v10596_v42 }
 0x166   : > { %v7375_v9 = vld [vmem:[%s10479_s11 + $0x4c0] sm:$0xf]  ;;  %v9247_v10 = vld [vmem:[%s10479_s11 + $0x4cc] sm:$0xf0]  ;;  %v7776_v16 = vor.u32 %v9347_v6, %v7775_v5  ;;  %5612 = vmatpush.bf16.msrb.mxu1 %v7520_v11 }
 0x167   : > { %v7503_v13 = vld [vmem:[%s10479_s11 + $0x5c0] sm:$0xf]  ;;  %v9279_v14 = vld [vmem:[%s10479_s11 + $0x5cc] sm:$0xf0]  ;;  %v7376_v23 = vor.u32 %v9247_v10, %v7375_v9  ;;  %5626 = vmatpush.bf16.msrb.mxu2 %v7648_v12  ;;  %5592 = vmatmul.bf16.vlgmr.msra.gmra.mxu3 %v10604_v49 }
 0x168   : > { %v7631_v15 = vld [vmem:[%s10479_s11 + $0x6c0] sm:$0xf]  ;;  %v9311_v17 = vld [vmem:[%s10479_s11 + $0x6cc] sm:$0xf0]  ;;  %v7504_v28 = vor.u32 %v9279_v14, %v7503_v13  ;;  %5640 = vmatpush.bf16.msrb.mxu3 %v7776_v16 }
 0x169   : > { %v7759_v18 = vld [vmem:[%s10479_s11 + $0x7c0] sm:$0xf]  ;;  %v9343_v19 = vld [vmem:[%s10479_s11 + $0x7cc] sm:$0xf0]  ;;  %v7632_v29 = vor.u32 %v9311_v17, %v7631_v15  ;;  %5599 = vmatpush.bf16.msrb.mxu0 %v7376_v23 }
 0x16a   : > { %v6695_v20 = vld [vmem:[%s12073_s0] sm:$0xf]  ;;  %v9243_v25 = vld [vmem:[%s10479_s11 + $0x4ac] sm:$0xf0]  ;;  %v7760_v34 = vor.u32 %v9343_v19, %v7759_v18  ;;  %5613 = vmatpush.bf16.msrb.mxu1 %v7504_v28 }
 0x16b   : > { %v7359_v24 = vld [vmem:[%s10479_s11 + $0x4a0] sm:$0xf]  ;;  %v10572_v26 = vor.u32 %v9084_v21, %v6695_v20  ;;  %v9085_v27 = vld [vmem:[%s12073_s0 + $0x4c] sm:$0xf0]  ;;  %5627 = vmatpush.bf16.msrb.mxu2 %v7632_v29 }
 0x16c   : > { %v7487_v30 = vld [vmem:[%s10479_s11 + $0x5a0] sm:$0xf]  ;;  %v9275_v31 = vld [vmem:[%s10479_s11 + $0x5ac] sm:$0xf0]  ;;  %v10580_v33 = vor.u32 %v9085_v27, %v6703_v22  ;;  %v7360_v41 = vor.u32 %v9243_v25, %v7359_v24  ;;  %5641 = vmatpush.bf16.msrb.mxu3 %v7760_v34 }
 0x16d   : > { %12096 = vst [vmem:[#allocation4_spill] sm:$0xff] %v10572_v26  ;;  %v7615_v32 = vld [vmem:[%s10479_s11 + $0x6a0] sm:$0xf]  ;;  %v9307_v35 = vld [vmem:[%s10479_s11 + $0x6ac] sm:$0xf0]  ;;  %5550 = vmatmul.bf16.vlgmr.msra.gmra.mxu0 %v10572_v26  ;;  %v7488_v44 = vor.u32 %v9275_v31, %v7487_v30 }
 0x16e   : > { %12097 = vst [vmem:[#allocation5_spill] sm:$0xff] %v10580_v33  ;;  %v7743_v36 = vld [vmem:[%s10479_s11 + $0x7a0] sm:$0xf]  ;;  %v9339_v37 = vld [vmem:[%s10479_s11 + $0x7ac] sm:$0xf0]  ;;  %5578 = vmatmul.bf16.vlgmr.msra.gmra.mxu2 %v10580_v33  ;;  %v7616_v45 = vor.u32 %v9307_v35, %v7615_v32  ;;  %5600 = vmatpush.bf16.msrb.mxu0 %v7360_v41 }
 0x16f   : > { %v7343_v46 = vld [vmem:[%s10479_s11 + $0x480] sm:$0xf]  ;;  %v9239_v47 = vld [vmem:[%s10479_s11 + $0x48c] sm:$0xf0]  ;;  %v7744_v50 = vor.u32 %v9339_v37, %v7743_v36  ;;  %5614 = vmatpush.bf16.msrb.mxu1 %v7488_v44 }
 0x170   : > { %v7471_v48 = vld [vmem:[%s10479_s11 + $0x580] sm:$0xf]  ;;  %v9271_v51 = vld [vmem:[%s10479_s11 + $0x58c] sm:$0xf0]  ;;  %v7344_v56 = vor.u32 %v9239_v47, %v7343_v46  ;;  %5628 = vmatpush.bf16.msrb.mxu2 %v7616_v45 }
 0x171   : > { %v7599_v52 = vld [vmem:[%s10479_s11 + $0x680] sm:$0xf]  ;;  %v9303_v53 = vld [vmem:[%s10479_s11 + $0x68c] sm:$0xf0]  ;;  %v7472_v57 = vor.u32 %v9271_v51, %v7471_v48  ;;  %5642 = vmatpush.bf16.msrb.mxu3 %v7744_v50 }
 0x172   : > { %v7727_v54 = vld [vmem:[%s10479_s11 + $0x780] sm:$0xf]  ;;  %v9335_v55 = vld [vmem:[%s10479_s11 + $0x78c] sm:$0xf0]  ;;  %v7600_v58 = vor.u32 %v9303_v53, %v7599_v52  ;;  %5601 = vmatpush.bf16.msrb.mxu0 %v7344_v56 }
 0x173   : > { %v7327_v59 = vld [vmem:[%s10479_s11 + $0x460] sm:$0xf]  ;;  %v9235_v60 = vld [vmem:[%s10479_s11 + $0x46c] sm:$0xf0]  ;;  %v7728_v62 = vor.u32 %v9335_v55, %v7727_v54  ;;  %5615 = vmatpush.bf16.msrb.mxu1 %v7472_v57  ;;  %v9086_v54 = vld [vmem:[%s12073_s0 + $0x54] sm:$0xf0] }
 0x174   : > { %v7455_v61 = vld [vmem:[%s10479_s11 + $0x560] sm:$0xf]  ;;  %v9267_v63 = vld [vmem:[%s10479_s11 + $0x56c] sm:$0xf0]  ;;  %v7328_v4 = vor.u32 %v9235_v60, %v7327_v59  ;;  %5629 = vmatpush.bf16.msrb.mxu2 %v7600_v58  ;;  %v6719_v57 = vld [vmem:[%s12073_s0 + $0x18] sm:$0xf] }
 0x175   : > { %v7583_v0 = vld [vmem:[%s10479_s11 + $0x660] sm:$0xf]  ;;  %v9299_v1 = vld [vmem:[%s10479_s11 + $0x66c] sm:$0xf0]  ;;  %v7456_v5 = vor.u32 %v9267_v63, %v7455_v61  ;;  %5643 = vmatpush.bf16.msrb.mxu3 %v7728_v62  ;;  %v9077_v59 = vld [vmem:[%s12073_s0 + $0x14] sm:$0xf] }
 0x176   : > { %v7711_v2 = vld [vmem:[%s10479_s11 + $0x760] sm:$0xf]  ;;  %v9331_v3 = vld [vmem:[%s10479_s11 + $0x76c] sm:$0xf0]  ;;  %v7584_v6 = vor.u32 %v9299_v1, %v7583_v0  ;;  %5602 = vmatpush.bf16.msrb.mxu0 %v7328_v4  ;;  %v6713_v62 = vld [vmem:[%s12073_s0 + $0x58] sm:$0xf0] }
 0x177   : > { %v7311_v7 = vld [vmem:[%s10479_s11 + $0x440] sm:$0xf]  ;;  %v9231_v8 = vld [vmem:[%s10479_s11 + $0x44c] sm:$0xf0]  ;;  %v7712_v10 = vor.u32 %v9331_v3, %v7711_v2  ;;  %5616 = vmatpush.bf16.msrb.mxu1 %v7456_v5  ;;  %v9078_v63 = vld [vmem:[%s12073_s0 + $0x1c] sm:$0xf] }
 0x178   : > { %v7439_v9 = vld [vmem:[%s10479_s11 + $0x540] sm:$0xf]  ;;  %v9263_v11 = vld [vmem:[%s10479_s11 + $0x54c] sm:$0xf0]  ;;  %v7312_v16 = vor.u32 %v9231_v8, %v7311_v7  ;;  %5630 = vmatpush.bf16.msrb.mxu2 %v7584_v6  ;;  %v6721_v0 = vld [vmem:[%s12073_s0 + $0x60] sm:$0xf0] }
 0x179   : > { %v7567_v12 = vld [vmem:[%s10479_s11 + $0x640] sm:$0xf]  ;;  %v9295_v13 = vld [vmem:[%s10479_s11 + $0x64c] sm:$0xf0]  ;;  %v7440_v18 = vor.u32 %v9263_v11, %v7439_v9  ;;  %5644 = vmatpush.bf16.msrb.mxu3 %v7712_v10 }
 0x17a   : > { %v7695_v14 = vld [vmem:[%s10479_s11 + $0x740] sm:$0xf]  ;;  %v9327_v15 = vld [vmem:[%s10479_s11 + $0x74c] sm:$0xf0]  ;;  %v7568_v19 = vor.u32 %v9295_v13, %v7567_v12  ;;  %5603 = vmatpush.bf16.msrb.mxu0 %v7312_v16  ;;  %v10687_v12 = vor.u32 %v9077_v59, %v6713_v62 }
 0x17b   : > { %v7295_v17 = vld [vmem:[%s10479_s11 + $0x420] sm:$0xf]  ;;  %v9227_v20 = vld [vmem:[%s10479_s11 + $0x42c] sm:$0xf0]  ;;  %v7696_v23 = vor.u32 %v9327_v15, %v7695_v14  ;;  %5617 = vmatpush.bf16.msrb.mxu1 %v7440_v18  ;;  %v10691_v15 = vor.u32 %v9078_v63, %v6721_v0 }
 0x17c   : > { %v7423_v21 = vld [vmem:[%s10479_s11 + $0x520] sm:$0xf]  ;;  %v9259_v22 = vld [vmem:[%s10479_s11 + $0x52c] sm:$0xf0]  ;;  %v7296_v31 = vor.u32 %v9227_v20, %v7295_v17  ;;  %5631 = vmatpush.bf16.msrb.mxu2 %v7568_v19  ;;  %12102 = vst [vmem:[#allocation10_spill] sm:$0xff] %v10687_v12 }
 0x17d   : > { %v7551_v24 = vld [vmem:[%s10479_s11 + $0x620] sm:$0xf]  ;;  %v9291_v25 = vld [vmem:[%s10479_s11 + $0x62c] sm:$0xf0]  ;;  %v7424_v37 = vor.u32 %v9259_v22, %v7423_v21  ;;  %5645 = vmatpush.bf16.msrb.mxu3 %v7696_v23  ;;  %12103 = vst [vmem:[#allocation11_spill] sm:$0xff] %v10691_v15 }
 0x17e   : > { %v7679_v27 = vld [vmem:[%s10479_s11 + $0x720] sm:$0xf]  ;;  %v9323_v28 = vld [vmem:[%s10479_s11 + $0x72c] sm:$0xf0]  ;;  %v7552_v38 = vor.u32 %v9291_v25, %v7551_v24  ;;  %5604 = vmatpush.bf16.msrb.mxu0 %v7296_v31 }
 0x17f   : > { %v7279_v29 = vld [vmem:[%s10479_s11 + $0x400] sm:$0xf]  ;;  %v9223_v30 = vld [vmem:[%s10479_s11 + $0x40c] sm:$0xf0]  ;;  %v7680_v43 = vor.u32 %v9323_v28, %v7679_v27  ;;  %5618 = vmatpush.bf16.msrb.mxu1 %v7424_v37 }
 0x180   : > { %v7407_v32 = vld [vmem:[%s10479_s11 + $0x500] sm:$0xf]  ;;  %v9255_v34 = vld [vmem:[%s10479_s11 + $0x50c] sm:$0xf0]  ;;  %v7280_v51 = vor.u32 %v9223_v30, %v7279_v29  ;;  %5632 = vmatpush.bf16.msrb.mxu2 %v7552_v38 }
 0x181   : > { %v7535_v35 = vld [vmem:[%s10479_s11 + $0x600] sm:$0xf]  ;;  %v9287_v36 = vld [vmem:[%s10479_s11 + $0x60c] sm:$0xf0]  ;;  %v7408_v55 = vor.u32 %v9255_v34, %v7407_v32  ;;  %5646 = vmatpush.bf16.msrb.mxu3 %v7680_v43 }
 0x182   : > { %v7663_v39 = vld [vmem:[%s10479_s11 + $0x700] sm:$0xf]  ;;  %v9319_v40 = vld [vmem:[%s10479_s11 + $0x70c] sm:$0xf0]  ;;  %v7536_v56 = vor.u32 %v9287_v36, %v7535_v35  ;;  %5605 = vmatpush.bf16.msrb.mxu0 %v7280_v51 }
 0x183   : > { %v7903_v41 = vld [vmem:[%s10479_s11 + $0x8e0] sm:$0xf]  ;;  %v9379_v44 = vld [vmem:[%s10479_s11 + $0x8ec] sm:$0xf0]  ;;  %v7664_v60 = vor.u32 %v9319_v40, %v7663_v39  ;;  %5619 = vmatpush.bf16.msrb.mxu1 %v7408_v55 }
 0x184   : > { %v8031_v45 = vld [vmem:[%s10479_s11 + $0x9e0] sm:$0xf]  ;;  %v9411_v46 = vld [vmem:[%s10479_s11 + $0x9ec] sm:$0xf0]  ;;  %v7904_v61 = vor.u32 %v9379_v44, %v7903_v41  ;;  %5633 = vmatpush.bf16.msrb.mxu2 %v7536_v56 }
 0x185   : > { %v8159_v47 = vld [vmem:[%s10479_s11 + $0xae0] sm:$0xf]  ;;  %v9443_v48 = vld [vmem:[%s10479_s11 + $0xaec] sm:$0xf0]  ;;  %v8032_v1 = vor.u32 %v9411_v46, %v8031_v45  ;;  %5647 = vmatpush.bf16.msrb.mxu3 %v7664_v60 }
 0x186   : > { %v8287_v50 = vld [vmem:[%s10479_s11 + $0xbe0] sm:$0xf]  ;;  %v9475_v52 = vld [vmem:[%s10479_s11 + $0xbec] sm:$0xf0]  ;;  %v8160_v2 = vor.u32 %v9443_v48, %v8159_v47  ;;  %5654 = vmatpush.bf16.msra.mxu0 %v7904_v61  ;;  %5620 = vmatmul.bf16.vlgmr.msrb.gmra.mxu1 %v10687_v12 }
 0x187   : > { %v6711_v53 = vld [vmem:[%s12073_s0 + $0x10] sm:$0xf]  ;;  %v9087_v58 = vld [vmem:[%s12073_s0 + $0x5c] sm:$0xf0]  ;;  %v8288_v6 = vor.u32 %v9475_v52, %v8287_v50  ;;  %5668 = vmatpush.bf16.msra.mxu1 %v8032_v1 }
 0x188   : > { %v7887_v3 = vld [vmem:[%s10479_s11 + $0x8c0] sm:$0xf]  ;;  %v9375_v4 = vld [vmem:[%s10479_s11 + $0x8cc] sm:$0xf0]  ;;  %v10680_v7 = vor.u32 %v9086_v54, %v6711_v53  ;;  %v10685_v11 = vor.u32 %v9087_v58, %v6719_v57  ;;  %5682 = vmatpush.bf16.msra.mxu2 %v8160_v2  ;;  %5648 = vmatmul.bf16.vlgmr.msrb.gmra.mxu3 %v10691_v15 }
 0x189   : > { %v8015_v5 = vld [vmem:[%s10479_s11 + $0x9c0] sm:$0xf]  ;;  %v9407_v8 = vld [vmem:[%s10479_s11 + $0x9cc] sm:$0xf0]  ;;  %v7888_v16 = vor.u32 %v9375_v4, %v7887_v3  ;;  %5696 = vmatpush.bf16.msra.mxu3 %v8288_v6 }
 0x18a   : > { %12100 = vst [vmem:[#allocation8_spill] sm:$0xff] %v10680_v7  ;;  %v8143_v9 = vld [vmem:[%s10479_s11 + $0xac0] sm:$0xf]  ;;  %v9439_v10 = vld [vmem:[%s10479_s11 + $0xacc] sm:$0xf0]  ;;  %v8016_v17 = vor.u32 %v9407_v8, %v8015_v5  ;;  %5606 = vmatmul.bf16.vlgmr.msrb.gmra.mxu0 %v10680_v7  ;;  %5634 = vmatmul.bf16.vlgmr.msrb.gmra.mxu2 %v10685_v11 }
 0x18b   : > { %12101 = vst [vmem:[#allocation9_spill] sm:$0xff] %v10685_v11  ;;  %v8271_v13 = vld [vmem:[%s10479_s11 + $0xbc0] sm:$0xf]  ;;  %v9471_v14 = vld [vmem:[%s10479_s11 + $0xbcc] sm:$0xf0]  ;;  %v8144_v18 = vor.u32 %v9439_v10, %v8143_v9  ;;  %5655 = vmatpush.bf16.msra.mxu0 %v7888_v16 }
 0x18c   : > { %v7871_v19 = vld [vmem:[%s10479_s11 + $0x8a0] sm:$0xf]  ;;  %v9371_v20 = vld [vmem:[%s10479_s11 + $0x8ac] sm:$0xf0]  ;;  %v8272_v22 = vor.u32 %v9471_v14, %v8271_v13  ;;  %5669 = vmatpush.bf16.msra.mxu1 %v8016_v17 }
 0x18d   : > { %v7999_v21 = vld [vmem:[%s10479_s11 + $0x9a0] sm:$0xf]  ;;  %v9403_v23 = vld [vmem:[%s10479_s11 + $0x9ac] sm:$0xf0]  ;;  %v7872_v29 = vor.u32 %v9371_v20, %v7871_v19  ;;  %5683 = vmatpush.bf16.msra.mxu2 %v8144_v18 }
 0x18e   : > { %v8127_v24 = vld [vmem:[%s10479_s11 + $0xaa0] sm:$0xf]  ;;  %v9435_v25 = vld [vmem:[%s10479_s11 + $0xaac] sm:$0xf0]  ;;  %v8000_v30 = vor.u32 %v9403_v23, %v7999_v21  ;;  %5697 = vmatpush.bf16.msra.mxu3 %v8272_v22 }
 0x18f   : > { %v8255_v27 = vld [vmem:[%s10479_s11 + $0xba0] sm:$0xf]  ;;  %v9467_v28 = vld [vmem:[%s10479_s11 + $0xbac] sm:$0xf0]  ;;  %v8128_v31 = vor.u32 %v9435_v25, %v8127_v24  ;;  %5656 = vmatpush.bf16.msra.mxu0 %v7872_v29 }
 0x190   : > { %v7855_v32 = vld [vmem:[%s10479_s11 + $0x880] sm:$0xf]  ;;  %v9367_v34 = vld [vmem:[%s10479_s11 + $0x88c] sm:$0xf0]  ;;  %v8256_v36 = vor.u32 %v9467_v28, %v8255_v27  ;;  %5670 = vmatpush.bf16.msra.mxu1 %v8000_v30 }
 0x191   : > { %v7983_v35 = vld [vmem:[%s10479_s11 + $0x980] sm:$0xf]  ;;  %v9399_v37 = vld [vmem:[%s10479_s11 + $0x98c] sm:$0xf0]  ;;  %v7856_v43 = vor.u32 %v9367_v34, %v7855_v32  ;;  %5684 = vmatpush.bf16.msra.mxu2 %v8128_v31 }
 0x192   : > { %v8111_v38 = vld [vmem:[%s10479_s11 + $0xa80] sm:$0xf]  ;;  %v9431_v39 = vld [vmem:[%s10479_s11 + $0xa8c] sm:$0xf0]  ;;  %v7984_v44 = vor.u32 %v9399_v37, %v7983_v35  ;;  %5698 = vmatpush.bf16.msra.mxu3 %v8256_v36 }
 0x193   : > { %v8239_v40 = vld [vmem:[%s10479_s11 + $0xb80] sm:$0xf]  ;;  %v9463_v41 = vld [vmem:[%s10479_s11 + $0xb8c] sm:$0xf0]  ;;  %v8112_v45 = vor.u32 %v9431_v39, %v8111_v38  ;;  %5657 = vmatpush.bf16.msra.mxu0 %v7856_v43 }
 0x194   : > { %v7839_v46 = vld [vmem:[%s10479_s11 + $0x860] sm:$0xf]  ;;  %v9363_v47 = vld [vmem:[%s10479_s11 + $0x86c] sm:$0xf0]  ;;  %v8240_v50 = vor.u32 %v9463_v41, %v8239_v40  ;;  %5671 = vmatpush.bf16.msra.mxu1 %v7984_v44 }
 0x195   : > { %v7967_v48 = vld [vmem:[%s10479_s11 + $0x960] sm:$0xf]  ;;  %v9395_v51 = vld [vmem:[%s10479_s11 + $0x96c] sm:$0xf0]  ;;  %v7840_v56 = vor.u32 %v9363_v47, %v7839_v46  ;;  %5685 = vmatpush.bf16.msra.mxu2 %v8112_v45  ;;  %v9088_v45 = vld [vmem:[%s12073_s0 + $0x64] sm:$0xf0] }
 0x196   : > { %v8095_v52 = vld [vmem:[%s10479_s11 + $0xa60] sm:$0xf]  ;;  %v9427_v53 = vld [vmem:[%s10479_s11 + $0xa6c] sm:$0xf0]  ;;  %v7968_v57 = vor.u32 %v9395_v51, %v7967_v48  ;;  %5699 = vmatpush.bf16.msra.mxu3 %v8240_v50  ;;  %v6735_v48 = vld [vmem:[%s12073_s0 + $0x28] sm:$0xf] }
 0x197   : > { %v8223_v54 = vld [vmem:[%s10479_s11 + $0xb60] sm:$0xf]  ;;  %v9459_v55 = vld [vmem:[%s10479_s11 + $0xb6c] sm:$0xf0]  ;;  %v8096_v58 = vor.u32 %v9427_v53, %v8095_v52  ;;  %5658 = vmatpush.bf16.msra.mxu0 %v7840_v56  ;;  %v9079_v51 = vld [vmem:[%s12073_s0 + $0x24] sm:$0xf] }
 0x198   : > { %v7823_v59 = vld [vmem:[%s10479_s11 + $0x840] sm:$0xf]  ;;  %v9359_v60 = vld [vmem:[%s10479_s11 + $0x84c] sm:$0xf0]  ;;  %v8224_v62 = vor.u32 %v9459_v55, %v8223_v54  ;;  %5672 = vmatpush.bf16.msra.mxu1 %v7968_v57  ;;  %v6729_v54 = vld [vmem:[%s12073_s0 + $0x68] sm:$0xf0] }
 0x199   : > { %v7951_v61 = vld [vmem:[%s10479_s11 + $0x940] sm:$0xf]  ;;  %v9391_v63 = vld [vmem:[%s10479_s11 + $0x94c] sm:$0xf0]  ;;  %v7824_v4 = vor.u32 %v9359_v60, %v7823_v59  ;;  %5686 = vmatpush.bf16.msra.mxu2 %v8096_v58  ;;  %v9080_v55 = vld [vmem:[%s12073_s0 + $0x2c] sm:$0xf] }
 0x19a   : > { %v8079_v0 = vld [vmem:[%s10479_s11 + $0xa40] sm:$0xf]  ;;  %v9423_v1 = vld [vmem:[%s10479_s11 + $0xa4c] sm:$0xf0]  ;;  %v7952_v6 = vor.u32 %v9391_v63, %v7951_v61  ;;  %5700 = vmatpush.bf16.msra.mxu3 %v8224_v62  ;;  %v6737_v56 = vld [vmem:[%s12073_s0 + $0x70] sm:$0xf0] }
 0x19b   : > { %v8207_v2 = vld [vmem:[%s10479_s11 + $0xb40] sm:$0xf]  ;;  %v9455_v3 = vld [vmem:[%s10479_s11 + $0xb4c] sm:$0xf0]  ;;  %v8080_v8 = vor.u32 %v9423_v1, %v8079_v0  ;;  %5659 = vmatpush.bf16.msra.mxu0 %v7824_v4  ;;  %v10787_v4 = vor.u32 %v9079_v51, %v6729_v54 }
 0x19c   : > { %v7807_v5 = vld [vmem:[%s10479_s11 + $0x820] sm:$0xf]  ;;  %v9355_v9 = vld [vmem:[%s10479_s11 + $0x82c] sm:$0xf0]  ;;  %v8208_v14 = vor.u32 %v9455_v3, %v8207_v2  ;;  %5673 = vmatpush.bf16.msra.mxu1 %v7952_v6 }
 0x19d   : > { %v7935_v10 = vld [vmem:[%s10479_s11 + $0x920] sm:$0xf]  ;;  %v9387_v13 = vld [vmem:[%s10479_s11 + $0x92c] sm:$0xf0]  ;;  %v7808_v22 = vor.u32 %v9355_v9, %v7807_v5  ;;  %5687 = vmatpush.bf16.msra.mxu2 %v8080_v8  ;;  %v10791_v8 = vor.u32 %v9080_v55, %v6737_v56 }
 0x19e   : > { %v8063_v16 = vld [vmem:[%s10479_s11 + $0xa20] sm:$0xf]  ;;  %v9419_v17 = vld [vmem:[%s10479_s11 + $0xa2c] sm:$0xf0]  ;;  %v7936_v28 = vor.u32 %v9387_v13, %v7935_v10  ;;  %5701 = vmatpush.bf16.msra.mxu3 %v8208_v14 }
 0x19f   : > { %v8191_v18 = vld [vmem:[%s10479_s11 + $0xb20] sm:$0xf]  ;;  %v9451_v19 = vld [vmem:[%s10479_s11 + $0xb2c] sm:$0xf0]  ;;  %v8064_v29 = vor.u32 %v9419_v17, %v8063_v16  ;;  %5660 = vmatpush.bf16.msra.mxu0 %v7808_v22 }
 0x1a0   : > { %v7791_v20 = vld [vmem:[%s10479_s11 + $0x800] sm:$0xf]  ;;  %v9351_v21 = vld [vmem:[%s10479_s11 + $0x80c] sm:$0xf0]  ;;  %v8192_v34 = vor.u32 %v9451_v19, %v8191_v18  ;;  %5674 = vmatpush.bf16.msra.mxu1 %v7936_v28 }
 0x1a1   : > { %v7919_v23 = vld [vmem:[%s10479_s11 + $0x900] sm:$0xf]  ;;  %v9383_v24 = vld [vmem:[%s10479_s11 + $0x90c] sm:$0xf0]  ;;  %v7792_v41 = vor.u32 %v9351_v21, %v7791_v20  ;;  %5688 = vmatpush.bf16.msra.mxu2 %v8064_v29 }
 0x1a2   : > { %v8047_v25 = vld [vmem:[%s10479_s11 + $0xa00] sm:$0xf]  ;;  %v9415_v27 = vld [vmem:[%s10479_s11 + $0xa0c] sm:$0xf0]  ;;  %v7920_v46 = vor.u32 %v9383_v24, %v7919_v23  ;;  %5702 = vmatpush.bf16.msra.mxu3 %v8192_v34 }
 0x1a3   : > { %v8175_v30 = vld [vmem:[%s10479_s11 + $0xb00] sm:$0xf]  ;;  %v9447_v31 = vld [vmem:[%s10479_s11 + $0xb0c] sm:$0xf0]  ;;  %v8048_v47 = vor.u32 %v9415_v27, %v8047_v25  ;;  %5661 = vmatpush.bf16.msra.mxu0 %v7792_v41 }
 0x1a4   : > { %v8415_v32 = vld [vmem:[%s10479_s11 + $0xce0] sm:$0xf]  ;;  %v9507_v35 = vld [vmem:[%s10479_s11 + $0xcec] sm:$0xf0]  ;;  %v8176_v52 = vor.u32 %v9447_v31, %v8175_v30  ;;  %5675 = vmatpush.bf16.msra.mxu1 %v7920_v46 }
 0x1a5   : > { %v8543_v36 = vld [vmem:[%s10479_s11 + $0xde0] sm:$0xf]  ;;  %v9539_v37 = vld [vmem:[%s10479_s11 + $0xdec] sm:$0xf0]  ;;  %v8416_v53 = vor.u32 %v9507_v35, %v8415_v32  ;;  %5689 = vmatpush.bf16.msra.mxu2 %v8048_v47 }
 0x1a6   : > { %v8671_v38 = vld [vmem:[%s10479_s11 + $0xee0] sm:$0xf]  ;;  %v9571_v39 = vld [vmem:[%s10479_s11 + $0xeec] sm:$0xf0]  ;;  %v8544_v57 = vor.u32 %v9539_v37, %v8543_v36  ;;  %5703 = vmatpush.bf16.msra.mxu3 %v8176_v52 }
 0x1a7   : > { %v8799_v40 = vld [vmem:[%s10479_s11 + $0xfe0] sm:$0xf]  ;;  %v9603_v43 = vld [vmem:[%s10479_s11 + $0xfec] sm:$0xf0]  ;;  %v8672_v58 = vor.u32 %v9571_v39, %v8671_v38  ;;  %5710 = vmatpush.bf16.msrb.mxu0 %v8416_v53  ;;  %5676 = vmatmul.bf16.vlgmr.msra.gmra.mxu1 %v10787_v4 }
 0x1a8   : > { %v6727_v44 = vld [vmem:[%s12073_s0 + $0x20] sm:$0xf]  ;;  %v9089_v50 = vld [vmem:[%s12073_s0 + $0x6c] sm:$0xf0]  ;;  %v8800_v62 = vor.u32 %v9603_v43, %v8799_v40  ;;  %5724 = vmatpush.bf16.msrb.mxu1 %v8544_v57 }
 0x1a9   : > { %v8399_v59 = vld [vmem:[%s10479_s11 + $0xcc0] sm:$0xf]  ;;  %v9503_v60 = vld [vmem:[%s10479_s11 + $0xccc] sm:$0xf0]  ;;  %v10780_v63 = vor.u32 %v9088_v45, %v6727_v44  ;;  %v10785_v3 = vor.u32 %v9089_v50, %v6735_v48  ;;  %5738 = vmatpush.bf16.msrb.mxu2 %v8672_v58  ;;  %5704 = vmatmul.bf16.vlgmr.msra.gmra.mxu3 %v10791_v8 }
 0x1aa   : > { %v8527_v61 = vld [vmem:[%s10479_s11 + $0xdc0] sm:$0xf]  ;;  %v9535_v0 = vld [vmem:[%s10479_s11 + $0xdcc] sm:$0xf0]  ;;  %v8400_v9 = vor.u32 %v9503_v60, %v8399_v59  ;;  %5752 = vmatpush.bf16.msrb.mxu3 %v8800_v62 }
 0x1ab   : > { %v8655_v1 = vld [vmem:[%s10479_s11 + $0xec0] sm:$0xf]  ;;  %v9567_v2 = vld [vmem:[%s10479_s11 + $0xecc] sm:$0xf0]  ;;  %v8528_v10 = vor.u32 %v9535_v0, %v8527_v61  ;;  %5662 = vmatmul.bf16.vlgmr.msra.gmra.mxu0 %v10780_v63  ;;  %5690 = vmatmul.bf16.vlgmr.msra.gmra.mxu2 %v10785_v3 }
 0x1ac   : > { %v8783_v5 = vld [vmem:[%s10479_s11 + $0xfc0] sm:$0xf]  ;;  %v9599_v6 = vld [vmem:[%s10479_s11 + $0xfcc] sm:$0xf0]  ;;  %v8656_v13 = vor.u32 %v9567_v2, %v8655_v1  ;;  %5711 = vmatpush.bf16.msrb.mxu0 %v8400_v9 }
 0x1ad   : > { %v8383_v14 = vld [vmem:[%s10479_s11 + $0xca0] sm:$0xf]  ;;  %v9499_v16 = vld [vmem:[%s10479_s11 + $0xcac] sm:$0xf0]  ;;  %v8784_v18 = vor.u32 %v9599_v6, %v8783_v5  ;;  %5725 = vmatpush.bf16.msrb.mxu1 %v8528_v10 }
 0x1ae   : > { %v8511_v17 = vld [vmem:[%s10479_s11 + $0xda0] sm:$0xf]  ;;  %v9531_v19 = vld [vmem:[%s10479_s11 + $0xdac] sm:$0xf0]  ;;  %v8384_v24 = vor.u32 %v9499_v16, %v8383_v14  ;;  %5739 = vmatpush.bf16.msrb.mxu2 %v8656_v13 }
 0x1af   : > { %v8639_v20 = vld [vmem:[%s10479_s11 + $0xea0] sm:$0xf]  ;;  %v9563_v21 = vld [vmem:[%s10479_s11 + $0xeac] sm:$0xf0]  ;;  %v8512_v25 = vor.u32 %v9531_v19, %v8511_v17  ;;  %5753 = vmatpush.bf16.msrb.mxu3 %v8784_v18 }
 0x1b0   : > { %v8767_v22 = vld [vmem:[%s10479_s11 + $0xfa0] sm:$0xf]  ;;  %v9595_v23 = vld [vmem:[%s10479_s11 + $0xfac] sm:$0xf0]  ;;  %v8640_v27 = vor.u32 %v9563_v21, %v8639_v20  ;;  %5712 = vmatpush.bf16.msrb.mxu0 %v8384_v24 }
 0x1b1   : > { %v8367_v28 = vld [vmem:[%s10479_s11 + $0xc80] sm:$0xf]  ;;  %v9495_v29 = vld [vmem:[%s10479_s11 + $0xc8c] sm:$0xf0]  ;;  %v8768_v31 = vor.u32 %v9595_v23, %v8767_v22  ;;  %5726 = vmatpush.bf16.msrb.mxu1 %v8512_v25 }
 0x1b2   : > { %v8495_v30 = vld [vmem:[%s10479_s11 + $0xd80] sm:$0xf]  ;;  %v9527_v32 = vld [vmem:[%s10479_s11 + $0xd8c] sm:$0xf0]  ;;  %v8368_v38 = vor.u32 %v9495_v29, %v8367_v28  ;;  %5740 = vmatpush.bf16.msrb.mxu2 %v8640_v27 }
 0x1b3   : > { %v8623_v34 = vld [vmem:[%s10479_s11 + $0xe80] sm:$0xf]  ;;  %v9559_v35 = vld [vmem:[%s10479_s11 + $0xe8c] sm:$0xf0]  ;;  %v8496_v39 = vor.u32 %v9527_v32, %v8495_v30  ;;  %5754 = vmatpush.bf16.msrb.mxu3 %v8768_v31 }
 0x1b4   : > { %v8751_v36 = vld [vmem:[%s10479_s11 + $0xf80] sm:$0xf]  ;;  %v9591_v37 = vld [vmem:[%s10479_s11 + $0xf8c] sm:$0xf0]  ;;  %v8624_v40 = vor.u32 %v9559_v35, %v8623_v34  ;;  %5713 = vmatpush.bf16.msrb.mxu0 %v8368_v38  ;;  %v9121_v38 = vld [vmem:[%s10479_s11 + $0xe4] sm:$0xf] }
 0x1b5   : > { %v8351_v41 = vld [vmem:[%s10479_s11 + $0xc60] sm:$0xf]  ;;  %v9491_v43 = vld [vmem:[%s10479_s11 + $0xc6c] sm:$0xf0]  ;;  %v8752_v45 = vor.u32 %v9591_v37, %v8751_v36  ;;  %5727 = vmatpush.bf16.msrb.mxu1 %v8496_v39  ;;  %v6881_v39 = vld [vmem:[%s10479_s11 + $0xf0] sm:$0xf0] }
 0x1b6   : > { %v8479_v44 = vld [vmem:[%s10479_s11 + $0xd60] sm:$0xf]  ;;  %v9523_v46 = vld [vmem:[%s10479_s11 + $0xd6c] sm:$0xf0]  ;;  %v8352_v52 = vor.u32 %v9491_v43, %v8351_v41  ;;  %5741 = vmatpush.bf16.msrb.mxu2 %v8624_v40  ;;  %v9153_v40 = vld [vmem:[%s10479_s11 + $0x1e4] sm:$0xf] }
 0x1b7   : > { %v8607_v47 = vld [vmem:[%s10479_s11 + $0xe60] sm:$0xf]  ;;  %v9555_v48 = vld [vmem:[%s10479_s11 + $0xe6c] sm:$0xf0]  ;;  %v8480_v53 = vor.u32 %v9523_v46, %v8479_v44  ;;  %5755 = vmatpush.bf16.msrb.mxu3 %v8752_v45  ;;  %v7009_v43 = vld [vmem:[%s10479_s11 + $0x1f0] sm:$0xf0] }
 0x1b8   : > { %v8735_v50 = vld [vmem:[%s10479_s11 + $0xf60] sm:$0xf]  ;;  %v9587_v51 = vld [vmem:[%s10479_s11 + $0xf6c] sm:$0xf0]  ;;  %v8608_v54 = vor.u32 %v9555_v48, %v8607_v47  ;;  %5714 = vmatpush.bf16.msrb.mxu0 %v8352_v52  ;;  %v9090_v45 = vld [vmem:[%s12073_s0 + $0x74] sm:$0xf0] }
 0x1b9   : > { %v8335_v55 = vld [vmem:[%s10479_s11 + $0xc40] sm:$0xf]  ;;  %v9487_v56 = vld [vmem:[%s10479_s11 + $0xc4c] sm:$0xf0]  ;;  %v8736_v58 = vor.u32 %v9587_v51, %v8735_v50  ;;  %5728 = vmatpush.bf16.msrb.mxu1 %v8480_v53  ;;  %v6751_v48 = vld [vmem:[%s12073_s0 + $0x38] sm:$0xf] }
 0x1ba   : > { %v8463_v57 = vld [vmem:[%s10479_s11 + $0xd40] sm:$0xf]  ;;  %v9519_v59 = vld [vmem:[%s10479_s11 + $0xd4c] sm:$0xf0]  ;;  %v8336_v1 = vor.u32 %v9487_v56, %v8335_v55  ;;  %5742 = vmatpush.bf16.msrb.mxu2 %v8608_v54  ;;  %v9081_v51 = vld [vmem:[%s12073_s0 + $0x34] sm:$0xf] }
 0x1bb   : > { %v8591_v60 = vld [vmem:[%s10479_s11 + $0xe40] sm:$0xf]  ;;  %v9551_v61 = vld [vmem:[%s10479_s11 + $0xe4c] sm:$0xf0]  ;;  %v8464_v5 = vor.u32 %v9519_v59, %v8463_v57  ;;  %5756 = vmatpush.bf16.msrb.mxu3 %v8736_v58  ;;  %v6745_v54 = vld [vmem:[%s12073_s0 + $0x78] sm:$0xf0]  ;;  %v6884_v58 = vor.u32 %v9121_v38, %v6881_v39 }
 0x1bc   : > { %v8719_v62 = vld [vmem:[%s10479_s11 + $0xf40] sm:$0xf]  ;;  %v9583_v0 = vld [vmem:[%s10479_s11 + $0xf4c] sm:$0xf0]  ;;  %v8592_v6 = vor.u32 %v9551_v61, %v8591_v60  ;;  %5715 = vmatpush.bf16.msrb.mxu0 %v8336_v1  ;;  %v9082_v55 = vld [vmem:[%s12073_s0 + $0x3c] sm:$0xf] }
 0x1bd   : > { %v8319_v2 = vld [vmem:[%s10479_s11 + $0xc20] sm:$0xf]  ;;  %v9483_v9 = vld [vmem:[%s10479_s11 + $0xc2c] sm:$0xf0]  ;;  %v8720_v14 = vor.u32 %v9583_v0, %v8719_v62  ;;  %5729 = vmatpush.bf16.msrb.mxu1 %v8464_v5  ;;  %v6753_v56 = vld [vmem:[%s12073_s0 + $0x80] sm:$0xf0]  ;;  %v7012_v62 = vor.u32 %v9153_v40, %v7009_v43 }
 0x1be   : > { %v8447_v10 = vld [vmem:[%s10479_s11 + $0xd20] sm:$0xf]  ;;  %v9515_v13 = vld [vmem:[%s10479_s11 + $0xd2c] sm:$0xf0]  ;;  %v8320_v22 = vor.u32 %v9483_v9, %v8319_v2  ;;  %5743 = vmatpush.bf16.msrb.mxu2 %v8592_v6  ;;  %v9117_v2 = vld [vmem:[%s10479_s11 + $0xc4] sm:$0xf]  ;;  %v10887_v9 = vor.u32 %v9081_v51, %v6745_v54 }
 0x1bf   : > { %v8575_v16 = vld [vmem:[%s10479_s11 + $0xe20] sm:$0xf]  ;;  %v9547_v17 = vld [vmem:[%s10479_s11 + $0xe2c] sm:$0xf0]  ;;  %v8448_v28 = vor.u32 %v9515_v13, %v8447_v10  ;;  %5757 = vmatpush.bf16.msrb.mxu3 %v8720_v14  ;;  %v6865_v5 = vld [vmem:[%s10479_s11 + $0xd0] sm:$0xf0]  ;;  %v10891_v14 = vor.u32 %v9082_v55, %v6753_v56 }
 0x1c0   : > { %v8703_v18 = vld [vmem:[%s10479_s11 + $0xf20] sm:$0xf]  ;;  %v9579_v19 = vld [vmem:[%s10479_s11 + $0xf2c] sm:$0xf0]  ;;  %v8576_v29 = vor.u32 %v9547_v17, %v8575_v16  ;;  %5716 = vmatpush.bf16.msrb.mxu0 %v8320_v22  ;;  %v9149_v10 = vld [vmem:[%s10479_s11 + $0x1c4] sm:$0xf] }
 0x1c1   : > { %v8303_v20 = vld [vmem:[%s10479_s11 + $0xc00] sm:$0xf]  ;;  %v9479_v21 = vld [vmem:[%s10479_s11 + $0xc0c] sm:$0xf0]  ;;  %v8704_v34 = vor.u32 %v9579_v19, %v8703_v18  ;;  %5730 = vmatpush.bf16.msrb.mxu1 %v8448_v28  ;;  %v6993_v13 = vld [vmem:[%s10479_s11 + $0x1d0] sm:$0xf0]  ;;  %v6868_v18 = vor.u32 %v9117_v2, %v6865_v5 }
 0x1c2   : > { %v8431_v23 = vld [vmem:[%s10479_s11 + $0xd00] sm:$0xf]  ;;  %v9511_v24 = vld [vmem:[%s10479_s11 + $0xd0c] sm:$0xf0]  ;;  %v8304_v41 = vor.u32 %v9479_v21, %v8303_v20  ;;  %5744 = vmatpush.bf16.msrb.mxu2 %v8576_v29  ;;  %v6996_v22 = vor.u32 %v9149_v10, %v6993_v13  ;;  %v6977_v28 = vld [vmem:[%s10479_s11 + $0x1b0] sm:$0xf0] }
 0x1c3   : > { %v8559_v25 = vld [vmem:[%s10479_s11 + $0xe00] sm:$0xf]  ;;  %v9543_v27 = vld [vmem:[%s10479_s11 + $0xe0c] sm:$0xf0]  ;;  %v8432_v46 = vor.u32 %v9511_v24, %v8431_v23  ;;  %5758 = vmatpush.bf16.msrb.mxu3 %v8704_v34  ;;  %v9113_v24 = vld [vmem:[%s10479_s11 + $0xa4] sm:$0xf] }
 0x1c4   : > { %v8687_v30 = vld [vmem:[%s10479_s11 + $0xf00] sm:$0xf]  ;;  %v9575_v31 = vld [vmem:[%s10479_s11 + $0xf0c] sm:$0xf0]  ;;  %v8560_v47 = vor.u32 %v9543_v27, %v8559_v25  ;;  %5717 = vmatpush.bf16.msrb.mxu0 %v8304_v41  ;;  %v6849_v25 = vld [vmem:[%s10479_s11 + $0xb0] sm:$0xf0] }
 0x1c5   : > { %v8927_v32 = vld [vmem:[%s10479_s11 + $0x10e0] sm:$0xf]  ;;  %v9635_v35 = vld [vmem:[%s10479_s11 + $0x10ec] sm:$0xf0]  ;;  %v8688_v52 = vor.u32 %v9575_v31, %v8687_v30  ;;  %5731 = vmatpush.bf16.msrb.mxu1 %v8432_v46  ;;  %v9145_v27 = vld [vmem:[%s10479_s11 + $0x1a4] sm:$0xf]  ;;  %v6852_v31 = vor.u32 %v9113_v24, %v6849_v25 }
 0x1c6   : > { %v9055_v36 = vld [vmem:[%s10479_s11 + $0x11e0] sm:$0xf]  ;;  %v9667_v37 = vld [vmem:[%s10479_s11 + $0x11ec] sm:$0xf0]  ;;  %v8928_v53 = vor.u32 %v9635_v35, %v8927_v32  ;;  %5745 = vmatpush.bf16.msrb.mxu2 %v8560_v47  ;;  %v9109_v38 = vld [vmem:[%s10479_s11 + $0x84] sm:$0xf] }
 0x1c7   : > { %v6743_v44 = vld [vmem:[%s12073_s0 + $0x30] sm:$0xf]  ;;  %v9091_v50 = vld [vmem:[%s12073_s0 + $0x7c] sm:$0xf0]  ;;  %v9056_v57 = vor.u32 %v9667_v37, %v9055_v36  ;;  %5759 = vmatpush.bf16.msrb.mxu3 %v8688_v52  ;;  %v6980_v36 = vor.u32 %v9145_v27, %v6977_v28  ;;  %v6833_v39 = vld [vmem:[%s10479_s11 + $0x90] sm:$0xf0] }
 0x1c8   : > { %v8911_v59 = vld [vmem:[%s10479_s11 + $0x10c0] sm:$0xf]  ;;  %v9631_v60 = vld [vmem:[%s10479_s11 + $0x10cc] sm:$0xf0]  ;;  %v10880_v0 = vor.u32 %v9090_v45, %v6743_v44  ;;  %v10885_v6 = vor.u32 %v9091_v50, %v6751_v48  ;;  %5766 = vmatpush.bf16.msra.mxu0 %v8928_v53  ;;  %5732 = vmatmul.bf16.vlgmr.msrb.gmra.mxu1 %v10887_v9  ;;  %v9141_v40 = vld [vmem:[%s10479_s11 + $0x184] sm:$0xf]  ;;  %v6836_v45 = vor.u32 %v9109_v38, %v6833_v39 }
 0x1c9   : > { %v9039_v61 = vld [vmem:[%s10479_s11 + $0x11c0] sm:$0xf]  ;;  %v9663_v1 = vld [vmem:[%s10479_s11 + $0x11cc] sm:$0xf0]  ;;  %v8912_v16 = vor.u32 %v9631_v60, %v8911_v59  ;;  %5780 = vmatpush.bf16.msra.mxu1 %v9056_v57  ;;  %v6961_v41 = vld [vmem:[%s10479_s11 + $0x190] sm:$0xf0] }
 0x1ca   : > { %5794 = vmatpush.bf16.msra.mxu2 %v6884_v58  ;;  %v9040_v17 = vor.u32 %v9663_v1, %v9039_v61  ;;  %v8895_v19 = vld [vmem:[%s10479_s11 + $0x10a0] sm:$0xf]  ;;  %v9627_v20 = vld [vmem:[%s10479_s11 + $0x10ac] sm:$0xf0]  ;;  %5718 = vmatmul.bf16.vlgmr.msrb.gmra.mxu0 %v10880_v0  ;;  %v6964_v50 = vor.u32 %v9141_v40, %v6961_v41  ;;  %v9105_v52 = vld [vmem:[%s10479_s11 + $0x64] sm:$0xf] }
 0x1cb   : > { %v9023_v21 = vld [vmem:[%s10479_s11 + $0x11a0] sm:$0xf]  ;;  %5808 = vmatpush.bf16.msra.mxu3 %v7012_v62  ;;  %v9659_v23 = vld [vmem:[%s10479_s11 + $0x11ac] sm:$0xf0]  ;;  %5746 = vmatmul.bf16.vlgmr.msrb.gmra.mxu2 %v10885_v6  ;;  %v8896_v29 = vor.u32 %v9627_v20, %v8895_v19  ;;  %v6817_v53 = vld [vmem:[%s10479_s11 + $0x70] sm:$0xf0] }
 0x1cc   : > { %5760 = vmatmul.bf16.vlgmr.msrb.gmra.mxu3 %v10891_v14  ;;  %5767 = vmatpush.bf16.msra.mxu0 %v8912_v16  ;;  %v9024_v30 = vor.u32 %v9659_v23, %v9023_v21  ;;  %v8879_v32 = vld [vmem:[%s10479_s11 + $0x1080] sm:$0xf]  ;;  %v9623_v34 = vld [vmem:[%s10479_s11 + $0x108c] sm:$0xf0]  ;;  %v9137_v54 = vld [vmem:[%s10479_s11 + $0x164] sm:$0xf]  ;;  %v6820_v58 = vor.u32 %v9105_v52, %v6817_v53 }
 0x1cd   : > { %5781 = vmatpush.bf16.msra.mxu1 %v9040_v17  ;;  %v9007_v35 = vld [vmem:[%s10479_s11 + $0x1180] sm:$0xf]  ;;  %v9655_v37 = vld [vmem:[%s10479_s11 + $0x118c] sm:$0xf0]  ;;  %v8880_v43 = vor.u32 %v9623_v34, %v8879_v32  ;;  %v6945_v55 = vld [vmem:[%s10479_s11 + $0x170] sm:$0xf0] }
 0x1ce   : > { %5795 = vmatpush.bf16.msra.mxu2 %v6868_v18  ;;  %v9008_v44 = vor.u32 %v9655_v37, %v9007_v35  ;;  %v8863_v46 = vld [vmem:[%s10479_s11 + $0x1060] sm:$0xf]  ;;  %v9619_v47 = vld [vmem:[%s10479_s11 + $0x106c] sm:$0xf0]  ;;  %v6948_v62 = vor.u32 %v9137_v54, %v6945_v55  ;;  %v9101_v2 = vld [vmem:[%s10479_s11 + $0x44] sm:$0xf] }
 0x1cf   : > { %5809 = vmatpush.bf16.msra.mxu3 %v6996_v22  ;;  %v8991_v48 = vld [vmem:[%s10479_s11 + $0x1160] sm:$0xf]  ;;  %v9651_v51 = vld [vmem:[%s10479_s11 + $0x116c] sm:$0xf0]  ;;  %v8864_v56 = vor.u32 %v9619_v47, %v8863_v46  ;;  %v6801_v5 = vld [vmem:[%s10479_s11 + $0x50] sm:$0xf0] }
 0x1d0   : > { %5768 = vmatpush.bf16.msra.mxu0 %v8896_v29  ;;  %v8992_v57 = vor.u32 %v9651_v51, %v8991_v48  ;;  %v8847_v59 = vld [vmem:[%s10479_s11 + $0x1040] sm:$0xf]  ;;  %v9615_v60 = vld [vmem:[%s10479_s11 + $0x104c] sm:$0xf0]  ;;  %v9133_v10 = vld [vmem:[%s10479_s11 + $0x144] sm:$0xf]  ;;  %v6804_v18 = vor.u32 %v9101_v2, %v6801_v5 }
 0x1d1   : > { %5782 = vmatpush.bf16.msra.mxu1 %v9024_v30  ;;  %v8975_v61 = vld [vmem:[%s10479_s11 + $0x1140] sm:$0xf]  ;;  %v9647_v1 = vld [vmem:[%s10479_s11 + $0x114c] sm:$0xf0]  ;;  %v6929_v13 = vld [vmem:[%s10479_s11 + $0x150] sm:$0xf0]  ;;  %v8848_v16 = vor.u32 %v9615_v60, %v8847_v59 }
 0x1d2   : > { %5796 = vmatpush.bf16.msra.mxu2 %v6852_v31  ;;  %v8976_v17 = vor.u32 %v9647_v1, %v8975_v61  ;;  %v8831_v19 = vld [vmem:[%s10479_s11 + $0x1020] sm:$0xf]  ;;  %v9611_v20 = vld [vmem:[%s10479_s11 + $0x102c] sm:$0xf0]  ;;  %v6932_v22 = vor.u32 %v9133_v10, %v6929_v13  ;;  %v9097_v24 = vld [vmem:[%s10479_s11 + $0x24] sm:$0xf] }
 0x1d3   : > { %5810 = vmatpush.bf16.msra.mxu3 %v6980_v36  ;;  %v8959_v21 = vld [vmem:[%s10479_s11 + $0x1120] sm:$0xf]  ;;  %v9643_v23 = vld [vmem:[%s10479_s11 + $0x112c] sm:$0xf0]  ;;  %v6785_v25 = vld [vmem:[%s10479_s11 + $0x30] sm:$0xf0]  ;;  %v8832_v29 = vor.u32 %v9611_v20, %v8831_v19 }
 0x1d4   : > { %5769 = vmatpush.bf16.msra.mxu0 %v8880_v43  ;;  %v9129_v27 = vld [vmem:[%s10479_s11 + $0x124] sm:$0xf]  ;;  %v6913_v28 = vld [vmem:[%s10479_s11 + $0x130] sm:$0xf0]  ;;  %v8815_v30 = vld [vmem:[%s10479_s11 + $0x1000] sm:$0xf]  ;;  %v8960_v34 = vor.u32 %v9643_v23, %v8959_v21  ;;  %v6788_v35 = vor.u32 %v9097_v24, %v6785_v25 }
 0x1d5   : > { %5783 = vmatpush.bf16.msra.mxu1 %v9008_v44  ;;  %v9607_v31 = vld [vmem:[%s10479_s11 + $0x100c] sm:$0xf0]  ;;  %v8943_v32 = vld [vmem:[%s10479_s11 + $0x1100] sm:$0xf]  ;;  %v9093_v37 = vld [vmem:[%s10479_s11 + $0x4] sm:$0xf]  ;;  %v6916_v39 = vor.u32 %v9129_v27, %v6913_v28 }
 0x1d6   : > { %5797 = vmatpush.bf16.msra.mxu2 %v6836_v45  ;;  %v9639_v36 = vld [vmem:[%s10479_s11 + $0x110c] sm:$0xf0]  ;;  %v6769_v38 = vld [vmem:[%s10479_s11 + $0x10] sm:$0xf0]  ;;  %v9125_v40 = vld [vmem:[%s10479_s11 + $0x104] sm:$0xf]  ;;  %v8816_v47 = vor.u32 %v9607_v31, %v8815_v30 }
 0x1d7   : > { %5811 = vmatpush.bf16.msra.mxu3 %v6964_v50  ;;  %v6897_v41 = vld [vmem:[%s10479_s11 + $0x110] sm:$0xf0]  ;;  %v9185_v43 = vld [vmem:[%s10479_s11 + $0x2e4] sm:$0xf]  ;;  %v8944_v52 = vor.u32 %v9639_v36, %v8943_v32  ;;  %v6772_v53 = vor.u32 %v9093_v37, %v6769_v38  ;;  %v6759_v55 = vld [vmem:[%s12073_s0 + $0x40] sm:$0xf] }
 0x1d8   : > { %5770 = vmatpush.bf16.msra.mxu0 %v8864_v56  ;;  %v7137_v44 = vld [vmem:[%s10479_s11 + $0x2f0] sm:$0xf0]  ;;  %v9217_v45 = vld [vmem:[%s10479_s11 + $0x3e4] sm:$0xf]  ;;  %v9092_v56 = vld [vmem:[%s12073_s0 + $0x84] sm:$0xf0] }
 0x1d9   : > { %5784 = vmatpush.bf16.msra.mxu1 %v8992_v57  ;;  %v7265_v46 = vld [vmem:[%s10479_s11 + $0x3f0] sm:$0xf0]  ;;  %v9249_v48 = vld [vmem:[%s10479_s11 + $0x4e4] sm:$0xf]  ;;  %v6900_v57 = vor.u32 %v9125_v40, %v6897_v41  ;;  %v6761_v60 = vld [vmem:[%s12073_s0 + $0x88] sm:$0xf0]  ;;  %v10981_v13 = vor.u32 %v9092_v56, %v6759_v55 }
 0x1da   : > { %5798 = vmatpush.bf16.msra.mxu2 %v6820_v58  ;;  %v7393_v50 = vld [vmem:[%s10479_s11 + $0x4f0] sm:$0xf0]  ;;  %v9281_v51 = vld [vmem:[%s10479_s11 + $0x5e4] sm:$0xf]  ;;  %v7140_v58 = vor.u32 %v9185_v43, %v7137_v44  ;;  %v7268_v61 = vor.u32 %v9217_v45, %v7265_v46 }
 0x1db   : > { %5812 = vmatpush.bf16.msra.mxu3 %v6948_v62  ;;  %v7521_v54 = vld [vmem:[%s10479_s11 + $0x5f0] sm:$0xf0]  ;;  %v9083_v59 = vld [vmem:[%s12073_s0 + $0x44] sm:$0xf]  ;;  %v7396_v62 = vor.u32 %v9249_v48, %v7393_v50  ;;  %12105 = vst [vmem:[#allocation12_spill] sm:$0xff] %v10981_v13 }
 0x1dc   : > { %5771 = vmatpush.bf16.msra.mxu0 %v8848_v16  ;;  %v9181_v1 = vld [vmem:[%s10479_s11 + $0x2c4] sm:$0xf]  ;;  %v7121_v2 = vld [vmem:[%s10479_s11 + $0x2d0] sm:$0xf0]  ;;  %v7524_v10 = vor.u32 %v9281_v51, %v7521_v54  ;;  %v10992_v19 = vor.u32 %v9083_v59, %v6761_v60 }
 0x1dd   : > { %5785 = vmatpush.bf16.msra.mxu1 %v8976_v17  ;;  %v9213_v5 = vld [vmem:[%s10479_s11 + $0x3c4] sm:$0xf]  ;;  %v7249_v16 = vld [vmem:[%s10479_s11 + $0x3d0] sm:$0xf0] }
 0x1de   : > { %5799 = vmatpush.bf16.msra.mxu2 %v6804_v18  ;;  %v9245_v17 = vld [vmem:[%s10479_s11 + $0x4c4] sm:$0xf]  ;;  %v7377_v18 = vld [vmem:[%s10479_s11 + $0x4d0] sm:$0xf0]  ;;  %12106 = vst [vmem:[#allocation13_spill] sm:$0xff] %v10992_v19  ;;  %v7252_v24 = vor.u32 %v9213_v5, %v7249_v16 }
 0x1df   : > { %5813 = vmatpush.bf16.msra.mxu3 %v6932_v22  ;;  %v9277_v20 = vld [vmem:[%s10479_s11 + $0x5c4] sm:$0xf]  ;;  %v7505_v21 = vld [vmem:[%s10479_s11 + $0x5d0] sm:$0xf0]  ;;  %v7124_v22 = vor.u32 %v9181_v1, %v7121_v2  ;;  %v7380_v25 = vor.u32 %v9245_v17, %v7377_v18 }
 0x1e0   : > { %5772 = vmatpush.bf16.msra.mxu0 %v8832_v29  ;;  %v9177_v23 = vld [vmem:[%s10479_s11 + $0x2a4] sm:$0xf]  ;;  %v7105_v27 = vld [vmem:[%s10479_s11 + $0x2b0] sm:$0xf0]  ;;  %v11000_v29 = vld [vmem:[%s10990_s14] sm:$0xf]  ;;  %v7508_v30 = vor.u32 %v9277_v20, %v7505_v21 }
 0x1e1   : > { %5786 = vmatpush.bf16.msra.mxu1 %v8960_v34  ;;  %v9209_v28 = vld [vmem:[%s10479_s11 + $0x3a4] sm:$0xf]  ;;  %v7233_v31 = vld [vmem:[%s10479_s11 + $0x3b0] sm:$0xf0]  ;;  %v7108_v37 = vor.u32 %v9177_v23, %v7105_v27  ;;  %v12077_v38 = vperm.slane %v11000_v29, 0 }
 0x1e2   : > { %5800 = vmatpush.bf16.msra.mxu2 %v6788_v35  ;;  %v9241_v32 = vld [vmem:[%s10479_s11 + $0x4a4] sm:$0xf]  ;;  %v7361_v34 = vld [vmem:[%s10479_s11 + $0x4b0] sm:$0xf0] }
 0x1e3   : > { %5814 = vmatpush.bf16.msra.mxu3 %v6916_v39  ;;  %v9273_v35 = vld [vmem:[%s10479_s11 + $0x5a4] sm:$0xf]  ;;  %v7489_v36 = vld [vmem:[%s10479_s11 + $0x5b0] sm:$0xf0]  ;;  %v7236_v39 = vor.u32 %v9209_v28, %v7233_v31  ;;  %v7364_v40 = vor.u32 %v9241_v32, %v7361_v34 }
 0x1e4   : > { %5773 = vmatpush.bf16.msra.mxu0 %v8816_v47  ;;  %v9173_v41 = vld [vmem:[%s10479_s11 + $0x284] sm:$0xf]  ;;  %v7089_v43 = vld [vmem:[%s10479_s11 + $0x290] sm:$0xf0]  ;;  %v7492_v45 = vor.u32 %v9273_v35, %v7489_v36 }
 0x1e5   : > { %5787 = vmatpush.bf16.msra.mxu1 %v8944_v52  ;;  %v9205_v44 = vld [vmem:[%s10479_s11 + $0x384] sm:$0xf]  ;;  %v7217_v46 = vld [vmem:[%s10479_s11 + $0x390] sm:$0xf0] }
 0x1e6   : > { %5801 = vmatpush.bf16.msra.mxu2 %v6772_v53  ;;  %v9237_v47 = vld [vmem:[%s10479_s11 + $0x484] sm:$0xf]  ;;  %v7345_v48 = vld [vmem:[%s10479_s11 + $0x490] sm:$0xf0]  ;;  %v7092_v53 = vor.u32 %v9173_v41, %v7089_v43  ;;  %v7220_v55 = vor.u32 %v9205_v44, %v7217_v46 }
 0x1e7   : > { %5815 = vmatpush.bf16.msra.mxu3 %v6900_v57  ;;  %5774 = vmatmul.bf16.vlgmr.msra.gmra.mxu0 %v10981_v13  ;;  %v9269_v50 = vld [vmem:[%s10479_s11 + $0x584] sm:$0xf]  ;;  %v7473_v51 = vld [vmem:[%s10479_s11 + $0x590] sm:$0xf0]  ;;  %v7348_v56 = vor.u32 %v9237_v47, %v7345_v48 }
 0x1e8   : > { %5822 = vmatpush.bf16.msrb.mxu0 %v7140_v58  ;;  %5788 = vmatmul.bf16.vlgmr.msra.gmra.mxu1 %v10992_v19  ;;  %v9169_v57 = vld [vmem:[%s10479_s11 + $0x264] sm:$0xf]  ;;  %v7073_v58 = vld [vmem:[%s10479_s11 + $0x270] sm:$0xf0]  ;;  %v7476_v60 = vor.u32 %v9269_v50, %v7473_v51 }
 0x1e9   : > { %5836 = vmatpush.bf16.msrb.mxu1 %v7268_v61  ;;  %5802 = vmatmul.bf16.vlgmr.msra.gmra.mxu2 %v10572_v26  ;;  %v9201_v59 = vld [vmem:[%s10479_s11 + $0x364] sm:$0xf]  ;;  %v7201_v61 = vld [vmem:[%s10479_s11 + $0x370] sm:$0xf0]  ;;  %v7076_v16 = vor.u32 %v9169_v57, %v7073_v58 }
 0x1ea   : > { %5850 = vmatpush.bf16.msrb.mxu2 %v7396_v62  ;;  %5816 = vmatmul.bf16.vlgmr.msra.gmra.mxu3 %v10596_v42  ;;  %v5551_v52 = vpop.f32.mrf.mxu0  ;;  %v9233_v62 = vld [vmem:[%s10479_s11 + $0x464] sm:$0xf]  ;;  %v7329_v1 = vld [vmem:[%s10479_s11 + $0x470] sm:$0xf0]  ;;  %v7204_v18 = vor.u32 %v9201_v59, %v7201_v61  ;;  %v5593_v47 = vpop.f32.mrf.mxu3 }
 0x1eb   : > { %5864 = vmatpush.bf16.msrb.mxu3 %v7524_v10  ;;  %v5552_v54 = vadd.f32 %v5551_v52, %v12077_v38  ;;  %v9265_v2 = vld [vmem:[%s10479_s11 + $0x564] sm:$0xf]  ;;  %v7457_v5 = vld [vmem:[%s10479_s11 + $0x570] sm:$0xf0]  ;;  %v5565_v10 = vpop.f32.mrf.mxu1  ;;  %v7332_v20 = vor.u32 %v9233_v62, %v7329_v1  ;;  %v9408_v38 = vld [vmem:[%s10479_s11 + $0x9d4] sm:$0xf0] }
 0x1ec   : > { %5823 = vmatpush.bf16.msrb.mxu0 %v7124_v22  ;;  %v9165_v21 = vld [vmem:[%s10479_s11 + $0x244] sm:$0xf]  ;;  %v7057_v22 = vld [vmem:[%s10479_s11 + $0x250] sm:$0xf0] }
 0x1ed   : > { %5837 = vmatpush.bf16.msrb.mxu1 %v7252_v24  ;;  %v5566_v17 = vadd.f32 %v5565_v10, %v5552_v54  ;;  %v9197_v23 = vld [vmem:[%s10479_s11 + $0x344] sm:$0xf]  ;;  %v7460_v24 = vor.u32 %v9265_v2, %v7457_v5  ;;  %v7313_v28 = vld [vmem:[%s10479_s11 + $0x450] sm:$0xf0]  ;;  %v7060_v35 = vor.u32 %v9165_v21, %v7057_v22 }
 0x1ee   : > { %5851 = vmatpush.bf16.msrb.mxu2 %v7380_v25  ;;  %v7185_v25 = vld [vmem:[%s10479_s11 + $0x350] sm:$0xf0]  ;;  %v9229_v27 = vld [vmem:[%s10479_s11 + $0x444] sm:$0xf] }
 0x1ef   : > { %5865 = vmatpush.bf16.msrb.mxu3 %v7508_v30  ;;  %v9261_v31 = vld [vmem:[%s10479_s11 + $0x544] sm:$0xf]  ;;  %v7441_v32 = vld [vmem:[%s10479_s11 + $0x550] sm:$0xf0]  ;;  %v7188_v36 = vor.u32 %v9197_v23, %v7185_v25 }
 0x1f0   : > { %5824 = vmatpush.bf16.msrb.mxu0 %v7108_v37  ;;  %v7316_v37 = vor.u32 %v9229_v27, %v7313_v28  ;;  %v9193_v41 = vld [vmem:[%s10479_s11 + $0x324] sm:$0xf]  ;;  %v7444_v43 = vor.u32 %v9261_v31, %v7441_v32  ;;  %v7169_v44 = vld [vmem:[%s10479_s11 + $0x330] sm:$0xf0] }
 0x1f1   : > { %5838 = vmatpush.bf16.msrb.mxu1 %v7236_v39  ;;  %v5579_v30 = vpop.f32.mrf.mxu2  ;;  %v9161_v39 = vld [vmem:[%s10479_s11 + $0x224] sm:$0xf]  ;;  %v7297_v46 = vld [vmem:[%s10479_s11 + $0x430] sm:$0xf0] }
 0x1f2   : > { %5852 = vmatpush.bf16.msrb.mxu2 %v7364_v40  ;;  %v5580_v34 = vadd.f32 %v5579_v30, %v5566_v17  ;;  %v7041_v40 = vld [vmem:[%s10479_s11 + $0x230] sm:$0xf0]  ;;  %v9257_v48 = vld [vmem:[%s10479_s11 + $0x524] sm:$0xf]  ;;  %v11064_v31 = vpop.f32.mrf.mxu0 }
 0x1f3   : > { %5866 = vmatpush.bf16.msrb.mxu3 %v7492_v45  ;;  %v9225_v45 = vld [vmem:[%s10479_s11 + $0x424] sm:$0xf]  ;;  %v7425_v50 = vld [vmem:[%s10479_s11 + $0x530] sm:$0xf0]  ;;  %v7044_v52 = vor.u32 %v9161_v39, %v7041_v40 }
 0x1f4   : > { %5825 = vmatpush.bf16.msrb.mxu0 %v7092_v53  ;;  %v11046_v51 = vadd.f32 %v5593_v47, %v5580_v34  ;;  %v9157_v53 = vld [vmem:[%s10479_s11 + $0x204] sm:$0xf]  ;;  %v7025_v54 = vld [vmem:[%s10479_s11 + $0x210] sm:$0xf0] }
 0x1f5   : > { %5839 = vmatpush.bf16.msrb.mxu1 %v7220_v55  ;;  %v7172_v55 = vor.u32 %v9193_v41, %v7169_v44  ;;  %v9189_v57 = vld [vmem:[%s10479_s11 + $0x304] sm:$0xf]  ;;  %v7153_v58 = vld [vmem:[%s10479_s11 + $0x310] sm:$0xf0]  ;;  %v11074_v44 = vpop.f32.mrf.mxu1 }
 0x1f6   : > { %5853 = vmatpush.bf16.msrb.mxu2 %v7348_v56  ;;  %v7300_v56 = vor.u32 %v9225_v45, %v7297_v46  ;;  %v9221_v59 = vld [vmem:[%s10479_s11 + $0x404] sm:$0xf]  ;;  %v7281_v61 = vld [vmem:[%s10479_s11 + $0x410] sm:$0xf0]  ;;  %v7156_v21 = vor.u32 %v9189_v57, %v7153_v58 }
 0x1f7   : > { %5867 = vmatpush.bf16.msrb.mxu3 %v7476_v60  ;;  %v7428_v60 = vor.u32 %v9257_v48, %v7425_v50  ;;  %v9253_v62 = vld [vmem:[%s10479_s11 + $0x504] sm:$0xf]  ;;  %v7409_v1 = vld [vmem:[%s10479_s11 + $0x510] sm:$0xf0]  ;;  %v7284_v22 = vor.u32 %v9221_v59, %v7281_v61 }
 0x1f8   : > { %5826 = vmatpush.bf16.msrb.mxu0 %v7076_v16  ;;  %v9313_v2 = vld [vmem:[%s10479_s11 + $0x6e4] sm:$0xf]  ;;  %v7649_v5 = vld [vmem:[%s10479_s11 + $0x6f0] sm:$0xf0]  ;;  %v7028_v16 = vor.u32 %v9157_v53, %v7025_v54  ;;  %v7412_v25 = vor.u32 %v9253_v62, %v7409_v1 }
 0x1f9   : > { %5840 = vmatpush.bf16.msrb.mxu1 %v7204_v18  ;;  %v9345_v10 = vld [vmem:[%s10479_s11 + $0x7e4] sm:$0xf]  ;;  %v7777_v17 = vld [vmem:[%s10479_s11 + $0x7f0] sm:$0xf0]  ;;  %v7652_v27 = vor.u32 %v9313_v2, %v7649_v5 }
 0x1fa   : > { %5854 = vmatpush.bf16.msrb.mxu2 %v7332_v20  ;;  %v9377_v18 = vld [vmem:[%s10479_s11 + $0x8e4] sm:$0xf]  ;;  %v7905_v20 = vld [vmem:[%s10479_s11 + $0x8f0] sm:$0xf0]  ;;  %v7780_v28 = vor.u32 %v9345_v10, %v7777_v17 }
 0x1fb   : > { %5868 = vmatpush.bf16.msrb.mxu3 %v7460_v24  ;;  %v9409_v23 = vld [vmem:[%s10479_s11 + $0x9e4] sm:$0xf]  ;;  %v8033_v24 = vld [vmem:[%s10479_s11 + $0x9f0] sm:$0xf0]  ;;  %v7908_v30 = vor.u32 %v9377_v18, %v7905_v20 }
 0x1fc   : > { %5827 = vmatpush.bf16.msrb.mxu0 %v7060_v35  ;;  %v9309_v32 = vld [vmem:[%s10479_s11 + $0x6c4] sm:$0xf]  ;;  %v7633_v34 = vld [vmem:[%s10479_s11 + $0x6d0] sm:$0xf0] }
 0x1fd   : > { %5841 = vmatpush.bf16.msrb.mxu1 %v7188_v36  ;;  %v9341_v35 = vld [vmem:[%s10479_s11 + $0x7c4] sm:$0xf]  ;;  %v8036_v36 = vor.u32 %v9409_v23, %v8033_v24  ;;  %v7889_v40 = vld [vmem:[%s10479_s11 + $0x8d0] sm:$0xf0]  ;;  %v7636_v45 = vor.u32 %v9309_v32, %v7633_v34 }
 0x1fe   : > { %5855 = vmatpush.bf16.msrb.mxu2 %v7316_v37  ;;  %v7761_v37 = vld [vmem:[%s10479_s11 + $0x7d0] sm:$0xf0]  ;;  %v9373_v39 = vld [vmem:[%s10479_s11 + $0x8c4] sm:$0xf] }
 0x1ff   : > { %5869 = vmatpush.bf16.msrb.mxu3 %v7444_v43  ;;  %v9405_v41 = vld [vmem:[%s10479_s11 + $0x9c4] sm:$0xf]  ;;  %v8017_v43 = vld [vmem:[%s10479_s11 + $0x9d0] sm:$0xf0]  ;;  %v7764_v46 = vor.u32 %v9341_v35, %v7761_v37  ;;  %v7892_v47 = vor.u32 %v9373_v39, %v7889_v40 }
 0x200   : > { %5828 = vmatpush.bf16.msrb.mxu0 %v7044_v52  ;;  %v9305_v48 = vld [vmem:[%s10479_s11 + $0x6a4] sm:$0xf]  ;;  %v7617_v50 = vld [vmem:[%s10479_s11 + $0x6b0] sm:$0xf0]  ;;  %v8020_v53 = vor.u32 %v9405_v41, %v8017_v43 }
 0x201   : > { %5842 = vmatpush.bf16.msrb.mxu1 %v7172_v55  ;;  %v9337_v52 = vld [vmem:[%s10479_s11 + $0x7a4] sm:$0xf]  ;;  %v7745_v54 = vld [vmem:[%s10479_s11 + $0x7b0] sm:$0xf0]  ;;  %v7620_v59 = vor.u32 %v9305_v48, %v7617_v50 }
 0x202   : > { %5856 = vmatpush.bf16.msrb.mxu2 %v7300_v56  ;;  %v9369_v55 = vld [vmem:[%s10479_s11 + $0x8a4] sm:$0xf]  ;;  %v7873_v56 = vld [vmem:[%s10479_s11 + $0x8b0] sm:$0xf0]  ;;  %v7748_v61 = vor.u32 %v9337_v52, %v7745_v54 }
 0x203   : > { %5870 = vmatpush.bf16.msrb.mxu3 %v7428_v60  ;;  %v9401_v57 = vld [vmem:[%s10479_s11 + $0x9a4] sm:$0xf]  ;;  %v8001_v58 = vld [vmem:[%s10479_s11 + $0x9b0] sm:$0xf0]  ;;  %v11088_v60 = vpop.f32.mrf.mxu2  ;;  %v7876_v62 = vor.u32 %v9369_v55, %v7873_v56 }
 0x204   : > { %5829 = vmatpush.bf16.msrb.mxu0 %v7028_v16  ;;  %v9301_v1 = vld [vmem:[%s10479_s11 + $0x684] sm:$0xf]  ;;  %v7601_v2 = vld [vmem:[%s10479_s11 + $0x690] sm:$0xf0]  ;;  %v8004_v10 = vor.u32 %v9401_v57, %v8001_v58  ;;  %v11093_v16 = vpop.f32.mrf.mxu3 }
 0x205   : > { %5843 = vmatpush.bf16.msrb.mxu1 %v7156_v21  ;;  %v9333_v5 = vld [vmem:[%s10479_s11 + $0x784] sm:$0xf]  ;;  %v7729_v17 = vld [vmem:[%s10479_s11 + $0x790] sm:$0xf0] }
 0x206   : > { %5857 = vmatpush.bf16.msrb.mxu2 %v7284_v22  ;;  %v9365_v18 = vld [vmem:[%s10479_s11 + $0x884] sm:$0xf]  ;;  %v7857_v20 = vld [vmem:[%s10479_s11 + $0x890] sm:$0xf0] }
 0x207   : > { %5871 = vmatpush.bf16.msrb.mxu3 %v7412_v25  ;;  %5830 = vmatmul.bf16.vlgmr.msrb.gmra.mxu0 %v10580_v33  ;;  %v5607_v21 = vpop.f32.mrf.mxu0  ;;  %v9397_v22 = vld [vmem:[%s10479_s11 + $0x984] sm:$0xf]  ;;  %v7985_v23 = vld [vmem:[%s10479_s11 + $0x990] sm:$0xf0]  ;;  %v7604_v25 = vor.u32 %v9301_v1, %v7601_v2 }
 0x208   : > { %5878 = vmatpush.bf16.msra.mxu0 %v7652_v27  ;;  %5844 = vmatmul.bf16.vlgmr.msrb.gmra.mxu1 %v10604_v49  ;;  %v5608_v24 = vadd.f32 %v5607_v21, %v11046_v51  ;;  %v7732_v27 = vor.u32 %v9333_v5, %v7729_v17  ;;  %v9297_v32 = vld [vmem:[%s10479_s11 + $0x664] sm:$0xf]  ;;  %v7585_v34 = vld [vmem:[%s10479_s11 + $0x670] sm:$0xf0] }
 0x209   : > { %5892 = vmatpush.bf16.msra.mxu1 %v7780_v28  ;;  %5858 = vmatmul.bf16.vlgmr.msrb.gmra.mxu2 %v10680_v7  ;;  %v7860_v28 = vor.u32 %v9365_v18, %v7857_v20  ;;  %v9329_v35 = vld [vmem:[%s10479_s11 + $0x764] sm:$0xf]  ;;  %v7713_v39 = vld [vmem:[%s10479_s11 + $0x770] sm:$0xf0] }
 0x20a   : > { %5906 = vmatpush.bf16.msra.mxu2 %v7908_v30  ;;  %5872 = vmatmul.bf16.vlgmr.msrb.gmra.mxu3 %v10687_v12  ;;  %v5621_v30 = vpop.f32.mrf.mxu1  ;;  %v9361_v40 = vld [vmem:[%s10479_s11 + $0x864] sm:$0xf]  ;;  %v7841_v51 = vld [vmem:[%s10479_s11 + $0x870] sm:$0xf0] }
 0x20b   : > { %5920 = vmatpush.bf16.msra.mxu3 %v8036_v36  ;;  %v7988_v36 = vor.u32 %v9397_v22, %v7985_v23  ;;  %v5622_v37 = vadd.f32 %v5621_v30, %v5608_v24  ;;  %v9393_v41 = vld [vmem:[%s10479_s11 + $0x964] sm:$0xf]  ;;  %v7969_v43 = vld [vmem:[%s10479_s11 + $0x970] sm:$0xf0] }
 0x20c   : > { %5879 = vmatpush.bf16.msra.mxu0 %v7636_v45  ;;  %v7588_v45 = vor.u32 %v9297_v32, %v7585_v34  ;;  %v9293_v48 = vld [vmem:[%s10479_s11 + $0x644] sm:$0xf]  ;;  %v7569_v50 = vld [vmem:[%s10479_s11 + $0x650] sm:$0xf0] }
 0x20d   : > { %5893 = vmatpush.bf16.msra.mxu1 %v7764_v46  ;;  %v7716_v46 = vor.u32 %v9329_v35, %v7713_v39  ;;  %v9325_v52 = vld [vmem:[%s10479_s11 + $0x744] sm:$0xf]  ;;  %v5635_v54 = vpop.f32.mrf.mxu2  ;;  %v7697_v55 = vld [vmem:[%s10479_s11 + $0x750] sm:$0xf0]  ;;  %v7572_v1 = vor.u32 %v9293_v48, %v7569_v50 }
 0x20e   : > { %5907 = vmatpush.bf16.msra.mxu2 %v7892_v47  ;;  %v7844_v47 = vor.u32 %v9361_v40, %v7841_v51  ;;  %v9357_v56 = vld [vmem:[%s10479_s11 + $0x844] sm:$0xf]  ;;  %v7825_v57 = vld [vmem:[%s10479_s11 + $0x850] sm:$0xf0]  ;;  %v5636_v58 = vadd.f32 %v5635_v54, %v5622_v37  ;;  %v7700_v5 = vor.u32 %v9325_v52, %v7697_v55 }
 0x20f   : > { %5921 = vmatpush.bf16.msra.mxu3 %v8020_v53  ;;  %v7972_v53 = vor.u32 %v9393_v41, %v7969_v43  ;;  %v9289_v17 = vld [vmem:[%s10479_s11 + $0x624] sm:$0xf]  ;;  %v7553_v18 = vld [vmem:[%s10479_s11 + $0x630] sm:$0xf0] }
 0x210   : > { %5880 = vmatpush.bf16.msra.mxu0 %v7620_v59  ;;  %v9389_v59 = vld [vmem:[%s10479_s11 + $0x944] sm:$0xf]  ;;  %v7681_v22 = vld [vmem:[%s10479_s11 + $0x730] sm:$0xf0] }
 0x211   : > { %5894 = vmatpush.bf16.msra.mxu1 %v7748_v61  ;;  %v7953_v61 = vld [vmem:[%s10479_s11 + $0x950] sm:$0xf0]  ;;  %v9321_v20 = vld [vmem:[%s10479_s11 + $0x724] sm:$0xf] }
 0x212   : > { %5908 = vmatpush.bf16.msra.mxu2 %v7876_v62  ;;  %v5649_v62 = vpop.f32.mrf.mxu3  ;;  %v7956_v21 = vor.u32 %v9389_v59, %v7953_v61  ;;  %v9353_v23 = vld [vmem:[%s10479_s11 + $0x824] sm:$0xf]  ;;  %v7809_v24 = vld [vmem:[%s10479_s11 + $0x830] sm:$0xf0]  ;;  %v7684_v34 = vor.u32 %v9321_v20, %v7681_v22  ;;  %v11149_v22 = vpop.f32.mrf.mxu0 }
 0x213   : > { %5922 = vmatpush.bf16.msra.mxu3 %v8004_v10  ;;  %v11117_v2 = vadd.f32 %v5649_v62, %v5636_v58  ;;  %v7828_v10 = vor.u32 %v9357_v56, %v7825_v57  ;;  %v9285_v30 = vld [vmem:[%s10479_s11 + $0x604] sm:$0xf]  ;;  %v7537_v32 = vld [vmem:[%s10479_s11 + $0x610] sm:$0xf0]  ;;  %v7812_v35 = vor.u32 %v9353_v23, %v7809_v24 }
 0x214   : > { %5881 = vmatpush.bf16.msra.mxu0 %v7604_v25  ;;  %v9385_v25 = vld [vmem:[%s10479_s11 + $0x924] sm:$0xf]  ;;  %v7665_v37 = vld [vmem:[%s10479_s11 + $0x710] sm:$0xf0]  ;;  %v7540_v48 = vor.u32 %v9285_v30, %v7537_v32 }
 0x215   : > { %5895 = vmatpush.bf16.msra.mxu1 %v7732_v27  ;;  %v7937_v27 = vld [vmem:[%s10479_s11 + $0x930] sm:$0xf0]  ;;  %v9349_v39 = vld [vmem:[%s10479_s11 + $0x804] sm:$0xf] }
 0x216   : > { %5909 = vmatpush.bf16.msra.mxu2 %v7860_v28  ;;  %v7556_v28 = vor.u32 %v9289_v17, %v7553_v18  ;;  %v7940_v40 = vor.u32 %v9385_v25, %v7937_v27  ;;  %v7793_v51 = vld [vmem:[%s10479_s11 + $0x810] sm:$0xf0]  ;;  %v9381_v41 = vld [vmem:[%s10479_s11 + $0x904] sm:$0xf]  ;;  %v11153_v25 = vpop.f32.mrf.mxu1 }
 0x217   : > { %5923 = vmatpush.bf16.msra.mxu3 %v7988_v36  ;;  %v9317_v36 = vld [vmem:[%s10479_s11 + $0x704] sm:$0xf]  ;;  %v7921_v43 = vld [vmem:[%s10479_s11 + $0x910] sm:$0xf0]  ;;  %v7796_v55 = vor.u32 %v9349_v39, %v7793_v51 }
 0x218   : > { %5882 = vmatpush.bf16.msra.mxu0 %v7588_v45  ;;  %v9441_v45 = vld [vmem:[%s10479_s11 + $0xae4] sm:$0xf]  ;;  %v8289_v50 = vld [vmem:[%s10479_s11 + $0xbf0] sm:$0xf0]  ;;  %v7668_v54 = vor.u32 %v9317_v36, %v7665_v37  ;;  %v7924_v58 = vor.u32 %v9381_v41, %v7921_v43 }
 0x219   : > { %5896 = vmatpush.bf16.msra.mxu1 %v7716_v46  ;;  %v8161_v46 = vld [vmem:[%s10479_s11 + $0xaf0] sm:$0xf0]  ;;  %v9505_v52 = vld [vmem:[%s10479_s11 + $0xce4] sm:$0xf] }
 0x21a   : > { %5910 = vmatpush.bf16.msra.mxu2 %v7844_v47  ;;  %v9473_v47 = vld [vmem:[%s10479_s11 + $0xbe4] sm:$0xf]  ;;  %v8545_v57 = vld [vmem:[%s10479_s11 + $0xdf0] sm:$0xf0]  ;;  %v8164_v59 = vor.u32 %v9441_v45, %v8161_v46 }
 0x21b   : > { %5924 = vmatpush.bf16.msra.mxu3 %v7972_v53  ;;  %v8417_v53 = vld [vmem:[%s10479_s11 + $0xcf0] sm:$0xf0]  ;;  %v9537_v56 = vld [vmem:[%s10479_s11 + $0xde4] sm:$0xf]  ;;  %v8292_v61 = vor.u32 %v9473_v47, %v8289_v50 }
 0x21c   : > { %5883 = vmatpush.bf16.msra.mxu0 %v7572_v1  ;;  %v8420_v62 = vor.u32 %v9505_v52, %v8417_v53  ;;  %v9437_v1 = vld [vmem:[%s10479_s11 + $0xac4] sm:$0xf]  ;;  %v8548_v17 = vor.u32 %v9537_v56, %v8545_v57  ;;  %v8273_v18 = vld [vmem:[%s10479_s11 + $0xbd0] sm:$0xf0]  ;;  %v11170_v52 = vpop.f32.mrf.mxu2  ;;  %v11175_v57 = vpop.f32.mrf.mxu3 }
 0x21d   : > { %5897 = vmatpush.bf16.msra.mxu1 %v7700_v5  ;;  %v8145_v5 = vld [vmem:[%s10479_s11 + $0xad0] sm:$0xf0]  ;;  %v9501_v20 = vld [vmem:[%s10479_s11 + $0xcc4] sm:$0xf] }
 0x21e   : > { %5911 = vmatpush.bf16.msra.mxu2 %v7828_v10  ;;  %v9469_v10 = vld [vmem:[%s10479_s11 + $0xbc4] sm:$0xf]  ;;  %v8529_v24 = vld [vmem:[%s10479_s11 + $0xdd0] sm:$0xf0]  ;;  %v8148_v27 = vor.u32 %v9437_v1, %v8145_v5 }
 0x21f   : > { %5925 = vmatpush.bf16.msra.mxu3 %v7956_v21  ;;  %v8401_v21 = vld [vmem:[%s10479_s11 + $0xcd0] sm:$0xf0]  ;;  %v9533_v23 = vld [vmem:[%s10479_s11 + $0xdc4] sm:$0xf] }
 0x220   : > { %5884 = vmatpush.bf16.msra.mxu0 %v7556_v28  ;;  %v8276_v28 = vor.u32 %v9469_v10, %v8273_v18  ;;  %v8404_v30 = vor.u32 %v9501_v20, %v8401_v21  ;;  %v9433_v32 = vld [vmem:[%s10479_s11 + $0xaa4] sm:$0xf]  ;;  %v8532_v36 = vor.u32 %v9533_v23, %v8529_v24  ;;  %v8257_v37 = vld [vmem:[%s10479_s11 + $0xbb0] sm:$0xf0] }
 0x221   : > { %5898 = vmatpush.bf16.msra.mxu1 %v7684_v34  ;;  %v8129_v34 = vld [vmem:[%s10479_s11 + $0xab0] sm:$0xf0]  ;;  %v9497_v39 = vld [vmem:[%s10479_s11 + $0xca4] sm:$0xf] }
 0x222   : > { %5912 = vmatpush.bf16.msra.mxu2 %v7812_v35  ;;  %v9465_v35 = vld [vmem:[%s10479_s11 + $0xba4] sm:$0xf]  ;;  %v8513_v41 = vld [vmem:[%s10479_s11 + $0xdb0] sm:$0xf0]  ;;  %v8132_v43 = vor.u32 %v9433_v32, %v8129_v34 }
 0x223   : > { %5926 = vmatpush.bf16.msra.mxu3 %v7940_v40  ;;  %v8385_v40 = vld [vmem:[%s10479_s11 + $0xcb0] sm:$0xf0]  ;;  %v9529_v51 = vld [vmem:[%s10479_s11 + $0xda4] sm:$0xf]  ;;  %v8260_v45 = vor.u32 %v9465_v35, %v8257_v37 }
 0x224   : > { %5885 = vmatpush.bf16.msra.mxu0 %v7540_v48  ;;  %v8388_v46 = vor.u32 %v9497_v39, %v8385_v40  ;;  %v9429_v47 = vld [vmem:[%s10479_s11 + $0xa84] sm:$0xf]  ;;  %v8113_v48 = vld [vmem:[%s10479_s11 + $0xa90] sm:$0xf0]  ;;  %v8516_v53 = vor.u32 %v9529_v51, %v8513_v41  ;;  %v5677_v5 = vpop.f32.mrf.mxu1 }
 0x225   : > { %5899 = vmatpush.bf16.msra.mxu1 %v7668_v54  ;;  %v9461_v50 = vld [vmem:[%s10479_s11 + $0xb84] sm:$0xf]  ;;  %v8241_v54 = vld [vmem:[%s10479_s11 + $0xb90] sm:$0xf0]  ;;  %v8116_v1 = vor.u32 %v9429_v47, %v8113_v48 }
 0x226   : > { %5913 = vmatpush.bf16.msra.mxu2 %v7796_v55  ;;  %v9493_v55 = vld [vmem:[%s10479_s11 + $0xc84] sm:$0xf]  ;;  %v8369_v56 = vld [vmem:[%s10479_s11 + $0xc90] sm:$0xf0]  ;;  %v8244_v10 = vor.u32 %v9461_v50, %v8241_v54 }
 0x227   : > { %5927 = vmatpush.bf16.msra.mxu3 %v7924_v58  ;;  %5886 = vmatmul.bf16.vlgmr.msra.gmra.mxu0 %v10685_v11  ;;  %v9425_v18 = vld [vmem:[%s10479_s11 + $0xa64] sm:$0xf]  ;;  %v8097_v20 = vld [vmem:[%s10479_s11 + $0xa70] sm:$0xf0] }
 0x228   : > { %5934 = vmatpush.bf16.msrb.mxu0 %v8164_v59  ;;  %5900 = vmatmul.bf16.vlgmr.msra.gmra.mxu1 %v10691_v15  ;;  %v5663_v58 = vpop.f32.mrf.mxu0  ;;  %v9525_v59 = vld [vmem:[%s10479_s11 + $0xd84] sm:$0xf]  ;;  %v8481_v32 = vld [vmem:[%s10479_s11 + $0xd70] sm:$0xf0]  ;;  %v8100_v34 = vor.u32 %v9425_v18, %v8097_v20 }
 0x229   : > { %5948 = vmatpush.bf16.msrb.mxu1 %v8292_v61  ;;  %5914 = vmatmul.bf16.vlgmr.msra.gmra.mxu2 %v10780_v63  ;;  %v8497_v61 = vld [vmem:[%s10479_s11 + $0xd90] sm:$0xf0]  ;;  %v9457_v21 = vld [vmem:[%s10479_s11 + $0xb64] sm:$0xf] }
 0x22a   : > { %5962 = vmatpush.bf16.msrb.mxu2 %v8420_v62  ;;  %5928 = vmatmul.bf16.vlgmr.msra.gmra.mxu3 %v10787_v4  ;;  %v5664_v62 = vadd.f32 %v5663_v58, %v11117_v2  ;;  %v8500_v23 = vor.u32 %v9525_v59, %v8497_v61  ;;  %v8353_v2 = vld [vmem:[%s10479_s11 + $0xc70] sm:$0xf0]  ;;  %v9421_v37 = vld [vmem:[%s10479_s11 + $0xa44] sm:$0xf] }
 0x22b   : > { %5976 = vmatpush.bf16.msrb.mxu3 %v8548_v17  ;;  %v8372_v17 = vor.u32 %v9493_v55, %v8369_v56  ;;  %v8081_v39 = vld [vmem:[%s10479_s11 + $0xa50] sm:$0xf0]  ;;  %v9453_v40 = vld [vmem:[%s10479_s11 + $0xb44] sm:$0xf] }
 0x22c   : > { %5935 = vmatpush.bf16.msrb.mxu0 %v8148_v27  ;;  %v5678_v24 = vadd.f32 %v5677_v5, %v5664_v62  ;;  %v8225_v27 = vld [vmem:[%s10479_s11 + $0xb70] sm:$0xf0]  ;;  %v5705_v48 = vpop.f32.mrf.mxu3  ;;  %v9517_v50 = vld [vmem:[%s10479_s11 + $0xd44] sm:$0xf]  ;;  %v8084_v54 = vor.u32 %v9421_v37, %v8081_v39 }
 0x22d   : > { %5949 = vmatpush.bf16.msrb.mxu1 %v8276_v28  ;;  %v9489_v28 = vld [vmem:[%s10479_s11 + $0xc64] sm:$0xf]  ;;  %v8228_v35 = vor.u32 %v9457_v21, %v8225_v27  ;;  %v8065_v61 = vld [vmem:[%s10479_s11 + $0xa30] sm:$0xf0] }
 0x22e   : > { %5963 = vmatpush.bf16.msrb.mxu2 %v8404_v30  ;;  %v9521_v30 = vld [vmem:[%s10479_s11 + $0xd64] sm:$0xf]  ;;  %v5691_v41 = vpop.f32.mrf.mxu2  ;;  %v8193_v5 = vld [vmem:[%s10479_s11 + $0xb30] sm:$0xf0] }
 0x22f   : > { %5977 = vmatpush.bf16.msrb.mxu3 %v8532_v36  ;;  %v8356_v36 = vor.u32 %v9489_v28, %v8353_v2  ;;  %v8484_v51 = vor.u32 %v9521_v30, %v8481_v32  ;;  %v5692_v47 = vadd.f32 %v5691_v41, %v5678_v24  ;;  %v9417_v59 = vld [vmem:[%s10479_s11 + $0xa24] sm:$0xf]  ;;  %v8449_v20 = vld [vmem:[%s10479_s11 + $0xd30] sm:$0xf0] }
 0x230   : > { %5936 = vmatpush.bf16.msrb.mxu0 %v8132_v43  ;;  %v8209_v43 = vld [vmem:[%s10479_s11 + $0xb50] sm:$0xf0]  ;;  %v9449_v62 = vld [vmem:[%s10479_s11 + $0xb24] sm:$0xf]  ;;  %v8068_v21 = vor.u32 %v9417_v59, %v8065_v61 }
 0x231   : > { %5950 = vmatpush.bf16.msrb.mxu1 %v8260_v45  ;;  %v9485_v45 = vld [vmem:[%s10479_s11 + $0xc44] sm:$0xf]  ;;  %v11196_v55 = vadd.f32 %v5705_v48, %v5692_v47  ;;  %v8212_v56 = vor.u32 %v9453_v40, %v8209_v43  ;;  %v8049_v24 = vld [vmem:[%s10479_s11 + $0xa10] sm:$0xf0]  ;;  %v8196_v27 = vor.u32 %v9449_v62, %v8193_v5 }
 0x232   : > { %5964 = vmatpush.bf16.msrb.mxu2 %v8388_v46  ;;  %v8337_v46 = vld [vmem:[%s10479_s11 + $0xc50] sm:$0xf0]  ;;  %v9513_v18 = vld [vmem:[%s10479_s11 + $0xd24] sm:$0xf] }
 0x233   : > { %5978 = vmatpush.bf16.msrb.mxu3 %v8516_v53  ;;  %v8465_v53 = vld [vmem:[%s10479_s11 + $0xd50] sm:$0xf0]  ;;  %v8340_v58 = vor.u32 %v9485_v45, %v8337_v46  ;;  %v9445_v2 = vld [vmem:[%s10479_s11 + $0xb04] sm:$0xf] }
 0x234   : > { %5937 = vmatpush.bf16.msrb.mxu0 %v8116_v1  ;;  %v8468_v1 = vor.u32 %v9517_v50, %v8465_v53  ;;  %v8177_v30 = vld [vmem:[%s10479_s11 + $0xb10] sm:$0xf0]  ;;  %v9477_v32 = vld [vmem:[%s10479_s11 + $0xc04] sm:$0xf] }
 0x235   : > { %5951 = vmatpush.bf16.msrb.mxu1 %v8244_v10  ;;  %v9481_v10 = vld [vmem:[%s10479_s11 + $0xc24] sm:$0xf]  ;;  %v8433_v37 = vld [vmem:[%s10479_s11 + $0xd10] sm:$0xf0]  ;;  %v8180_v47 = vor.u32 %v9445_v2, %v8177_v30 }
 0x236   : > { %5965 = vmatpush.bf16.msrb.mxu2 %v8372_v17  ;;  %v8321_v17 = vld [vmem:[%s10479_s11 + $0xc30] sm:$0xf0]  ;;  %v9569_v39 = vld [vmem:[%s10479_s11 + $0xee4] sm:$0xf] }
 0x237   : > { %5979 = vmatpush.bf16.msrb.mxu3 %v8500_v23  ;;  %v9413_v23 = vld [vmem:[%s10479_s11 + $0xa04] sm:$0xf]  ;;  %v8324_v28 = vor.u32 %v9481_v10, %v8321_v17  ;;  %v8673_v40 = vld [vmem:[%s10479_s11 + $0xef0] sm:$0xf0] }
 0x238   : > { %5938 = vmatpush.bf16.msrb.mxu0 %v8100_v34  ;;  %v8452_v34 = vor.u32 %v9513_v18, %v8449_v20  ;;  %v8052_v41 = vor.u32 %v9413_v23, %v8049_v24  ;;  %v8801_v43 = vld [vmem:[%s10479_s11 + $0xff0] sm:$0xf0]  ;;  %v9633_v45 = vld [vmem:[%s10479_s11 + $0x10e4] sm:$0xf]  ;;  %v11228_v20 = vpop.f32.mrf.mxu0  ;;  %v11232_v24 = vpop.f32.mrf.mxu1 }
 0x239   : > { %5952 = vmatpush.bf16.msrb.mxu1 %v8228_v35  ;;  %v8305_v35 = vld [vmem:[%s10479_s11 + $0xc10] sm:$0xf0]  ;;  %v9665_v50 = vld [vmem:[%s10479_s11 + $0x11e4] sm:$0xf] }
 0x23a   : > { %5966 = vmatpush.bf16.msrb.mxu2 %v8356_v36  ;;  %v9509_v36 = vld [vmem:[%s10479_s11 + $0xd04] sm:$0xf]  ;;  %v8929_v46 = vld [vmem:[%s10479_s11 + $0x10f0] sm:$0xf0]  ;;  %v8308_v48 = vor.u32 %v9477_v32, %v8305_v35 }
 0x23b   : > { %5980 = vmatpush.bf16.msrb.mxu3 %v8484_v51  ;;  %v9601_v51 = vld [vmem:[%s10479_s11 + $0xfe4] sm:$0xf]  ;;  %v9057_v53 = vld [vmem:[%s10479_s11 + $0x11f0] sm:$0xf0]  ;;  %v8932_v59 = vor.u32 %v9633_v45, %v8929_v46 }
 0x23c   : > { %5939 = vmatpush.bf16.msrb.mxu0 %v8084_v54  ;;  %v8436_v54 = vor.u32 %v9509_v36, %v8433_v37  ;;  %v9565_v61 = vld [vmem:[%s10479_s11 + $0xec4] sm:$0xf]  ;;  %v8657_v62 = vld [vmem:[%s10479_s11 + $0xed0] sm:$0xf0]  ;;  %v9060_v5 = vor.u32 %v9665_v50, %v9057_v53  ;;  %v11249_v50 = vpop.f32.mrf.mxu2 }
 0x23d   : > { %5953 = vmatpush.bf16.msrb.mxu1 %v8212_v56  ;;  %v8676_v56 = vor.u32 %v9569_v39, %v8673_v40  ;;  %v8785_v10 = vld [vmem:[%s10479_s11 + $0xfd0] sm:$0xf0]  ;;  %v9629_v17 = vld [vmem:[%s10479_s11 + $0x10c4] sm:$0xf] }
 0x23e   : > { %5967 = vmatpush.bf16.msrb.mxu2 %v8340_v58  ;;  %v8804_v58 = vor.u32 %v9601_v51, %v8801_v43  ;;  %v8913_v18 = vld [vmem:[%s10479_s11 + $0x10d0] sm:$0xf0]  ;;  %v9561_v30 = vld [vmem:[%s10479_s11 + $0xea4] sm:$0xf] }
 0x23f   : > { %5981 = vmatpush.bf16.msrb.mxu3 %v8468_v1  ;;  %v9597_v1 = vld [vmem:[%s10479_s11 + $0xfc4] sm:$0xf]  ;;  %v9041_v23 = vld [vmem:[%s10479_s11 + $0x11d0] sm:$0xf0]  ;;  %v8916_v2 = vor.u32 %v9629_v17, %v8913_v18 }
 0x240   : > { %5940 = vmatpush.bf16.msrb.mxu0 %v8068_v21  ;;  %v9661_v21 = vld [vmem:[%s10479_s11 + $0x11c4] sm:$0xf]  ;;  %v8641_v32 = vld [vmem:[%s10479_s11 + $0xeb0] sm:$0xf0] }
 0x241   : > { %5954 = vmatpush.bf16.msrb.mxu1 %v8196_v27  ;;  %v8660_v27 = vor.u32 %v9565_v61, %v8657_v62  ;;  %v9044_v35 = vor.u32 %v9661_v21, %v9041_v23  ;;  %v8769_v36 = vld [vmem:[%s10479_s11 + $0xfb0] sm:$0xf0]  ;;  %v9625_v37 = vld [vmem:[%s10479_s11 + $0x10a4] sm:$0xf] }
 0x242   : > { %5968 = vmatpush.bf16.msrb.mxu2 %v8324_v28  ;;  %v8788_v28 = vor.u32 %v9597_v1, %v8785_v10  ;;  %v8897_v39 = vld [vmem:[%s10479_s11 + $0x10b0] sm:$0xf0]  ;;  %v9657_v40 = vld [vmem:[%s10479_s11 + $0x11a4] sm:$0xf] }
 0x243   : > { %5982 = vmatpush.bf16.msrb.mxu3 %v8452_v34  ;;  %v9593_v34 = vld [vmem:[%s10479_s11 + $0xfa4] sm:$0xf]  ;;  %v9025_v51 = vld [vmem:[%s10479_s11 + $0x11b0] sm:$0xf0]  ;;  %v8900_v45 = vor.u32 %v9625_v37, %v8897_v39 }
 0x244   : > { %5941 = vmatpush.bf16.msrb.mxu0 %v8052_v41  ;;  %v8644_v41 = vor.u32 %v9561_v30, %v8641_v32  ;;  %v8772_v43 = vor.u32 %v9593_v34, %v8769_v36  ;;  %v9557_v46 = vld [vmem:[%s10479_s11 + $0xe84] sm:$0xf]  ;;  %v9028_v53 = vor.u32 %v9657_v40, %v9025_v51  ;;  %v9009_v1 = vld [vmem:[%s10479_s11 + $0x1190] sm:$0xf0] }
 0x245   : > { %5955 = vmatpush.bf16.msrb.mxu1 %v8180_v47  ;;  %v8625_v47 = vld [vmem:[%s10479_s11 + $0xe90] sm:$0xf0]  ;;  %v9653_v62 = vld [vmem:[%s10479_s11 + $0x1184] sm:$0xf]  ;;  %v5733_v17 = vpop.f32.mrf.mxu1 }
 0x246   : > { %5969 = vmatpush.bf16.msrb.mxu2 %v8308_v48  ;;  %v9589_v48 = vld [vmem:[%s10479_s11 + $0xf84] sm:$0xf]  ;;  %v8628_v10 = vor.u32 %v9557_v46, %v8625_v47  ;;  %v8737_v32 = vld [vmem:[%s10479_s11 + $0xf70] sm:$0xf0] }
 0x247   : > { %5983 = vmatpush.bf16.msrb.mxu3 %v8436_v54  ;;  %5942 = vmatmul.bf16.vlgmr.msrb.gmra.mxu0 %v10785_v3  ;;  %v8753_v54 = vld [vmem:[%s10479_s11 + $0xf90] sm:$0xf0]  ;;  %v5719_v61 = vpop.f32.mrf.mxu0  ;;  %v9553_v23 = vld [vmem:[%s10479_s11 + $0xe64] sm:$0xf] }
 0x248   : > { %5990 = vmatpush.bf16.msra.mxu0 %v8676_v56  ;;  %5956 = vmatmul.bf16.vlgmr.msrb.gmra.mxu1 %v10791_v8  ;;  %v9621_v56 = vld [vmem:[%s10479_s11 + $0x1084] sm:$0xf]  ;;  %v8756_v18 = vor.u32 %v9589_v48, %v8753_v54  ;;  %v8993_v36 = vld [vmem:[%s10479_s11 + $0x1170] sm:$0xf0] }
 0x249   : > { %6004 = vmatpush.bf16.msra.mxu1 %v8804_v58  ;;  %5970 = vmatmul.bf16.vlgmr.msrb.gmra.mxu2 %v10880_v0  ;;  %v8881_v58 = vld [vmem:[%s10479_s11 + $0x1090] sm:$0xf0]  ;;  %v9617_v34 = vld [vmem:[%s10479_s11 + $0x1064] sm:$0xf] }
 0x24a   : > { %6018 = vmatpush.bf16.msra.mxu2 %v8932_v59  ;;  %5984 = vmatmul.bf16.vlgmr.msrb.gmra.mxu3 %v10887_v9  ;;  %v11254_v59 = vpop.f32.mrf.mxu3  ;;  %v8884_v21 = vor.u32 %v9621_v56, %v8881_v58  ;;  %v9549_v51 = vld [vmem:[%s10479_s11 + $0xe44] sm:$0xf]  ;;  %v8721_v47 = vld [vmem:[%s10479_s11 + $0xf50] sm:$0xf0] }
 0x24b   : > { %6032 = vmatpush.bf16.msra.mxu3 %v9060_v5  ;;  %v5720_v5 = vadd.f32 %v5719_v61, %v11196_v55  ;;  %v8865_v55 = vld [vmem:[%s10479_s11 + $0x1070] sm:$0xf0]  ;;  %v9613_v48 = vld [vmem:[%s10479_s11 + $0x1044] sm:$0xf] }
 0x24c   : > { %5991 = vmatpush.bf16.msra.mxu0 %v8660_v27  ;;  %v8609_v27 = vld [vmem:[%s10479_s11 + $0xe70] sm:$0xf0]  ;;  %v8868_v40 = vor.u32 %v9617_v34, %v8865_v55  ;;  %v9645_v58 = vld [vmem:[%s10479_s11 + $0x1144] sm:$0xf] }
 0x24d   : > { %6005 = vmatpush.bf16.msra.mxu1 %v8788_v28  ;;  %v9585_v28 = vld [vmem:[%s10479_s11 + $0xf64] sm:$0xf]  ;;  %v5734_v30 = vadd.f32 %v5733_v17, %v5720_v5  ;;  %v8612_v37 = vor.u32 %v9553_v23, %v8609_v27  ;;  %v8977_v61 = vld [vmem:[%s10479_s11 + $0x1150] sm:$0xf0] }
 0x24e   : > { %6019 = vmatpush.bf16.msra.mxu2 %v8916_v2  ;;  %v9012_v2 = vor.u32 %v9653_v62, %v9009_v1  ;;  %v8740_v39 = vor.u32 %v9585_v28, %v8737_v32  ;;  %v5747_v46 = vpop.f32.mrf.mxu2  ;;  %v9545_v17 = vld [vmem:[%s10479_s11 + $0xe24] sm:$0xf]  ;;  %v8980_v23 = vor.u32 %v9645_v58, %v8977_v61  ;;  %v8705_v27 = vld [vmem:[%s10479_s11 + $0xf30] sm:$0xf0]  ;;  %v7143_v58 = vld [vmem:[%s10479_s11 + $0x2e8] sm:$0xf] }
 0x24f   : > { %6033 = vmatpush.bf16.msra.mxu3 %v9044_v35  ;;  %v9649_v35 = vld [vmem:[%s10479_s11 + $0x1164] sm:$0xf]  ;;  %v5748_v54 = vadd.f32 %v5747_v46, %v5734_v30  ;;  %v8961_v32 = vld [vmem:[%s10479_s11 + $0x1130] sm:$0xf0]  ;;  %v9188_v61 = vld [vmem:[%s10479_s11 + $0x2f4] sm:$0xf0] }
 0x250   : > { %5992 = vmatpush.bf16.msra.mxu0 %v8644_v41  ;;  %v8593_v41 = vld [vmem:[%s10479_s11 + $0xe50] sm:$0xf0]  ;;  %v9609_v28 = vld [vmem:[%s10479_s11 + $0x1024] sm:$0xf] }
 0x251   : > { %6006 = vmatpush.bf16.msra.mxu1 %v8772_v43  ;;  %v9581_v43 = vld [vmem:[%s10479_s11 + $0xf44] sm:$0xf]  ;;  %v8596_v62 = vor.u32 %v9549_v51, %v8593_v41  ;;  %v8945_v46 = vld [vmem:[%s10479_s11 + $0x1110] sm:$0xf0] }
 0x252   : > { %6020 = vmatpush.bf16.msra.mxu2 %v8900_v45  ;;  %v8996_v45 = vor.u32 %v9649_v35, %v8993_v36  ;;  %v5761_v56 = vpop.f32.mrf.mxu3  ;;  %v8724_v5 = vor.u32 %v9581_v43, %v8721_v47  ;;  %v9641_v30 = vld [vmem:[%s10479_s11 + $0x1124] sm:$0xf]  ;;  %v8561_v35 = vld [vmem:[%s10479_s11 + $0xe10] sm:$0xf0]  ;;  %v6887_v47 = vld [vmem:[%s10479_s11 + $0xe8] sm:$0xf] }
 0x253   : > { %6034 = vmatpush.bf16.msra.mxu3 %v9028_v53  ;;  %v8849_v53 = vld [vmem:[%s10479_s11 + $0x1050] sm:$0xf0]  ;;  %v11275_v1 = vadd.f32 %v5761_v56, %v5748_v54  ;;  %v9541_v55 = vld [vmem:[%s10479_s11 + $0xe04] sm:$0xf]  ;;  %v8964_v41 = vor.u32 %v9641_v30, %v8961_v32  ;;  %v9156_v56 = vld [vmem:[%s10479_s11 + $0x1f4] sm:$0xf0] }
 0x254   : > { %5993 = vmatpush.bf16.msra.mxu0 %v8628_v10  ;;  %v8852_v10 = vor.u32 %v9613_v48, %v8849_v53  ;;  %v9605_v51 = vld [vmem:[%s10479_s11 + $0x1004] sm:$0xf]  ;;  %v8817_v43 = vld [vmem:[%s10479_s11 + $0x1010] sm:$0xf0]  ;;  %v9124_v48 = vld [vmem:[%s10479_s11 + $0xf4] sm:$0xf0]  ;;  %v8564_v54 = vor.u32 %v9541_v55, %v8561_v35 }
 0x255   : > { %6007 = vmatpush.bf16.msra.mxu1 %v8756_v18  ;;  %v8577_v18 = vld [vmem:[%s10479_s11 + $0xe30] sm:$0xf0]  ;;  %v7015_v53 = vld [vmem:[%s10479_s11 + $0x1e8] sm:$0xf]  ;;  %v9184_v35 = vld [vmem:[%s10479_s11 + $0x2d4] sm:$0xf0] }
 0x256   : > { %6021 = vmatpush.bf16.msra.mxu2 %v8884_v21  ;;  %v9577_v21 = vld [vmem:[%s10479_s11 + $0xf24] sm:$0xf]  ;;  %v8580_v34 = vor.u32 %v9545_v17, %v8577_v18  ;;  %v9220_v17 = vld [vmem:[%s10479_s11 + $0x3f4] sm:$0xf0]  ;;  %v6999_v30 = vld [vmem:[%s10479_s11 + $0x1c8] sm:$0xf] }
 0x257   : > { %6035 = vmatpush.bf16.msra.mxu3 %v9012_v2  ;;  %v8833_v2 = vld [vmem:[%s10479_s11 + $0x1030] sm:$0xf0]  ;;  %v8708_v36 = vor.u32 %v9577_v21, %v8705_v27  ;;  %v6888_v21 = vor.u32 %v9124_v48, %v6887_v47  ;;  %v7144_v27 = vor.u32 %v9188_v61, %v7143_v58  ;;  %v7127_v55 = vld [vmem:[%s10479_s11 + $0x2c8] sm:$0xf]  ;;  %v9212_v61 = vld [vmem:[%s10479_s11 + $0x3b4] sm:$0xf0] }
 0x258   : > { %5994 = vmatpush.bf16.msra.mxu0 %v8612_v37  ;;  %v8836_v37 = vor.u32 %v9609_v28, %v8833_v2  ;;  %v6871_v28 = vld [vmem:[%s10479_s11 + $0xc8] sm:$0xf]  ;;  %v9120_v2 = vld [vmem:[%s10479_s11 + $0xd4] sm:$0xf0] }
 0x259   : > { %6008 = vmatpush.bf16.msra.mxu1 %v8740_v39  ;;  %v9573_v39 = vld [vmem:[%s10479_s11 + $0xf04] sm:$0xf]  ;;  %v6983_v47 = vld [vmem:[%s10479_s11 + $0x1a8] sm:$0xf] }
 0x25a   : > { %6022 = vmatpush.bf16.msra.mxu2 %v8868_v40  ;;  %v8689_v40 = vld [vmem:[%s10479_s11 + $0xf10] sm:$0xf0]  ;;  %v7239_v58 = vld [vmem:[%s10479_s11 + $0x3a8] sm:$0xf] }
 0x25b   : > { %6036 = vmatpush.bf16.msra.mxu3 %v8996_v45  ;;  %v9637_v45 = vld [vmem:[%s10479_s11 + $0x1104] sm:$0xf] }
 0x25c   : > { %5995 = vmatpush.bf16.msra.mxu0 %v8596_v62  ;;  %v8692_v62 = vor.u32 %v9573_v39, %v8689_v40  ;;  %v8948_v18 = vor.u32 %v9637_v45, %v8945_v46  ;;  %v9216_v39 = vld [vmem:[%s10479_s11 + $0x3d4] sm:$0xf0]  ;;  %v11311_v40 = vpop.f32.mrf.mxu1  ;;  %v6855_v45 = vld [vmem:[%s10479_s11 + $0xa8] sm:$0xf] }
 0x25d   : > { %6009 = vmatpush.bf16.msra.mxu1 %v8724_v5  ;;  %v8820_v5 = vor.u32 %v9605_v51, %v8817_v43  ;;  %v6872_v51 = vor.u32 %v9120_v2, %v6871_v28  ;;  %v7128_v43 = vor.u32 %v9184_v35, %v7127_v55  ;;  %v9116_v46 = vld [vmem:[%s10479_s11 + $0xb4] sm:$0xf0]  ;;  %v7095_v28 = vld [vmem:[%s10479_s11 + $0x288] sm:$0xf] }
 0x25e   : > { %6023 = vmatpush.bf16.msra.mxu2 %v8852_v10  ;;  %v7271_v10 = vld [vmem:[%s10479_s11 + $0x3e8] sm:$0xf]  ;;  %v9176_v2 = vld [vmem:[%s10479_s11 + $0x294] sm:$0xf0] }
 0x25f   : > { %6037 = vmatpush.bf16.msra.mxu3 %v8980_v23  ;;  %v7016_v23 = vor.u32 %v9156_v56, %v7015_v53  ;;  %v7272_v32 = vor.u32 %v9220_v17, %v7271_v10  ;;  %v9148_v53 = vld [vmem:[%s10479_s11 + $0x1b4] sm:$0xf0]  ;;  %v6839_v17 = vld [vmem:[%s10479_s11 + $0x88] sm:$0xf] }
 0x260   : > { %5996 = vmatpush.bf16.msra.mxu0 %v8580_v34  ;;  %v9152_v34 = vld [vmem:[%s10479_s11 + $0x1d4] sm:$0xf0] }
 0x261   : > { %6010 = vmatpush.bf16.msra.mxu1 %v8708_v36  ;;  %v11307_v36 = vpop.f32.mrf.mxu0  ;;  %v9180_v56 = vld [vmem:[%s10479_s11 + $0x2b4] sm:$0xf0] }
 0x262   : > { %6024 = vmatpush.bf16.msra.mxu2 %v8836_v37  ;;  %v7255_v37 = vld [vmem:[%s10479_s11 + $0x3c8] sm:$0xf] }
 0x263   : > { %6038 = vmatpush.bf16.msra.mxu3 %v8964_v41  ;;  %v7000_v41 = vor.u32 %v9152_v34, %v6999_v30  ;;  %v7256_v48 = vor.u32 %v9216_v39, %v7255_v37  ;;  %v9208_v34 = vld [vmem:[%s10479_s11 + $0x394] sm:$0xf0] }
 0x264   : > { %5997 = vmatpush.bf16.msra.mxu0 %v8564_v54  ;;  %v7111_v54 = vld [vmem:[%s10479_s11 + $0x2a8] sm:$0xf] }
 0x265   : > { %6011 = vmatpush.bf16.msra.mxu1 %v8692_v62  ;;  %v6856_v62 = vor.u32 %v9116_v46, %v6855_v45  ;;  %v7112_v10 = vor.u32 %v9180_v56, %v7111_v54  ;;  %v5789_v37 = vpop.f32.mrf.mxu1  ;;  %v6951_v45 = vld [vmem:[%s10479_s11 + $0x168] sm:$0xf]  ;;  %v9204_v56 = vld [vmem:[%s10479_s11 + $0x374] sm:$0xf0] }
 0x266   : > { %6025 = vmatpush.bf16.msra.mxu2 %v8820_v5  ;;  %v6984_v5 = vor.u32 %v9148_v53, %v6983_v47  ;;  %v9172_v53 = vld [vmem:[%s10479_s11 + $0x274] sm:$0xf0]  ;;  %v7207_v54 = vld [vmem:[%s10479_s11 + $0x368] sm:$0xf] }
 0x267   : > { %6039 = vmatpush.bf16.msra.mxu3 %v8948_v18  ;;  %5998 = vmatmul.bf16.vlgmr.msra.gmra.mxu0 %v10885_v6  ;;  %v9112_v18 = vld [vmem:[%s10479_s11 + $0x94] sm:$0xf0] }
 0x268   : > { %6046 = vmatpush.bf16.msrb.mxu0 %v6888_v21  ;;  %6012 = vmatmul.bf16.vlgmr.msra.gmra.mxu1 %v10891_v14  ;;  %v6967_v21 = vld [vmem:[%s10479_s11 + $0x188] sm:$0xf]  ;;  %v6840_v35 = vor.u32 %v9112_v18, %v6839_v17  ;;  %v7208_v18 = vor.u32 %v9204_v56, %v7207_v54 }
 0x269   : > { %6060 = vmatpush.bf16.msrb.mxu1 %v7016_v23  ;;  %6026 = vmatmul.bf16.vlgmr.msra.gmra.mxu2 %v10981_v13  ;;  %v7240_v23 = vor.u32 %v9212_v61, %v7239_v58  ;;  %v5775_v30 = vpop.f32.mrf.mxu0  ;;  %v6935_v17 = vld [vmem:[%s10479_s11 + $0x148] sm:$0xf] }
 0x26a   : > { %6074 = vmatpush.bf16.msrb.mxu2 %v7144_v27  ;;  %6040 = vmatmul.bf16.vlgmr.msra.gmra.mxu3 %v10992_v19  ;;  %v9144_v27 = vld [vmem:[%s10479_s11 + $0x194] sm:$0xf0]  ;;  %v5776_v55 = vadd.f32 %v5775_v30, %v11275_v1  ;;  %v7079_v1 = vld [vmem:[%s10479_s11 + $0x268] sm:$0xf]  ;;  %v12111_v19 = vperm.slane %v11000_v29, 0 }
 0x26b   : > { %6088 = vmatpush.bf16.msrb.mxu3 %v7272_v32  ;;  %v7223_v32 = vld [vmem:[%s10479_s11 + $0x388] sm:$0xf]  ;;  %v6968_v39 = vor.u32 %v9144_v27, %v6967_v21  ;;  %v9136_v21 = vld [vmem:[%s10479_s11 + $0x154] sm:$0xf0] }
 0x26c   : > { %6047 = vmatpush.bf16.msrb.mxu0 %v6872_v51  ;;  %v7096_v51 = vor.u32 %v9176_v2, %v7095_v28  ;;  %v7224_v46 = vor.u32 %v9208_v34, %v7223_v32  ;;  %v11337_v47 = vadd.f32 %v5789_v37, %v5776_v55  ;;  %v9168_v27 = vld [vmem:[%s10479_s11 + $0x254] sm:$0xf0]  ;;  %v7191_v28 = vld [vmem:[%s10479_s11 + $0x348] sm:$0xf]  ;;  %v6936_v32 = vor.u32 %v9136_v21, %v6935_v17 }
 0x26d   : > { %6061 = vmatpush.bf16.msrb.mxu1 %v7000_v41  ;;  %v6823_v41 = vld [vmem:[%s10479_s11 + $0x68] sm:$0xf]  ;;  %v9200_v2 = vld [vmem:[%s10479_s11 + $0x354] sm:$0xf0] }
 0x26e   : > { %6075 = vmatpush.bf16.msrb.mxu2 %v7128_v43  ;;  %v9108_v43 = vld [vmem:[%s10479_s11 + $0x74] sm:$0xf0]  ;;  %12107 = vst [vmem:[#allocation14_spill] sm:$0xff] %v11337_v47  ;;  %v6791_v55 = vld [vmem:[%s10479_s11 + $0x28] sm:$0xf] }
 0x26f   : > { %6089 = vmatpush.bf16.msrb.mxu3 %v7256_v48  ;;  %v9140_v48 = vld [vmem:[%s10479_s11 + $0x174] sm:$0xf0]  ;;  %v6824_v58 = vor.u32 %v9108_v43, %v6823_v41  ;;  %v6919_v37 = vld [vmem:[%s10479_s11 + $0x128] sm:$0xf] }
 0x270   : > { %6048 = vmatpush.bf16.msrb.mxu0 %v6856_v62  ;;  %v6952_v61 = vor.u32 %v9140_v48, %v6951_v45  ;;  %v7080_v62 = vor.u32 %v9172_v53, %v7079_v1  ;;  %v7047_v41 = vld [vmem:[%s10479_s11 + $0x228] sm:$0xf]  ;;  %v9164_v43 = vld [vmem:[%s10479_s11 + $0x234] sm:$0xf0] }
 0x271   : > { %6062 = vmatpush.bf16.msrb.mxu1 %v6984_v5  ;;  %v6807_v5 = vld [vmem:[%s10479_s11 + $0x48] sm:$0xf]  ;;  %v9096_v53 = vld [vmem:[%s10479_s11 + $0x14] sm:$0xf0]  ;;  %v7048_v56 = vor.u32 %v9164_v43, %v7047_v41 }
 0x272   : > { %6076 = vmatpush.bf16.msrb.mxu2 %v7112_v10  ;;  %v9104_v10 = vld [vmem:[%s10479_s11 + $0x54] sm:$0xf0]  ;;  %v7175_v45 = vld [vmem:[%s10479_s11 + $0x328] sm:$0xf] }
 0x273   : > { %6090 = vmatpush.bf16.msrb.mxu3 %v7240_v23  ;;  %v7063_v23 = vld [vmem:[%s10479_s11 + $0x248] sm:$0xf]  ;;  %v6808_v30 = vor.u32 %v9104_v10, %v6807_v5  ;;  %v9160_v10 = vld [vmem:[%s10479_s11 + $0x214] sm:$0xf0] }
 0x274   : > { %6049 = vmatpush.bf16.msrb.mxu0 %v6840_v35  ;;  %v7064_v34 = vor.u32 %v9168_v27, %v7063_v23  ;;  %v9100_v35 = vld [vmem:[%s10479_s11 + $0x34] sm:$0xf0]  ;;  %v6775_v1 = vld [vmem:[%s10479_s11 + $0x8] sm:$0xf] }
 0x275   : > { %6063 = vmatpush.bf16.msrb.mxu1 %v6968_v39  ;;  %v7192_v39 = vor.u32 %v9200_v2, %v7191_v28  ;;  %v6792_v48 = vor.u32 %v9100_v35, %v6791_v55  ;;  %v7159_v17 = vld [vmem:[%s10479_s11 + $0x308] sm:$0xf]  ;;  %v9252_v23 = vld [vmem:[%s10479_s11 + $0x4f4] sm:$0xf0]  ;;  %v6776_v28 = vor.u32 %v9096_v53, %v6775_v1 }
 0x276   : > { %6077 = vmatpush.bf16.msrb.mxu2 %v7096_v51  ;;  %v9132_v51 = vld [vmem:[%s10479_s11 + $0x134] sm:$0xf0]  ;;  %v7399_v21 = vld [vmem:[%s10479_s11 + $0x4e8] sm:$0xf] }
 0x277   : > { %6091 = vmatpush.bf16.msrb.mxu3 %v7224_v46  ;;  %v9196_v46 = vld [vmem:[%s10479_s11 + $0x334] sm:$0xf0]  ;;  %v6920_v54 = vor.u32 %v9132_v51, %v6919_v37  ;;  %v7527_v27 = vld [vmem:[%s10479_s11 + $0x5e8] sm:$0xf]  ;;  %v7400_v51 = vor.u32 %v9252_v23, %v7399_v21 }
 0x278   : > { %6050 = vmatpush.bf16.msrb.mxu0 %v6824_v58  ;;  %v6903_v58 = vld [vmem:[%s10479_s11 + $0x108] sm:$0xf]  ;;  %v7176_v5 = vor.u32 %v9196_v46, %v7175_v45  ;;  %v9284_v2 = vld [vmem:[%s10479_s11 + $0x5f4] sm:$0xf0] }
 0x279   : > { %6064 = vmatpush.bf16.msrb.mxu1 %v6952_v61  ;;  %v9128_v61 = vld [vmem:[%s10479_s11 + $0x114] sm:$0xf0]  ;;  %v7783_v35 = vld [vmem:[%s10479_s11 + $0x7e8] sm:$0xf]  ;;  %v7528_v41 = vor.u32 %v9284_v2, %v7527_v27 }
 0x27a   : > { %6078 = vmatpush.bf16.msrb.mxu2 %v7080_v62  ;;  %v7031_v62 = vld [vmem:[%s10479_s11 + $0x208] sm:$0xf]  ;;  %v9348_v37 = vld [vmem:[%s10479_s11 + $0x7f4] sm:$0xf0] }
 0x27b   : > { %6092 = vmatpush.bf16.msrb.mxu3 %v7208_v18  ;;  %v9192_v18 = vld [vmem:[%s10479_s11 + $0x314] sm:$0xf0]  ;;  %v7032_v55 = vor.u32 %v9160_v10, %v7031_v62  ;;  %v7383_v45 = vld [vmem:[%s10479_s11 + $0x4c8] sm:$0xf]  ;;  %v7784_v1 = vor.u32 %v9348_v37, %v7783_v35 }
 0x27c   : > { %6051 = vmatpush.bf16.msrb.mxu0 %v6808_v30  ;;  %v7655_v30 = vld [vmem:[%s10479_s11 + $0x6e8] sm:$0xf]  ;;  %v9248_v46 = vld [vmem:[%s10479_s11 + $0x4d4] sm:$0xf0] }
 0x27d   : > { %6065 = vmatpush.bf16.msrb.mxu1 %v6936_v32  ;;  %v9316_v32 = vld [vmem:[%s10479_s11 + $0x6f4] sm:$0xf0]  ;;  %v7384_v62 = vor.u32 %v9248_v46, %v7383_v45  ;;  %v7495_v21 = vld [vmem:[%s10479_s11 + $0x5a8] sm:$0xf] }
 0x27e   : > { %6079 = vmatpush.bf16.msrb.mxu2 %v7064_v34  ;;  %v6904_v34 = vor.u32 %v9128_v61, %v6903_v58  ;;  %v7656_v43 = vor.u32 %v9316_v32, %v7655_v30  ;;  %v9280_v53 = vld [vmem:[%s10479_s11 + $0x5d4] sm:$0xf0]  ;;  %v7767_v58 = vld [vmem:[%s10479_s11 + $0x7c8] sm:$0xf] }
 0x27f   : > { %6093 = vmatpush.bf16.msrb.mxu3 %v7192_v39  ;;  %v7160_v39 = vor.u32 %v9192_v18, %v7159_v17  ;;  %v9344_v61 = vld [vmem:[%s10479_s11 + $0x7d4] sm:$0xf0]  ;;  %v7367_v17 = vld [vmem:[%s10479_s11 + $0x4a8] sm:$0xf] }
 0x280   : > { %6052 = vmatpush.bf16.msrb.mxu0 %v6792_v48  ;;  %v7511_v48 = vld [vmem:[%s10479_s11 + $0x5c8] sm:$0xf]  ;;  %v9244_v18 = vld [vmem:[%s10479_s11 + $0x4b4] sm:$0xf0]  ;;  %v7768_v23 = vor.u32 %v9344_v61, %v7767_v58 }
 0x281   : > { %6066 = vmatpush.bf16.msrb.mxu1 %v6920_v54  ;;  %v7639_v54 = vld [vmem:[%s10479_s11 + $0x6c8] sm:$0xf]  ;;  %v9276_v27 = vld [vmem:[%s10479_s11 + $0x5b4] sm:$0xf0] }
 0x282   : > { %6080 = vmatpush.bf16.msrb.mxu2 %v7048_v56  ;;  %v9312_v56 = vld [vmem:[%s10479_s11 + $0x6d4] sm:$0xf0]  ;;  %v7751_v30 = vld [vmem:[%s10479_s11 + $0x7a8] sm:$0xf] }
 0x283   : > { %6094 = vmatpush.bf16.msrb.mxu3 %v7176_v5  ;;  %v7512_v5 = vor.u32 %v9280_v53, %v7511_v48  ;;  %v7640_v10 = vor.u32 %v9312_v56, %v7639_v54  ;;  %v9308_v2 = vld [vmem:[%s10479_s11 + $0x6b4] sm:$0xf0]  ;;  %v7351_v37 = vld [vmem:[%s10479_s11 + $0x488] sm:$0xf] }
 0x284   : > { %6053 = vmatpush.bf16.msrb.mxu0 %v6776_v28  ;;  %v7623_v28 = vld [vmem:[%s10479_s11 + $0x6a8] sm:$0xf]  ;;  %v9340_v32 = vld [vmem:[%s10479_s11 + $0x7b4] sm:$0xf0] }
 0x285   : > { %6067 = vmatpush.bf16.msrb.mxu1 %v6904_v34  ;;  %v7368_v34 = vor.u32 %v9244_v18, %v7367_v17  ;;  %v7624_v35 = vor.u32 %v9308_v2, %v7623_v28  ;;  %v7607_v45 = vld [vmem:[%s10479_s11 + $0x688] sm:$0xf]  ;;  %v9304_v46 = vld [vmem:[%s10479_s11 + $0x694] sm:$0xf0] }
 0x286   : > { %6081 = vmatpush.bf16.msrb.mxu2 %v7032_v55  ;;  %v7496_v55 = vor.u32 %v9276_v27, %v7495_v21  ;;  %v7735_v48 = vld [vmem:[%s10479_s11 + $0x788] sm:$0xf]  ;;  %v7608_v56 = vor.u32 %v9304_v46, %v7607_v45  ;;  %v9236_v61 = vld [vmem:[%s10479_s11 + $0x474] sm:$0xf0] }
 0x287   : > { %6095 = vmatpush.bf16.msrb.mxu3 %v7160_v39  ;;  %6054 = vmatmul.bf16.vlgmr.msrb.gmra.mxu0 %v10572_v26  ;;  %v9240_v39 = vld [vmem:[%s10479_s11 + $0x494] sm:$0xf0]  ;;  %v7335_v58 = vld [vmem:[%s10479_s11 + $0x468] sm:$0xf] }
 0x288   : > { %6102 = vmatpush.bf16.msra.mxu0 %v7400_v51  ;;  %6068 = vmatmul.bf16.vlgmr.msrb.gmra.mxu1 %v10596_v42  ;;  %v7479_v51 = vld [vmem:[%s10479_s11 + $0x588] sm:$0xf]  ;;  %v7352_v53 = vor.u32 %v9240_v39, %v7351_v37  ;;  %v9300_v18 = vld [vmem:[%s10479_s11 + $0x674] sm:$0xf0]  ;;  %v7336_v27 = vor.u32 %v9236_v61, %v7335_v58 }
 0x289   : > { %6116 = vmatpush.bf16.msra.mxu1 %v7528_v41  ;;  %6082 = vmatmul.bf16.vlgmr.msrb.gmra.mxu2 %v10580_v33  ;;  %v7752_v41 = vor.u32 %v9340_v32, %v7751_v30  ;;  %v7591_v17 = vld [vmem:[%s10479_s11 + $0x668] sm:$0xf]  ;;  %v9232_v32 = vld [vmem:[%s10479_s11 + $0x454] sm:$0xf0] }
 0x28a   : > { %6130 = vmatpush.bf16.msra.mxu2 %v7656_v43  ;;  %6096 = vmatmul.bf16.vlgmr.msrb.gmra.mxu3 %v10604_v49  ;;  %v9272_v43 = vld [vmem:[%s10479_s11 + $0x594] sm:$0xf0]  ;;  %v7719_v21 = vld [vmem:[%s10479_s11 + $0x768] sm:$0xf]  ;;  %v7592_v2 = vor.u32 %v9300_v18, %v7591_v17 }
 0x28b   : > { %6144 = vmatpush.bf16.msra.mxu3 %v7784_v1  ;;  %v9336_v1 = vld [vmem:[%s10479_s11 + $0x794] sm:$0xf0]  ;;  %v7480_v54 = vor.u32 %v9272_v43, %v7479_v51  ;;  %v7319_v30 = vld [vmem:[%s10479_s11 + $0x448] sm:$0xf] }
 0x28c   : > { %6103 = vmatpush.bf16.msra.mxu0 %v7384_v62  ;;  %v7463_v62 = vld [vmem:[%s10479_s11 + $0x568] sm:$0xf]  ;;  %v9296_v39 = vld [vmem:[%s10479_s11 + $0x654] sm:$0xf0]  ;;  %v7320_v43 = vor.u32 %v9232_v32, %v7319_v30  ;;  %v11433_v30 = vpop.f32.mrf.mxu2 }
 0x28d   : > { %6117 = vmatpush.bf16.msra.mxu1 %v7512_v5  ;;  %v7736_v5 = vor.u32 %v9336_v1, %v7735_v48  ;;  %v7575_v37 = vld [vmem:[%s10479_s11 + $0x648] sm:$0xf]  ;;  %v9228_v1 = vld [vmem:[%s10479_s11 + $0x434] sm:$0xf0] }
 0x28e   : > { %6131 = vmatpush.bf16.msra.mxu2 %v7640_v10  ;;  %v9268_v10 = vld [vmem:[%s10479_s11 + $0x574] sm:$0xf0]  ;;  %v7703_v51 = vld [vmem:[%s10479_s11 + $0x748] sm:$0xf]  ;;  %v7576_v46 = vor.u32 %v9296_v39, %v7575_v37  ;;  %v11438_v37 = vpop.f32.mrf.mxu3 }
 0x28f   : > { %6145 = vmatpush.bf16.msra.mxu3 %v7768_v23  ;;  %v9332_v23 = vld [vmem:[%s10479_s11 + $0x774] sm:$0xf0]  ;;  %v7464_v28 = vor.u32 %v9268_v10, %v7463_v62  ;;  %v7303_v48 = vld [vmem:[%s10479_s11 + $0x428] sm:$0xf] }
 0x290   : > { %6104 = vmatpush.bf16.msra.mxu0 %v7368_v34  ;;  %v7447_v34 = vld [vmem:[%s10479_s11 + $0x548] sm:$0xf]  ;;  %v9292_v61 = vld [vmem:[%s10479_s11 + $0x634] sm:$0xf0]  ;;  %v7304_v10 = vor.u32 %v9228_v1, %v7303_v48 }
 0x291   : > { %6118 = vmatpush.bf16.msra.mxu1 %v7496_v55  ;;  %v7720_v55 = vor.u32 %v9332_v23, %v7719_v21  ;;  %v7559_v58 = vld [vmem:[%s10479_s11 + $0x628] sm:$0xf]  ;;  %v9224_v18 = vld [vmem:[%s10479_s11 + $0x414] sm:$0xf0] }
 0x292   : > { %6132 = vmatpush.bf16.msra.mxu2 %v7624_v35  ;;  %v9264_v35 = vld [vmem:[%s10479_s11 + $0x554] sm:$0xf0]  ;;  %v7687_v62 = vld [vmem:[%s10479_s11 + $0x728] sm:$0xf]  ;;  %v7560_v23 = vor.u32 %v9292_v61, %v7559_v58 }
 0x293   : > { %6146 = vmatpush.bf16.msra.mxu3 %v7752_v41  ;;  %v9328_v41 = vld [vmem:[%s10479_s11 + $0x754] sm:$0xf0]  ;;  %v7448_v45 = vor.u32 %v9264_v35, %v7447_v34  ;;  %v7287_v17 = vld [vmem:[%s10479_s11 + $0x408] sm:$0xf] }
 0x294   : > { %6105 = vmatpush.bf16.msra.mxu0 %v7352_v53  ;;  %v7431_v53 = vld [vmem:[%s10479_s11 + $0x528] sm:$0xf]  ;;  %v9288_v34 = vld [vmem:[%s10479_s11 + $0x614] sm:$0xf0] }
 0x295   : > { %6119 = vmatpush.bf16.msra.mxu1 %v7480_v54  ;;  %v7704_v54 = vor.u32 %v9328_v41, %v7703_v51  ;;  %v9320_v35 = vld [vmem:[%s10479_s11 + $0x714] sm:$0xf0]  ;;  %v7911_v39 = vld [vmem:[%s10479_s11 + $0x8e8] sm:$0xf] }
 0x296   : > { %6133 = vmatpush.bf16.msra.mxu2 %v7608_v56  ;;  %v9260_v56 = vld [vmem:[%s10479_s11 + $0x534] sm:$0xf0]  ;;  %v8039_v41 = vld [vmem:[%s10479_s11 + $0x9e8] sm:$0xf] }
 0x297   : > { %6147 = vmatpush.bf16.msra.mxu3 %v7736_v5  ;;  %v9324_v5 = vld [vmem:[%s10479_s11 + $0x734] sm:$0xf0]  ;;  %v7432_v21 = vor.u32 %v9260_v56, %v7431_v53 }
 0x298   : > { %6106 = vmatpush.bf16.msra.mxu0 %v7336_v27  ;;  %v7415_v27 = vld [vmem:[%s10479_s11 + $0x508] sm:$0xf]  ;;  %v7688_v32 = vor.u32 %v9324_v5, %v7687_v62  ;;  %v9380_v51 = vld [vmem:[%s10479_s11 + $0x8f4] sm:$0xf0] }
 0x299   : > { %6120 = vmatpush.bf16.msra.mxu1 %v7464_v28  ;;  %v9256_v28 = vld [vmem:[%s10479_s11 + $0x514] sm:$0xf0]  ;;  %v7912_v61 = vor.u32 %v9380_v51, %v7911_v39  ;;  %v7879_v51 = vld [vmem:[%s10479_s11 + $0x8a8] sm:$0xf] }
 0x29a   : > { %6134 = vmatpush.bf16.msra.mxu2 %v7592_v2  ;;  %v7543_v2 = vld [vmem:[%s10479_s11 + $0x608] sm:$0xf]  ;;  %v9444_v48 = vld [vmem:[%s10479_s11 + $0xaf4] sm:$0xf0]  ;;  %v7416_v1 = vor.u32 %v9256_v28, %v7415_v27 }
 0x29b   : > { %6148 = vmatpush.bf16.msra.mxu3 %v7720_v55  ;;  %v7671_v55 = vld [vmem:[%s10479_s11 + $0x708] sm:$0xf]  ;;  %v7544_v53 = vor.u32 %v9288_v34, %v7543_v2  ;;  %v9476_v56 = vld [vmem:[%s10479_s11 + $0xbf4] sm:$0xf0] }
 0x29c   : > { %6107 = vmatpush.bf16.msra.mxu0 %v7320_v43  ;;  %v7288_v43 = vor.u32 %v9224_v18, %v7287_v17  ;;  %v7672_v58 = vor.u32 %v9320_v35, %v7671_v55  ;;  %v9376_v17 = vld [vmem:[%s10479_s11 + $0x8d4] sm:$0xf0]  ;;  %v8023_v18 = vld [vmem:[%s10479_s11 + $0x9c8] sm:$0xf]  ;;  %v11458_v55 = vpop.f32.mrf.mxu3 }
 0x29d   : > { %6121 = vmatpush.bf16.msra.mxu1 %v7448_v45  ;;  %v9412_v45 = vld [vmem:[%s10479_s11 + $0x9f4] sm:$0xf0]  ;;  %v8279_v28 = vld [vmem:[%s10479_s11 + $0xbc8] sm:$0xf]  ;;  %v8024_v35 = vor.u32 %v9408_v38, %v8023_v18 }
 0x29e   : > { %6135 = vmatpush.bf16.msra.mxu2 %v7576_v46  ;;  %v8167_v46 = vld [vmem:[%s10479_s11 + $0xae8] sm:$0xf]  ;;  %v8040_v62 = vor.u32 %v9412_v45, %v8039_v41  ;;  %v9440_v27 = vld [vmem:[%s10479_s11 + $0xad4] sm:$0xf0] }
 0x29f   : > { %6149 = vmatpush.bf16.msra.mxu3 %v7704_v54  ;;  %v8295_v54 = vld [vmem:[%s10479_s11 + $0xbe8] sm:$0xf]  ;;  %v8168_v5 = vor.u32 %v9444_v48, %v8167_v46  ;;  %v9472_v2 = vld [vmem:[%s10479_s11 + $0xbd4] sm:$0xf0] }
 0x2a0   : > { %6108 = vmatpush.bf16.msra.mxu0 %v7304_v10  ;;  %v7895_v10 = vld [vmem:[%s10479_s11 + $0x8c8] sm:$0xf]  ;;  %v9372_v41 = vld [vmem:[%s10479_s11 + $0x8b4] sm:$0xf0]  ;;  %v8280_v45 = vor.u32 %v9472_v2, %v8279_v28 }
 0x2a1   : > { %6122 = vmatpush.bf16.msra.mxu1 %v7432_v21  ;;  %v8296_v21 = vor.u32 %v9476_v56, %v8295_v54  ;;  %v7896_v34 = vor.u32 %v9376_v17, %v7895_v10  ;;  %v9404_v46 = vld [vmem:[%s10479_s11 + $0x9b4] sm:$0xf0]  ;;  %v8135_v48 = vld [vmem:[%s10479_s11 + $0xaa8] sm:$0xf]  ;;  %v7880_v54 = vor.u32 %v9372_v41, %v7879_v51  ;;  %v11472_v56 = vpop.f32.mrf.mxu0  ;;  %v11477_v17 = vpop.f32.mrf.mxu1 }
 0x2a2   : > { %6136 = vmatpush.bf16.msra.mxu2 %v7560_v23  ;;  %v8151_v23 = vld [vmem:[%s10479_s11 + $0xac8] sm:$0xf]  ;;  %v9468_v38 = vld [vmem:[%s10479_s11 + $0xbb4] sm:$0xf0]  ;;  %12108 = vst [vmem:[#allocation15_spill] sm:$0xff] %v11472_v56 }
 0x2a3   : > { %6150 = vmatpush.bf16.msra.mxu3 %v7688_v32  ;;  %v11456_v32 = vpop.f32.mrf.mxu2  ;;  %v8152_v39 = vor.u32 %v9440_v27, %v8151_v23  ;;  %v7991_v10 = vld [vmem:[%s10479_s11 + $0x988] sm:$0xf]  ;;  %12109 = vst [vmem:[#allocation16_spill] sm:$0xff] %v11477_v17  ;;  %v9432_v27 = vld [vmem:[%s10479_s11 + $0xa94] sm:$0xf0] }
 0x2a4   : > { %6109 = vmatpush.bf16.msra.mxu0 %v7288_v43  ;;  %v8007_v43 = vld [vmem:[%s10479_s11 + $0x9a8] sm:$0xf]  ;;  %v9464_v2 = vld [vmem:[%s10479_s11 + $0xb94] sm:$0xf0] }
 0x2a5   : > { %6123 = vmatpush.bf16.msra.mxu1 %v7416_v1  ;;  %v9436_v1 = vld [vmem:[%s10479_s11 + $0xab4] sm:$0xf0]  ;;  %v8119_v23 = vld [vmem:[%s10479_s11 + $0xa88] sm:$0xf] }
 0x2a6   : > { %6137 = vmatpush.bf16.msra.mxu2 %v7544_v53  ;;  %v8263_v53 = vld [vmem:[%s10479_s11 + $0xba8] sm:$0xf]  ;;  %v9364_v41 = vld [vmem:[%s10479_s11 + $0x874] sm:$0xf0] }
 0x2a7   : > { %6151 = vmatpush.bf16.msra.mxu3 %v7672_v58  ;;  %6110 = vmatmul.bf16.vlgmr.msra.gmra.mxu0 %v10680_v7  ;;  %v8008_v58 = vor.u32 %v9404_v46, %v8007_v43  ;;  %v8264_v18 = vor.u32 %v9468_v38, %v8263_v53  ;;  %v8247_v28 = vld [vmem:[%s10479_s11 + $0xb88] sm:$0xf]  ;;  %v9428_v53 = vld [vmem:[%s10479_s11 + $0xa74] sm:$0xf0]  ;;  %v11492_v38 = vpop.f32.mrf.mxu3 }
 0x2a8   : > { %6158 = vmatpush.bf16.msrb.mxu0 %v7912_v61  ;;  %6124 = vmatmul.bf16.vlgmr.msra.gmra.mxu1 %v10687_v12  ;;  %v8136_v61 = vor.u32 %v9436_v1, %v8135_v48  ;;  %v7847_v51 = vld [vmem:[%s10479_s11 + $0x868] sm:$0xf]  ;;  %v8248_v46 = vor.u32 %v9464_v2, %v8247_v28  ;;  %v9396_v48 = vld [vmem:[%s10479_s11 + $0x974] sm:$0xf0] }
 0x2a9   : > { %6172 = vmatpush.bf16.msrb.mxu1 %v8040_v62  ;;  %6138 = vmatmul.bf16.vlgmr.msra.gmra.mxu2 %v10685_v11  ;;  %v7863_v62 = vld [vmem:[%s10479_s11 + $0x888] sm:$0xf]  ;;  %v9392_v2 = vld [vmem:[%s10479_s11 + $0x954] sm:$0xf0] }
 0x2aa   : > { %6186 = vmatpush.bf16.msrb.mxu2 %v8168_v5  ;;  %6152 = vmatmul.bf16.vlgmr.msra.gmra.mxu3 %v10691_v15  ;;  %v9368_v5 = vld [vmem:[%s10479_s11 + $0x894] sm:$0xf0]  ;;  %v7975_v43 = vld [vmem:[%s10479_s11 + $0x968] sm:$0xf] }
 0x2ab   : > { %6200 = vmatpush.bf16.msrb.mxu3 %v8296_v21  ;;  %v9400_v21 = vld [vmem:[%s10479_s11 + $0x994] sm:$0xf0]  ;;  %v8103_v1 = vld [vmem:[%s10479_s11 + $0xa68] sm:$0xf] }
 0x2ac   : > { %6159 = vmatpush.bf16.msrb.mxu0 %v7896_v34  ;;  %v7864_v34 = vor.u32 %v9368_v5, %v7863_v62  ;;  %v11496_v62 = vpop.f32.mrf.mxu0  ;;  %v7976_v5 = vor.u32 %v9396_v48, %v7975_v43  ;;  %v8071_v15 = vld [vmem:[%s10479_s11 + $0xa28] sm:$0xf]  ;;  %v9420_v11 = vld [vmem:[%s10479_s11 + $0xa34] sm:$0xf0] }
 0x2ad   : > { %6173 = vmatpush.bf16.msrb.mxu1 %v8024_v35  ;;  %v7992_v35 = vor.u32 %v9400_v21, %v7991_v10  ;;  %v8104_v10 = vor.u32 %v9428_v53, %v8103_v1  ;;  %v9360_v21 = vld [vmem:[%s10479_s11 + $0x854] sm:$0xf0]  ;;  %v7943_v53 = vld [vmem:[%s10479_s11 + $0x928] sm:$0xf] }
 0x2ae   : > { %6187 = vmatpush.bf16.msrb.mxu2 %v8152_v39  ;;  %v8120_v39 = vor.u32 %v9432_v27, %v8119_v23  ;;  %v7959_v23 = vld [vmem:[%s10479_s11 + $0x948] sm:$0xf]  ;;  %v11501_v27 = vpop.f32.mrf.mxu1  ;;  %v9356_v1 = vld [vmem:[%s10479_s11 + $0x834] sm:$0xf0] }
 0x2af   : > { %6201 = vmatpush.bf16.msrb.mxu3 %v8280_v45  ;;  %v11487_v45 = vpop.f32.mrf.mxu2  ;;  %v7960_v43 = vor.u32 %v9392_v2, %v7959_v23  ;;  %v9352_v2 = vld [vmem:[%s10479_s11 + $0x814] sm:$0xf0]  ;;  %v8055_v12 = vld [vmem:[%s10479_s11 + $0xa08] sm:$0xf] }
 0x2b0   : > { %6160 = vmatpush.bf16.msrb.mxu0 %v7880_v54  ;;  %v8231_v54 = vld [vmem:[%s10479_s11 + $0xb68] sm:$0xf]  ;;  %v9448_v49 = vld [vmem:[%s10479_s11 + $0xb14] sm:$0xf0] }
 0x2b1   : > { %6174 = vmatpush.bf16.msrb.mxu1 %v8008_v58  ;;  %v9460_v58 = vld [vmem:[%s10479_s11 + $0xb74] sm:$0xf0]  ;;  %v8663_v56 = vld [vmem:[%s10479_s11 + $0xec8] sm:$0xf] }
 0x2b2   : > { %6188 = vmatpush.bf16.msrb.mxu2 %v8136_v61  ;;  %v7848_v61 = vor.u32 %v9364_v41, %v7847_v51  ;;  %v8232_v28 = vor.u32 %v9460_v58, %v8231_v54  ;;  %v9424_v51 = vld [vmem:[%s10479_s11 + $0xa54] sm:$0xf0] }
 0x2b3   : > { %6202 = vmatpush.bf16.msrb.mxu3 %v8264_v18  ;;  %v7831_v18 = vld [vmem:[%s10479_s11 + $0x848] sm:$0xf]  ;;  %v9388_v58 = vld [vmem:[%s10479_s11 + $0x934] sm:$0xf0] }
 0x2b4   : > { %6161 = vmatpush.bf16.msrb.mxu0 %v7864_v34  ;;  %v8087_v34 = vld [vmem:[%s10479_s11 + $0xa48] sm:$0xf]  ;;  %v7832_v41 = vor.u32 %v9360_v21, %v7831_v18  ;;  %v9452_v18 = vld [vmem:[%s10479_s11 + $0xb34] sm:$0xf0] }
 0x2b5   : > { %6175 = vmatpush.bf16.msrb.mxu1 %v7992_v35  ;;  %v8215_v35 = vld [vmem:[%s10479_s11 + $0xb48] sm:$0xf]  ;;  %v8088_v48 = vor.u32 %v9424_v51, %v8087_v34  ;;  %v11524_v34 = vpop.f32.mrf.mxu3  ;;  %v7944_v51 = vor.u32 %v9388_v58, %v7943_v53  ;;  %v9604_v26 = vld [vmem:[%s10479_s11 + $0xff4] sm:$0xf0] }
 0x2b6   : > { %6189 = vmatpush.bf16.msrb.mxu2 %v8120_v39  ;;  %v9456_v39 = vld [vmem:[%s10479_s11 + $0xb54] sm:$0xf0]  ;;  %v8551_v53 = vld [vmem:[%s10479_s11 + $0xde8] sm:$0xf]  ;;  %v11540_v58 = vpop.f32.mrf.mxu1 }
 0x2b7   : > { %6203 = vmatpush.bf16.msrb.mxu3 %v8248_v46  ;;  %v7815_v46 = vld [vmem:[%s10479_s11 + $0x828] sm:$0xf]  ;;  %v8216_v54 = vor.u32 %v9456_v39, %v8215_v35  ;;  %v11520_v21 = vpop.f32.mrf.mxu2  ;;  %v8072_v35 = vor.u32 %v9420_v11, %v8071_v15  ;;  %v9508_v15 = vld [vmem:[%s10479_s11 + $0xcf4] sm:$0xf0] }
 0x2b8   : > { %6162 = vmatpush.bf16.msrb.mxu0 %v7848_v61  ;;  %v11515_v61 = vld [vmem:[%s10990_s14] sm:$0xf]  ;;  %v7816_v23 = vor.u32 %v9356_v1, %v7815_v46  ;;  %v7927_v39 = vld [vmem:[%s10479_s11 + $0x908] sm:$0xf]  ;;  %v9416_v46 = vld [vmem:[%s10479_s11 + $0xa14] sm:$0xf0] }
 0x2b9   : > { %6176 = vmatpush.bf16.msrb.mxu1 %v7976_v5  ;;  %v9384_v5 = vld [vmem:[%s10479_s11 + $0x914] sm:$0xf0]  ;;  %v8183_v1 = vld [vmem:[%s10479_s11 + $0xb08] sm:$0xf]  ;;  %v12110_v7 = vperm.slane %v11515_v61, 1 }
 0x2ba   : > { %6190 = vmatpush.bf16.msrb.mxu2 %v8104_v10  ;;  %v8199_v10 = vld [vmem:[%s10479_s11 + $0xb28] sm:$0xf]  ;;  %v7928_v42 = vor.u32 %v9384_v5, %v7927_v39  ;;  %v9504_v39 = vld [vmem:[%s10479_s11 + $0xcd4] sm:$0xf0] }
 0x2bb   : > { %6204 = vmatpush.bf16.msrb.mxu3 %v8232_v28  ;;  %v7799_v28 = vld [vmem:[%s10479_s11 + $0x808] sm:$0xf]  ;;  %v9536_v17 = vld [vmem:[%s10479_s11 + $0xdd4] sm:$0xf0] }
 0x2bc   : > { %6163 = vmatpush.bf16.msrb.mxu0 %v7832_v41  ;;  %v8200_v41 = vor.u32 %v9452_v18, %v8199_v10  ;;  %v8423_v11 = vld [vmem:[%s10479_s11 + $0xce8] sm:$0xf]  ;;  %v7800_v33 = vor.u32 %v9352_v2, %v7799_v28  ;;  %v9572_v18 = vld [vmem:[%s10479_s11 + $0xef4] sm:$0xf0]  ;;  %v8184_v28 = vor.u32 %v9448_v49, %v8183_v1 }
 0x2bd   : > { %6177 = vmatpush.bf16.msrb.mxu1 %v7960_v43  ;;  %v5804_v43 = vadd.f32 %v11456_v32, %v12110_v7  ;;  %v8679_v10 = vld [vmem:[%s10479_s11 + $0xee8] sm:$0xf]  ;;  %v8056_v7 = vor.u32 %v9416_v46, %v8055_v12  ;;  %v8424_v2 = vor.u32 %v9508_v15, %v8423_v11  ;;  %v9568_v47 = vld [vmem:[%s10479_s11 + $0xed4] sm:$0xf0]  ;;  %v12112_v15 = vperm.slane %v11515_v61, 1 }
 0x2be   : > { %6191 = vmatpush.bf16.msrb.mxu2 %v8088_v48  ;;  %v11535_v48 = vpop.f32.mrf.mxu0  ;;  %v8807_v32 = vld [vmem:[%s10479_s11 + $0xfe8] sm:$0xf]  ;;  %v9600_v49 = vld [vmem:[%s10479_s11 + $0xfd4] sm:$0xf0] }
 0x2bf   : > { %6205 = vmatpush.bf16.msrb.mxu3 %v8216_v54  ;;  %v9540_v54 = vld [vmem:[%s10479_s11 + $0xdf4] sm:$0xf0]  ;;  %v5818_v13 = vadd.f32 %v11458_v55, %v5804_v43  ;;  %v8407_v5 = vld [vmem:[%s10479_s11 + $0xcc8] sm:$0xf]  ;;  %v8808_v46 = vor.u32 %v9604_v26, %v8807_v32 }
 0x2c0   : > { %6164 = vmatpush.bf16.msrb.mxu0 %v7816_v23  ;;  %v5554_v23 = vadd.f32 %v11064_v31, %v12111_v19  ;;  %v8535_v12 = vld [vmem:[%s10479_s11 + $0xdc8] sm:$0xf]  ;;  %v11560_v31 = vpop.f32.mrf.mxu2  ;;  %v8408_v55 = vor.u32 %v9504_v39, %v8407_v5  ;;  %v9500_v43 = vld [vmem:[%s10479_s11 + $0xcb4] sm:$0xf0] }
 0x2c1   : > { %6178 = vmatpush.bf16.msrb.mxu1 %v7944_v51  ;;  %v8552_v51 = vor.u32 %v9540_v54, %v8551_v53  ;;  %v8791_v19 = vld [vmem:[%s10479_s11 + $0xfc8] sm:$0xf]  ;;  %v5832_v26 = vadd.f32 %v11496_v62, %v5818_v13  ;;  %v5806_v53 = vadd.f32 %v11487_v45, %v12112_v15  ;;  %v11573_v13 = vpop.f32.mrf.mxu1  ;;  %v9532_v54 = vld [vmem:[%s10479_s11 + $0xdb4] sm:$0xf0] }
 0x2c2   : > { %6192 = vmatpush.bf16.msrb.mxu2 %v8072_v35  ;;  %v8680_v35 = vor.u32 %v9572_v18, %v8679_v10  ;;  %v5568_v29 = vadd.f32 %v11074_v44, %v5554_v23  ;;  %v8664_v44 = vor.u32 %v9568_v47, %v8663_v56  ;;  %v8391_v1 = vld [vmem:[%s10479_s11 + $0xca8] sm:$0xf]  ;;  %v8792_v62 = vor.u32 %v9600_v49, %v8791_v19  ;;  %v9596_v56 = vld [vmem:[%s10479_s11 + $0xfb4] sm:$0xf0] }
 0x2c3   : > { %6206 = vmatpush.bf16.msrb.mxu3 %v8200_v41  ;;  %v8536_v41 = vor.u32 %v9536_v17, %v8535_v12  ;;  %v8519_v11 = vld [vmem:[%s10479_s11 + $0xda8] sm:$0xf]  ;;  %v9564_v17 = vld [vmem:[%s10479_s11 + $0xeb4] sm:$0xf0]  ;;  %v8392_v18 = vor.u32 %v9500_v43, %v8391_v1 }
 0x2c4   : > { %6165 = vmatpush.bf16.msrb.mxu0 %v7800_v33  ;;  %v11563_v33 = vpop.f32.mrf.mxu3  ;;  %v8647_v10 = vld [vmem:[%s10479_s11 + $0xea8] sm:$0xf]  ;;  %v5582_v45 = vadd.f32 %v11088_v60, %v5568_v29  ;;  %v8520_v32 = vor.u32 %v9532_v54, %v8519_v11  ;;  %v9528_v5 = vld [vmem:[%s10479_s11 + $0xd94] sm:$0xf0] }
 0x2c5   : > { %6179 = vmatpush.bf16.msrb.mxu1 %v7928_v42  ;;  %v8775_v47 = vld [vmem:[%s10479_s11 + $0xfa8] sm:$0xf]  ;;  %v8648_v23 = vor.u32 %v9564_v17, %v8647_v10  ;;  %v9560_v12 = vld [vmem:[%s10479_s11 + $0xe94] sm:$0xf0] }
 0x2c6   : > { %6193 = vmatpush.bf16.msrb.mxu2 %v8056_v7  ;;  %v11565_v42 = vpop.f32.mrf.mxu0  ;;  %v5846_v7 = vadd.f32 %v11501_v27, %v5832_v26  ;;  %v8776_v60 = vor.u32 %v9596_v56, %v8775_v47  ;;  %v8631_v39 = vld [vmem:[%s10479_s11 + $0xe88] sm:$0xf]  ;;  %v9592_v19 = vld [vmem:[%s10479_s11 + $0xf94] sm:$0xf0]  ;;  %v5596_v27 = vadd.f32 %v11093_v16, %v5582_v45 }
 0x2c7   : > { %6207 = vmatpush.bf16.msrb.mxu3 %v8184_v28  ;;  %6166 = vmatmul.bf16.vlgmr.msrb.gmra.mxu0 %v10780_v63  ;;  %v8375_v28 = vld [vmem:[%s10479_s11 + $0xc88] sm:$0xf]  ;;  %v9492_v1 = vld [vmem:[%s10479_s11 + $0xc74] sm:$0xf0] }
 0x2c8   : > { %6214 = vmatpush.bf16.msra.mxu0 %v8424_v2  ;;  %6180 = vmatmul.bf16.vlgmr.msrb.gmra.mxu1 %v10787_v4  ;;  %v9496_v2 = vld [vmem:[%s10479_s11 + $0xc94] sm:$0xf0]  ;;  %v11596_v49 = vpop.f32.mrf.mxu2  ;;  %v8487_v16 = vld [vmem:[%s10479_s11 + $0xd68] sm:$0xf]  ;;  %v5610_v17 = vadd.f32 %v11149_v22, %v5596_v27 }
 0x2c9   : > { %6228 = vmatpush.bf16.msra.mxu1 %v8552_v51  ;;  %6194 = vmatmul.bf16.vlgmr.msrb.gmra.mxu2 %v10785_v3  ;;  %v8503_v51 = vld [vmem:[%s10479_s11 + $0xd88] sm:$0xf]  ;;  %v8376_v29 = vor.u32 %v9496_v2, %v8375_v28  ;;  %v9524_v15 = vld [vmem:[%s10479_s11 + $0xd74] sm:$0xf0]  ;;  %v11613_v47 = vpop.f32.mrf.mxu1 }
 0x2ca   : > { %6242 = vmatpush.bf16.msra.mxu2 %v8680_v35  ;;  %6208 = vmatmul.bf16.vlgmr.msrb.gmra.mxu3 %v10791_v8  ;;  %v5820_v35 = vadd.f32 %v11492_v38, %v5806_v53  ;;  %v5860_v38 = vadd.f32 %v11520_v21, %v5846_v7  ;;  %v8504_v26 = vor.u32 %v9528_v5, %v8503_v51  ;;  %v8615_v53 = vld [vmem:[%s10479_s11 + $0xe68] sm:$0xf]  ;;  %v9556_v21 = vld [vmem:[%s10479_s11 + $0xe74] sm:$0xf0] }
 0x2cb   : > { %6256 = vmatpush.bf16.msra.mxu3 %v8808_v46  ;;  %v8759_v46 = vld [vmem:[%s10479_s11 + $0xf88] sm:$0xf]  ;;  %v9588_v10 = vld [vmem:[%s10479_s11 + $0xf74] sm:$0xf0]  ;;  %v8488_v45 = vor.u32 %v9524_v15, %v8487_v16 }
 0x2cc   : > { %6215 = vmatpush.bf16.msra.mxu0 %v8408_v55  ;;  %v11599_v55 = vpop.f32.mrf.mxu3  ;;  %v5834_v43 = vadd.f32 %v11535_v48, %v5820_v35  ;;  %v8760_v11 = vor.u32 %v9592_v19, %v8759_v46  ;;  %v8743_v54 = vld [vmem:[%s10479_s11 + $0xf68] sm:$0xf]  ;;  %v5874_v56 = vadd.f32 %v11524_v34, %v5860_v38  ;;  %v9520_v2 = vld [vmem:[%s10479_s11 + $0xd54] sm:$0xf0] }
 0x2cd   : > { %6229 = vmatpush.bf16.msra.mxu1 %v8536_v41  ;;  %v8632_v41 = vor.u32 %v9560_v12, %v8631_v39  ;;  %v8343_v7 = vld [vmem:[%s10479_s11 + $0xc48] sm:$0xf]  ;;  %v8744_v22 = vor.u32 %v9588_v10, %v8743_v54  ;;  %v9552_v35 = vld [vmem:[%s10479_s11 + $0xe54] sm:$0xf0]  ;;  %v5624_v39 = vadd.f32 %v11153_v25, %v5610_v17 }
 0x2ce   : > { %6243 = vmatpush.bf16.msra.mxu2 %v8664_v44  ;;  %v8359_v44 = vld [vmem:[%s10479_s11 + $0xc68] sm:$0xf]  ;;  %v5848_v28 = vadd.f32 %v11540_v58, %v5834_v43  ;;  %v5888_v34 = vadd.f32 %v11565_v42, %v5874_v56  ;;  %v9584_v5 = vld [vmem:[%s10479_s11 + $0xf54] sm:$0xf0] }
 0x2cf   : > { %6257 = vmatpush.bf16.msra.mxu3 %v8792_v62  ;;  %v11608_v62 = vpop.f32.mrf.mxu0  ;;  %v8360_v48 = vor.u32 %v9492_v1, %v8359_v44  ;;  %v8599_v51 = vld [vmem:[%s10479_s11 + $0xe48] sm:$0xf]  ;;  %v5638_v38 = vadd.f32 %v11170_v52, %v5624_v39  ;;  %v9548_v44 = vld [vmem:[%s10479_s11 + $0xe34] sm:$0xf0]  ;;  %v6889_v39 = vld [vmem:[%s10479_s11 + $0xf8] sm:$0xf0] }
 0x2d0   : > { %6216 = vmatpush.bf16.msra.mxu0 %v8392_v18  ;;  %v8616_v18 = vor.u32 %v9556_v21, %v8615_v53  ;;  %v5862_v12 = vadd.f32 %v11560_v31, %v5848_v28  ;;  %v8600_v19 = vor.u32 %v9552_v35, %v8599_v51  ;;  %v8327_v27 = vld [vmem:[%s10479_s11 + $0xc28] sm:$0xf]  ;;  %v9516_v31 = vld [vmem:[%s10479_s11 + $0xd34] sm:$0xf0]  ;;  %v5902_v1 = vadd.f32 %v11573_v13, %v5888_v34 }
 0x2d1   : > { %6230 = vmatpush.bf16.msra.mxu1 %v8520_v32  ;;  %v9488_v32 = vld [vmem:[%s10479_s11 + $0xc54] sm:$0xf0]  ;;  %v8455_v42 = vld [vmem:[%s10479_s11 + $0xd28] sm:$0xf]  ;;  %v11643_v53 = vpop.f32.mrf.mxu1 }
 0x2d2   : > { %6244 = vmatpush.bf16.msra.mxu2 %v8648_v23  ;;  %v8471_v23 = vld [vmem:[%s10479_s11 + $0xd48] sm:$0xf]  ;;  %v8344_v58 = vor.u32 %v9488_v32, %v8343_v7  ;;  %v9580_v15 = vld [vmem:[%s10479_s11 + $0xf34] sm:$0xf0]  ;;  %v5876_v52 = vadd.f32 %v11563_v33, %v5862_v12  ;;  %v5916_v13 = vadd.f32 %v11596_v49, %v5902_v1  ;;  %v8456_v17 = vor.u32 %v9516_v31, %v8455_v42 }
 0x2d3   : > { %6258 = vmatpush.bf16.msra.mxu3 %v8776_v60  ;;  %v8727_v60 = vld [vmem:[%s10479_s11 + $0xf48] sm:$0xf]  ;;  %v8472_v46 = vor.u32 %v9520_v2, %v8471_v23  ;;  %v9480_v10 = vld [vmem:[%s10479_s11 + $0xc14] sm:$0xf0] }
 0x2d4   : > { %6217 = vmatpush.bf16.msra.mxu0 %v8376_v29  ;;  %v9484_v29 = vld [vmem:[%s10479_s11 + $0xc34] sm:$0xf0]  ;;  %v8728_v25 = vor.u32 %v9584_v5, %v8727_v60  ;;  %v11638_v16 = vpop.f32.mrf.mxu3  ;;  %v8311_v54 = vld [vmem:[%s10479_s11 + $0xc08] sm:$0xf]  ;;  %v5890_v49 = vadd.f32 %v11608_v62, %v5876_v52  ;;  %v9122_v5 = vld [vmem:[%s10479_s11 + $0xec] sm:$0xf] }
 0x2d5   : > { %6231 = vmatpush.bf16.msra.mxu1 %v8504_v26  ;;  %v11632_v26 = vpop.f32.mrf.mxu2  ;;  %v8328_v21 = vor.u32 %v9484_v29, %v8327_v27  ;;  %v8439_v56 = vld [vmem:[%s10479_s11 + $0xd08] sm:$0xf]  ;;  %v9512_v33 = vld [vmem:[%s10479_s11 + $0xd14] sm:$0xf0]  ;;  %v8312_v34 = vor.u32 %v9480_v10, %v8311_v54  ;;  %v9118_v52 = vld [vmem:[%s10479_s11 + $0xcc] sm:$0xf] }
 0x2d6   : > { %6245 = vmatpush.bf16.msra.mxu2 %v8632_v41  ;;  %v8583_v41 = vld [vmem:[%s10479_s11 + $0xe28] sm:$0xf]  ;;  %v9544_v32 = vld [vmem:[%s10479_s11 + $0xe14] sm:$0xf0]  ;;  %v8440_v12 = vor.u32 %v9512_v33, %v8439_v56  ;;  %v5904_v29 = vadd.f32 %v11613_v47, %v5890_v49  ;;  %v7001_v10 = vld [vmem:[%s10479_s11 + $0x1d8] sm:$0xf0] }
 0x2d7   : > { %6259 = vmatpush.bf16.msra.mxu3 %v8760_v11  ;;  %v5943_v43 = vpop.f32.mrf.mxu0  ;;  %v8711_v11 = vld [vmem:[%s10479_s11 + $0xf28] sm:$0xf]  ;;  %v9576_v28 = vld [vmem:[%s10479_s11 + $0xf14] sm:$0xf0]  ;;  %v9146_v49 = vld [vmem:[%s10479_s11 + $0x1ac] sm:$0xf] }
 0x2d8   : > { %6218 = vmatpush.bf16.msra.mxu0 %v8360_v48  ;;  %v8584_v48 = vor.u32 %v9548_v44, %v8583_v41  ;;  %v8712_v7 = vor.u32 %v9580_v15, %v8711_v11  ;;  %v8695_v23 = vld [vmem:[%s10479_s11 + $0xf08] sm:$0xf]  ;;  %v9636_v2 = vld [vmem:[%s10479_s11 + $0x10f4] sm:$0xf0]  ;;  %v5918_v54 = vadd.f32 %v11632_v26, %v5904_v29  ;;  %v9142_v29 = vld [vmem:[%s10479_s11 + $0x18c] sm:$0xf] }
 0x2d9   : > { %6232 = vmatpush.bf16.msra.mxu1 %v8488_v45  ;;  %v8567_v45 = vld [vmem:[%s10479_s11 + $0xe08] sm:$0xf]  ;;  %v9668_v60 = vld [vmem:[%s10479_s11 + $0x11f4] sm:$0xf0] }
 0x2da   : > { %6246 = vmatpush.bf16.msra.mxu2 %v8616_v18  ;;  %v5652_v18 = vadd.f32 %v11175_v57, %v5638_v38  ;;  %v9063_v51 = vld [vmem:[%s10479_s11 + $0x11e8] sm:$0xf]  ;;  %v5930_v57 = vadd.f32 %v11599_v55, %v5916_v13  ;;  %v8568_v62 = vor.u32 %v9544_v32, %v8567_v45  ;;  %v9632_v41 = vld [vmem:[%s10479_s11 + $0x10d4] sm:$0xf0]  ;;  %v9114_v32 = vld [vmem:[%s10479_s11 + $0xac] sm:$0xf] }
 0x2db   : > { %6260 = vmatpush.bf16.msra.mxu3 %v8744_v22  ;;  %v8935_v22 = vld [vmem:[%s10479_s11 + $0x10e8] sm:$0xf]  ;;  %v9064_v38 = vor.u32 %v9668_v60, %v9063_v51  ;;  %v9664_v15 = vld [vmem:[%s10479_s11 + $0x11d4] sm:$0xf0] }
 0x2dc   : > { %6219 = vmatpush.bf16.msra.mxu0 %v8344_v58  ;;  %v5666_v35 = vadd.f32 %v11228_v20, %v5652_v18  ;;  %v9154_v58 = vld [vmem:[%s10479_s11 + $0x1ec] sm:$0xf]  ;;  %v8696_v20 = vor.u32 %v9576_v28, %v8695_v23  ;;  %v8936_v27 = vor.u32 %v9636_v2, %v8935_v22  ;;  %v5944_v42 = vadd.f32 %v5943_v43, %v5930_v57  ;;  %v5985_v55 = vpop.f32.mrf.mxu3  ;;  %v8919_v31 = vld [vmem:[%s10479_s11 + $0x10c8] sm:$0xf]  ;;  %v9628_v45 = vld [vmem:[%s10479_s11 + $0x10b4] sm:$0xf0] }
 0x2dd   : > { %6233 = vmatpush.bf16.msra.mxu1 %v8472_v46  ;;  %v7017_v46 = vld [vmem:[%s10479_s11 + $0x1f8] sm:$0xf0]  ;;  %v9047_v44 = vld [vmem:[%s10479_s11 + $0x11c8] sm:$0xf]  ;;  %v9150_v43 = vld [vmem:[%s10479_s11 + $0x1cc] sm:$0xf]  ;;  %v5932_v28 = vadd.f32 %v11638_v16, %v5918_v54 }
 0x2de   : > { %6247 = vmatpush.bf16.msra.mxu2 %v8600_v19  ;;  %v5971_v19 = vpop.f32.mrf.mxu2  ;;  %v5680_v1 = vadd.f32 %v11232_v24, %v5666_v35  ;;  %v7020_v11 = vor.u32 %v9154_v58, %v7017_v46  ;;  %v8920_v24 = vor.u32 %v9632_v41, %v8919_v31  ;;  %v9048_v26 = vor.u32 %v9664_v15, %v9047_v44  ;;  %v8903_v33 = vld [vmem:[%s10479_s11 + $0x10a8] sm:$0xf]  ;;  %v6857_v23 = vld [vmem:[%s10479_s11 + $0xb8] sm:$0xf0]  ;;  %v9656_v57 = vld [vmem:[%s10479_s11 + $0x1194] sm:$0xf0] }
 0x2df   : > { %6261 = vmatpush.bf16.msra.mxu3 %v8728_v25  ;;  %v6892_v25 = vor.u32 %v9122_v5, %v6889_v39  ;;  %v5945_v47 = vpop.f32.mrf.mxu0  ;;  %v9031_v18 = vld [vmem:[%s10479_s11 + $0x11a8] sm:$0xf]  ;;  %v6985_v22 = vld [vmem:[%s10479_s11 + $0x1b8] sm:$0xf0]  ;;  %v8904_v51 = vor.u32 %v9628_v45, %v8903_v33  ;;  %v6860_v60 = vor.u32 %v9114_v32, %v6857_v23  ;;  %v9624_v5 = vld [vmem:[%s10479_s11 + $0x1094] sm:$0xf0] }
 0x2e0   : > { %6220 = vmatpush.bf16.msra.mxu0 %v8328_v21  ;;  %v6873_v21 = vld [vmem:[%s10479_s11 + $0xd8] sm:$0xf0]  ;;  %v5694_v13 = vadd.f32 %v11249_v50, %v5680_v1  ;;  %v7004_v50 = vor.u32 %v9150_v43, %v7001_v10  ;;  %v8887_v35 = vld [vmem:[%s10479_s11 + $0x1088] sm:$0xf]  ;;  %v5946_v16 = vadd.f32 %v5945_v47, %v5932_v28  ;;  %v9110_v58 = vld [vmem:[%s10479_s11 + $0x8c] sm:$0xf] }
 0x2e1   : > { %6234 = vmatpush.bf16.msra.mxu1 %v8456_v17  ;;  %v5959_v17 = vpop.f32.mrf.mxu1  ;;  %v6876_v56 = vor.u32 %v9118_v52, %v6873_v21  ;;  %v9015_v39 = vld [vmem:[%s10479_s11 + $0x1188] sm:$0xf]  ;;  %v6841_v46 = vld [vmem:[%s10479_s11 + $0x98] sm:$0xf0]  ;;  %v9620_v1 = vld [vmem:[%s10479_s11 + $0x1074] sm:$0xf0] }
 0x2e2   : > { %6248 = vmatpush.bf16.msra.mxu2 %v8584_v48  ;;  %v5958_v48 = vadd.f32 %v11643_v53, %v5944_v42  ;;  %v5708_v2 = vadd.f32 %v11254_v59, %v5694_v13  ;;  %v6969_v42 = vld [vmem:[%s10479_s11 + $0x198] sm:$0xf0]  ;;  %v5960_v31 = vadd.f32 %v5959_v17, %v5946_v16  ;;  %v6844_v44 = vor.u32 %v9110_v58, %v6841_v46  ;;  %v9652_v21 = vld [vmem:[%s10479_s11 + $0x1174] sm:$0xf0]  ;;  %v9106_v54 = vld [vmem:[%s10479_s11 + $0x6c] sm:$0xf] }
 0x2e3   : > { %6262 = vmatpush.bf16.msra.mxu3 %v8712_v7  ;;  %v9660_v7 = vld [vmem:[%s10479_s11 + $0x11b4] sm:$0xf0]  ;;  %v6972_v52 = vor.u32 %v9142_v29, %v6969_v42  ;;  %v6825_v47 = vld [vmem:[%s10479_s11 + $0x78] sm:$0xf0]  ;;  %v9138_v10 = vld [vmem:[%s10479_s11 + $0x16c] sm:$0xf] }
 0x2e4   : > { %6221 = vmatpush.bf16.msra.mxu0 %v8312_v34  ;;  %v5972_v53 = vadd.f32 %v5971_v19, %v5958_v48  ;;  %v9032_v34 = vor.u32 %v9660_v7, %v9031_v18  ;;  %v6953_v13 = vld [vmem:[%s10479_s11 + $0x178] sm:$0xf0]  ;;  %v8855_v48 = vld [vmem:[%s10479_s11 + $0x1048] sm:$0xf]  ;;  %v9616_v33 = vld [vmem:[%s10479_s11 + $0x1054] sm:$0xf0] }
 0x2e5   : > { %6235 = vmatpush.bf16.msra.mxu1 %v8440_v12  ;;  %v5722_v12 = vadd.f32 %v11307_v36, %v5708_v2  ;;  %v8983_v45 = vld [vmem:[%s10479_s11 + $0x1148] sm:$0xf]  ;;  %v9648_v18 = vld [vmem:[%s10479_s11 + $0x1154] sm:$0xf0]  ;;  %v6809_v32 = vld [vmem:[%s10479_s11 + $0x58] sm:$0xf0] }
 0x2e6   : > { %6249 = vmatpush.bf16.msra.mxu2 %v8568_v62  ;;  %v5973_v59 = vpop.f32.mrf.mxu2  ;;  %v6988_v62 = vor.u32 %v9146_v49, %v6985_v22  ;;  %v5986_v19 = vadd.f32 %v5985_v55, %v5972_v53  ;;  %v8871_v55 = vld [vmem:[%s10479_s11 + $0x1068] sm:$0xf]  ;;  %v9134_v22 = vld [vmem:[%s10479_s11 + $0x14c] sm:$0xf]  ;;  %v6937_v2 = vld [vmem:[%s10479_s11 + $0x158] sm:$0xf0]  ;;  %v8984_v16 = vor.u32 %v9648_v18, %v8983_v45 }
 0x2e7   : > { %6263 = vmatpush.bf16.msra.mxu3 %v8696_v20  ;;  %6222 = vmatmul.bf16.vlgmr.msra.gmra.mxu0 %v10880_v0  ;;  %v5987_v20 = vpop.f32.mrf.mxu3  ;;  %v5736_v15 = vadd.f32 %v11311_v40, %v5722_v12  ;;  %v5974_v43 = vadd.f32 %v5973_v59, %v5960_v31  ;;  %v8967_v12 = vld [vmem:[%s10479_s11 + $0x1128] sm:$0xf]  ;;  %v6940_v59 = vor.u32 %v9134_v22, %v6937_v2  ;;  %v9098_v58 = vld [vmem:[%s10479_s11 + $0x2c] sm:$0xf]  ;;  %v6793_v46 = vld [vmem:[%s10479_s11 + $0x38] sm:$0xf0] }
 0x2e8   : > { %6270 = vmatpush.bf16.msrb.mxu0 %v8936_v27  ;;  %6236 = vmatmul.bf16.vlgmr.msra.gmra.mxu1 %v10887_v9  ;;  %v5999_v27 = vpop.f32.mrf.mxu0  ;;  %v7273_v18 = vld [vmem:[%s10479_s11 + $0x3f8] sm:$0xf0]  ;;  %v9182_v2 = vld [vmem:[%s10479_s11 + $0x2cc] sm:$0xf] }
 0x2e9   : > { %6284 = vmatpush.bf16.msrb.mxu1 %v9064_v38  ;;  %6250 = vmatmul.bf16.vlgmr.msra.gmra.mxu2 %v10885_v6  ;;  %v8888_v38 = vor.u32 %v9624_v5, %v8887_v35  ;;  %v6013_v36 = vpop.f32.mrf.mxu1  ;;  %v6000_v41 = vadd.f32 %v5999_v27, %v5986_v19  ;;  %v5750_v17 = vadd.f32 %v11433_v30, %v5736_v15  ;;  %v9102_v30 = vld [vmem:[%s10479_s11 + $0x4c] sm:$0xf]  ;;  %v12113_v19 = vld [vmem:[#allocation14_spill] sm:$0xff]  ;;  %v12114_v27 = vld [vmem:[#allocation15_spill] sm:$0xff] }
 0x2ea   : > { %6298 = vmatpush.bf16.msrb.mxu2 %v6892_v25  ;;  %6264 = vmatmul.bf16.vlgmr.msra.gmra.mxu3 %v10891_v14  ;;  %v9016_v25 = vor.u32 %v9656_v57, %v9015_v39  ;;  %v5988_v23 = vadd.f32 %v5987_v20, %v5974_v43  ;;  %v8856_v35 = vor.u32 %v9616_v33, %v8855_v48  ;;  %v9612_v57 = vld [vmem:[%s10479_s11 + $0x1034] sm:$0xf0]  ;;  %v6550_v20 = vmax.f32 %v12113_v19, 0.0  ;;  %v8951_v15 = vld [vmem:[%s10479_s11 + $0x1108] sm:$0xf] }
 0x2eb   : > { %6312 = vmatpush.bf16.msrb.mxu3 %v7020_v11  ;;  %v8999_v11 = vld [vmem:[%s10479_s11 + $0x1168] sm:$0xf]  ;;  %v6014_v40 = vadd.f32 %v6013_v36, %v6000_v41  ;;  %v6812_v39 = vor.u32 %v9102_v30, %v6809_v32  ;;  %v6777_v43 = vld [vmem:[%s10479_s11 + $0x18] sm:$0xf0]  ;;  %v9218_v33 = vld [vmem:[%s10479_s11 + $0x3ec] sm:$0xf] }
 0x2ec   : > { %6271 = vmatpush.bf16.msrb.mxu0 %v8920_v24  ;;  %v8872_v24 = vor.u32 %v9620_v1, %v8871_v55  ;;  %v8823_v41 = vld [vmem:[%s10479_s11 + $0x1008] sm:$0xf]  ;;  %v9178_v19 = vld [vmem:[%s10479_s11 + $0x2ac] sm:$0xf] }
 0x2ed   : > { %6285 = vmatpush.bf16.msrb.mxu1 %v9048_v26  ;;  %v9000_v26 = vor.u32 %v9652_v21, %v8999_v11  ;;  %v6796_v11 = vor.u32 %v9098_v58, %v6793_v46  ;;  %v9094_v21 = vld [vmem:[%s10479_s11 + $0xc] sm:$0xf]  ;;  %v7513_v58 = vld [vmem:[%s10479_s11 + $0x5d8] sm:$0xf0] }
 0x2ee   : > { %6299 = vmatpush.bf16.msrb.mxu2 %v6876_v56  ;;  %v6828_v56 = vor.u32 %v9106_v54, %v6825_v47  ;;  %v6027_v7 = vpop.f32.mrf.mxu2 }
 0x2ef   : > { %6313 = vmatpush.bf16.msrb.mxu3 %v7004_v50  ;;  %v6956_v50 = vor.u32 %v9138_v10, %v6953_v13  ;;  %v6028_v28 = vadd.f32 %v6027_v7, %v6014_v40  ;;  %v6041_v49 = vpop.f32.mrf.mxu3  ;;  %v9126_v10 = vld [vmem:[%s10479_s11 + $0x10c] sm:$0xf]  ;;  %v6905_v13 = vld [vmem:[%s10479_s11 + $0x118] sm:$0xf0] }
 0x2f0   : > { %6272 = vmatpush.bf16.msrb.mxu0 %v8904_v51  ;;  %v6001_v53 = vpop.f32.mrf.mxu0  ;;  %v5764_v51 = vadd.f32 %v11438_v37, %v5750_v17  ;;  %v9644_v37 = vld [vmem:[%s10479_s11 + $0x1134] sm:$0xf0]  ;;  %v12115_v17 = vld [vmem:[#allocation16_spill] sm:$0xff]  ;;  %v7401_v7 = vld [vmem:[%s10479_s11 + $0x4f8] sm:$0xf0] }
 0x2f1   : > { %6286 = vmatpush.bf16.msrb.mxu1 %v9032_v34  ;;  %v8839_v34 = vld [vmem:[%s10479_s11 + $0x1028] sm:$0xf]  ;;  %v6042_v5 = vadd.f32 %v6041_v49, %v6028_v28  ;;  %v8968_v31 = vor.u32 %v9644_v37, %v8967_v12  ;;  %v9282_v28 = vld [vmem:[%s10479_s11 + $0x5ec] sm:$0xf]  ;;  %v6908_v49 = vor.u32 %v9126_v10, %v6905_v13  ;;  %v7385_v37 = vld [vmem:[%s10479_s11 + $0x4d8] sm:$0xf0] }
 0x2f2   : > { %6300 = vmatpush.bf16.msrb.mxu2 %v6860_v60  ;;  %v6002_v60 = vadd.f32 %v6001_v53, %v5988_v23  ;;  %v5778_v29 = vadd.f32 %v12114_v27, %v5764_v51  ;;  %v8840_v36 = vor.u32 %v9612_v57, %v8839_v34  ;;  %v6780_v23 = vor.u32 %v9094_v21, %v6777_v43  ;;  %v7529_v53 = vld [vmem:[%s10479_s11 + $0x5f8] sm:$0xf0]  ;;  %v9246_v12 = vld [vmem:[%s10479_s11 + $0x4cc] sm:$0xf] }
 0x2f3   : > { %6314 = vmatpush.bf16.msrb.mxu3 %v6988_v62  ;;  %v6015_v62 = vpop.f32.mrf.mxu1  ;;  %v6551_v42 = vmax.f32 %v6042_v5, 0.0  ;;  %v9214_v5 = vld [vmem:[%s10479_s11 + $0x3cc] sm:$0xf]  ;;  %v7257_v57 = vld [vmem:[%s10479_s11 + $0x3d8] sm:$0xf0]  ;;  %v7388_v27 = vor.u32 %v9246_v12, %v7385_v37  ;;  %v2566_v21 = vperm.slane %v11515_v61, 2 }
 0x2f4   : > { %6273 = vmatpush.bf16.msrb.mxu0 %v8888_v38  ;;  %v9130_v38 = vld [vmem:[%s10479_s11 + $0x12c] sm:$0xf]  ;;  %v6016_v1 = vadd.f32 %v6015_v62, %v6002_v60  ;;  %v7129_v60 = vld [vmem:[%s10479_s11 + $0x2d8] sm:$0xf0] }
 0x2f5   : > { %6287 = vmatpush.bf16.msrb.mxu1 %v9016_v25  ;;  %v6921_v25 = vld [vmem:[%s10479_s11 + $0x138] sm:$0xf0]  ;;  %v6558_v55 = vpack.c.bf16 %v6551_v42, %v6550_v20  ;;  %v9278_v62 = vld [vmem:[%s10479_s11 + $0x5cc] sm:$0xf]  ;;  %v7132_v46 = vor.u32 %v9182_v2, %v7129_v60  ;;  %v7260_v20 = vor.u32 %v9214_v5, %v7257_v57 }
 0x2f6   : > { %6301 = vmatpush.bf16.msrb.mxu2 %v6844_v44  ;;  %v9608_v44 = vld [vmem:[%s10479_s11 + $0x1014] sm:$0xf0]  ;;  %v6924_v54 = vor.u32 %v9130_v38, %v6921_v25  ;;  %v6029_v47 = vpop.f32.mrf.mxu2  ;;  %v9210_v42 = vld [vmem:[%s10479_s11 + $0x3ac] sm:$0xf]  ;;  %v12116_v38 = vld [vmem:[#allocation12_spill] sm:$0xff]  ;;  %v7516_v25 = vor.u32 %v9278_v62, %v7513_v58 }
 0x2f7   : > { %6315 = vmatpush.bf16.msrb.mxu3 %v6972_v52  ;;  %v9640_v52 = vld [vmem:[%s10479_s11 + $0x1114] sm:$0xf0]  ;;  %6562 = vst [vmem:[%s11745_s12] sm:$0xff] %v6558_v55  ;;  %v6030_v48 = vadd.f32 %v6029_v47, %v6016_v1  ;;  %v6043_v40 = vpop.f32.mrf.mxu3  ;;  %v8824_v45 = vor.u32 %v9608_v44, %v8823_v41  ;;  %v7369_v41 = vld [vmem:[%s10479_s11 + $0x4b8] sm:$0xf0]  ;;  %v12117_v44 = vld [vmem:[#allocation13_spill] sm:$0xff] }
 0x2f8   : > { %6274 = vmatpush.bf16.msrb.mxu0 %v8872_v24  ;;  %v5792_v24 = vadd.f32 %v12115_v17, %v5778_v29  ;;  %v8952_v32 = vor.u32 %v9640_v52, %v8951_v15  ;;  %v7113_v29 = vld [vmem:[%s10479_s11 + $0x2b8] sm:$0xf0]  ;;  %v9274_v55 = vld [vmem:[%s10479_s11 + $0x5ac] sm:$0xf]  ;;  %v12119_v52 = vld [vmem:[#allocation6_spill] sm:$0xff] }
 0x2f9   : > { %6288 = vmatpush.bf16.msrb.mxu1 %v9000_v26  ;;  %v9186_v26 = vld [vmem:[%s10479_s11 + $0x2ec] sm:$0xf]  ;;  %v6044_v30 = vadd.f32 %v6043_v40, %v6030_v48  ;;  %v7497_v1 = vld [vmem:[%s10479_s11 + $0x5b8] sm:$0xf0]  ;;  %v7116_v15 = vor.u32 %v9178_v19, %v7113_v29 }
 0x2fa   : > { %6302 = vmatpush.bf16.msrb.mxu2 %v6828_v56  ;;  %v7145_v56 = vld [vmem:[%s10479_s11 + $0x2f8] sm:$0xf0]  ;;  %v6554_v51 = vmax.f32 %v5792_v24, 0.0  ;;  %v9174_v43 = vld [vmem:[%s10479_s11 + $0x28c] sm:$0xf]  ;;  %v7500_v17 = vor.u32 %v9274_v55, %v7497_v1 }
 0x2fb   : > { %6316 = vmatpush.bf16.msrb.mxu3 %v6956_v50  ;;  %v9250_v50 = vld [vmem:[%s10479_s11 + $0x4ec] sm:$0xf]  ;;  %v7148_v22 = vor.u32 %v9186_v26, %v7145_v56  ;;  %v7097_v10 = vld [vmem:[%s10479_s11 + $0x298] sm:$0xf0] }
 0x2fc   : > { %6275 = vmatpush.bf16.msrb.mxu0 %v8856_v35  ;;  %v6555_v35 = vmax.f32 %v6044_v30, 0.0  ;;  %v7404_v34 = vor.u32 %v9250_v50, %v7401_v7  ;;  %v9206_v13 = vld [vmem:[%s10479_s11 + $0x38c] sm:$0xf]  ;;  %v7225_v24 = vld [vmem:[%s10479_s11 + $0x398] sm:$0xf0] }
 0x2fd   : > { %6289 = vmatpush.bf16.msrb.mxu1 %v8984_v16  ;;  %v7276_v16 = vor.u32 %v9218_v33, %v7273_v18  ;;  %v9238_v48 = vld [vmem:[%s10479_s11 + $0x48c] sm:$0xf]  ;;  %v7353_v40 = vld [vmem:[%s10479_s11 + $0x498] sm:$0xf0]  ;;  %v7100_v33 = vor.u32 %v9174_v43, %v7097_v10  ;;  %v7228_v50 = vor.u32 %v9206_v13, %v7225_v24 }
 0x2fe   : > { %6303 = vmatpush.bf16.msrb.mxu2 %v6812_v39  ;;  %v7532_v39 = vor.u32 %v9282_v28, %v7529_v53  ;;  %v9270_v26 = vld [vmem:[%s10479_s11 + $0x58c] sm:$0xf]  ;;  %v7481_v56 = vld [vmem:[%s10479_s11 + $0x598] sm:$0xf0]  ;;  %v7356_v7 = vor.u32 %v9238_v48, %v7353_v40 }
 0x2ff   : > { %6317 = vmatpush.bf16.msrb.mxu3 %v6940_v59  ;;  %v6560_v59 = vpack.c.bf16 %v6555_v35, %v6554_v51  ;;  %v9170_v30 = vld [vmem:[%s10479_s11 + $0x26c] sm:$0xf]  ;;  %v7484_v28 = vor.u32 %v9270_v26, %v7481_v56  ;;  %v7209_v53 = vld [vmem:[%s10479_s11 + $0x378] sm:$0xf0] }
 0x300   : > { %6276 = vmatpush.bf16.msrb.mxu0 %v8840_v36  ;;  %v7241_v36 = vld [vmem:[%s10479_s11 + $0x3b8] sm:$0xf0]  ;;  %v9266_v51 = vld [vmem:[%s10479_s11 + $0x56c] sm:$0xf] }
 0x301   : > { %6290 = vmatpush.bf16.msrb.mxu1 %v8968_v31  ;;  %6564 = vst [vmem:[%s11745_s12 + $0x10] sm:$0xff] %v6560_v59  ;;  %v9242_v31 = vld [vmem:[%s10479_s11 + $0x4ac] sm:$0xf]  ;;  %v7465_v35 = vld [vmem:[%s10479_s11 + $0x578] sm:$0xf0] }
 0x302   : > { %6304 = vmatpush.bf16.msrb.mxu2 %v6796_v11  ;;  %v12118_v11 = vld [vmem:[#allocation4_spill] sm:$0xff]  ;;  %v7372_v47 = vor.u32 %v9242_v31, %v7369_v41  ;;  %v9166_v5 = vld [vmem:[%s10479_s11 + $0x24c] sm:$0xf]  ;;  %v7468_v12 = vor.u32 %v9266_v51, %v7465_v35  ;;  %v7193_v37 = vld [vmem:[%s10479_s11 + $0x358] sm:$0xf0] }
 0x303   : > { %6318 = vmatpush.bf16.msrb.mxu3 %v6924_v54  ;;  %v7244_v54 = vor.u32 %v9210_v42, %v7241_v36  ;;  %v9198_v57 = vld [vmem:[%s10479_s11 + $0x34c] sm:$0xf]  ;;  %v7321_v62 = vld [vmem:[%s10479_s11 + $0x458] sm:$0xf0] }
 0x304   : > { %6277 = vmatpush.bf16.msrb.mxu0 %v8824_v45  ;;  %v6055_v61 = vpop.f32.mrf.mxu0  ;;  %v9230_v59 = vld [vmem:[%s10479_s11 + $0x44c] sm:$0xf]  ;;  %v7449_v19 = vld [vmem:[%s10479_s11 + $0x558] sm:$0xf0]  ;;  %v7196_v36 = vor.u32 %v9198_v57, %v7193_v37 }
 0x305   : > { %6291 = vmatpush.bf16.msrb.mxu1 %v8952_v32  ;;  %v6056_v45 = vadd.f32 %v6055_v61, %v2566_v21  ;;  %v6069_v18 = vpop.f32.mrf.mxu1  ;;  %v7081_v32 = vld [vmem:[%s10479_s11 + $0x278] sm:$0xf0]  ;;  %v7324_v31 = vor.u32 %v9230_v59, %v7321_v62  ;;  %v9162_v41 = vld [vmem:[%s10479_s11 + $0x22c] sm:$0xf] }
 0x306   : > { %6305 = vmatpush.bf16.msrb.mxu2 %v6780_v23  ;;  %v9202_v23 = vld [vmem:[%s10479_s11 + $0x36c] sm:$0xf]  ;;  %v7049_v55 = vld [vmem:[%s10479_s11 + $0x238] sm:$0xf0] }
 0x307   : > { %6319 = vmatpush.bf16.msrb.mxu3 %v6908_v49  ;;  %6278 = vmatmul.bf16.vlgmr.msrb.gmra.mxu0 %v12116_v38  ;;  %v9234_v49 = vld [vmem:[%s10479_s11 + $0x46c] sm:$0xf]  ;;  %v6070_v2 = vadd.f32 %v6069_v18, %v6056_v45  ;;  %v7433_v13 = vld [vmem:[%s10479_s11 + $0x538] sm:$0xf0] }
 0x308   : > { %6326 = vmatpush.bf16.msra.mxu0 %v7148_v22  ;;  %6292 = vmatmul.bf16.vlgmr.msrb.gmra.mxu1 %v12117_v44  ;;  %v7337_v22 = vld [vmem:[%s10479_s11 + $0x478] sm:$0xf0]  ;;  %v9194_v1 = vld [vmem:[%s10479_s11 + $0x32c] sm:$0xf] }
 0x309   : > { %6340 = vmatpush.bf16.msra.mxu1 %v7276_v16  ;;  %6306 = vmatmul.bf16.vlgmr.msrb.gmra.mxu2 %v12118_v11  ;;  %v7084_v16 = vor.u32 %v9170_v30, %v7081_v32  ;;  %v7340_v60 = vor.u32 %v9234_v49, %v7337_v22  ;;  %v9258_v10 = vld [vmem:[%s10479_s11 + $0x52c] sm:$0xf]  ;;  %v7033_v48 = vld [vmem:[%s10479_s11 + $0x218] sm:$0xf0] }
 0x30a   : > { %6354 = vmatpush.bf16.msra.mxu2 %v7404_v34  ;;  %6320 = vmatmul.bf16.vlgmr.msrb.gmra.mxu3 %v12119_v52  ;;  %v7212_v34 = vor.u32 %v9202_v23, %v7209_v53  ;;  %v9158_v24 = vld [vmem:[%s10479_s11 + $0x20c] sm:$0xf]  ;;  %v7161_v61 = vld [vmem:[%s10479_s11 + $0x318] sm:$0xf0]  ;;  %v7436_v45 = vor.u32 %v9258_v10, %v7433_v13  ;;  %v12121_v10 = vld [vmem:[#allocation8_spill] sm:$0xff] }
 0x30b   : > { %6368 = vmatpush.bf16.msra.mxu3 %v7532_v39  ;;  %v7065_v39 = vld [vmem:[%s10479_s11 + $0x258] sm:$0xf0]  ;;  %v9190_v56 = vld [vmem:[%s10479_s11 + $0x30c] sm:$0xf]  ;;  %v7036_v49 = vor.u32 %v9158_v24, %v7033_v48  ;;  %v12123_v48 = vld [vmem:[#allocation10_spill] sm:$0xff] }
 0x30c   : > { %6327 = vmatpush.bf16.msra.mxu0 %v7132_v46  ;;  %v6083_v58 = vpop.f32.mrf.mxu2  ;;  %v9262_v46 = vld [vmem:[%s10479_s11 + $0x54c] sm:$0xf]  ;;  %v7068_v42 = vor.u32 %v9166_v5, %v7065_v39  ;;  %v7289_v18 = vld [vmem:[%s10479_s11 + $0x418] sm:$0xf0] }
 0x30d   : > { %6341 = vmatpush.bf16.msra.mxu1 %v7260_v20  ;;  %v6084_v20 = vadd.f32 %v6083_v58, %v6070_v2  ;;  %v6097_v29 = vpop.f32.mrf.mxu3  ;;  %v7452_v52 = vor.u32 %v9262_v46, %v7449_v19  ;;  %v9314_v32 = vld [vmem:[%s10479_s11 + $0x6ec] sm:$0xf]  ;;  %v7657_v23 = vld [vmem:[%s10479_s11 + $0x6f8] sm:$0xf0] }
 0x30e   : > { %6355 = vmatpush.bf16.msra.mxu2 %v7388_v27  ;;  %v6057_v27 = vpop.f32.mrf.mxu0  ;;  %v7785_v22 = vld [vmem:[%s10479_s11 + $0x7f8] sm:$0xf0]  ;;  %v9378_v2 = vld [vmem:[%s10479_s11 + $0x8ec] sm:$0xf] }
 0x30f   : > { %6369 = vmatpush.bf16.msra.mxu3 %v7516_v25  ;;  %v6058_v25 = vadd.f32 %v6057_v27, %v2566_v21  ;;  %v11805_v11 = vadd.f32 %v6097_v29, %v6084_v20  ;;  %v9226_v21 = vld [vmem:[%s10479_s11 + $0x42c] sm:$0xf]  ;;  %v7913_v51 = vld [vmem:[%s10479_s11 + $0x8f8] sm:$0xf0] }
 0x310   : > { %6328 = vmatpush.bf16.msra.mxu0 %v7116_v15  ;;  %v6071_v15 = vpop.f32.mrf.mxu1  ;;  %v8041_v5 = vld [vmem:[%s10479_s11 + $0x9f8] sm:$0xf0]  ;;  %v7916_v59 = vor.u32 %v9378_v2, %v7913_v51  ;;  %v9310_v62 = vld [vmem:[%s10479_s11 + $0x6cc] sm:$0xf] }
 0x311   : > { %6342 = vmatpush.bf16.msra.mxu1 %v7244_v54  ;;  %v7177_v54 = vld [vmem:[%s10479_s11 + $0x338] sm:$0xf0]  ;;  %v6072_v43 = vadd.f32 %v6071_v15, %v6058_v25  ;;  %v9342_v46 = vld [vmem:[%s10479_s11 + $0x7cc] sm:$0xf] }
 0x312   : > { %6356 = vmatpush.bf16.msra.mxu2 %v7372_v47  ;;  %v7305_v47 = vld [vmem:[%s10479_s11 + $0x438] sm:$0xf0]  ;;  %v7180_v40 = vor.u32 %v9194_v1, %v7177_v54  ;;  %v9374_v27 = vld [vmem:[%s10479_s11 + $0x8cc] sm:$0xf] }
 0x313   : > { %6370 = vmatpush.bf16.msra.mxu3 %v7500_v17  ;;  %v7052_v17 = vor.u32 %v9162_v41, %v7049_v55  ;;  %v7308_v26 = vor.u32 %v9226_v21, %v7305_v47  ;;  %v7641_v58 = vld [vmem:[%s10479_s11 + $0x6d8] sm:$0xf0]  ;;  %v9306_v55 = vld [vmem:[%s10479_s11 + $0x6ac] sm:$0xf] }
 0x314   : > { %6329 = vmatpush.bf16.msra.mxu0 %v7100_v33  ;;  %v9222_v33 = vld [vmem:[%s10479_s11 + $0x40c] sm:$0xf]  ;;  %v6085_v30 = vpop.f32.mrf.mxu2  ;;  %v7769_v20 = vld [vmem:[%s10479_s11 + $0x7d8] sm:$0xf0] }
 0x315   : > { %6343 = vmatpush.bf16.msra.mxu1 %v7228_v50  ;;  %v9254_v50 = vld [vmem:[%s10479_s11 + $0x50c] sm:$0xf]  ;;  %v6086_v53 = vadd.f32 %v6085_v30, %v6072_v43  ;;  %v6099_v35 = vpop.f32.mrf.mxu3  ;;  %v7897_v29 = vld [vmem:[%s10479_s11 + $0x8d8] sm:$0xf0] }
 0x316   : > { %6357 = vmatpush.bf16.msra.mxu2 %v7356_v7  ;;  %v7417_v7 = vld [vmem:[%s10479_s11 + $0x518] sm:$0xf0]  ;;  %v7900_v41 = vor.u32 %v9374_v27, %v7897_v29  ;;  %v9338_v15 = vld [vmem:[%s10479_s11 + $0x7ac] sm:$0xf] }
 0x317   : > { %6371 = vmatpush.bf16.msra.mxu3 %v7484_v28  ;;  %v9346_v28 = vld [vmem:[%s10479_s11 + $0x7ec] sm:$0xf]  ;;  %v11828_v39 = vadd.f32 %v6099_v35, %v6086_v53  ;;  %v7420_v57 = vor.u32 %v9254_v50, %v7417_v7  ;;  %v8025_v25 = vld [vmem:[%s10479_s11 + $0x9d8] sm:$0xf0] }
 0x318   : > { %6330 = vmatpush.bf16.msra.mxu0 %v7084_v16  ;;  %v7164_v16 = vor.u32 %v9190_v56, %v7161_v61  ;;  %v7788_v37 = vor.u32 %v9346_v28, %v7785_v22  ;;  %v7625_v1 = vld [vmem:[%s10479_s11 + $0x6b8] sm:$0xf0]  ;;  %v9370_v47 = vld [vmem:[%s10479_s11 + $0x8ac] sm:$0xf] }
 0x319   : > { %6344 = vmatpush.bf16.msra.mxu1 %v7212_v34  ;;  %v7292_v34 = vor.u32 %v9222_v33, %v7289_v18  ;;  %v7753_v21 = vld [vmem:[%s10479_s11 + $0x7b8] sm:$0xf0]  ;;  %v9302_v61 = vld [vmem:[%s10479_s11 + $0x68c] sm:$0xf] }
 0x31a   : > { %6358 = vmatpush.bf16.msra.mxu2 %v7340_v60  ;;  %v9410_v60 = vld [vmem:[%s10479_s11 + $0x9ec] sm:$0xf]  ;;  %v7881_v43 = vld [vmem:[%s10479_s11 + $0x8b8] sm:$0xf0] }
 0x31b   : > { %6372 = vmatpush.bf16.msra.mxu3 %v7468_v12  ;;  %v7660_v12 = vor.u32 %v9314_v32, %v7657_v23  ;;  %v8044_v19 = vor.u32 %v9410_v60, %v8041_v5  ;;  %v12122_v13 = vld [vmem:[#allocation7_spill] sm:$0xff]  ;;  %v7884_v56 = vor.u32 %v9370_v47, %v7881_v43  ;;  %v9366_v7 = vld [vmem:[%s10479_s11 + $0x88c] sm:$0xf] }
 0x31c   : > { %6331 = vmatpush.bf16.msra.mxu0 %v7068_v42  ;;  %v9406_v42 = vld [vmem:[%s10479_s11 + $0x9cc] sm:$0xf]  ;;  %v8009_v24 = vld [vmem:[%s10479_s11 + $0x9b8] sm:$0xf0] }
 0x31d   : > { %6345 = vmatpush.bf16.msra.mxu1 %v7196_v36  ;;  %v7644_v36 = vor.u32 %v9310_v62, %v7641_v58  ;;  %v8028_v54 = vor.u32 %v9406_v42, %v8025_v25  ;;  %v7609_v33 = vld [vmem:[%s10479_s11 + $0x698] sm:$0xf0]  ;;  %v9398_v23 = vld [vmem:[%s10479_s11 + $0x98c] sm:$0xf] }
 0x31e   : > { %6359 = vmatpush.bf16.msra.mxu2 %v7324_v31  ;;  %v7772_v31 = vor.u32 %v9342_v46, %v7769_v20  ;;  %v7737_v50 = vld [vmem:[%s10479_s11 + $0x798] sm:$0xf0]  ;;  %v9298_v35 = vld [vmem:[%s10479_s11 + $0x66c] sm:$0xf] }
 0x31f   : > { %6373 = vmatpush.bf16.msra.mxu3 %v7452_v52  ;;  %v12120_v52 = vld [vmem:[#allocation5_spill] sm:$0xff]  ;;  %v7865_v30 = vld [vmem:[%s10479_s11 + $0x898] sm:$0xf0] }
 0x320   : > { %6332 = vmatpush.bf16.msra.mxu0 %v7052_v17  ;;  %v9402_v17 = vld [vmem:[%s10479_s11 + $0x9ac] sm:$0xf]  ;;  %v7993_v28 = vld [vmem:[%s10479_s11 + $0x998] sm:$0xf0]  ;;  %v7868_v51 = vor.u32 %v9366_v7, %v7865_v30 }
 0x321   : > { %6346 = vmatpush.bf16.msra.mxu1 %v7180_v40  ;;  %v7628_v40 = vor.u32 %v9306_v55, %v7625_v1  ;;  %v8012_v18 = vor.u32 %v9402_v17, %v8009_v24  ;;  %v7996_v60 = vor.u32 %v9398_v23, %v7993_v28  ;;  %v7577_v20 = vld [vmem:[%s10479_s11 + $0x658] sm:$0xf0]  ;;  %v9326_v27 = vld [vmem:[%s10479_s11 + $0x74c] sm:$0xf] }
 0x322   : > { %6360 = vmatpush.bf16.msra.mxu2 %v7308_v26  ;;  %v7756_v26 = vor.u32 %v9338_v15, %v7753_v21  ;;  %v7705_v25 = vld [vmem:[%s10479_s11 + $0x758] sm:$0xf0]  ;;  %v9390_v15 = vld [vmem:[%s10479_s11 + $0x94c] sm:$0xf] }
 0x323   : > { %6374 = vmatpush.bf16.msra.mxu3 %v7436_v45  ;;  %v9334_v45 = vld [vmem:[%s10479_s11 + $0x78c] sm:$0xf]  ;;  %v7561_v24 = vld [vmem:[%s10479_s11 + $0x638] sm:$0xf0] }
 0x324   : > { %6333 = vmatpush.bf16.msra.mxu0 %v7036_v49  ;;  %v6111_v32 = vpop.f32.mrf.mxu0  ;;  %v7612_v49 = vor.u32 %v9302_v61, %v7609_v33  ;;  %v7740_v2 = vor.u32 %v9334_v45, %v7737_v50  ;;  %v9290_v17 = vld [vmem:[%s10479_s11 + $0x62c] sm:$0xf]  ;;  %v7817_v61 = vld [vmem:[%s10479_s11 + $0x838] sm:$0xf0] }
 0x325   : > { %6347 = vmatpush.bf16.msra.mxu1 %v7164_v16  ;;  %v6112_v53 = vadd.f32 %v6111_v32, %v11805_v11  ;;  %v6125_v22 = vpop.f32.mrf.mxu1  ;;  %v7593_v16 = vld [vmem:[%s10479_s11 + $0x678] sm:$0xf0]  ;;  %v9386_v33 = vld [vmem:[%s10479_s11 + $0x92c] sm:$0xf] }
 0x326   : > { %6361 = vmatpush.bf16.msra.mxu2 %v7292_v34  ;;  %v9330_v34 = vld [vmem:[%s10479_s11 + $0x76c] sm:$0xf]  ;;  %v7849_v11 = vld [vmem:[%s10479_s11 + $0x878] sm:$0xf0]  ;;  %v7596_v62 = vor.u32 %v9298_v35, %v7593_v16 }
 0x327   : > { %6375 = vmatpush.bf16.msra.mxu3 %v7420_v57  ;;  %6334 = vmatmul.bf16.vlgmr.msra.gmra.mxu0 %v12120_v52  ;;  %v6126_v5 = vadd.f32 %v6125_v22, %v6112_v53  ;;  %v7721_v57 = vld [vmem:[%s10479_s11 + $0x778] sm:$0xf0]  ;;  %v9286_v50 = vld [vmem:[%s10479_s11 + $0x60c] sm:$0xf] }
 0x328   : > { %6382 = vmatpush.bf16.msrb.mxu0 %v7660_v12  ;;  %6348 = vmatmul.bf16.vlgmr.msra.gmra.mxu1 %v12122_v13  ;;  %v9362_v12 = vld [vmem:[%s10479_s11 + $0x86c] sm:$0xf]  ;;  %v7724_v58 = vor.u32 %v9330_v34, %v7721_v57  ;;  %v7961_v52 = vld [vmem:[%s10479_s11 + $0x958] sm:$0xf0] }
 0x329   : > { %6396 = vmatpush.bf16.msrb.mxu1 %v7788_v37  ;;  %6362 = vmatmul.bf16.vlgmr.msra.gmra.mxu2 %v12121_v10  ;;  %v9394_v37 = vld [vmem:[%s10479_s11 + $0x96c] sm:$0xf]  ;;  %v7852_v46 = vor.u32 %v9362_v12, %v7849_v11  ;;  %v7708_v10 = vor.u32 %v9326_v27, %v7705_v25  ;;  %v7945_v45 = vld [vmem:[%s10479_s11 + $0x938] sm:$0xf0] }
 0x32a   : > { %6410 = vmatpush.bf16.msrb.mxu2 %v7916_v59  ;;  %6376 = vmatmul.bf16.vlgmr.msra.gmra.mxu3 %v12123_v48  ;;  %v7977_v59 = vld [vmem:[%s10479_s11 + $0x978] sm:$0xf0]  ;;  %v9322_v48 = vld [vmem:[%s10479_s11 + $0x72c] sm:$0xf] }
 0x32b   : > { %6424 = vmatpush.bf16.msrb.mxu3 %v8044_v19  ;;  %v9294_v19 = vld [vmem:[%s10479_s11 + $0x64c] sm:$0xf]  ;;  %v7980_v29 = vor.u32 %v9394_v37, %v7977_v59  ;;  %v7545_v7 = vld [vmem:[%s10479_s11 + $0x618] sm:$0xf0] }
 0x32c   : > { %6383 = vmatpush.bf16.msrb.mxu0 %v7644_v36  ;;  %v6139_v42 = vpop.f32.mrf.mxu2  ;;  %v9358_v36 = vld [vmem:[%s10479_s11 + $0x84c] sm:$0xf]  ;;  %v6113_v55 = vpop.f32.mrf.mxu0  ;;  %v7580_v21 = vor.u32 %v9294_v19, %v7577_v20  ;;  %v7673_v28 = vld [vmem:[%s10479_s11 + $0x718] sm:$0xf0]  ;;  %v7548_v12 = vor.u32 %v9286_v50, %v7545_v7 }
 0x32d   : > { %6397 = vmatpush.bf16.msrb.mxu1 %v7772_v31  ;;  %v7833_v31 = vld [vmem:[%s10479_s11 + $0x858] sm:$0xf0]  ;;  %v6153_v1 = vpop.f32.mrf.mxu3  ;;  %v6127_v47 = vpop.f32.mrf.mxu1  ;;  %v9318_v23 = vld [vmem:[%s10479_s11 + $0x70c] sm:$0xf] }
 0x32e   : > { %6411 = vmatpush.bf16.msrb.mxu2 %v7900_v41  ;;  %v6140_v41 = vadd.f32 %v6139_v42, %v6126_v5  ;;  %v7836_v13 = vor.u32 %v9358_v36, %v7833_v31  ;;  %v9350_v53 = vld [vmem:[%s10479_s11 + $0x80c] sm:$0xf]  ;;  %v7929_v35 = vld [vmem:[%s10479_s11 + $0x918] sm:$0xf0] }
 0x32f   : > { %6425 = vmatpush.bf16.msrb.mxu3 %v8028_v54  ;;  %v6114_v54 = vadd.f32 %v6113_v55, %v11828_v39  ;;  %v8169_v5 = vld [vmem:[%s10479_s11 + $0xaf8] sm:$0xf0]  ;;  %v9474_v57 = vld [vmem:[%s10479_s11 + $0xbec] sm:$0xf] }
 0x330   : > { %6384 = vmatpush.bf16.msrb.mxu0 %v7628_v40  ;;  %v11876_v43 = vadd.f32 %v6153_v1, %v6140_v41  ;;  %v7964_v40 = vor.u32 %v9390_v15, %v7961_v52  ;;  %v8297_v11 = vld [vmem:[%s10479_s11 + $0xbf8] sm:$0xf0]  ;;  %v9506_v37 = vld [vmem:[%s10479_s11 + $0xcec] sm:$0xf] }
 0x331   : > { %6398 = vmatpush.bf16.msrb.mxu1 %v7756_v26  ;;  %v6128_v39 = vadd.f32 %v6127_v47, %v6114_v54  ;;  %v7689_v26 = vld [vmem:[%s10479_s11 + $0x738] sm:$0xf0]  ;;  %v9538_v19 = vld [vmem:[%s10479_s11 + $0xdec] sm:$0xf]  ;;  %v8300_v42 = vor.u32 %v9474_v57, %v8297_v11 }
 0x332   : > { %6412 = vmatpush.bf16.msrb.mxu2 %v7884_v56  ;;  %v9354_v56 = vld [vmem:[%s10479_s11 + $0x82c] sm:$0xf]  ;;  %v7692_v30 = vor.u32 %v9322_v48, %v7689_v26  ;;  %v8425_v59 = vld [vmem:[%s10479_s11 + $0xcf8] sm:$0xf0] }
 0x333   : > { %6426 = vmatpush.bf16.msrb.mxu3 %v8012_v18  ;;  %v7564_v18 = vor.u32 %v9290_v17, %v7561_v24  ;;  %v7820_v32 = vor.u32 %v9354_v56, %v7817_v61  ;;  %v8553_v20 = vld [vmem:[%s10479_s11 + $0xdf8] sm:$0xf0]  ;;  %v8428_v25 = vor.u32 %v9506_v37, %v8425_v59  ;;  %v9438_v36 = vld [vmem:[%s10479_s11 + $0xacc] sm:$0xf] }
 0x334   : > { %6385 = vmatpush.bf16.msrb.mxu0 %v7612_v49  ;;  %v7948_v49 = vor.u32 %v9386_v33, %v7945_v45  ;;  %v6141_v22 = vpop.f32.mrf.mxu2  ;;  %v8153_v31 = vld [vmem:[%s10479_s11 + $0xad8] sm:$0xf0]  ;;  %v9470_v41 = vld [vmem:[%s10479_s11 + $0xbcc] sm:$0xf]  ;;  %v8556_v55 = vor.u32 %v9538_v19, %v8553_v20 }
 0x335   : > { %6399 = vmatpush.bf16.msrb.mxu1 %v7740_v2  ;;  %v7801_v2 = vld [vmem:[%s10479_s11 + $0x818] sm:$0xf0]  ;;  %v6142_v16 = vadd.f32 %v6141_v22, %v6128_v39  ;;  %v6155_v34 = vpop.f32.mrf.mxu3  ;;  %v9502_v15 = vld [vmem:[%s10479_s11 + $0xccc] sm:$0xf]  ;;  %v8156_v47 = vor.u32 %v9438_v36, %v8153_v31 }
 0x336   : > { %6413 = vmatpush.bf16.msrb.mxu2 %v7868_v51  ;;  %v9382_v51 = vld [vmem:[%s10479_s11 + $0x90c] sm:$0xf]  ;;  %v8281_v1 = vld [vmem:[%s10479_s11 + $0xbd8] sm:$0xf0] }
 0x337   : > { %6427 = vmatpush.bf16.msrb.mxu3 %v7996_v60  ;;  %v9442_v60 = vld [vmem:[%s10479_s11 + $0xaec] sm:$0xf]  ;;  %v7932_v27 = vor.u32 %v9382_v51, %v7929_v35  ;;  %v8409_v52 = vld [vmem:[%s10479_s11 + $0xcd8] sm:$0xf0] }
 0x338   : > { %6386 = vmatpush.bf16.msrb.mxu0 %v7596_v62  ;;  %v11900_v62 = vadd.f32 %v6155_v34, %v6142_v16  ;;  %v9534_v54 = vld [vmem:[%s10479_s11 + $0xdcc] sm:$0xf]  ;;  %v8137_v24 = vld [vmem:[%s10479_s11 + $0xab8] sm:$0xf0] }
 0x339   : > { %6400 = vmatpush.bf16.msrb.mxu1 %v7724_v58  ;;  %v7676_v58 = vor.u32 %v9318_v23, %v7673_v28  ;;  %v9434_v17 = vld [vmem:[%s10479_s11 + $0xaac] sm:$0xf]  ;;  %v8265_v26 = vld [vmem:[%s10479_s11 + $0xbb8] sm:$0xf0] }
 0x33a   : > { %6414 = vmatpush.bf16.msrb.mxu2 %v7852_v46  ;;  %v7804_v46 = vor.u32 %v9350_v53, %v7801_v2  ;;  %v9466_v48 = vld [vmem:[%s10479_s11 + $0xbac] sm:$0xf]  ;;  %v8393_v61 = vld [vmem:[%s10479_s11 + $0xcb8] sm:$0xf0]  ;;  %v8140_v50 = vor.u32 %v9434_v17, %v8137_v24 }
 0x33b   : > { %6428 = vmatpush.bf16.msrb.mxu3 %v7980_v29  ;;  %v8172_v29 = vor.u32 %v9442_v60, %v8169_v5  ;;  %v9498_v56 = vld [vmem:[%s10479_s11 + $0xcac] sm:$0xf]  ;;  %v12125_v33 = vld [vmem:[#allocation11_spill] sm:$0xff]  ;;  %v8268_v7 = vor.u32 %v9466_v48, %v8265_v26 }
 0x33c   : > { %6387 = vmatpush.bf16.msrb.mxu0 %v7580_v21  ;;  %v8537_v21 = vld [vmem:[%s10479_s11 + $0xdd8] sm:$0xf0]  ;;  %v9530_v45 = vld [vmem:[%s10479_s11 + $0xdac] sm:$0xf] }
 0x33d   : > { %6401 = vmatpush.bf16.msrb.mxu1 %v7708_v10  ;;  %v8284_v10 = vor.u32 %v9470_v41, %v8281_v1  ;;  %v8540_v39 = vor.u32 %v9534_v54, %v8537_v21  ;;  %v8121_v23 = vld [vmem:[%s10479_s11 + $0xa98] sm:$0xf0]  ;;  %v9526_v2 = vld [vmem:[%s10479_s11 + $0xd8c] sm:$0xf] }
 0x33e   : > { %6415 = vmatpush.bf16.msrb.mxu2 %v7836_v13  ;;  %v8412_v13 = vor.u32 %v9502_v15, %v8409_v52  ;;  %v8249_v53 = vld [vmem:[%s10479_s11 + $0xb98] sm:$0xf0]  ;;  %v9426_v57 = vld [vmem:[%s10479_s11 + $0xa6c] sm:$0xf] }
 0x33f   : > { %6429 = vmatpush.bf16.msrb.mxu3 %v7964_v40  ;;  %v12124_v40 = vld [vmem:[#allocation9_spill] sm:$0xff]  ;;  %v8377_v22 = vld [vmem:[%s10479_s11 + $0xc98] sm:$0xf0] }
 0x340   : > { %6388 = vmatpush.bf16.msrb.mxu0 %v7564_v18  ;;  %v8521_v18 = vld [vmem:[%s10479_s11 + $0xdb8] sm:$0xf0]  ;;  %v9458_v11 = vld [vmem:[%s10479_s11 + $0xb6c] sm:$0xf] }
 0x341   : > { %6402 = vmatpush.bf16.msrb.mxu1 %v7692_v30  ;;  %v8396_v30 = vor.u32 %v9498_v56, %v8393_v61  ;;  %v8524_v28 = vor.u32 %v9530_v45, %v8521_v18  ;;  %v8505_v51 = vld [vmem:[%s10479_s11 + $0xd98] sm:$0xf0]  ;;  %v9522_v19 = vld [vmem:[%s10479_s11 + $0xd6c] sm:$0xf] }
 0x342   : > { %6416 = vmatpush.bf16.msrb.mxu2 %v7820_v32  ;;  %v9430_v32 = vld [vmem:[%s10479_s11 + $0xa8c] sm:$0xf]  ;;  %v8508_v37 = vor.u32 %v9526_v2, %v8505_v51  ;;  %v8489_v20 = vld [vmem:[%s10479_s11 + $0xd78] sm:$0xf0] }
 0x343   : > { %6430 = vmatpush.bf16.msrb.mxu3 %v7948_v49  ;;  %v9494_v49 = vld [vmem:[%s10479_s11 + $0xc8c] sm:$0xf]  ;;  %v8124_v16 = vor.u32 %v9430_v32, %v8121_v23  ;;  %v8089_v36 = vld [vmem:[%s10479_s11 + $0xa58] sm:$0xf0]  ;;  %v8492_v41 = vor.u32 %v9522_v19, %v8489_v20 }
 0x344   : > { %6389 = vmatpush.bf16.msrb.mxu0 %v7548_v12  ;;  %v8380_v5 = vor.u32 %v9494_v49, %v8377_v22  ;;  %v8105_v12 = vld [vmem:[%s10479_s11 + $0xa78] sm:$0xf0]  ;;  %v9454_v31 = vld [vmem:[%s10479_s11 + $0xb4c] sm:$0xf] }
 0x345   : > { %6403 = vmatpush.bf16.msrb.mxu1 %v7676_v58  ;;  %v6181_v34 = vpop.f32.mrf.mxu1  ;;  %v8233_v58 = vld [vmem:[%s10479_s11 + $0xb78] sm:$0xf0]  ;;  %v9486_v15 = vld [vmem:[%s10479_s11 + $0xc4c] sm:$0xf] }
 0x346   : > { %6417 = vmatpush.bf16.msrb.mxu2 %v7804_v46  ;;  %v9490_v46 = vld [vmem:[%s10479_s11 + $0xc6c] sm:$0xf]  ;;  %v8217_v1 = vld [vmem:[%s10479_s11 + $0xb58] sm:$0xf0] }
 0x347   : > { %6431 = vmatpush.bf16.msrb.mxu3 %v7932_v27  ;;  %6390 = vmatmul.bf16.vlgmr.msrb.gmra.mxu0 %v12124_v40  ;;  %v8108_v27 = vor.u32 %v9426_v57, %v8105_v12  ;;  %v8345_v52 = vld [vmem:[%s10479_s11 + $0xc58] sm:$0xf0]  ;;  %v9418_v56 = vld [vmem:[%s10479_s11 + $0xa2c] sm:$0xf] }
 0x348   : > { %6438 = vmatpush.bf16.msra.mxu0 %v8172_v29  ;;  %6404 = vmatmul.bf16.vlgmr.msrb.gmra.mxu1 %v12125_v33  ;;  %v8236_v29 = vor.u32 %v9458_v11, %v8233_v58  ;;  %v8348_v26 = vor.u32 %v9486_v15, %v8345_v52  ;;  %v8073_v61 = vld [vmem:[%s10479_s11 + $0xa38] sm:$0xf0]  ;;  %v9450_v33 = vld [vmem:[%s10479_s11 + $0xb2c] sm:$0xf] }
 0x349   : > { %6452 = vmatpush.bf16.msra.mxu1 %v8300_v42  ;;  %6418 = vmatmul.bf16.vlgmr.msrb.gmra.mxu2 %v10780_v63  ;;  %v9462_v63 = vld [vmem:[%s10479_s11 + $0xb8c] sm:$0xf]  ;;  %v8201_v18 = vld [vmem:[%s10479_s11 + $0xb38] sm:$0xf0]  ;;  %v8076_v23 = vor.u32 %v9418_v56, %v8073_v61 }
 0x34a   : > { %6466 = vmatpush.bf16.msra.mxu2 %v8428_v25  ;;  %6432 = vmatmul.bf16.vlgmr.msrb.gmra.mxu3 %v10787_v4  ;;  %v6167_v4 = vpop.f32.mrf.mxu0  ;;  %v8252_v60 = vor.u32 %v9462_v63, %v8249_v53  ;;  %v9422_v25 = vld [vmem:[%s10479_s11 + $0xa4c] sm:$0xf]  ;;  %v8457_v32 = vld [vmem:[%s10479_s11 + $0xd38] sm:$0xf0]  ;;  %v8204_v53 = vor.u32 %v9450_v33, %v8201_v18 }
 0x34b   : > { %6480 = vmatpush.bf16.msra.mxu3 %v8556_v55  ;;  %v6168_v35 = vadd.f32 %v6167_v4, %v11876_v43  ;;  %v8361_v43 = vld [vmem:[%s10479_s11 + $0xc78] sm:$0xf0]  ;;  %v8092_v24 = vor.u32 %v9422_v25, %v8089_v36  ;;  %v9414_v63 = vld [vmem:[%s10479_s11 + $0xa0c] sm:$0xf] }
 0x34c   : > { %6439 = vmatpush.bf16.msra.mxu0 %v8156_v47  ;;  %v8364_v42 = vor.u32 %v9490_v46, %v8361_v43  ;;  %v6195_v55 = vpop.f32.mrf.mxu2  ;;  %v9446_v22 = vld [vmem:[%s10479_s11 + $0xb0c] sm:$0xf]  ;;  %v8185_v4 = vld [vmem:[%s10479_s11 + $0xb18] sm:$0xf0] }
 0x34d   : > { %6453 = vmatpush.bf16.msra.mxu1 %v8284_v10  ;;  %v6182_v59 = vadd.f32 %v6181_v34, %v6168_v35  ;;  %v6209_v47 = vpop.f32.mrf.mxu3  ;;  %v9518_v10 = vld [vmem:[%s10479_s11 + $0xd4c] sm:$0xf]  ;;  %v6183_v48 = vpop.f32.mrf.mxu1  ;;  %v8681_v11 = vld [vmem:[%s10479_s11 + $0xef8] sm:$0xf0]  ;;  %v8188_v20 = vor.u32 %v9446_v22, %v8185_v4 }
 0x34e   : > { %6467 = vmatpush.bf16.msra.mxu2 %v8412_v13  ;;  %v8473_v13 = vld [vmem:[%s10479_s11 + $0xd58] sm:$0xf0]  ;;  %v9478_v2 = vld [vmem:[%s10479_s11 + $0xc0c] sm:$0xf] }
 0x34f   : > { %6481 = vmatpush.bf16.msra.mxu3 %v8540_v39  ;;  %v6196_v54 = vadd.f32 %v6195_v55, %v6182_v59  ;;  %v8220_v39 = vor.u32 %v9454_v31, %v8217_v1  ;;  %v8476_v45 = vor.u32 %v9518_v10, %v8473_v13  ;;  %v9510_v34 = vld [vmem:[%s10479_s11 + $0xd0c] sm:$0xf]  ;;  %v8809_v58 = vld [vmem:[%s10479_s11 + $0xff8] sm:$0xf0] }
 0x350   : > { %6440 = vmatpush.bf16.msra.mxu0 %v8140_v50  ;;  %v9482_v50 = vld [vmem:[%s10479_s11 + $0xc2c] sm:$0xf]  ;;  %v8937_v43 = vld [vmem:[%s10479_s11 + $0x10f8] sm:$0xf0] }
 0x351   : > { %6454 = vmatpush.bf16.msra.mxu1 %v8268_v7  ;;  %v11950_v40 = vadd.f32 %v6209_v47, %v6196_v54  ;;  %v8329_v7 = vld [vmem:[%s10479_s11 + $0xc38] sm:$0xf0]  ;;  %v9570_v12 = vld [vmem:[%s10479_s11 + $0xeec] sm:$0xf] }
 0x352   : > { %6468 = vmatpush.bf16.msra.mxu2 %v8396_v30  ;;  %v6169_v21 = vpop.f32.mrf.mxu0  ;;  %v9514_v30 = vld [vmem:[%s10479_s11 + $0xd2c] sm:$0xf]  ;;  %v8332_v49 = vor.u32 %v9482_v50, %v8329_v7  ;;  %v8684_v36 = vor.u32 %v9570_v12, %v8681_v11  ;;  %v8665_v1 = vld [vmem:[%s10479_s11 + $0xed8] sm:$0xf0] }
 0x353   : > { %6482 = vmatpush.bf16.msra.mxu3 %v8524_v28  ;;  %v6170_v17 = vadd.f32 %v6169_v21, %v11900_v62  ;;  %v8057_v28 = vld [vmem:[%s10479_s11 + $0xa18] sm:$0xf0]  ;;  %v8460_v51 = vor.u32 %v9514_v30, %v8457_v32  ;;  %v9634_v46 = vld [vmem:[%s10479_s11 + $0x10ec] sm:$0xf] }
 0x354   : > { %6441 = vmatpush.bf16.msra.mxu0 %v8124_v16  ;;  %v6197_v35 = vpop.f32.mrf.mxu2  ;;  %v8313_v16 = vld [vmem:[%s10479_s11 + $0xc18] sm:$0xf0]  ;;  %v8060_v59 = vor.u32 %v9414_v63, %v8057_v28  ;;  %v9566_v55 = vld [vmem:[%s10479_s11 + $0xecc] sm:$0xf] }
 0x355   : > { %6455 = vmatpush.bf16.msra.mxu1 %v8252_v60  ;;  %v6184_v62 = vadd.f32 %v6183_v48, %v6170_v17  ;;  %v8441_v60 = vld [vmem:[%s10479_s11 + $0xd18] sm:$0xf0]  ;;  %v6211_v57 = vpop.f32.mrf.mxu3  ;;  %v9598_v15 = vld [vmem:[%s10479_s11 + $0xfcc] sm:$0xf]  ;;  %v8668_v17 = vor.u32 %v9566_v55, %v8665_v1 }
 0x356   : > { %6469 = vmatpush.bf16.msra.mxu2 %v8380_v5  ;;  %v8444_v25 = vor.u32 %v9510_v34, %v8441_v60  ;;  %v8793_v54 = vld [vmem:[%s10479_s11 + $0xfd8] sm:$0xf0]  ;;  %v9630_v21 = vld [vmem:[%s10479_s11 + $0x10cc] sm:$0xf] }
 0x357   : > { %6483 = vmatpush.bf16.msra.mxu3 %v8508_v37  ;;  %v6198_v5 = vadd.f32 %v6197_v35, %v6184_v62  ;;  %v9602_v37 = vld [vmem:[%s10479_s11 + $0xfec] sm:$0xf]  ;;  %v8921_v47 = vld [vmem:[%s10479_s11 + $0x10d8] sm:$0xf0] }
 0x358   : > { %6442 = vmatpush.bf16.msra.mxu0 %v8108_v27  ;;  %v8316_v27 = vor.u32 %v9478_v2, %v8313_v16  ;;  %v8812_v31 = vor.u32 %v9602_v37, %v8809_v58  ;;  %v9662_v10 = vld [vmem:[%s10479_s11 + $0x11cc] sm:$0xf]  ;;  %v9049_v13 = vld [vmem:[%s10479_s11 + $0x11d8] sm:$0xf0]  ;;  %v8924_v48 = vor.u32 %v9630_v21, %v8921_v47 }
 0x359   : > { %6456 = vmatpush.bf16.msra.mxu1 %v8236_v29  ;;  %v11974_v19 = vadd.f32 %v6211_v57, %v6198_v5  ;;  %v9666_v29 = vld [vmem:[%s10479_s11 + $0x11ec] sm:$0xf]  ;;  %v9052_v61 = vor.u32 %v9662_v10, %v9049_v13  ;;  %v8777_v33 = vld [vmem:[%s10479_s11 + $0xfb8] sm:$0xf0] }
 0x35a   : > { %6470 = vmatpush.bf16.msra.mxu2 %v8364_v42  ;;  %v9065_v42 = vld [vmem:[%s10479_s11 + $0x11f8] sm:$0xf0]  ;;  %v9594_v56 = vld [vmem:[%s10479_s11 + $0xfac] sm:$0xf] }
 0x35b   : > { %6484 = vmatpush.bf16.msra.mxu3 %v8492_v41  ;;  %v8940_v41 = vor.u32 %v9634_v46, %v8937_v43  ;;  %v9068_v52 = vor.u32 %v9666_v29, %v9065_v42  ;;  %v8905_v62 = vld [vmem:[%s10479_s11 + $0x10b8] sm:$0xf0]  ;;  %v9658_v18 = vld [vmem:[%s10479_s11 + $0x11ac] sm:$0xf]  ;;  %v8780_v7 = vor.u32 %v9594_v56, %v8777_v33 }
 0x35c   : > { %6443 = vmatpush.bf16.msra.mxu0 %v8092_v24  ;;  %v8796_v24 = vor.u32 %v9598_v15, %v8793_v54  ;;  %v9033_v50 = vld [vmem:[%s10479_s11 + $0x11b8] sm:$0xf0]  ;;  %v9558_v32 = vld [vmem:[%s10479_s11 + $0xe8c] sm:$0xf] }
 0x35d   : > { %6457 = vmatpush.bf16.msra.mxu1 %v8220_v39  ;;  %v9562_v39 = vld [vmem:[%s10479_s11 + $0xeac] sm:$0xf]  ;;  %v8761_v63 = vld [vmem:[%s10479_s11 + $0xf98] sm:$0xf0] }
 0x35e   : > { %6471 = vmatpush.bf16.msra.mxu2 %v8348_v26  ;;  %v8649_v26 = vld [vmem:[%s10479_s11 + $0xeb8] sm:$0xf0]  ;;  %v9622_v28 = vld [vmem:[%s10479_s11 + $0x108c] sm:$0xf] }
 0x35f   : > { %6485 = vmatpush.bf16.msra.mxu3 %v8476_v45  ;;  %v9626_v45 = vld [vmem:[%s10479_s11 + $0x10ac] sm:$0xf]  ;;  %v9017_v22 = vld [vmem:[%s10479_s11 + $0x1198] sm:$0xf0] }
 0x360   : > { %6444 = vmatpush.bf16.msra.mxu0 %v8076_v23  ;;  %v8908_v30 = vor.u32 %v9626_v45, %v8905_v62  ;;  %v8633_v23 = vld [vmem:[%s10479_s11 + $0xe98] sm:$0xf0]  ;;  %v9554_v34 = vld [vmem:[%s10479_s11 + $0xe6c] sm:$0xf] }
 0x361   : > { %6458 = vmatpush.bf16.msra.mxu1 %v8204_v53  ;;  %v8889_v53 = vld [vmem:[%s10479_s11 + $0x1098] sm:$0xf0]  ;;  %v8636_v2 = vor.u32 %v9558_v32, %v8633_v23  ;;  %v9586_v5 = vld [vmem:[%s10479_s11 + $0xf6c] sm:$0xf] }
 0x362   : > { %6472 = vmatpush.bf16.msra.mxu2 %v8332_v49  ;;  %v9654_v49 = vld [vmem:[%s10479_s11 + $0x118c] sm:$0xf]  ;;  %v8892_v16 = vor.u32 %v9622_v28, %v8889_v53  ;;  %v8617_v60 = vld [vmem:[%s10479_s11 + $0xe78] sm:$0xf0] }
 0x363   : > { %6486 = vmatpush.bf16.msra.mxu3 %v8460_v51  ;;  %v9020_v57 = vor.u32 %v9654_v49, %v9017_v22  ;;  %v8745_v11 = vld [vmem:[%s10479_s11 + $0xf78] sm:$0xf0]  ;;  %v9618_v37 = vld [vmem:[%s10479_s11 + $0x106c] sm:$0xf]  ;;  %v8620_v46 = vor.u32 %v9554_v34, %v8617_v60 }
 0x364   : > { %6445 = vmatpush.bf16.msra.mxu0 %v8060_v59  ;;  %v9650_v59 = vld [vmem:[%s10479_s11 + $0x116c] sm:$0xf]  ;;  %v9001_v58 = vld [vmem:[%s10479_s11 + $0x1178] sm:$0xf0]  ;;  %v8748_v43 = vor.u32 %v9586_v5, %v8745_v11 }
 0x365   : > { %6459 = vmatpush.bf16.msra.mxu1 %v8188_v20  ;;  %v6237_v51 = vpop.f32.mrf.mxu1  ;;  %v8601_v29 = vld [vmem:[%s10479_s11 + $0xe58] sm:$0xf0]  ;;  %v9582_v42 = vld [vmem:[%s10479_s11 + $0xf4c] sm:$0xf] }
 0x366   : > { %6473 = vmatpush.bf16.msra.mxu2 %v8316_v27  ;;  %v9550_v27 = vld [vmem:[%s10479_s11 + $0xe4c] sm:$0xf]  ;;  %v8857_v55 = vld [vmem:[%s10479_s11 + $0x1058] sm:$0xf0] }
 0x367   : > { %6487 = vmatpush.bf16.msra.mxu3 %v8444_v25  ;;  %6446 = vmatmul.bf16.vlgmr.msra.gmra.mxu0 %v10785_v3  ;;  %v8652_v3 = vor.u32 %v9562_v39, %v8649_v26  ;;  %v9004_v25 = vor.u32 %v9650_v59, %v9001_v58  ;;  %v9646_v54 = vld [vmem:[%s10479_s11 + $0x114c] sm:$0xf]  ;;  %v8985_v21 = vld [vmem:[%s10479_s11 + $0x1158] sm:$0xf0]  ;;  %v8604_v10 = vor.u32 %v9550_v27, %v8601_v29 }
 0x368   : > { %6494 = vmatpush.bf16.msrb.mxu0 %v8684_v36  ;;  %6460 = vmatmul.bf16.vlgmr.msra.gmra.mxu1 %v10791_v8  ;;  %v9036_v8 = vor.u32 %v9658_v18, %v9033_v50  ;;  %v9546_v39 = vld [vmem:[%s10479_s11 + $0xe2c] sm:$0xf]  ;;  %v8585_v26 = vld [vmem:[%s10479_s11 + $0xe38] sm:$0xf0] }
 0x369   : > { %6508 = vmatpush.bf16.msrb.mxu1 %v8812_v31  ;;  %6474 = vmatmul.bf16.vlgmr.msra.gmra.mxu2 %v10880_v0  ;;  %v9590_v0 = vld [vmem:[%s10479_s11 + $0xf8c] sm:$0xf]  ;;  %v8729_v31 = vld [vmem:[%s10479_s11 + $0xf58] sm:$0xf0] }
 0x36a   : > { %6522 = vmatpush.bf16.msrb.mxu2 %v8940_v41  ;;  %6488 = vmatmul.bf16.vlgmr.msra.gmra.mxu3 %v10887_v9  ;;  %v6223_v9 = vpop.f32.mrf.mxu0  ;;  %v8764_v35 = vor.u32 %v9590_v0, %v8761_v63  ;;  %v9614_v41 = vld [vmem:[%s10479_s11 + $0x104c] sm:$0xf]  ;;  %v8841_v62 = vld [vmem:[%s10479_s11 + $0x1038] sm:$0xf0] }
 0x36b   : > { %6536 = vmatpush.bf16.msrb.mxu3 %v9068_v52  ;;  %v6224_v4 = vadd.f32 %v6223_v9, %v11950_v40  ;;  %v8873_v40 = vld [vmem:[%s10479_s11 + $0x1078] sm:$0xf0]  ;;  %v9578_v56 = vld [vmem:[%s10479_s11 + $0xf2c] sm:$0xf] }
 0x36c   : > { %6495 = vmatpush.bf16.msrb.mxu0 %v8668_v17  ;;  %v8876_v20 = vor.u32 %v9618_v37, %v8873_v40  ;;  %v6251_v36 = vpop.f32.mrf.mxu2  ;;  %v9610_v45 = vld [vmem:[%s10479_s11 + $0x102c] sm:$0xf]  ;;  %v8969_v50 = vld [vmem:[%s10479_s11 + $0x1138] sm:$0xf0] }
 0x36d   : > { %6509 = vmatpush.bf16.msrb.mxu1 %v8796_v24  ;;  %v6238_v12 = vadd.f32 %v6237_v51, %v6224_v4  ;;  %v6265_v52 = vpop.f32.mrf.mxu3  ;;  %v6239_v13 = vpop.f32.mrf.mxu1  ;;  %v8732_v24 = vor.u32 %v9582_v42, %v8729_v31  ;;  %v9642_v18 = vld [vmem:[%s10479_s11 + $0x112c] sm:$0xf]  ;;  %v8569_v23 = vld [vmem:[%s10479_s11 + $0xe18] sm:$0xf0] }
 0x36e   : > { %6523 = vmatpush.bf16.msrb.mxu2 %v8924_v48  ;;  %v8860_v48 = vor.u32 %v9614_v41, %v8857_v55  ;;  %v9542_v32 = vld [vmem:[%s10479_s11 + $0xe0c] sm:$0xf]  ;;  %v8697_v28 = vld [vmem:[%s10479_s11 + $0xf18] sm:$0xf0] }
 0x36f   : > { %6537 = vmatpush.bf16.msrb.mxu3 %v9052_v61  ;;  %v6252_v1 = vadd.f32 %v6251_v36, %v6238_v12  ;;  %v8988_v61 = vor.u32 %v9646_v54, %v8985_v21  ;;  %v9574_v0 = vld [vmem:[%s10479_s11 + $0xf0c] sm:$0xf]  ;;  %v8825_v9 = vld [vmem:[%s10479_s11 + $0x1018] sm:$0xf0]  ;;  %v8572_v51 = vor.u32 %v9542_v32, %v8569_v23 }
 0x370   : > { %6496 = vmatpush.bf16.msrb.mxu0 %v8652_v3  ;;  %v8588_v3 = vor.u32 %v9546_v39, %v8585_v26  ;;  %v9606_v53 = vld [vmem:[%s10479_s11 + $0x100c] sm:$0xf] }
 0x371   : > { %6510 = vmatpush.bf16.msrb.mxu1 %v8780_v7  ;;  %v6266_v17 = vadd.f32 %v6265_v52, %v6252_v1  ;;  %v9638_v4 = vld [vmem:[%s10479_s11 + $0x110c] sm:$0xf]  ;;  %v8828_v34 = vor.u32 %v9606_v53, %v8825_v9 }
 0x372   : > { %6524 = vmatpush.bf16.msrb.mxu2 %v8908_v30  ;;  %v6225_v15 = vpop.f32.mrf.mxu0  ;;  %v8844_v30 = vor.u32 %v9610_v45, %v8841_v62 }
 0x373   : > { %6538 = vmatpush.bf16.msrb.mxu3 %v9036_v8  ;;  %v6226_v47 = vadd.f32 %v6225_v15, %v11974_v19  ;;  %v8713_v19 = vld [vmem:[%s10479_s11 + $0xf38] sm:$0xf0]  ;;  %v8972_v8 = vor.u32 %v9642_v18, %v8969_v50 }
 0x374   : > { %6497 = vmatpush.bf16.msrb.mxu0 %v8636_v2  ;;  %v8716_v7 = vor.u32 %v9578_v56, %v8713_v19  ;;  %v6253_v63 = vpop.f32.mrf.mxu2  ;;  %v8953_v2 = vld [vmem:[%s10479_s11 + $0x1118] sm:$0xf0] }
 0x375   : > { %6511 = vmatpush.bf16.msrb.mxu1 %v8764_v35  ;;  %v6240_v33 = vadd.f32 %v6239_v13, %v6226_v47  ;;  %v6267_v22 = vpop.f32.mrf.mxu3  ;;  %v8956_v60 = vor.u32 %v9638_v4, %v8953_v2 }
 0x376   : > { %6525 = vmatpush.bf16.msrb.mxu2 %v8892_v16  ;;  %v8700_v16 = vor.u32 %v9574_v0, %v8697_v28 }
 0x377   : > { %6539 = vmatpush.bf16.msrb.mxu3 %v9020_v57  ;;  %v6254_v49 = vadd.f32 %v6253_v63, %v6240_v33 }
 0x378   : > { %6498 = vmatpush.bf16.msrb.mxu0 %v8620_v46 }
 0x379   : > { %6512 = vmatpush.bf16.msrb.mxu1 %v8748_v43  ;;  %v6268_v35 = vadd.f32 %v6267_v22, %v6254_v49 }
 0x37a   : > { %6526 = vmatpush.bf16.msrb.mxu2 %v8876_v20 }
 0x37b   : > { %6540 = vmatpush.bf16.msrb.mxu3 %v9004_v25 }
 0x37c   : > { %6499 = vmatpush.bf16.msrb.mxu0 %v8604_v10 }
 0x37d   : > { %6513 = vmatpush.bf16.msrb.mxu1 %v8732_v24 }
 0x37e   : > { %6527 = vmatpush.bf16.msrb.mxu2 %v8860_v48 }
 0x37f   : > { %6541 = vmatpush.bf16.msrb.mxu3 %v8988_v61 }
 0x380   : > { %6500 = vmatpush.bf16.msrb.mxu0 %v8588_v3 }
 0x381   : > { %6514 = vmatpush.bf16.msrb.mxu1 %v8716_v7 }
 0x382   : > { %6528 = vmatpush.bf16.msrb.mxu2 %v8844_v30 }
 0x383   : > { %6542 = vmatpush.bf16.msrb.mxu3 %v8972_v8 }
 0x384   : > { %6501 = vmatpush.bf16.msrb.mxu0 %v8572_v51  ;;  %v6279_v5 = vpop.f32.mrf.mxu0 }
 0x385   : > { %6515 = vmatpush.bf16.msrb.mxu1 %v8700_v16  ;;  %v6280_v57 = vadd.f32 %v6279_v5, %v6266_v17  ;;  %v6293_v12 = vpop.f32.mrf.mxu1 }
 0x386   : > { %6529 = vmatpush.bf16.msrb.mxu2 %v8828_v34 }
 0x387   : > { %6543 = vmatpush.bf16.msrb.mxu3 %v8956_v60  ;;  %6502 = vmatmul.bf16.vlgmr.msrb.gmra.mxu0 %v10885_v6  ;;  %v12044_v11 = vadd.f32 %v6293_v12, %v6280_v57 }
 0x388   : > { %6516 = vmatmul.bf16.vlgmr.msrb.gmra.mxu1 %v10891_v14 }
 0x389   : > { %6530 = vmatmul.bf16.vlgmr.msrb.gmra.mxu2 %v12116_v38  ;;  %v9729_v38 = vld [vmem:[%s10990_s14] sm:$0xf] }
 0x38a   : > { %6544 = vmatmul.bf16.vlgmr.msrb.gmra.mxu3 %v12117_v44  ;;  %v2567_v29 = vperm.slane %v9729_v38, 3  ;;  %v6552_v38 = vmax.f32 %v12044_v11, 0.0  ;;  %v6588_v11 = vld [vmem:[%s11745_s12] sm:$0xff] (%p9837_p5) }
 0x38b   : > { %6589 = vst [vmem:[%s6575_s21] sm:$0xff] (%p9837_p5), %v6588_v11 }
 0x38c   : > { %v6281_v37 = vpop.f32.mrf.mxu0  ;;  %v6307_v46 = vpop.f32.mrf.mxu2 }
 0x38d   : > { %v6282_v40 = vadd.f32 %v6281_v37, %v6268_v35  ;;  %v6295_v59 = vpop.f32.mrf.mxu1  ;;  %v6321_v43 = vpop.f32.mrf.mxu3  ;;  %v6308_v25 = vadd.f32 %v6307_v46, %v2567_v29 }
 0x38f   : > { %v12046_v58 = vadd.f32 %v6295_v59, %v6282_v40  ;;  %v6322_v41 = vadd.f32 %v6321_v43, %v6308_v25 }
 0x394   : > { %v6309_v6 = vpop.f32.mrf.mxu2 }
 0x395   : > { %v6323_v20 = vpop.f32.mrf.mxu3  ;;  %v6310_v54 = vadd.f32 %v6309_v6, %v2567_v29 }
 0x397   : > { %v6324_v10 = vadd.f32 %v6323_v20, %v6310_v54 }
 0x3a4   : > { %v6335_v14 = vpop.f32.mrf.mxu0 }
 0x3a5   : > { %v6349_v27 = vpop.f32.mrf.mxu1  ;;  %v6336_v1 = vadd.f32 %v6335_v14, %v6322_v41 }
 0x3a7   : > { %v6350_v47 = vadd.f32 %v6349_v27, %v6336_v1  ;;  %v6556_v1 = vmax.f32 %v12046_v58, 0.0 }
 0x3ac   : > { %v6363_v42 = vpop.f32.mrf.mxu2  ;;  %v6337_v36 = vpop.f32.mrf.mxu0 }
 0x3ad   : > { %v6377_v44 = vpop.f32.mrf.mxu3  ;;  %v6351_v31 = vpop.f32.mrf.mxu1  ;;  %v6364_v17 = vadd.f32 %v6363_v42, %v6350_v47  ;;  %v6338_v48 = vadd.f32 %v6337_v36, %v6324_v10 }
 0x3af   : > { %v6378_v26 = vadd.f32 %v6377_v44, %v6364_v17  ;;  %v6352_v61 = vadd.f32 %v6351_v31, %v6338_v48 }
 0x3b4   : > { %v6365_v55 = vpop.f32.mrf.mxu2 }
 0x3b5   : > { %v6379_v15 = vpop.f32.mrf.mxu3  ;;  %v6366_v19 = vadd.f32 %v6365_v55, %v6352_v61 }
 0x3b7   : > { %v6380_v3 = vadd.f32 %v6379_v15, %v6366_v19 }
 0x3c4   : > { %v6391_v52 = vpop.f32.mrf.mxu0 }
 0x3c5   : > { %v6405_v21 = vpop.f32.mrf.mxu1  ;;  %v6392_v33 = vadd.f32 %v6391_v52, %v6378_v26 }
 0x3c7   : > { %v6406_v62 = vadd.f32 %v6405_v21, %v6392_v33  ;;  %v6592_v21 = vld [vmem:[%s11745_s12 + $0x10] sm:$0xff] (%p9837_p5) }
 0x3c8   : > { %6593 = vst [vmem:[%s6575_s21 + $0x20] sm:$0xff] (%p9837_p5), %v6592_v21 }
 0x3cc   : > { %v6419_v13 = vpop.f32.mrf.mxu2  ;;  %v6393_v39 = vpop.f32.mrf.mxu0 }
 0x3cd   : > { %v6433_v24 = vpop.f32.mrf.mxu3  ;;  %v6407_v56 = vpop.f32.mrf.mxu1  ;;  %v6420_v7 = vadd.f32 %v6419_v13, %v6406_v62  ;;  %v6394_v32 = vadd.f32 %v6393_v39, %v6380_v3 }
 0x3cf   : > { %v6434_v23 = vadd.f32 %v6433_v24, %v6420_v7  ;;  %v6408_v8 = vadd.f32 %v6407_v56, %v6394_v32 }
 0x3d4   : > { %v6421_v45 = vpop.f32.mrf.mxu2 }
 0x3d5   : > { %v6435_v18 = vpop.f32.mrf.mxu3  ;;  %v6422_v53 = vadd.f32 %v6421_v45, %v6408_v8 }
 0x3d7   : > { %v6436_v4 = vadd.f32 %v6435_v18, %v6422_v53 }
 0x3e4   : > { %v6447_v50 = vpop.f32.mrf.mxu0 }
 0x3e5   : > { %v6461_v30 = vpop.f32.mrf.mxu1  ;;  %v6448_v63 = vadd.f32 %v6447_v50, %v6434_v23 }
 0x3e7   : > { %v6462_v49 = vadd.f32 %v6461_v30, %v6448_v63 }
 0x3ec   : > { %v6475_v0 = vpop.f32.mrf.mxu2  ;;  %v6449_v9 = vpop.f32.mrf.mxu0 }
 0x3ed   : > { %v6489_v28 = vpop.f32.mrf.mxu3  ;;  %v6463_v22 = vpop.f32.mrf.mxu1  ;;  %v6476_v2 = vadd.f32 %v6475_v0, %v6462_v49  ;;  %v6450_v51 = vadd.f32 %v6449_v9, %v6436_v4 }
 0x3ef   : > { %v6490_v16 = vadd.f32 %v6489_v28, %v6476_v2  ;;  %v6464_v5 = vadd.f32 %v6463_v22, %v6450_v51 }
 0x3f4   : > { %v6477_v35 = vpop.f32.mrf.mxu2 }
 0x3f5   : > { %v6491_v34 = vpop.f32.mrf.mxu3  ;;  %v6478_v37 = vadd.f32 %v6477_v35, %v6464_v5 }
 0x3f7   : > { %v6492_v46 = vadd.f32 %v6491_v34, %v6478_v37 }
 0x404   : > { %v6503_v60 = vpop.f32.mrf.mxu0 }
 0x405   : > { %v6504_v57 = vadd.f32 %v6503_v60, %v6490_v16  ;;  %v6517_v12 = vpop.f32.mrf.mxu1 }
 0x407   : > { %v6518_v40 = vadd.f32 %v6517_v12, %v6504_v57 }
 0x40c   : > { %v6531_v59 = vpop.f32.mrf.mxu2  ;;  %v6505_v20 = vpop.f32.mrf.mxu0 }
 0x40d   : > { %v6532_v43 = vadd.f32 %v6531_v59, %v6518_v40  ;;  %v6545_v6 = vpop.f32.mrf.mxu3  ;;  %v6506_v27 = vadd.f32 %v6505_v20, %v6492_v46  ;;  %v6519_v42 = vpop.f32.mrf.mxu1 }
 0x40f   : > { %v6546_v14 = vadd.f32 %v6545_v6, %v6532_v43  ;;  %v6520_v25 = vadd.f32 %v6519_v42, %v6506_v27 }
 0x411   : > { %v6553_v29 = vmax.f32 %v6546_v14, 0.0 }
 0x413   : > { %v6559_v44 = vpack.c.bf16 %v6553_v29, %v6552_v38 }
 0x414   : > { %v6533_v36 = vpop.f32.mrf.mxu2 }
 0x415   : > { %6563 = vst [vmem:[%s11745_s12 + $0x8] sm:$0xff] %v6559_v44  ;;  %v6534_v31 = vadd.f32 %v6533_v36, %v6520_v25  ;;  %v6547_v41 = vpop.f32.mrf.mxu3 }
 0x417   : > { %v6548_v55 = vadd.f32 %v6547_v41, %v6534_v31 }
 0x419   : > { %v6557_v15 = vmax.f32 %v6548_v55, 0.0  ;;  %6572 = sbr.rel (!%p9837_p5) target bundleno = 1062 (0x426), region = 73 }
 0x41b   : > { %v6561_v52 = vpack.c.bf16 %v6557_v15, %v6556_v1 }
 0x41c   : > { %v6590_v54 = vld [vmem:[%s11745_s12 + $0x8] sm:$0xff] (%p9837_p5) }
 0x41d   : > { %6565 = vst [vmem:[%s11745_s12 + $0x18] sm:$0xff] %v6561_v52 }
 0x41e   : > { %6591 = vst [vmem:[%s6575_s21 + $0x8] sm:$0xff] %v6590_v54 }
 0x424   : > { %v6594_v58 = vld [vmem:[%s11745_s12 + $0x18] sm:$0xff] }
 0x425   : > { %6595 = vst [vmem:[%s6575_s21 + $0x28] sm:$0xff] %v6594_v58 }
 0x426 PF: > { %p10_p13 = scmp.ge.s32.totalorder %s9825_s16, 4   ;;  %s12126_s12 = smov %s9764_s13 }
 0x427   : > { %s12127_s13 = smov %s9835_s19  ;;  %s12128_s14 = smov %s9825_s16 }
 0x428   :  { %12 = sbr.rel (!%p10_p13) target bundleno = 2 (0x2), region = 143 }

</bundles_post_ra>
